<compile_context>
chip_gen: v7x
topology: tpu7x:2x2x1
jax: 0.10.0
libtpu: 0.0.40
codegen_flags: <defaults>
</compile_context>

<pallas_src>
import functools

import jax
import jax.numpy as jnp
import numpy as np
from jax.experimental import pallas as pl
from jax.experimental.pallas import tpu as pltpu


# ----------------------------------------------------------------------------
# Pallas kernel: entire forward pass for one tile of rows.
# ----------------------------------------------------------------------------
def _implicit_net_kernel(
    x_ref,           # (tm, P+Dd) f32
    w_in_ref,        # (P+Dd, 2F+Hp) f32  block-diag [w1 | w5p | 0 ; 0 | 0 | wr1d]
    b1_ref,          # (1, F) bf16
    wmid_ref,        # (7, F, F) bf16   stacked w2..w4, w5t, w6..w8
    bmid_ref,        # (7, 1, F) bf16
    w_head_ref,      # (F, F+128) bf16  [wi | ws | 0]
    bi_ref,          # (1, F) bf16
    wr1t_ref,        # (F, Hp) bf16     [wr1t | 0]
    br1_ref,         # (1, Hp) bf16
    wr2_ref,         # (Hp, 128) bf16   rgb weights in lanes 1..3
    b_out_ref,       # (1, 128) f32     bs in lane 0, br2 in lanes 1..3
    out_ref,         # (tm, 128) f32    lane-dense: [sigma | rgb | junk]
    *, feature_dim,
):
    f32 = jnp.float32
    bf16 = jnp.bfloat16
    F = feature_dim

    # Fused f32 input projection (keeps raw coordinates at full precision):
    #   [layer-1 preact | layer-5 pos skip | rgb-layer-1 dirs term]
    xin = jnp.dot(x_ref[...], w_in_ref[...], preferred_element_type=f32)
    h = jnp.maximum(xin[:, :F].astype(bf16) + b1_ref[...], 0.0)      # (tm, F) bf16
    skip5 = xin[:, F:2 * F].astype(bf16)
    dirs_term = xin[:, 2 * F:].astype(bf16)                          # (tm, Hp)

    # 7 mid layers: bf16 operands, f32 MXU accumulation, bf16 bias/ReLU.
    for layer in range(7):
        acc = jnp.dot(h, wmid_ref[layer], preferred_element_type=f32)
        y = acc.astype(bf16) + bmid_ref[layer]
        if layer == 3:  # part_2 layer 5 consumes cat([h, pos]) -> split matmul
            y = y + skip5
        h = jnp.maximum(y, 0.0)

    # Fused head: cols [0:F] = intermediate, lane 0 of cols [F:F+128] = sigma.
    hp = jnp.dot(h, w_head_ref[...], preferred_element_type=f32)     # (tm, F+128)
    t = hp[:, :F].astype(bf16) + bi_ref[...]
    sig_slab = hp[:, F:]                                             # (tm, 128) f32

    # rgb head: cat([t, dirs]) @ wr1 == t @ wr1t + dirs_term (precomputed)
    r = jnp.maximum(
        jnp.dot(t, wr1t_ref[...], preferred_element_type=f32).astype(bf16)
        + dirs_term + br1_ref[...],
        0.0,
    )
    rgb_slab = jnp.dot(r, wr2_ref[...], preferred_element_type=f32)  # lanes 1..3

    # One sigmoid over the 128-lane slab, one unmasked lane-dense store.
    out_ref[...] = jax.nn.sigmoid(
        sig_slab + rgb_slab + b_out_ref[...]
    ).astype(out_ref.dtype)


# ----------------------------------------------------------------------------
# Wrapper: pads/tiles the batch dimension, keeps weights VMEM-resident.
# ----------------------------------------------------------------------------
def implicit_network_forward(pos, dirs, packed, *, feature_dim, tm=2048):
    n, pos_dim = pos.shape
    _, dir_dim = dirs.shape
    F = feature_dim

    # Keep >= 4 grid steps when possible (v7x megacore sharding needs >= 2;
    # per-step overhead is negligible once tm >= 256).
    while tm > 256 and pl.cdiv(n, tm) < 4:
        tm //= 2

    x = jnp.concatenate([pos, dirs], axis=1)          # (N, P+Dd)
    n_pad = pl.cdiv(n, tm) * tm
    if n_pad != n:
        x = jnp.pad(x, ((0, n_pad - n), (0, 0)))
    grid = (n_pad // tm,)

    def const_spec(p):
        return pl.BlockSpec(p.shape, lambda i, _nd=p.ndim: (0,) * _nd)

    in_specs = [pl.BlockSpec((tm, pos_dim + dir_dim), lambda i: (i, 0))]
    in_specs += [const_spec(p) for p in packed]

    Hp = packed[-2].shape[0]                          # padded rgb hidden width
    flops = 2 * n_pad * ((pos_dim + dir_dim) * (2 * F + Hp) + 7 * F * F
                         + F * (F + 128) + F * Hp + Hp * 128)
    bytes_accessed = n_pad * 4 * (pos_dim + dir_dim + 128) + sum(
        int(np.prod(p.shape)) * p.dtype.itemsize for p in packed)

    out = pl.pallas_call(
        functools.partial(_implicit_net_kernel, feature_dim=feature_dim),
        grid=grid,
        in_specs=in_specs,
        out_specs=pl.BlockSpec((tm, 128), lambda i: (i, 0)),
        out_shape=jax.ShapeDtypeStruct((n_pad, 128), jnp.float32),
        compiler_params=pltpu.CompilerParams(dimension_semantics=("parallel",)),
        cost_estimate=pl.CostEstimate(
            flops=int(flops),
            transcendentals=int(n_pad * 128),
            bytes_accessed=int(bytes_accessed),
        ),
    )(x, *packed)

    out = out[:n]
    return out[:, 0:1], out[:, 1:4]


# ----------------------------------------------------------------------------
# Parameter init (PyTorch Linear-style uniform bounds), stored (fan_in, fan_out).
# ----------------------------------------------------------------------------
def init_params(key, pos_dim, dir_dim, feature_dim=128):
    F = feature_dim

    def linear(k, fan_in, fan_out):
        k1, k2 = jax.random.split(k)
        bound = 1.0 / np.sqrt(fan_in)
        w = jax.random.uniform(k1, (fan_in, fan_out), jnp.float32, -bound, bound)
        b = jax.random.uniform(k2, (1, fan_out), jnp.float32, -bound, bound)
        return w, b

    keys = jax.random.split(key, 12)
    return [
        linear(keys[0], pos_dim, F),            # layer 1
        linear(keys[1], F, F),                  # layer 2
        linear(keys[2], F, F),                  # layer 3
        linear(keys[3], F, F),                  # layer 4
        linear(keys[4], F + pos_dim, F),        # layer 5: cat([tmp, pos])
        linear(keys[5], F, F),                  # layer 6
        linear(keys[6], F, F),                  # layer 7
        linear(keys[7], F, F),                  # layer 8
        linear(keys[8], F, 1),                  # sigma head
        linear(keys[9], F, F),                  # intermediate
        linear(keys[10], F + dir_dim, F // 2),  # rgb layer 1: cat([tmp, dirs])
        linear(keys[11], F // 2, 3),            # rgb layer 2
    ]


# ----------------------------------------------------------------------------
# Pack / cast parameters for the kernel.
# ----------------------------------------------------------------------------
def pack_params(params, pos_dim, dir_dim, feature_dim):
    ((w1, b1), (w2, b2), (w3, b3), (w4, b4), (w5, b5), (w6, b6), (w7, b7),
     (w8, b8), (ws, bs), (wi, bi), (wr1, br1), (wr2, br2)) = params
    F = feature_dim
    H = F // 2
    Hp = ((H + 127) // 128) * 128
    bf16 = jnp.bfloat16
    f32 = jnp.float32

    w5t, w5p = w5[:F], w5[F:]          # layer-5 rows: [tmp | pos]
    wr1t, wr1d = wr1[:F], wr1[F:]      # rgb-1  rows: [tmp | dirs]

    # f32 block-diagonal fused input projection.
    w_in = jnp.zeros((pos_dim + dir_dim, 2 * F + Hp), f32)
    w_in = w_in.at[:pos_dim, :F].set(w1)
    w_in = w_in.at[:pos_dim, F:2 * F].set(w5p)
    w_in = w_in.at[pos_dim:, 2 * F:2 * F + H].set(wr1d)

    wmid = jnp.stack([w2, w3, w4, w5t, w6, w7, w8], axis=0).astype(bf16)
    bmid = jnp.stack([b2, b3, b4, b5, b6, b7, b8], axis=0).astype(bf16)

    w_head = jnp.zeros((F, F + 128), f32).at[:, :F].set(wi).at[:, F:F + 1].set(ws)
    wr1t_pad = jnp.zeros((F, Hp), f32).at[:, :H].set(wr1t)
    br1_pad = jnp.zeros((1, Hp), f32).at[:, :H].set(br1)
    wr2_pad = jnp.zeros((Hp, 128), f32).at[:H, 1:4].set(wr2)
    b_out = jnp.zeros((1, 128), f32).at[:, 0:1].set(bs).at[:, 1:4].set(br2)

    return [
        w_in,                                   # f32 (raw-coordinate precision)
        b1.astype(bf16),
        wmid, bmid,
        w_head.astype(bf16), bi.astype(bf16),
        wr1t_pad.astype(bf16), br1_pad.astype(bf16),
        wr2_pad.astype(bf16), b_out,            # b_out stays f32
    ]


# ----------------------------------------------------------------------------
# Pure-JAX f32 reference (explicit concatenations, mirroring the torch code).
# ----------------------------------------------------------------------------
def reference_forward(pos, dirs, params):
    ((w1, b1), (w2, b2), (w3, b3), (w4, b4), (w5, b5), (w6, b6), (w7, b7),
     (w8, b8), (ws, bs), (wi, bi), (wr1, br1), (wr2, br2)) = params
    relu = lambda v: jnp.maximum(v, 0.0)
    h = relu(pos @ w1 + b1)
    h = relu(h @ w2 + b2)
    h = relu(h @ w3 + b3)
    h = relu(h @ w4 + b4)
    h = relu(jnp.concatenate([h, pos], axis=1) @ w5 + b5)
    h = relu(h @ w6 + b6)
    h = relu(h @ w7 + b7)
    h = relu(h @ w8 + b8)
    sigma = jax.nn.sigmoid(h @ ws + bs)
    t = h @ wi + bi
    r = relu(jnp.concatenate([t, dirs], axis=1) @ wr1 + br1)
    rgb = jax.nn.sigmoid(r @ wr2 + br2)
    return sigma, rgb


if __name__ == "__main__":
    # Small shapes consistent with the module; N chosen so the auto-capped tile
    # (2048 -> 1024) gives a 4-step grid and exercises padding (4000 -> 4096).
    N, POS_DIM, DIR_DIM, FEATURE_DIM = 4000, 8, 8, 128

    root = jax.random.PRNGKey(0)
    k_pos, k_dir, k_params = jax.random.split(root, 3)
    pos = jax.random.normal(k_pos, (N, POS_DIM), jnp.float32)
    dirs = jax.random.normal(k_dir, (N, DIR_DIM), jnp.float32)

    params = init_params(k_params, POS_DIM, DIR_DIM, FEATURE_DIM)
    packed = pack_params(params, POS_DIM, DIR_DIM, FEATURE_DIM)

    sigma, rgb = implicit_network_forward(
        pos, dirs, packed, feature_dim=FEATURE_DIM, tm=2048
    )
    sigma = jax.block_until_ready(sigma)
    rgb = jax.block_until_ready(rgb)

    sigma_ref, rgb_ref = reference_forward(pos, dirs, params)
    # bf16 matmul operands / activations with f32 accumulation -> relaxed tol.
    np.testing.assert_allclose(np.asarray(sigma), np.asarray(sigma_ref),
                               rtol=2e-2, atol=3e-2)
    np.testing.assert_allclose(np.asarray(rgb), np.asarray(rgb_ref),
                               rtol=2e-2, atol=3e-2)

    assert sigma.shape == (N, 1) and rgb.shape == (N, 3)
    print("KERNEL_OK")
</pallas_src>

<mosaic_0001>
module attributes {stable_mosaic.version = 11 : i64} {
  func.func @_implicit_net_kernel(%arg0: i32, %arg1: memref<1024x16xf32, #tpu.memory_space<vmem>>, %arg2: memref<16x384xf32, #tpu.memory_space<vmem>>, %arg3: memref<1x128xbf16, #tpu.memory_space<vmem>>, %arg4: memref<7x128x128xbf16, #tpu.memory_space<vmem>>, %arg5: memref<7x1x128xbf16, #tpu.memory_space<vmem>>, %arg6: memref<128x256xbf16, #tpu.memory_space<vmem>>, %arg7: memref<1x128xbf16, #tpu.memory_space<vmem>>, %arg8: memref<128x128xbf16, #tpu.memory_space<vmem>>, %arg9: memref<1x128xbf16, #tpu.memory_space<vmem>>, %arg10: memref<128x128xbf16, #tpu.memory_space<vmem>>, %arg11: memref<1x128xf32, #tpu.memory_space<vmem>>, %arg12: memref<1024x128xf32, #tpu.memory_space<vmem>>) attributes {dimension_semantics = [#tpu.dimension_semantics<parallel>], iteration_bounds = array<i64: 4>, scalar_prefetch = 0 : i64, scratch_operands = 0 : i64, tpu.core_type = #tpu.core_type<tc>, window_params = [{transform_indices = @transform_0, window_bounds = array<i64: 1024, 16>}, {pipeline_mode = #tpu.pipeline_mode<synchronous>, transform_indices = @transform_1, window_bounds = array<i64: 16, 384>}, {pipeline_mode = #tpu.pipeline_mode<synchronous>, transform_indices = @transform_2, window_bounds = array<i64: 1, 128>}, {pipeline_mode = #tpu.pipeline_mode<synchronous>, transform_indices = @transform_3, window_bounds = array<i64: 7, 128, 128>}, {pipeline_mode = #tpu.pipeline_mode<synchronous>, transform_indices = @transform_4, window_bounds = array<i64: 7, 1, 128>}, {pipeline_mode = #tpu.pipeline_mode<synchronous>, transform_indices = @transform_5, window_bounds = array<i64: 128, 256>}, {pipeline_mode = #tpu.pipeline_mode<synchronous>, transform_indices = @transform_6, window_bounds = array<i64: 1, 128>}, {pipeline_mode = #tpu.pipeline_mode<synchronous>, transform_indices = @transform_7, window_bounds = array<i64: 128, 128>}, {pipeline_mode = #tpu.pipeline_mode<synchronous>, transform_indices = @transform_8, window_bounds = array<i64: 1, 128>}, {pipeline_mode = #tpu.pipeline_mode<synchronous>, transform_indices = @transform_9, window_bounds = array<i64: 128, 128>}, {pipeline_mode = #tpu.pipeline_mode<synchronous>, transform_indices = @transform_10, window_bounds = array<i64: 1, 128>}, {transform_indices = @transform_11, window_bounds = array<i64: 1024, 128>}]} {
    %c0 = arith.constant 0 : index
    %c0_0 = arith.constant 0 : index
    %0 = vector.load %arg1[%c0, %c0_0] : memref<1024x16xf32, #tpu.memory_space<vmem>>, vector<1024x16xf32>
    %c0_1 = arith.constant 0 : index
    %c0_2 = arith.constant 0 : index
    %1 = vector.load %arg2[%c0_1, %c0_2] : memref<16x384xf32, #tpu.memory_space<vmem>>, vector<16x384xf32>
    %cst = arith.constant dense<0.000000e+00> : vector<1024x384xf32>
    %2 = tpu.matmul %0, %1, %cst {dimension_numbers = #tpu.dot_dimension_numbers<[1], [0], [0], [1], [0, 0, 1, 1], [], []>} : vector<1024x16xf32>, vector<16x384xf32>, vector<1024x384xf32> -> vector<1024x384xf32>
    %3 = vector.extract_strided_slice %2 {offsets = [0, 0], sizes = [1024, 128], strides = [1, 1]} : vector<1024x384xf32> to vector<1024x128xf32>
    %4 = arith.truncf %3 : vector<1024x128xf32> to vector<1024x128xbf16>
    %c0_3 = arith.constant 0 : index
    %c0_4 = arith.constant 0 : index
    %5 = vector.load %arg3[%c0_3, %c0_4] : memref<1x128xbf16, #tpu.memory_space<vmem>>, vector<1x128xbf16>
    %6 = vector.broadcast %5 : vector<1x128xbf16> to vector<1024x128xbf16>
    %7 = arith.addf %4, %6 : vector<1024x128xbf16>
    %cst_5 = arith.constant 0.000000e+00 : bf16
    %8 = vector.broadcast %cst_5 : bf16 to vector<1024x128xbf16>
    %9 = arith.maximumf %7, %8 : vector<1024x128xbf16>
    %10 = vector.extract_strided_slice %2 {offsets = [0, 128], sizes = [1024, 128], strides = [1, 1]} : vector<1024x384xf32> to vector<1024x128xf32>
    %11 = arith.truncf %10 : vector<1024x128xf32> to vector<1024x128xbf16>
    %12 = vector.extract_strided_slice %2 {offsets = [0, 256], sizes = [1024, 128], strides = [1, 1]} : vector<1024x384xf32> to vector<1024x128xf32>
    %13 = arith.truncf %12 : vector<1024x128xf32> to vector<1024x128xbf16>
    %c0_6 = arith.constant 0 : index
    %c0_7 = arith.constant 0 : index
    %c0_8 = arith.constant 0 : index
    %14 = vector.load %arg4[%c0_6, %c0_7, %c0_8] : memref<7x128x128xbf16, #tpu.memory_space<vmem>>, vector<1x128x128xbf16>
    %15 = vector.shape_cast %14 : vector<1x128x128xbf16> to vector<128x128xbf16>
    %cst_9 = arith.constant dense<0.000000e+00> : vector<1024x128xf32>
    %16 = tpu.matmul %9, %15, %cst_9 {dimension_numbers = #tpu.dot_dimension_numbers<[1], [0], [0], [1], [0, 0, 1, 1], [], []>} : vector<1024x128xbf16>, vector<128x128xbf16>, vector<1024x128xf32> -> vector<1024x128xf32>
    %17 = arith.truncf %16 : vector<1024x128xf32> to vector<1024x128xbf16>
    %c0_10 = arith.constant 0 : index
    %c0_11 = arith.constant 0 : index
    %c0_12 = arith.constant 0 : index
    %18 = vector.load %arg5[%c0_10, %c0_11, %c0_12] : memref<7x1x128xbf16, #tpu.memory_space<vmem>>, vector<1x1x128xbf16>
    %19 = vector.shape_cast %18 : vector<1x1x128xbf16> to vector<1x128xbf16>
    %20 = vector.broadcast %19 : vector<1x128xbf16> to vector<1024x128xbf16>
    %21 = arith.addf %17, %20 : vector<1024x128xbf16>
    %cst_13 = arith.constant 0.000000e+00 : bf16
    %22 = vector.broadcast %cst_13 : bf16 to vector<1024x128xbf16>
    %23 = arith.maximumf %21, %22 : vector<1024x128xbf16>
    %c1 = arith.constant 1 : index
    %c0_14 = arith.constant 0 : index
    %c0_15 = arith.constant 0 : index
    %24 = vector.load %arg4[%c1, %c0_14, %c0_15] : memref<7x128x128xbf16, #tpu.memory_space<vmem>>, vector<1x128x128xbf16>
    %25 = vector.shape_cast %24 : vector<1x128x128xbf16> to vector<128x128xbf16>
    %cst_16 = arith.constant dense<0.000000e+00> : vector<1024x128xf32>
    %26 = tpu.matmul %23, %25, %cst_16 {dimension_numbers = #tpu.dot_dimension_numbers<[1], [0], [0], [1], [0, 0, 1, 1], [], []>} : vector<1024x128xbf16>, vector<128x128xbf16>, vector<1024x128xf32> -> vector<1024x128xf32>
    %27 = arith.truncf %26 : vector<1024x128xf32> to vector<1024x128xbf16>
    %c1_17 = arith.constant 1 : index
    %c0_18 = arith.constant 0 : index
    %c0_19 = arith.constant 0 : index
    %28 = vector.load %arg5[%c1_17, %c0_18, %c0_19] : memref<7x1x128xbf16, #tpu.memory_space<vmem>>, vector<1x1x128xbf16>
    %29 = vector.shape_cast %28 : vector<1x1x128xbf16> to vector<1x128xbf16>
    %30 = vector.broadcast %29 : vector<1x128xbf16> to vector<1024x128xbf16>
    %31 = arith.addf %27, %30 : vector<1024x128xbf16>
    %cst_20 = arith.constant 0.000000e+00 : bf16
    %32 = vector.broadcast %cst_20 : bf16 to vector<1024x128xbf16>
    %33 = arith.maximumf %31, %32 : vector<1024x128xbf16>
    %c2 = arith.constant 2 : index
    %c0_21 = arith.constant 0 : index
    %c0_22 = arith.constant 0 : index
    %34 = vector.load %arg4[%c2, %c0_21, %c0_22] : memref<7x128x128xbf16, #tpu.memory_space<vmem>>, vector<1x128x128xbf16>
    %35 = vector.shape_cast %34 : vector<1x128x128xbf16> to vector<128x128xbf16>
    %cst_23 = arith.constant dense<0.000000e+00> : vector<1024x128xf32>
    %36 = tpu.matmul %33, %35, %cst_23 {dimension_numbers = #tpu.dot_dimension_numbers<[1], [0], [0], [1], [0, 0, 1, 1], [], []>} : vector<1024x128xbf16>, vector<128x128xbf16>, vector<1024x128xf32> -> vector<1024x128xf32>
    %37 = arith.truncf %36 : vector<1024x128xf32> to vector<1024x128xbf16>
    %c2_24 = arith.constant 2 : index
    %c0_25 = arith.constant 0 : index
    %c0_26 = arith.constant 0 : index
    %38 = vector.load %arg5[%c2_24, %c0_25, %c0_26] : memref<7x1x128xbf16, #tpu.memory_space<vmem>>, vector<1x1x128xbf16>
    %39 = vector.shape_cast %38 : vector<1x1x128xbf16> to vector<1x128xbf16>
    %40 = vector.broadcast %39 : vector<1x128xbf16> to vector<1024x128xbf16>
    %41 = arith.addf %37, %40 : vector<1024x128xbf16>
    %cst_27 = arith.constant 0.000000e+00 : bf16
    %42 = vector.broadcast %cst_27 : bf16 to vector<1024x128xbf16>
    %43 = arith.maximumf %41, %42 : vector<1024x128xbf16>
    %c3 = arith.constant 3 : index
    %c0_28 = arith.constant 0 : index
    %c0_29 = arith.constant 0 : index
    %44 = vector.load %arg4[%c3, %c0_28, %c0_29] : memref<7x128x128xbf16, #tpu.memory_space<vmem>>, vector<1x128x128xbf16>
    %45 = vector.shape_cast %44 : vector<1x128x128xbf16> to vector<128x128xbf16>
    %cst_30 = arith.constant dense<0.000000e+00> : vector<1024x128xf32>
    %46 = tpu.matmul %43, %45, %cst_30 {dimension_numbers = #tpu.dot_dimension_numbers<[1], [0], [0], [1], [0, 0, 1, 1], [], []>} : vector<1024x128xbf16>, vector<128x128xbf16>, vector<1024x128xf32> -> vector<1024x128xf32>
    %47 = arith.truncf %46 : vector<1024x128xf32> to vector<1024x128xbf16>
    %c3_31 = arith.constant 3 : index
    %c0_32 = arith.constant 0 : index
    %c0_33 = arith.constant 0 : index
    %48 = vector.load %arg5[%c3_31, %c0_32, %c0_33] : memref<7x1x128xbf16, #tpu.memory_space<vmem>>, vector<1x1x128xbf16>
    %49 = vector.shape_cast %48 : vector<1x1x128xbf16> to vector<1x128xbf16>
    %50 = vector.broadcast %49 : vector<1x128xbf16> to vector<1024x128xbf16>
    %51 = arith.addf %47, %50 : vector<1024x128xbf16>
    %52 = arith.addf %51, %11 : vector<1024x128xbf16>
    %cst_34 = arith.constant 0.000000e+00 : bf16
    %53 = vector.broadcast %cst_34 : bf16 to vector<1024x128xbf16>
    %54 = arith.maximumf %52, %53 : vector<1024x128xbf16>
    %c4 = arith.constant 4 : index
    %c0_35 = arith.constant 0 : index
    %c0_36 = arith.constant 0 : index
    %55 = vector.load %arg4[%c4, %c0_35, %c0_36] : memref<7x128x128xbf16, #tpu.memory_space<vmem>>, vector<1x128x128xbf16>
    %56 = vector.shape_cast %55 : vector<1x128x128xbf16> to vector<128x128xbf16>
    %cst_37 = arith.constant dense<0.000000e+00> : vector<1024x128xf32>
    %57 = tpu.matmul %54, %56, %cst_37 {dimension_numbers = #tpu.dot_dimension_numbers<[1], [0], [0], [1], [0, 0, 1, 1], [], []>} : vector<1024x128xbf16>, vector<128x128xbf16>, vector<1024x128xf32> -> vector<1024x128xf32>
    %58 = arith.truncf %57 : vector<1024x128xf32> to vector<1024x128xbf16>
    %c4_38 = arith.constant 4 : index
    %c0_39 = arith.constant 0 : index
    %c0_40 = arith.constant 0 : index
    %59 = vector.load %arg5[%c4_38, %c0_39, %c0_40] : memref<7x1x128xbf16, #tpu.memory_space<vmem>>, vector<1x1x128xbf16>
    %60 = vector.shape_cast %59 : vector<1x1x128xbf16> to vector<1x128xbf16>
    %61 = vector.broadcast %60 : vector<1x128xbf16> to vector<1024x128xbf16>
    %62 = arith.addf %58, %61 : vector<1024x128xbf16>
    %cst_41 = arith.constant 0.000000e+00 : bf16
    %63 = vector.broadcast %cst_41 : bf16 to vector<1024x128xbf16>
    %64 = arith.maximumf %62, %63 : vector<1024x128xbf16>
    %c5 = arith.constant 5 : index
    %c0_42 = arith.constant 0 : index
    %c0_43 = arith.constant 0 : index
    %65 = vector.load %arg4[%c5, %c0_42, %c0_43] : memref<7x128x128xbf16, #tpu.memory_space<vmem>>, vector<1x128x128xbf16>
    %66 = vector.shape_cast %65 : vector<1x128x128xbf16> to vector<128x128xbf16>
    %cst_44 = arith.constant dense<0.000000e+00> : vector<1024x128xf32>
    %67 = tpu.matmul %64, %66, %cst_44 {dimension_numbers = #tpu.dot_dimension_numbers<[1], [0], [0], [1], [0, 0, 1, 1], [], []>} : vector<1024x128xbf16>, vector<128x128xbf16>, vector<1024x128xf32> -> vector<1024x128xf32>
    %68 = arith.truncf %67 : vector<1024x128xf32> to vector<1024x128xbf16>
    %c5_45 = arith.constant 5 : index
    %c0_46 = arith.constant 0 : index
    %c0_47 = arith.constant 0 : index
    %69 = vector.load %arg5[%c5_45, %c0_46, %c0_47] : memref<7x1x128xbf16, #tpu.memory_space<vmem>>, vector<1x1x128xbf16>
    %70 = vector.shape_cast %69 : vector<1x1x128xbf16> to vector<1x128xbf16>
    %71 = vector.broadcast %70 : vector<1x128xbf16> to vector<1024x128xbf16>
    %72 = arith.addf %68, %71 : vector<1024x128xbf16>
    %cst_48 = arith.constant 0.000000e+00 : bf16
    %73 = vector.broadcast %cst_48 : bf16 to vector<1024x128xbf16>
    %74 = arith.maximumf %72, %73 : vector<1024x128xbf16>
    %c6 = arith.constant 6 : index
    %c0_49 = arith.constant 0 : index
    %c0_50 = arith.constant 0 : index
    %75 = vector.load %arg4[%c6, %c0_49, %c0_50] : memref<7x128x128xbf16, #tpu.memory_space<vmem>>, vector<1x128x128xbf16>
    %76 = vector.shape_cast %75 : vector<1x128x128xbf16> to vector<128x128xbf16>
    %cst_51 = arith.constant dense<0.000000e+00> : vector<1024x128xf32>
    %77 = tpu.matmul %74, %76, %cst_51 {dimension_numbers = #tpu.dot_dimension_numbers<[1], [0], [0], [1], [0, 0, 1, 1], [], []>} : vector<1024x128xbf16>, vector<128x128xbf16>, vector<1024x128xf32> -> vector<1024x128xf32>
    %78 = arith.truncf %77 : vector<1024x128xf32> to vector<1024x128xbf16>
    %c6_52 = arith.constant 6 : index
    %c0_53 = arith.constant 0 : index
    %c0_54 = arith.constant 0 : index
    %79 = vector.load %arg5[%c6_52, %c0_53, %c0_54] : memref<7x1x128xbf16, #tpu.memory_space<vmem>>, vector<1x1x128xbf16>
    %80 = vector.shape_cast %79 : vector<1x1x128xbf16> to vector<1x128xbf16>
    %81 = vector.broadcast %80 : vector<1x128xbf16> to vector<1024x128xbf16>
    %82 = arith.addf %78, %81 : vector<1024x128xbf16>
    %cst_55 = arith.constant 0.000000e+00 : bf16
    %83 = vector.broadcast %cst_55 : bf16 to vector<1024x128xbf16>
    %84 = arith.maximumf %82, %83 : vector<1024x128xbf16>
    %c0_56 = arith.constant 0 : index
    %c0_57 = arith.constant 0 : index
    %85 = vector.load %arg6[%c0_56, %c0_57] : memref<128x256xbf16, #tpu.memory_space<vmem>>, vector<128x256xbf16>
    %cst_58 = arith.constant dense<0.000000e+00> : vector<1024x256xf32>
    %86 = tpu.matmul %84, %85, %cst_58 {dimension_numbers = #tpu.dot_dimension_numbers<[1], [0], [0], [1], [0, 0, 1, 1], [], []>} : vector<1024x128xbf16>, vector<128x256xbf16>, vector<1024x256xf32> -> vector<1024x256xf32>
    %87 = vector.extract_strided_slice %86 {offsets = [0, 0], sizes = [1024, 128], strides = [1, 1]} : vector<1024x256xf32> to vector<1024x128xf32>
    %88 = arith.truncf %87 : vector<1024x128xf32> to vector<1024x128xbf16>
    %c0_59 = arith.constant 0 : index
    %c0_60 = arith.constant 0 : index
    %89 = vector.load %arg7[%c0_59, %c0_60] : memref<1x128xbf16, #tpu.memory_space<vmem>>, vector<1x128xbf16>
    %90 = vector.broadcast %89 : vector<1x128xbf16> to vector<1024x128xbf16>
    %91 = arith.addf %88, %90 : vector<1024x128xbf16>
    %92 = vector.extract_strided_slice %86 {offsets = [0, 128], sizes = [1024, 128], strides = [1, 1]} : vector<1024x256xf32> to vector<1024x128xf32>
    %c0_61 = arith.constant 0 : index
    %c0_62 = arith.constant 0 : index
    %93 = vector.load %arg8[%c0_61, %c0_62] : memref<128x128xbf16, #tpu.memory_space<vmem>>, vector<128x128xbf16>
    %cst_63 = arith.constant dense<0.000000e+00> : vector<1024x128xf32>
    %94 = tpu.matmul %91, %93, %cst_63 {dimension_numbers = #tpu.dot_dimension_numbers<[1], [0], [0], [1], [0, 0, 1, 1], [], []>} : vector<1024x128xbf16>, vector<128x128xbf16>, vector<1024x128xf32> -> vector<1024x128xf32>
    %95 = arith.truncf %94 : vector<1024x128xf32> to vector<1024x128xbf16>
    %96 = arith.addf %95, %13 : vector<1024x128xbf16>
    %c0_64 = arith.constant 0 : index
    %c0_65 = arith.constant 0 : index
    %97 = vector.load %arg9[%c0_64, %c0_65] : memref<1x128xbf16, #tpu.memory_space<vmem>>, vector<1x128xbf16>
    %98 = vector.broadcast %97 : vector<1x128xbf16> to vector<1024x128xbf16>
    %99 = arith.addf %96, %98 : vector<1024x128xbf16>
    %cst_66 = arith.constant 0.000000e+00 : bf16
    %100 = vector.broadcast %cst_66 : bf16 to vector<1024x128xbf16>
    %101 = arith.maximumf %99, %100 : vector<1024x128xbf16>
    %c0_67 = arith.constant 0 : index
    %c0_68 = arith.constant 0 : index
    %102 = vector.load %arg10[%c0_67, %c0_68] : memref<128x128xbf16, #tpu.memory_space<vmem>>, vector<128x128xbf16>
    %cst_69 = arith.constant dense<0.000000e+00> : vector<1024x128xf32>
    %103 = tpu.matmul %101, %102, %cst_69 {dimension_numbers = #tpu.dot_dimension_numbers<[1], [0], [0], [1], [0, 0, 1, 1], [], []>} : vector<1024x128xbf16>, vector<128x128xbf16>, vector<1024x128xf32> -> vector<1024x128xf32>
    %104 = arith.addf %92, %103 : vector<1024x128xf32>
    %c0_70 = arith.constant 0 : index
    %c0_71 = arith.constant 0 : index
    %105 = vector.load %arg11[%c0_70, %c0_71] : memref<1x128xf32, #tpu.memory_space<vmem>>, vector<1x128xf32>
    %106 = vector.broadcast %105 : vector<1x128xf32> to vector<1024x128xf32>
    %107 = arith.addf %104, %106 : vector<1024x128xf32>
    %108 = arith.negf %107 : vector<1024x128xf32>
    %109 = math.exp %108 : vector<1024x128xf32>
    %cst_72 = arith.constant 1.000000e+00 : f32
    %110 = vector.broadcast %cst_72 : f32 to vector<1024x128xf32>
    %111 = arith.addf %110, %109 : vector<1024x128xf32>
    %112 = arith.divf %110, %111 : vector<1024x128xf32>
    %c0_73 = arith.constant 0 : index
    %c0_74 = arith.constant 0 : index
    %113 = vector.load %arg12[%c0_73, %c0_74] : memref<1024x128xf32, #tpu.memory_space<vmem>>, vector<1024x128xf32>
    tpu.vector_store %arg12[%c0_73, %c0_74], %112 {strides = array<i32>} : memref<1024x128xf32, #tpu.memory_space<vmem>>, vector<1024x128xf32>,
    return
  }
  func.func @transform_0(%arg0: i32) -> (i32, i32) {
    %c0_i32 = arith.constant 0 : i32
    %c0_i32_0 = arith.constant 0 : i32
    return %arg0, %c0_i32 : i32, i32
  }
  func.func @transform_1(%arg0: i32) -> (i32, i32) {
    %c0_i32 = arith.constant 0 : i32
    %c0_i32_0 = arith.constant 0 : i32
    %c0_i32_1 = arith.constant 0 : i32
    return %c0_i32, %c0_i32_0 : i32, i32
  }
  func.func @transform_2(%arg0: i32) -> (i32, i32) {
    %c0_i32 = arith.constant 0 : i32
    %c0_i32_0 = arith.constant 0 : i32
    %c0_i32_1 = arith.constant 0 : i32
    return %c0_i32, %c0_i32_0 : i32, i32
  }
  func.func @transform_3(%arg0: i32) -> (i32, i32, i32) {
    %c0_i32 = arith.constant 0 : i32
    %c0_i32_0 = arith.constant 0 : i32
    %c0_i32_1 = arith.constant 0 : i32
    %c0_i32_2 = arith.constant 0 : i32
    return %c0_i32, %c0_i32_0, %c0_i32_1 : i32, i32, i32
  }
  func.func @transform_4(%arg0: i32) -> (i32, i32, i32) {
    %c0_i32 = arith.constant 0 : i32
    %c0_i32_0 = arith.constant 0 : i32
    %c0_i32_1 = arith.constant 0 : i32
    %c0_i32_2 = arith.constant 0 : i32
    return %c0_i32, %c0_i32_0, %c0_i32_1 : i32, i32, i32
  }
  func.func @transform_5(%arg0: i32) -> (i32, i32) {
    %c0_i32 = arith.constant 0 : i32
    %c0_i32_0 = arith.constant 0 : i32
    %c0_i32_1 = arith.constant 0 : i32
    return %c0_i32, %c0_i32_0 : i32, i32
  }
  func.func @transform_6(%arg0: i32) -> (i32, i32) {
    %c0_i32 = arith.constant 0 : i32
    %c0_i32_0 = arith.constant 0 : i32
    %c0_i32_1 = arith.constant 0 : i32
    return %c0_i32, %c0_i32_0 : i32, i32
  }
  func.func @transform_7(%arg0: i32) -> (i32, i32) {
    %c0_i32 = arith.constant 0 : i32
    %c0_i32_0 = arith.constant 0 : i32
    %c0_i32_1 = arith.constant 0 : i32
    return %c0_i32, %c0_i32_0 : i32, i32
  }
  func.func @transform_8(%arg0: i32) -> (i32, i32) {
    %c0_i32 = arith.constant 0 : i32
    %c0_i32_0 = arith.constant 0 : i32
    %c0_i32_1 = arith.constant 0 : i32
    return %c0_i32, %c0_i32_0 : i32, i32
  }
  func.func @transform_9(%arg0: i32) -> (i32, i32) {
    %c0_i32 = arith.constant 0 : i32
    %c0_i32_0 = arith.constant 0 : i32
    %c0_i32_1 = arith.constant 0 : i32
    return %c0_i32, %c0_i32_0 : i32, i32
  }
  func.func @transform_10(%arg0: i32) -> (i32, i32) {
    %c0_i32 = arith.constant 0 : i32
    %c0_i32_0 = arith.constant 0 : i32
    %c0_i32_1 = arith.constant 0 : i32
    return %c0_i32, %c0_i32_0 : i32, i32
  }
  func.func @transform_11(%arg0: i32) -> (i32, i32) {
    %c0_i32 = arith.constant 0 : i32
    %c0_i32_0 = arith.constant 0 : i32
    return %arg0, %c0_i32 : i32, i32
  }
}

</mosaic_0001>

<bundles_post_ra>
// kernel: tpu_custom_call.1
= control target key start
LH: loop header
LB: loop body
LE: loop exit
PB: predicated region body
PF: predicated region fallthrough
CT: control target
= control target key end

     0   :  { %16 = vsyncpa [#allocation3], 0  ;;  %s21044_s0 = inlined_call_operand.vmem [shape: f32[4096,16], index: 0, kind: input, shape index: {}]   ;;  %s21045_s1 = inlined_call_operand.vmem [shape: f32[16,384], index: 1, kind: input, shape index: {}]   ;;  %s21046_s2 = inlined_call_operand.vmem [shape: bf16[1,128], index: 2, kind: input, shape index: {}]   ;;  %s21047_s3 = inlined_call_operand.vmem [shape: bf16[7,128,128], index: 3, kind: input, shape index: {}]   ;;  %s21048_s4 = inlined_call_operand.vmem [shape: bf16[7,1,128], index: 4, kind: input, shape index: {}]   ;;  %s21049_s5 = inlined_call_operand.vmem [shape: bf16[128,256], index: 5, kind: input, shape index: {}]   ;;  %s21050_s6 = inlined_call_operand.vmem [shape: bf16[1,128], index: 6, kind: input, shape index: {}]   ;;  %s21051_s7 = inlined_call_operand.vmem [shape: bf16[128,128], index: 7, kind: input, shape index: {}]   ;;  %s21052_s8 = inlined_call_operand.vmem [shape: bf16[1,128], index: 8, kind: input, shape index: {}]   ;;  %s21053_s9 = inlined_call_operand.vmem [shape: bf16[128,128], index: 9, kind: input, shape index: {}]   ;;  %s21054_s10 = inlined_call_operand.vmem [shape: f32[1,128], index: 10, kind: input, shape index: {}]   ;;  %s21055_s11 = inlined_call_operand.hbm [shape: f32[4096,128], index: 11, kind: output, shape index: {}]  }
   0x1   :  { %18 = vsyncpa [#allocation3 + $0x1], 0  ;;  %s15814_s17 = smov 0   ;;  %s15816_s18 = smov 0  }
   0x2   :  { %s15818_s19 = smov 0   ;;  %s15820_s20 = smov 0  }
   0x3 LB: > { %s15835_s21 = sadd.s32 4294967295, %s15747_s20   ;;  %s12135_s22 = sadd.s32 4294967294, %s15747_s20   ;;  %s15747_s20 = sphi %s15820_s20, %s22113_s20   ;;  %s15743_s19 = sphi %s15818_s19, %s22112_s19   ;;  %s15739_s18 = sphi %s15816_s18, %s22111_s18   ;;  %s15735_s17 = sphi %s15814_s17, %s22110_s17  }
   0x4   : > { %s15839_s23 = sadd.s32 1, %s15747_s20   ;;  %s267_s24 = sadd.s32 1, %s15743_s19 }
   0x5   : > { %s264_s25 = ssub.s32 %s15747_s20, %s15839_s23  ;;  %p277_p0 = scmp.ne.s32.totalorder %s15743_s19, %s15739_s18 }
   0x6   : > { %p265_p1 = scmp.eq.s32.totalorder %s264_s25, 0  ;;  %p278_p2 = scmp.eq.s32.totalorder %s15835_s21, 3 }
   0x7   : > { %p283_p3 = scmp.ne.s32.totalorder %s15739_s18, %s15735_s17  ;;  %p284_p4 = scmp.eq.s32.totalorder %s12135_s22, 3 }
   0x8   : > { %s15850_s26 = scalar_select %p265_p1, %s15743_s19, %s267_s24  }
   0x9   : > { %p15852_p5 = por %p278_p2, %p277_p0  ;;  %p15856_p6 = por %p284_p4, %p283_p3 }
   0xa   : > { %21275 = sst [smem:[#allocation5_spill]] %s15850_s26  ;;  %p12138_p7 = scmp.ge.s32.totalorder %s15747_s20, 1 }
   0xb   : > { %p341_p8 = scmp.lt.s32.totalorder %s15747_s20, 5 }
   0xd   : > { %p342_p9 = pnand %p12138_p7, %p341_p8 }
   0xf   : > { %345 = sbr.rel (%p342_p9) target bundleno = 3120 (0xc30), region = 64 }
  0x16   : > { %v518_v0 = vld [vmem:[%s21045_s1 + $0x8] sm:$0xff]  ;;  %v521_v1 = vld [vmem:[%s21045_s1 + $0x20] sm:$0xff]  ;;  %s12140_s16 = sshll.u32 %s15835_s21, 7  ;;  %v520_v4 = vld [vmem:[%s21045_s1 + $0x18] sm:$0xff]  ;;  %v21060_v7 = vmov 0.0   ;;  %vm523_vm0 = vcmask 130048  }
  0x17   : > { %v517_v2 = vld [vmem:[%s21045_s1] sm:$0xff]  ;;  %v14993_v3 = vpack.c.bf16 %v521_v1, %v518_v0  ;;  %v519_v5 = vld [vmem:[%s21045_s1 + $0x10] sm:$0xff]  ;;  %v522_v6 = vld [vmem:[%s21045_s1 + $0x28] sm:$0xff]  ;;  %972 = vmatprep.mubr.f32.mxu0 %v21060_v7  ;;  %p382_p10 = scmp.lt.s32.totalorder %s12140_s16, 511  ;;  %s378_s29 = sand.u32 1, %s15739_s18  }
  0x18   : > { %v14995_v8 = vpack.c.bf16 %v520_v4, %v517_v2  ;;  %v14997_v9 = vpack.c.bf16 %v522_v6, %v519_v5  ;;  %v15044_v10 = vld [vmem:[%s21047_s3 + $0x40] sm:$0xff]   ;;  %v15046_v12 = vld [vmem:[%s21047_s3 + $0x48] sm:$0xff]   ;;  %v15048_v19 = vld [vmem:[%s21047_s3 + $0x10] sm:$0xff]   ;;  %s20613_s30 = sshll.u32 %s378_s29, 10  ;;  %s12722_s15 = sshll.u32 %s15835_s21, 14 }
  0x19   : > { %14994 = vmatprep.subr.bf16.mxu0 %v14993_v3  ;;  %s22115_s16 = smov (!%p382_p10, %s12140_s16), 511  ;;  %v15045_v11 = vld [vmem:[%s21047_s3] sm:$0xff]   ;;  %v15047_v16 = vld [vmem:[%s21047_s3 + $0x8] sm:$0xff]   ;;  %v15049_v29 = vld [vmem:[%s21047_s3 + $0x50] sm:$0xff]   ;;  %s15751_s21 = smov [#allocation2]  }
  0x1a   : > { %14996 = vmatpush1.bf16.msra.mxu0 %v14995_v8  ;;  %14998 = vmatprep.subr.bf16.mxu1 %v14997_v9  ;;  %s12141_s26 = sshll.u32 %s22115_s16, 3  ;;  %v15050_v30 = vld [vmem:[%s21047_s3 + $0x18] sm:$0xff]   ;;  %v15051_v37 = vld [vmem:[%s21047_s3 + $0x20] sm:$0xff]   ;;  %v15053_v55 = vld [vmem:[%s21047_s3 + $0x28] sm:$0xff]   ;;  %s20627_s16 = scalar_lea.vmem [#allocation2], %s20613_s30 }
  0x1b   : > { %15000 = vmatpush3.bf16.msra.mxu1 %v14997_v9  ;;  %13841 = vmatprep.subr.bf16.mxu0 %v15044_v10  ;;  %s15891_s25 = scalar_lea.vmem %s21044_s0, %s12141_s26  ;;  %v15052_v54 = vld [vmem:[%s21047_s3 + $0x58] sm:$0xff]   ;;  %s12073_s26 = sshll.u32 %s20627_s16, 4  ;;  %s20998_s26 = int_to_ptr.vmem [resolvable:$true] %s12073_s26 }
  0x1c   : > { %13697 = vmatprep.subr.bf16.mxu1 %v15045_v11  ;;  %v389_v13 = vld [vmem:[%s15891_s25] sm:$0xff]  ;;  %v390_v14 = vld [vmem:[%s15891_s25 + $0x8] sm:$0xff]  ;;  %v391_v15 = vld [vmem:[%s15891_s25 + $0x10] sm:$0xff]  ;;  %s20996_s30 = scalar_lea.hbm %s21055_s11, %s12722_s15  ;;  %s15685_s12 = scalar_lea.vmem %s20998_s26, 16384 }
  0x1d   : > { %12142 = vmatmul.mubr.msk.f32.vlgmr.msra.gmra.mrb[0].mxu0 %vm523_vm0, %v389_v13  ;;  %13505 = vmatprep.mubr.msk.f32.mxu1 %vm523_vm0, %v389_v13  ;;  %v392_v17 = vld [vmem:[%s15891_s25 + $0x18] sm:$0xff]  ;;  %v393_v18 = vld [vmem:[%s15891_s25 + $0x20] sm:$0xff]  ;;  %v394_v20 = vld [vmem:[%s15891_s25 + $0x28] sm:$0xff]  ;;  %p15686_p11 = scmp.ne.s32.totalorder %s20998_s26, %s15685_s12  ;;  %s15689_s13 = sshll.u32 %s15751_s21, 4  ;;  %s15690_s13 = int_to_ptr.vmem [resolvable:$false] %s15689_s13 }
  0x1e   : > { %13506 = vmatmul.mubr.msk.f32.vlgmr.msra.gmra.mrb[0].mxu1 %vm523_vm0, %v390_v14  ;;  %13842 = vmatpush3.bf16.msra.mxu0 %v15044_v10  ;;  %v395_v21 = vld [vmem:[%s15891_s25 + $0x30] sm:$0xff]  ;;  %v396_v22 = vld [vmem:[%s15891_s25 + $0x38] sm:$0xff]  ;;  %v397_v23 = vld [vmem:[%s15891_s25 + $0x40] sm:$0xff]  ;;  %s15691_s14 = scalar_lea.vmem %s15690_s13, 32768  ;;  %p15692_p0 = scmp.lt.s32.totalorder %s20998_s26, %s15690_s13 }
  0x1f   : > { %978 = vmatprep.mubr.f32.mxu0 %v21060_v7  ;;  %13508 = vmatprep.mubr.msk.f32.mxu1 %vm523_vm0, %v391_v15  ;;  %v398_v24 = vld [vmem:[%s15891_s25 + $0x48] sm:$0xff]  ;;  %v399_v25 = vld [vmem:[%s15891_s25 + $0x50] sm:$0xff]  ;;  %v400_v26 = vld [vmem:[%s15891_s25 + $0x58] sm:$0xff]  ;;  %p15687_p12 = pnand %p15686_p11, %p15852_p5  ;;  %p15693_p1 = scmp.lt.s32.totalorder %s15691_s14, %s15685_s12 }
  0x20   : > { %13698 = vmatpush3.bf16.msra.mxu1 %v15045_v11  ;;  %13843 = vmatprep.subr.bf16.mxu0 %v15046_v12  ;;  %v401_v27 = vld [vmem:[%s15891_s25 + $0x60] sm:$0xff]  ;;  %v402_v28 = vld [vmem:[%s15891_s25 + $0x68] sm:$0xff]  ;;  %v403_v31 = vld [vmem:[%s15891_s25 + $0x70] sm:$0xff] }
  0x21   : > { %12143 = vmatmul.mubr.msk.f32.gmra.mrb[2].mxu0 %vm523_vm0, %v390_v14  ;;  %13699 = vmatprep.subr.bf16.mxu1 %v15047_v16  ;;  %v404_v32 = vld [vmem:[%s15891_s25 + $0x78] sm:$0xff]  ;;  %v405_v33 = vld [vmem:[%s15891_s25 + $0x80] sm:$0xff]  ;;  %v15956_v34 = vld [vmem:[%s15891_s25 + $0x88] sm:$0xff]  ;;  %p15688_p13 = pneg %p15687_p12  ;;  %p15694_p2 = por %p15693_p1, %p15692_p0 }
  0x22   : > { %13509 = vmatmul.mubr.msk.f32.gmra.mrb[2].mxu1 %vm523_vm0, %v392_v17  ;;  %984 = vmatprep.mubr.f32.mxu0 %v21060_v7  ;;  %v15962_v35 = vld [vmem:[%s15891_s25 + $0x90] sm:$0xff]  ;;  %v15966_v36 = vld [vmem:[%s15891_s25 + $0x98] sm:$0xff]  ;;  %v15977_v38 = vld [vmem:[%s15891_s25 + $0xa0] sm:$0xff] }
  0x23   : > { %13511 = vmatprep.mubr.msk.f32.mxu1 %vm523_vm0, %v393_v18  ;;  %13844 = vmatpush3.bf16.msra.mxu0 %v15046_v12  ;;  %v15981_v39 = vld [vmem:[%s15891_s25 + $0xa8] sm:$0xff]  ;;  %v15989_v40 = vld [vmem:[%s15891_s25 + $0xb0] sm:$0xff]  ;;  %v15993_v41 = vld [vmem:[%s15891_s25 + $0xb8] sm:$0xff]  ;;  %p15695_p3 = pnand %p15694_p2, %p15688_p13 }
  0x24   : > { %13700 = vmatpush3.bf16.msra.mxu1 %v15047_v16  ;;  %13845 = vmatprep.subr.bf16.mxu0 %v15049_v29  ;;  %v16001_v42 = vld [vmem:[%s15891_s25 + $0xc0] sm:$0xff]  ;;  %v16005_v43 = vld [vmem:[%s15891_s25 + $0xc8] sm:$0xff]  ;;  %v16013_v44 = vld [vmem:[%s15891_s25 + $0xd0] sm:$0xff] }
  0x25   : > { %12144 = vmatmul.mubr.msk.f32.gmra.mrb[4].mxu0 %vm523_vm0, %v391_v15  ;;  %13701 = vmatprep.subr.bf16.mxu1 %v15048_v19  ;;  %v16017_v45 = vld [vmem:[%s15891_s25 + $0xd8] sm:$0xff]  ;;  %v16025_v46 = vld [vmem:[%s15891_s25 + $0xe0] sm:$0xff]  ;;  %v16029_v47 = vld [vmem:[%s15891_s25 + $0xe8] sm:$0xff] }
  0x26   : > { %13512 = vmatmul.mubr.msk.f32.gmra.mrb[4].mxu1 %vm523_vm0, %v394_v20  ;;  %990 = vmatprep.mubr.f32.mxu0 %v21060_v7  ;;  %v16037_v48 = vld [vmem:[%s15891_s25 + $0xf0] sm:$0xff]  ;;  %v16041_v49 = vld [vmem:[%s15891_s25 + $0xf8] sm:$0xff]  ;;  %v16049_v50 = vld [vmem:[%s15891_s25 + $0x100] sm:$0xff] }
  0x27   : > { %13514 = vmatprep.mubr.msk.f32.mxu1 %vm523_vm0, %v395_v21  ;;  %13846 = vmatpush3.bf16.msra.mxu0 %v15049_v29  ;;  %v16053_v51 = vld [vmem:[%s15891_s25 + $0x108] sm:$0xff]  ;;  %v16061_v52 = vld [vmem:[%s15891_s25 + $0x110] sm:$0xff]  ;;  %v16065_v53 = vld [vmem:[%s15891_s25 + $0x118] sm:$0xff] }
  0x28   : > { %13702 = vmatpush3.bf16.msra.mxu1 %v15048_v19  ;;  %13847 = vmatprep.subr.bf16.mxu0 %v15052_v54  ;;  %v16079_v56 = vld [vmem:[%s15891_s25 + $0x120] sm:$0xff]  ;;  %v16084_v57 = vld [vmem:[%s15891_s25 + $0x128] sm:$0xff]  ;;  %v16092_v58 = vld [vmem:[%s15891_s25 + $0x130] sm:$0xff] }
  0x29   : > { %12145 = vmatmul.mubr.msk.f32.gmra.mrb[6].mxu0 %vm523_vm0, %v392_v17  ;;  %13703 = vmatprep.subr.bf16.mxu1 %v15050_v30  ;;  %v16097_v59 = vld [vmem:[%s15891_s25 + $0x138] sm:$0xff]  ;;  %v16105_v60 = vld [vmem:[%s15891_s25 + $0x140] sm:$0xff]  ;;  %v16110_v61 = vld [vmem:[%s15891_s25 + $0x148] sm:$0xff] }
  0x2a   : > { %13515 = vmatmul.mubr.msk.f32.gmra.mrb[6].mxu1 %vm523_vm0, %v396_v22  ;;  %996 = vmatprep.mubr.f32.mxu0 %v21060_v7  ;;  %v16118_v62 = vld [vmem:[%s15891_s25 + $0x150] sm:$0xff]  ;;  %v16123_v63 = vld [vmem:[%s15891_s25 + $0x158] sm:$0xff]  ;;  %v16131_v0 = vld [vmem:[%s15891_s25 + $0x160] sm:$0xff] }
  0x2b   : > { %13517 = vmatprep.mubr.msk.f32.mxu1 %vm523_vm0, %v397_v23  ;;  %13848 = vmatpush3.bf16.msra.mxu0 %v15052_v54  ;;  %v16141_v1 = vld [vmem:[%s15891_s25 + $0x168] sm:$0xff]  ;;  %v16144_v2 = vld [vmem:[%s15891_s25 + $0x170] sm:$0xff]  ;;  %v16154_v3 = vld [vmem:[%s15891_s25 + $0x178] sm:$0xff] }
  0x2c   : > { %13704 = vmatpush3.bf16.msra.mxu1 %v15050_v30  ;;  %v16157_v4 = vld [vmem:[%s15891_s25 + $0x180] sm:$0xff]  ;;  %v16167_v5 = vld [vmem:[%s15891_s25 + $0x188] sm:$0xff]  ;;  %v16170_v6 = vld [vmem:[%s15891_s25 + $0x190] sm:$0xff] }
  0x2d   : > { %12146 = vmatmul.mubr.msk.f32.gmra.mrb[8].mxu0 %vm523_vm0, %v393_v18  ;;  %13705 = vmatprep.subr.bf16.mxu1 %v15051_v37  ;;  %v16180_v8 = vld [vmem:[%s15891_s25 + $0x198] sm:$0xff]  ;;  %v16183_v9 = vld [vmem:[%s15891_s25 + $0x1a0] sm:$0xff]  ;;  %v15054_v10 = vld [vmem:[%s21047_s3 + $0x30] sm:$0xff]  }
  0x2e   : > { %13518 = vmatmul.mubr.msk.f32.gmra.mrb[8].mxu1 %vm523_vm0, %v398_v24  ;;  %1002 = vmatprep.mubr.f32.mxu0 %v21060_v7  ;;  %v16196_v11 = vld [vmem:[%s15891_s25 + $0x1a8] sm:$0xff]  ;;  %v16199_v12 = vld [vmem:[%s15891_s25 + $0x1b0] sm:$0xff]  ;;  %v16209_v13 = vld [vmem:[%s15891_s25 + $0x1b8] sm:$0xff] }
  0x2f   : > { %13520 = vmatprep.mubr.msk.f32.mxu1 %vm523_vm0, %v399_v25  ;;  %v16212_v14 = vld [vmem:[%s15891_s25 + $0x1c0] sm:$0xff]  ;;  %v16222_v15 = vld [vmem:[%s15891_s25 + $0x1c8] sm:$0xff]  ;;  %v16225_v16 = vld [vmem:[%s15891_s25 + $0x1d0] sm:$0xff] }
  0x30   : > { %13706 = vmatpush3.bf16.msra.mxu1 %v15051_v37  ;;  %v16235_v17 = vld [vmem:[%s15891_s25 + $0x1d8] sm:$0xff]  ;;  %v16238_v18 = vld [vmem:[%s15891_s25 + $0x1e0] sm:$0xff]  ;;  %v16248_v19 = vld [vmem:[%s15891_s25 + $0x1e8] sm:$0xff] }
  0x31   : > { %12147 = vmatmul.mubr.msk.f32.gmra.mrb[10].mxu0 %vm523_vm0, %v394_v20  ;;  %13707 = vmatprep.subr.bf16.mxu1 %v15053_v55  ;;  %v16251_v20 = vld [vmem:[%s15891_s25 + $0x1f0] sm:$0xff]  ;;  %v16306_v29 = vld [vmem:[%s15891_s25 + $0x228] sm:$0xff] }
  0x32   : > { %13521 = vmatmul.mubr.msk.f32.gmra.mrb[10].mxu1 %vm523_vm0, %v400_v26  ;;  %1008 = vmatprep.mubr.f32.mxu0 %v21060_v7  ;;  %v16309_v30 = vld [vmem:[%s15891_s25 + $0x230] sm:$0xff]  ;;  %v16358_v37 = vld [vmem:[%s15891_s25 + $0x268] sm:$0xff] }
  0x33   : > { %13523 = vmatprep.mubr.msk.f32.mxu1 %vm523_vm0, %v401_v27  ;;  %v16465_v54 = vld [vmem:[%s15891_s25 + $0x2f0] sm:$0xff] }
  0x34   : > { %13708 = vmatpush3.bf16.msra.mxu1 %v15053_v55  ;;  %v16475_v55 = vld [vmem:[%s15891_s25 + $0x2f8] sm:$0xff] }
  0x35   : > { %12148 = vmatmul.mubr.msk.f32.gmra.mrb[12].mxu0 %vm523_vm0, %v395_v21  ;;  %13709 = vmatprep.subr.bf16.mxu1 %v15054_v10  ;;  %v16261_v21 = vld [vmem:[%s15891_s25 + $0x1f8] sm:$0xff] }
  0x36   : > { %13524 = vmatmul.mubr.msk.f32.gmra.mrb[12].mxu1 %vm523_vm0, %v402_v28  ;;  %1014 = vmatprep.mubr.f32.mxu0 %v21060_v7 }
  0x37   : > { %13526 = vmatprep.mubr.msk.f32.mxu1 %vm523_vm0, %v403_v31 }
  0x38   : > { %13710 = vmatpush3.bf16.msra.mxu1 %v15054_v10 }
  0x39   : > { %12149 = vmatmul.mubr.msk.f32.gmra.mrb[14].mxu0 %vm523_vm0, %v396_v22  ;;  %v16264_v22 = vld [vmem:[%s15891_s25 + $0x200] sm:$0xff] }
  0x3a   : > { %13527 = vmatmul.mubr.msk.f32.gmra.mrb[14].mxu1 %vm523_vm0, %v404_v32  ;;  %1020 = vmatprep.mubr.f32.mxu0 %v21060_v7 }
  0x3b   : > { %13529 = vmatprep.mubr.msk.f32.mxu1 %vm523_vm0, %v405_v33 }
  0x3d   : > { %12150 = vmatmul.mubr.msk.f32.gmra.mrb[16].mxu0 %vm523_vm0, %v397_v23  ;;  %v15055_v23 = vld [vmem:[%s21047_s3 + $0x38] sm:$0xff]  }
  0x3e   : > { %13530 = vmatmul.mubr.msk.f32.gmra.mrb[16].mxu1 %vm523_vm0, %v15956_v34  ;;  %1026 = vmatprep.mubr.f32.mxu0 %v21060_v7 }
  0x3f   : > { %13532 = vmatprep.mubr.msk.f32.mxu1 %vm523_vm0, %v15962_v35  ;;  %13711 = vmatprep.subr.bf16.mxu1 %v15055_v23 }
  0x40   : > { %13712 = vmatpush3.bf16.msra.mxu1 %v15055_v23  ;;  %v498_v23 = vld [vmem:[%s15891_s25 + $0x368] sm:$0xff] }
  0x41   : > { %12151 = vmatmul.mubr.msk.f32.gmra.mrb[18].mxu0 %vm523_vm0, %v398_v24  ;;  %v16277_v24 = vld [vmem:[%s15891_s25 + $0x208] sm:$0xff] }
  0x42   : > { %13533 = vmatmul.mubr.msk.f32.gmra.mrb[18].mxu1 %vm523_vm0, %v15966_v36  ;;  %1032 = vmatprep.mubr.f32.mxu0 %v21060_v7 }
  0x43   : > { %13535 = vmatprep.mubr.msk.f32.mxu1 %vm523_vm0, %v15977_v38 }
  0x45   : > { %12152 = vmatmul.mubr.msk.f32.gmra.mrb[20].mxu0 %vm523_vm0, %v399_v25  ;;  %v16280_v25 = vld [vmem:[%s15891_s25 + $0x210] sm:$0xff] }
  0x46   : > { %13536 = vmatmul.mubr.msk.f32.gmra.mrb[20].mxu1 %vm523_vm0, %v15981_v39  ;;  %1038 = vmatprep.mubr.f32.mxu0 %v21060_v7 }
  0x47   : > { %13538 = vmatprep.mubr.msk.f32.mxu1 %vm523_vm0, %v15989_v40 }
  0x49   : > { %12153 = vmatmul.mubr.msk.f32.gmra.mrb[22].mxu0 %vm523_vm0, %v400_v26  ;;  %v16290_v26 = vld [vmem:[%s15891_s25 + $0x218] sm:$0xff] }
  0x4a   : > { %13539 = vmatmul.mubr.msk.f32.gmra.mrb[22].mxu1 %vm523_vm0, %v15993_v41  ;;  %1044 = vmatprep.mubr.f32.mxu0 %v21060_v7 }
  0x4b   : > { %13541 = vmatprep.mubr.msk.f32.mxu1 %vm523_vm0, %v16001_v42 }
  0x4d   : > { %12154 = vmatmul.mubr.msk.f32.gmra.mrb[24].mxu0 %vm523_vm0, %v401_v27  ;;  %v15056_v27 = vld [vmem:[%s21047_s3 + $0x60] sm:$0xff]  }
  0x4e   : > { %13542 = vmatmul.mubr.msk.f32.gmra.mrb[24].mxu1 %vm523_vm0, %v16005_v43  ;;  %1050 = vmatprep.mubr.f32.mxu0 %v21060_v7 }
  0x4f   : > { %13544 = vmatprep.mubr.msk.f32.mxu1 %vm523_vm0, %v16013_v44  ;;  %13849 = vmatprep.subr.bf16.mxu0 %v15056_v27 }
  0x50   : > { %13850 = vmatpush3.bf16.msra.mxu0 %v15056_v27  ;;  %v503_v27 = vld [vmem:[%s15891_s25 + $0x390] sm:$0xff] }
  0x51   : > { %12155 = vmatmul.mubr.msk.f32.gmra.mrb[26].mxu0 %vm523_vm0, %v402_v28  ;;  %v16296_v28 = vld [vmem:[%s15891_s25 + $0x220] sm:$0xff] }
  0x52   : > { %13545 = vmatmul.mubr.msk.f32.gmra.mrb[26].mxu1 %vm523_vm0, %v16017_v45  ;;  %1056 = vmatprep.mubr.f32.mxu0 %v21060_v7 }
  0x53   : > { %13547 = vmatprep.mubr.msk.f32.mxu1 %vm523_vm0, %v16025_v46 }
  0x55   : > { %12156 = vmatmul.mubr.msk.f32.gmra.mrb[28].mxu0 %vm523_vm0, %v403_v31  ;;  %v16319_v31 = vld [vmem:[%s15891_s25 + $0x238] sm:$0xff] }
  0x56   : > { %13548 = vmatmul.mubr.msk.f32.gmra.mrb[28].mxu1 %vm523_vm0, %v16029_v47  ;;  %1062 = vmatprep.mubr.f32.mxu0 %v21060_v7 }
  0x57   : > { %13550 = vmatprep.mubr.msk.f32.mxu1 %vm523_vm0, %v16037_v48 }
  0x59   : > { %12157 = vmatmul.mubr.msk.f32.gmra.mrb[30].mxu0 %vm523_vm0, %v404_v32  ;;  %v16322_v32 = vld [vmem:[%s15891_s25 + $0x240] sm:$0xff] }
  0x5a   : > { %13551 = vmatmul.mubr.msk.f32.gmra.mrb[30].mxu1 %vm523_vm0, %v16041_v49  ;;  %1068 = vmatprep.mubr.f32.mxu0 %v21060_v7 }
  0x5b   : > { %13553 = vmatprep.mubr.msk.f32.mxu1 %vm523_vm0, %v16049_v50 }
  0x5d   : > { %12158 = vmatmul.mubr.msk.f32.gmra.mrb[32].mxu0 %vm523_vm0, %v405_v33  ;;  %v16332_v33 = vld [vmem:[%s15891_s25 + $0x248] sm:$0xff] }
  0x5e   : > { %13554 = vmatmul.mubr.msk.f32.gmra.mrb[32].mxu1 %vm523_vm0, %v16053_v51  ;;  %1074 = vmatprep.mubr.f32.mxu0 %v21060_v7 }
  0x5f   : > { %13556 = vmatprep.mubr.msk.f32.mxu1 %vm523_vm0, %v16061_v52 }
  0x61   : > { %12159 = vmatmul.mubr.msk.f32.gmra.mrb[34].mxu0 %vm523_vm0, %v15956_v34  ;;  %v16335_v34 = vld [vmem:[%s15891_s25 + $0x250] sm:$0xff] }
  0x62   : > { %13557 = vmatmul.mubr.msk.f32.gmra.mrb[34].mxu1 %vm523_vm0, %v16065_v53  ;;  %1080 = vmatprep.mubr.f32.mxu0 %v21060_v7 }
  0x63   : > { %13559 = vmatprep.mubr.msk.f32.mxu1 %vm523_vm0, %v16079_v56 }
  0x65   : > { %12160 = vmatmul.mubr.msk.f32.gmra.mrb[36].mxu0 %vm523_vm0, %v15962_v35  ;;  %v16345_v35 = vld [vmem:[%s15891_s25 + $0x258] sm:$0xff] }
  0x66   : > { %13560 = vmatmul.mubr.msk.f32.gmra.mrb[36].mxu1 %vm523_vm0, %v16084_v57  ;;  %1086 = vmatprep.mubr.f32.mxu0 %v21060_v7 }
  0x67   : > { %13562 = vmatprep.mubr.msk.f32.mxu1 %vm523_vm0, %v16092_v58 }
  0x69   : > { %12161 = vmatmul.mubr.msk.f32.gmra.mrb[38].mxu0 %vm523_vm0, %v15966_v36  ;;  %v16348_v36 = vld [vmem:[%s15891_s25 + $0x260] sm:$0xff] }
  0x6a   : > { %13563 = vmatmul.mubr.msk.f32.gmra.mrb[38].mxu1 %vm523_vm0, %v16097_v59  ;;  %1092 = vmatprep.mubr.f32.mxu0 %v21060_v7 }
  0x6b   : > { %13565 = vmatprep.mubr.msk.f32.mxu1 %vm523_vm0, %v16105_v60 }
  0x6d   : > { %12162 = vmatmul.mubr.msk.f32.gmra.mrb[40].mxu0 %vm523_vm0, %v15977_v38  ;;  %v16361_v38 = vld [vmem:[%s15891_s25 + $0x270] sm:$0xff] }
  0x6e   : > { %13566 = vmatmul.mubr.msk.f32.gmra.mrb[40].mxu1 %vm523_vm0, %v16110_v61  ;;  %1098 = vmatprep.mubr.f32.mxu0 %v21060_v7 }
  0x6f   : > { %13568 = vmatprep.mubr.msk.f32.mxu1 %vm523_vm0, %v16118_v62 }
  0x71   : > { %12163 = vmatmul.mubr.msk.f32.gmra.mrb[42].mxu0 %vm523_vm0, %v15981_v39  ;;  %v16371_v39 = vld [vmem:[%s15891_s25 + $0x278] sm:$0xff] }
  0x72   : > { %13569 = vmatmul.mubr.msk.f32.gmra.mrb[42].mxu1 %vm523_vm0, %v16123_v63  ;;  %1104 = vmatprep.mubr.f32.mxu0 %v21060_v7 }
  0x73   : > { %13571 = vmatprep.mubr.msk.f32.mxu1 %vm523_vm0, %v16131_v0 }
  0x75   : > { %12164 = vmatmul.mubr.msk.f32.gmra.mrb[44].mxu0 %vm523_vm0, %v15989_v40  ;;  %v16374_v40 = vld [vmem:[%s15891_s25 + $0x280] sm:$0xff] }
  0x76   : > { %13572 = vmatmul.mubr.msk.f32.gmra.mrb[44].mxu1 %vm523_vm0, %v16141_v1  ;;  %1110 = vmatprep.mubr.f32.mxu0 %v21060_v7 }
  0x77   : > { %13574 = vmatprep.mubr.msk.f32.mxu1 %vm523_vm0, %v16144_v2 }
  0x79   : > { %12165 = vmatmul.mubr.msk.f32.gmra.mrb[46].mxu0 %vm523_vm0, %v15993_v41  ;;  %v16384_v41 = vld [vmem:[%s15891_s25 + $0x288] sm:$0xff] }
  0x7a   : > { %13575 = vmatmul.mubr.msk.f32.gmra.mrb[46].mxu1 %vm523_vm0, %v16154_v3  ;;  %1116 = vmatprep.mubr.f32.mxu0 %v21060_v7 }
  0x7b   : > { %13577 = vmatprep.mubr.msk.f32.mxu1 %vm523_vm0, %v16157_v4 }
  0x7d   : > { %12166 = vmatmul.mubr.msk.f32.gmra.mrb[48].mxu0 %vm523_vm0, %v16001_v42  ;;  %v16387_v42 = vld [vmem:[%s15891_s25 + $0x290] sm:$0xff] }
  0x7e   : > { %13578 = vmatmul.mubr.msk.f32.gmra.mrb[48].mxu1 %vm523_vm0, %v16167_v5  ;;  %1122 = vmatprep.mubr.f32.mxu0 %v21060_v7 }
  0x7f   : > { %13580 = vmatprep.mubr.msk.f32.mxu1 %vm523_vm0, %v16170_v6 }
  0x81   : > { %12167 = vmatmul.mubr.msk.f32.gmra.mrb[50].mxu0 %vm523_vm0, %v16005_v43  ;;  %v16397_v43 = vld [vmem:[%s15891_s25 + $0x298] sm:$0xff] }
  0x82   : > { %13581 = vmatmul.mubr.msk.f32.gmra.mrb[50].mxu1 %vm523_vm0, %v16180_v8  ;;  %1128 = vmatprep.mubr.f32.mxu0 %v21060_v7 }
  0x83   : > { %13583 = vmatprep.mubr.msk.f32.mxu1 %vm523_vm0, %v16183_v9 }
  0x85   : > { %12168 = vmatmul.mubr.msk.f32.gmra.mrb[52].mxu0 %vm523_vm0, %v16013_v44  ;;  %v16400_v44 = vld [vmem:[%s15891_s25 + $0x2a0] sm:$0xff] }
  0x86   : > { %13584 = vmatmul.mubr.msk.f32.gmra.mrb[52].mxu1 %vm523_vm0, %v16196_v11  ;;  %1134 = vmatprep.mubr.f32.mxu0 %v21060_v7 }
  0x87   : > { %13586 = vmatprep.mubr.msk.f32.mxu1 %vm523_vm0, %v16199_v12 }
  0x89   : > { %12169 = vmatmul.mubr.msk.f32.gmra.mrb[54].mxu0 %vm523_vm0, %v16017_v45  ;;  %v16410_v45 = vld [vmem:[%s15891_s25 + $0x2a8] sm:$0xff] }
  0x8a   : > { %13587 = vmatmul.mubr.msk.f32.gmra.mrb[54].mxu1 %vm523_vm0, %v16209_v13  ;;  %1140 = vmatprep.mubr.f32.mxu0 %v21060_v7 }
  0x8b   : > { %13589 = vmatprep.mubr.msk.f32.mxu1 %vm523_vm0, %v16212_v14 }
  0x8d   : > { %12170 = vmatmul.mubr.msk.f32.gmra.mrb[56].mxu0 %vm523_vm0, %v16025_v46  ;;  %v16413_v46 = vld [vmem:[%s15891_s25 + $0x2b0] sm:$0xff] }
  0x8e   : > { %13590 = vmatmul.mubr.msk.f32.gmra.mrb[56].mxu1 %vm523_vm0, %v16222_v15  ;;  %1146 = vmatprep.mubr.f32.mxu0 %v21060_v7 }
  0x8f   : > { %13592 = vmatprep.mubr.msk.f32.mxu1 %vm523_vm0, %v16225_v16 }
  0x91   : > { %12171 = vmatmul.mubr.msk.f32.gmra.mrb[58].mxu0 %vm523_vm0, %v16029_v47  ;;  %v16423_v47 = vld [vmem:[%s15891_s25 + $0x2b8] sm:$0xff] }
  0x92   : > { %13593 = vmatmul.mubr.msk.f32.gmra.mrb[58].mxu1 %vm523_vm0, %v16235_v17  ;;  %1152 = vmatprep.mubr.f32.mxu0 %v21060_v7 }
  0x93   : > { %13595 = vmatprep.mubr.msk.f32.mxu1 %vm523_vm0, %v16238_v18 }
  0x95   : > { %12172 = vmatmul.mubr.msk.f32.gmra.mrb[60].mxu0 %vm523_vm0, %v16037_v48  ;;  %v16426_v48 = vld [vmem:[%s15891_s25 + $0x2c0] sm:$0xff] }
  0x96   : > { %13596 = vmatmul.mubr.msk.f32.gmra.mrb[60].mxu1 %vm523_vm0, %v16248_v19  ;;  %1158 = vmatprep.mubr.f32.mxu0 %v21060_v7 }
  0x97   : > { %13598 = vmatprep.mubr.msk.f32.mxu1 %vm523_vm0, %v16251_v20 }
  0x99   : > { %12173 = vmatmul.mubr.msk.f32.gmra.mrb[62].mxu0 %vm523_vm0, %v16041_v49  ;;  %v16436_v49 = vld [vmem:[%s15891_s25 + $0x2c8] sm:$0xff] }
  0x9a   : > { %13599 = vmatmul.mubr.msk.f32.gmra.mrb[62].mxu1 %vm523_vm0, %v16261_v21  ;;  %1164 = vmatprep.mubr.f32.mxu0 %v21060_v7 }
  0x9b   : > { %13601 = vmatprep.mubr.msk.f32.mxu1 %vm523_vm0, %v16264_v22 }
  0x9d   : > { %12174 = vmatmul.mubr.msk.f32.gmra.mrb[64].mxu0 %vm523_vm0, %v16049_v50  ;;  %v16439_v50 = vld [vmem:[%s15891_s25 + $0x2d0] sm:$0xff] }
  0x9e   : > { %13602 = vmatmul.mubr.msk.f32.gmra.mrb[64].mxu1 %vm523_vm0, %v16277_v24  ;;  %1170 = vmatprep.mubr.f32.mxu0 %v21060_v7 }
  0x9f   : > { %13604 = vmatprep.mubr.msk.f32.mxu1 %vm523_vm0, %v16280_v25 }
  0xa1   : > { %12175 = vmatmul.mubr.msk.f32.gmra.mrb[66].mxu0 %vm523_vm0, %v16053_v51  ;;  %v16449_v51 = vld [vmem:[%s15891_s25 + $0x2d8] sm:$0xff] }
  0xa2   : > { %13605 = vmatmul.mubr.msk.f32.gmra.mrb[66].mxu1 %vm523_vm0, %v16290_v26  ;;  %1176 = vmatprep.mubr.f32.mxu0 %v21060_v7 }
  0xa3   : > { %13607 = vmatprep.mubr.msk.f32.mxu1 %vm523_vm0, %v16296_v28 }
  0xa5   : > { %12176 = vmatmul.mubr.msk.f32.gmra.mrb[68].mxu0 %vm523_vm0, %v16061_v52  ;;  %v16452_v52 = vld [vmem:[%s15891_s25 + $0x2e0] sm:$0xff] }
  0xa6   : > { %13608 = vmatmul.mubr.msk.f32.gmra.mrb[68].mxu1 %vm523_vm0, %v16306_v29  ;;  %1182 = vmatprep.mubr.f32.mxu0 %v21060_v7 }
  0xa7   : > { %13610 = vmatprep.mubr.msk.f32.mxu1 %vm523_vm0, %v16309_v30 }
  0xa9   : > { %12177 = vmatmul.mubr.msk.f32.gmra.mrb[70].mxu0 %vm523_vm0, %v16065_v53  ;;  %v16462_v53 = vld [vmem:[%s15891_s25 + $0x2e8] sm:$0xff] }
  0xaa   : > { %13611 = vmatmul.mubr.msk.f32.gmra.mrb[70].mxu1 %vm523_vm0, %v16319_v31  ;;  %1188 = vmatprep.mubr.f32.mxu0 %v21060_v7 }
  0xab   : > { %13613 = vmatprep.mubr.msk.f32.mxu1 %vm523_vm0, %v16322_v32 }
  0xad   : > { %12178 = vmatmul.mubr.msk.f32.gmra.mrb[72].mxu0 %vm523_vm0, %v16079_v56  ;;  %v16478_v56 = vld [vmem:[%s15891_s25 + $0x300] sm:$0xff] }
  0xae   : > { %13614 = vmatmul.mubr.msk.f32.gmra.mrb[72].mxu1 %vm523_vm0, %v16332_v33  ;;  %1194 = vmatprep.mubr.f32.mxu0 %v21060_v7 }
  0xaf   : > { %13616 = vmatprep.mubr.msk.f32.mxu1 %vm523_vm0, %v16335_v34 }
  0xb1   : > { %12179 = vmatmul.mubr.msk.f32.gmra.mrb[74].mxu0 %vm523_vm0, %v16084_v57  ;;  %v486_v57 = vld [vmem:[%s15891_s25 + $0x308] sm:$0xff] }
  0xb2   : > { %13617 = vmatmul.mubr.msk.f32.gmra.mrb[74].mxu1 %vm523_vm0, %v16345_v35  ;;  %1200 = vmatprep.mubr.f32.mxu0 %v21060_v7 }
  0xb3   : > { %13619 = vmatprep.mubr.msk.f32.mxu1 %vm523_vm0, %v16348_v36 }
  0xb5   : > { %12180 = vmatmul.mubr.msk.f32.gmra.mrb[76].mxu0 %vm523_vm0, %v16092_v58  ;;  %v487_v58 = vld [vmem:[%s15891_s25 + $0x310] sm:$0xff] }
  0xb6   : > { %13620 = vmatmul.mubr.msk.f32.gmra.mrb[76].mxu1 %vm523_vm0, %v16358_v37  ;;  %1206 = vmatprep.mubr.f32.mxu0 %v21060_v7 }
  0xb7   : > { %13622 = vmatprep.mubr.msk.f32.mxu1 %vm523_vm0, %v16361_v38 }
  0xb9   : > { %12181 = vmatmul.mubr.msk.f32.gmra.mrb[78].mxu0 %vm523_vm0, %v16097_v59  ;;  %v488_v59 = vld [vmem:[%s15891_s25 + $0x318] sm:$0xff] }
  0xba   : > { %13623 = vmatmul.mubr.msk.f32.gmra.mrb[78].mxu1 %vm523_vm0, %v16371_v39  ;;  %1212 = vmatprep.mubr.f32.mxu0 %v21060_v7 }
  0xbb   : > { %13625 = vmatprep.mubr.msk.f32.mxu1 %vm523_vm0, %v16374_v40 }
  0xbd   : > { %12182 = vmatmul.mubr.msk.f32.gmra.mrb[80].mxu0 %vm523_vm0, %v16105_v60  ;;  %v15057_v60 = vld [vmem:[%s21047_s3 + $0x68] sm:$0xff]  }
  0xbe   : > { %13626 = vmatmul.mubr.msk.f32.gmra.mrb[80].mxu1 %vm523_vm0, %v16384_v41  ;;  %1218 = vmatprep.mubr.f32.mxu0 %v21060_v7 }
  0xbf   : > { %13628 = vmatprep.mubr.msk.f32.mxu1 %vm523_vm0, %v16387_v42  ;;  %13851 = vmatprep.subr.bf16.mxu0 %v15057_v60 }
  0xc0   : > { %13852 = vmatpush3.bf16.msra.mxu0 %v15057_v60 }
  0xc1   : > { %12183 = vmatmul.mubr.msk.f32.gmra.mrb[82].mxu0 %vm523_vm0, %v16110_v61  ;;  %v489_v61 = vld [vmem:[%s15891_s25 + $0x320] sm:$0xff] }
  0xc2   : > { %13629 = vmatmul.mubr.msk.f32.gmra.mrb[82].mxu1 %vm523_vm0, %v16397_v43  ;;  %1224 = vmatprep.mubr.f32.mxu0 %v21060_v7 }
  0xc3   : > { %13631 = vmatprep.mubr.msk.f32.mxu1 %vm523_vm0, %v16400_v44 }
  0xc5   : > { %12184 = vmatmul.mubr.msk.f32.gmra.mrb[84].mxu0 %vm523_vm0, %v16118_v62  ;;  %v490_v62 = vld [vmem:[%s15891_s25 + $0x328] sm:$0xff] }
  0xc6   : > { %13632 = vmatmul.mubr.msk.f32.gmra.mrb[84].mxu1 %vm523_vm0, %v16410_v45  ;;  %1230 = vmatprep.mubr.f32.mxu0 %v21060_v7 }
  0xc7   : > { %13634 = vmatprep.mubr.msk.f32.mxu1 %vm523_vm0, %v16413_v46 }
  0xc9   : > { %12185 = vmatmul.mubr.msk.f32.gmra.mrb[86].mxu0 %vm523_vm0, %v16123_v63  ;;  %v491_v63 = vld [vmem:[%s15891_s25 + $0x330] sm:$0xff] }
  0xca   : > { %13635 = vmatmul.mubr.msk.f32.gmra.mrb[86].mxu1 %vm523_vm0, %v16423_v47  ;;  %1236 = vmatprep.mubr.f32.mxu0 %v21060_v7 }
  0xcb   : > { %13637 = vmatprep.mubr.msk.f32.mxu1 %vm523_vm0, %v16426_v48 }
  0xcd   : > { %12186 = vmatmul.mubr.msk.f32.gmra.mrb[88].mxu0 %vm523_vm0, %v16131_v0  ;;  %v492_v0 = vld [vmem:[%s15891_s25 + $0x338] sm:$0xff] }
  0xce   : > { %13638 = vmatmul.mubr.msk.f32.gmra.mrb[88].mxu1 %vm523_vm0, %v16436_v49  ;;  %1242 = vmatprep.mubr.f32.mxu0 %v21060_v7 }
  0xcf   : > { %13640 = vmatprep.mubr.msk.f32.mxu1 %vm523_vm0, %v16439_v50 }
  0xd1   : > { %12187 = vmatmul.mubr.msk.f32.gmra.mrb[90].mxu0 %vm523_vm0, %v16141_v1  ;;  %v493_v1 = vld [vmem:[%s15891_s25 + $0x340] sm:$0xff] }
  0xd2   : > { %13641 = vmatmul.mubr.msk.f32.gmra.mrb[90].mxu1 %vm523_vm0, %v16449_v51  ;;  %1248 = vmatprep.mubr.f32.mxu0 %v21060_v7 }
  0xd3   : > { %13643 = vmatprep.mubr.msk.f32.mxu1 %vm523_vm0, %v16452_v52 }
  0xd5   : > { %12188 = vmatmul.mubr.msk.f32.gmra.mrb[92].mxu0 %vm523_vm0, %v16144_v2  ;;  %v494_v2 = vld [vmem:[%s15891_s25 + $0x348] sm:$0xff] }
  0xd6   : > { %13644 = vmatmul.mubr.msk.f32.gmra.mrb[92].mxu1 %vm523_vm0, %v16462_v53  ;;  %1254 = vmatprep.mubr.f32.mxu0 %v21060_v7 }
  0xd7   : > { %13646 = vmatprep.mubr.msk.f32.mxu1 %vm523_vm0, %v16465_v54 }
  0xd9   : > { %12189 = vmatmul.mubr.msk.f32.gmra.mrb[94].mxu0 %vm523_vm0, %v16154_v3  ;;  %v495_v3 = vld [vmem:[%s15891_s25 + $0x350] sm:$0xff] }
  0xda   : > { %13647 = vmatmul.mubr.msk.f32.gmra.mrb[94].mxu1 %vm523_vm0, %v16475_v55  ;;  %1260 = vmatprep.mubr.f32.mxu0 %v21060_v7 }
  0xdb   : > { %13649 = vmatprep.mubr.msk.f32.mxu1 %vm523_vm0, %v16478_v56 }
  0xdd   : > { %12190 = vmatmul.mubr.msk.f32.gmra.mrb[96].mxu0 %vm523_vm0, %v16157_v4  ;;  %v496_v4 = vld [vmem:[%s15891_s25 + $0x358] sm:$0xff] }
  0xde   : > { %13650 = vmatmul.mubr.msk.f32.gmra.mrb[96].mxu1 %vm523_vm0, %v486_v57  ;;  %1266 = vmatprep.mubr.f32.mxu0 %v21060_v7 }
  0xdf   : > { %13652 = vmatprep.mubr.msk.f32.mxu1 %vm523_vm0, %v487_v58  ;;  %v499_v58 = vld [vmem:[%s15891_s25 + $0x370] sm:$0xff] }
  0xe1   : > { %12191 = vmatmul.mubr.msk.f32.gmra.mrb[98].mxu0 %vm523_vm0, %v16167_v5 }
  0xe2   : > { %13653 = vmatmul.mubr.msk.f32.gmra.mrb[98].mxu1 %vm523_vm0, %v488_v59  ;;  %1272 = vmatprep.mubr.f32.mxu0 %v21060_v7 }
  0xe3   : > { %13655 = vmatprep.mubr.msk.f32.mxu1 %vm523_vm0, %v489_v61  ;;  %v504_v61 = vld [vmem:[%s15891_s25 + $0x398] sm:$0xff] }
  0xe5   : > { %12192 = vmatmul.mubr.msk.f32.gmra.mrb[100].mxu0 %vm523_vm0, %v16170_v6  ;;  %v497_v6 = vld [vmem:[%s15891_s25 + $0x360] sm:$0xff] }
  0xe6   : > { %13656 = vmatmul.mubr.msk.f32.gmra.mrb[100].mxu1 %vm523_vm0, %v490_v62  ;;  %1278 = vmatprep.mubr.f32.mxu0 %v21060_v7 }
  0xe7   : > { %13658 = vmatprep.mubr.msk.f32.mxu1 %vm523_vm0, %v491_v63  ;;  %v500_v63 = vld [vmem:[%s15891_s25 + $0x378] sm:$0xff] }
  0xe9   : > { %12193 = vmatmul.mubr.msk.f32.gmra.mrb[102].mxu0 %vm523_vm0, %v16180_v8 }
  0xea   : > { %13659 = vmatmul.mubr.msk.f32.gmra.mrb[102].mxu1 %vm523_vm0, %v492_v0  ;;  %1284 = vmatprep.mubr.f32.mxu0 %v21060_v7 }
  0xeb   : > { %13661 = vmatprep.mubr.msk.f32.mxu1 %vm523_vm0, %v493_v1  ;;  %v501_v1 = vld [vmem:[%s15891_s25 + $0x380] sm:$0xff] }
  0xed   : > { %12194 = vmatmul.mubr.msk.f32.gmra.mrb[104].mxu0 %vm523_vm0, %v16183_v9 }
  0xee   : > { %13662 = vmatmul.mubr.msk.f32.gmra.mrb[104].mxu1 %vm523_vm0, %v494_v2  ;;  %1290 = vmatprep.mubr.f32.mxu0 %v21060_v7 }
  0xef   : > { %13664 = vmatprep.mubr.msk.f32.mxu1 %vm523_vm0, %v495_v3 }
  0xf0   : > { %v16526_v5 = vpop.f32.mrb[0].mxu0 }
  0xf1   : > { %v16529_v8 = vpop.f32.mrb[1].mxu0  ;;  %12195 = vmatmul.mubr.msk.f32.gmra.mrb[106].mxu0 %vm523_vm0, %v16196_v11  ;;  %v16533_v10 = vpop.f32.mrb[0].mxu1  ;;  %v505_v11 = vld [vmem:[%s15891_s25 + $0x3a0] sm:$0xff] }
  0xf2   : > { %21278 = vst [vmem:[#allocation6_spill] sm:$0xff] %v16533_v10  ;;  %13665 = vmatmul.mubr.msk.f32.gmra.mrb[106].mxu1 %vm523_vm0, %v496_v4  ;;  %1296 = vmatprep.mubr.f32.mxu0 %v21060_v7  ;;  %v16537_v9 = vpop.f32.mrb[1].mxu1 }
  0xf3   : > { %21279 = vst [vmem:[#allocation7_spill] sm:$0xff] %v16537_v9  ;;  %13667 = vmatprep.mubr.msk.f32.mxu1 %vm523_vm0, %v497_v6  ;;  %v502_v6 = vld [vmem:[%s15891_s25 + $0x388] sm:$0xff]  ;;  %v509_v9 = vld [vmem:[%s15891_s25 + $0x3c0] sm:$0xff] }
  0xf4   : > { %v16543_v57 = vpop.f32.mrb[2].mxu0 }
  0xf5   : > { %v16548_v59 = vpop.f32.mrb[3].mxu0  ;;  %12196 = vmatmul.mubr.msk.f32.gmra.mrb[108].mxu0 %vm523_vm0, %v16199_v12  ;;  %v16552_v60 = vpop.f32.mrb[2].mxu1 }
  0xf6   : > { %21280 = vst [vmem:[#allocation8_spill] sm:$0xff] %v16552_v60  ;;  %13668 = vmatmul.mubr.msk.f32.gmra.mrb[108].mxu1 %vm523_vm0, %v498_v23  ;;  %1302 = vmatprep.mubr.f32.mxu0 %v21060_v7  ;;  %v16558_v62 = vpop.f32.mrb[3].mxu1 }
  0xf7   : > { %21281 = vst [vmem:[#allocation9_spill] sm:$0xff] %v16558_v62  ;;  %13670 = vmatprep.mubr.msk.f32.mxu1 %vm523_vm0, %v499_v58 }
  0xf8   : > { %v16564_v12 = vpop.f32.mrb[4].mxu0 }
  0xf9   : > { %v16567_v2 = vpop.f32.mrb[5].mxu0  ;;  %12197 = vmatmul.mubr.msk.f32.gmra.mrb[110].mxu0 %vm523_vm0, %v16209_v13  ;;  %v16571_v3 = vpop.f32.mrb[4].mxu1  ;;  %v21291_v13 = vmov 0.0  }
  0xfa   : > { %21282 = vst [vmem:[#allocation10_spill] sm:$0xff] %v16571_v3  ;;  %13671 = vmatmul.mubr.msk.f32.gmra.mrb[110].mxu1 %vm523_vm0, %v500_v63  ;;  %1308 = vmatprep.mubr.f32.mxu0 %v21060_v7  ;;  %v16575_v4 = vpop.f32.mrb[5].mxu1 }
  0xfb   : > { %21283 = vst [vmem:[#allocation11_spill] sm:$0xff] %v16575_v4  ;;  %13673 = vmatprep.mubr.msk.f32.mxu1 %vm523_vm0, %v501_v1 }
  0xfc   : > { %v16581_v58 = vpop.f32.mrb[6].mxu0 }
  0xfd   : > { %v16586_v0 = vpop.f32.mrb[7].mxu0  ;;  %12198 = vmatmul.mubr.msk.f32.gmra.mrb[112].mxu0 %vm523_vm0, %v16212_v14  ;;  %v16590_v63 = vpop.f32.mrb[6].mxu1 }
  0xfe   : > { %21284 = vst [vmem:[#allocation12_spill] sm:$0xff] %v16590_v63  ;;  %13674 = vmatmul.mubr.msk.f32.gmra.mrb[112].mxu1 %vm523_vm0, %v502_v6  ;;  %1314 = vmatprep.mubr.f32.mxu0 %v21060_v7  ;;  %v16596_v23 = vpop.f32.mrb[7].mxu1  ;;  %v508_v63 = vld [vmem:[%s15891_s25 + $0x3b8] sm:$0xff] }
  0xff   : > { %21285 = vst [vmem:[#allocation13_spill] sm:$0xff] %v16596_v23  ;;  %13676 = vmatprep.mubr.msk.f32.mxu1 %vm523_vm0, %v503_v27  ;;  %v506_v27 = vld [vmem:[%s15891_s25 + $0x3a8] sm:$0xff]  ;;  %v507_v23 = vld [vmem:[%s15891_s25 + $0x3b0] sm:$0xff] }
 0x100   : > { %v16602_v14 = vpop.f32.mrb[8].mxu0 }
 0x101   : > { %v16605_v4 = vpop.f32.mrb[9].mxu0  ;;  %12199 = vmatmul.mubr.msk.f32.gmra.mrb[114].mxu0 %vm523_vm0, %v16222_v15  ;;  %v16609_v6 = vpop.f32.mrb[8].mxu1  ;;  %v2514_v15 = vlaneseq }
 0x102   : > { %21286 = vst [vmem:[#allocation14_spill] sm:$0xff] %v16605_v4  ;;  %21287 = vst [vmem:[#allocation15_spill] sm:$0xff] %v16609_v6  ;;  %13677 = vmatmul.mubr.msk.f32.gmra.mrb[114].mxu1 %vm523_vm0, %v504_v61  ;;  %1320 = vmatprep.mubr.f32.mxu0 %v21060_v7  ;;  %v16613_v1 = vpop.f32.mrb[9].mxu1 }
 0x103   : > { %21288 = vst [vmem:[#allocation16_spill] sm:$0xff] %v16613_v1  ;;  %13679 = vmatprep.mubr.msk.f32.mxu1 %vm523_vm0, %v505_v11  ;;  %v2515_v10 = vshrl.u32 %v2514_v15, 7  ;;  %v510_v15 = vld [vmem:[%s15891_s25 + $0x3c8] sm:$0xff] }
 0x104   : > { %v16619_v3 = vpop.f32.mrb[10].mxu0 }
 0x105   : > { %v16624_v61 = vpop.f32.mrb[11].mxu0  ;;  %12200 = vmatmul.mubr.msk.f32.gmra.mrb[116].mxu0 %vm523_vm0, %v16225_v16  ;;  %v16628_v7 = vpop.f32.mrb[10].mxu1  ;;  %v16663_v60 = vsub.s32 0, %v2515_v10 }
 0x106   : > { %21289 = vst [vmem:[#allocation17_spill] sm:$0xff] %v16624_v61  ;;  %21290 = vst [vmem:[#allocation18_spill] sm:$0xff] %v16628_v7  ;;  %13680 = vmatmul.mubr.msk.f32.gmra.mrb[116].mxu1 %vm523_vm0, %v506_v27  ;;  %1326 = vmatprep.mubr.f32.mxu0 %v21291_v13  ;;  %v16634_v1 = vpop.f32.mrb[11].mxu1 }
 0x107   : > { %21292 = vst [vmem:[#allocation19_spill] sm:$0xff] %v16634_v1  ;;  %13682 = vmatprep.mubr.msk.f32.mxu1 %vm523_vm0, %v507_v23  ;;  %v2510_v23 = vld [vmem:[%s21046_s2] sm:$0x1]  ;;  %v511_v1 = vld [vmem:[%s15891_s25 + $0x3d0] sm:$0xff] }
 0x108   : > { %v16640_v16 = vpop.f32.mrb[12].mxu0  ;;  %v2512_v7 = vpack.i.b16 %v2510_v23, %v2510_v23  ;;  %v512_v23 = vld [vmem:[%s15891_s25 + $0x3d8] sm:$0xff] }
 0x109   : > { %v16643_v62 = vpop.f32.mrb[13].mxu0  ;;  %12201 = vmatmul.mubr.msk.f32.gmra.mrb[118].mxu0 %vm523_vm0, %v16235_v17  ;;  %v16647_v27 = vpop.f32.mrb[12].mxu1 }
 0x10a   : > { %21293 = vst [vmem:[#allocation20_spill] sm:$0xff] %v16643_v62  ;;  %21294 = vst [vmem:[#allocation21_spill] sm:$0xff] %v16647_v27  ;;  %13683 = vmatmul.mubr.msk.f32.gmra.mrb[118].mxu1 %vm523_vm0, %v508_v63  ;;  %1332 = vmatprep.mubr.f32.mxu0 %v21291_v13  ;;  %v16654_v6 = vpop.f32.mrb[13].mxu1  ;;  %v16685_v27 = vrot.slane %v2512_v7, %v16663_v60  ;;  %v514_v63 = vld [vmem:[%s15891_s25 + $0x3e8] sm:$0xff] }
 0x10b   : > { %21295 = vst [vmem:[#allocation22_spill] sm:$0xff] %v16654_v6  ;;  %13685 = vmatprep.mubr.msk.f32.mxu1 %vm523_vm0, %v509_v9  ;;  %v513_v6 = vld [vmem:[%s15891_s25 + $0x3e0] sm:$0xff] }
 0x10c   : > { %v16660_v17 = vpop.f32.mrb[14].mxu0 }
 0x10d   : > { %v16667_v4 = vpop.f32.mrb[15].mxu0  ;;  %12202 = vmatmul.mubr.msk.f32.gmra.mrb[120].mxu0 %vm523_vm0, %v16238_v18  ;;  %v16671_v9 = vpop.f32.mrb[14].mxu1 }
 0x10e   : > { %21296 = vst [vmem:[#allocation23_spill] sm:$0xff] %v16667_v4  ;;  %21297 = vst [vmem:[#allocation24_spill] sm:$0xff] %v16671_v9  ;;  %13686 = vmatmul.mubr.msk.f32.gmra.mrb[120].mxu1 %vm523_vm0, %v510_v15  ;;  %1338 = vmatprep.mubr.f32.mxu0 %v21291_v13  ;;  %v16677_v10 = vpop.f32.mrb[15].mxu1  ;;  %v515_v9 = vld [vmem:[%s15891_s25 + $0x3f0] sm:$0xff] }
 0x10f   : > { %21298 = vst [vmem:[#allocation25_spill] sm:$0xff] %v16677_v10  ;;  %13688 = vmatprep.mubr.msk.f32.mxu1 %vm523_vm0, %v511_v1 }
 0x110   : > { %v1022_v18 = vpop.f32.mrb[16].mxu0 }
 0x111   : > { %v16687_v11 = vpop.f32.mrb[17].mxu0  ;;  %12203 = vmatmul.mubr.msk.f32.gmra.mrb[122].mxu0 %vm523_vm0, %v16248_v19  ;;  %v16691_v15 = vpop.f32.mrb[16].mxu1  ;;  %v21301_v19 = vpack.c.bf16 %v16543_v57, %v16526_v5  ;;  %v516_v5 = vld [vmem:[%s15891_s25 + $0x3f8] sm:$0xff] }
 0x112   : > { %21299 = vst [vmem:[#allocation26_spill] sm:$0xff] %v16691_v15  ;;  %13689 = vmatmul.mubr.msk.f32.gmra.mrb[122].mxu1 %vm523_vm0, %v512_v23  ;;  %1344 = vmatprep.mubr.f32.mxu0 %v21291_v13  ;;  %v16695_v1 = vpop.f32.mrb[17].mxu1 }
 0x113   : > { %21300 = vst [vmem:[#allocation27_spill] sm:$0xff] %v16695_v1  ;;  %13691 = vmatprep.mubr.msk.f32.mxu1 %vm523_vm0, %v513_v6  ;;  %v2518_v61 = vadd.bf16 %v16685_v27, %v21301_v19  ;;  %v21305_v19 = vpack.c.bf16 %v16619_v3, %v16602_v14 }
 0x114   : > { %v1028_v10 = vpop.f32.mrb[18].mxu0 }
 0x115   : > { %v2450_v62 = vpack.c.bf16 %v1028_v10, %v1022_v18  ;;  %v16706_v23 = vpop.f32.mrb[19].mxu0  ;;  %12204 = vmatmul.mubr.msk.f32.gmra.mrb[124].mxu0 %vm523_vm0, %v16251_v20  ;;  %v16710_v4 = vpop.f32.mrb[18].mxu1  ;;  %v21304_v20 = vpack.c.bf16 %v16581_v58, %v16564_v12 }
 0x116   : > { %21302 = vst [vmem:[#allocation28_spill] sm:$0xff] %v16710_v4  ;;  %13692 = vmatmul.mubr.msk.f32.gmra.mrb[124].mxu1 %vm523_vm0, %v514_v63  ;;  %1350 = vmatprep.mubr.f32.mxu0 %v21291_v13  ;;  %v16716_v7 = vpop.f32.mrb[19].mxu1  ;;  %v2520_v63 = vadd.bf16 %v16685_v27, %v21305_v19 }
 0x117   : > { %21303 = vst [vmem:[#allocation29_spill] sm:$0xff] %v16716_v7  ;;  %13694 = vmatprep.mubr.msk.f32.mxu1 %vm523_vm0, %v515_v9  ;;  %v2519_v10 = vadd.bf16 %v16685_v27, %v21304_v20  ;;  %v21088_v9 = vmov 0  }
 0x118   : > { %v1034_v18 = vpop.f32.mrb[20].mxu0  ;;  %v2582_v1 = vmax.bf16 %v21088_v9, %v2518_v61  ;;  %v2584_v61 = vmax.bf16 %v21088_v9, %v2520_v63 }
 0x119   : > { %v16730_v6 = vpop.f32.mrb[21].mxu0  ;;  %12205 = vmatmul.mubr.msk.f32.gmra.mrb[126].mxu0 %vm523_vm0, %v16261_v21  ;;  %v16735_v57 = vpop.f32.mrb[20].mxu1  ;;  %v2583_v58 = vmax.bf16 %v21088_v9, %v2519_v10 }
 0x11a   : > { %21306 = vst [vmem:[#allocation30_spill] sm:$0xff] %v16735_v57  ;;  %13695 = vmatmul.mubr.msk.f32.gmra.mrb[126].mxu1 %vm523_vm0, %v516_v5  ;;  %1356 = vmatprep.mubr.f32.mxu0 %v21291_v13  ;;  %v16739_v12 = vpop.f32.mrb[21].mxu1 }
 0x11b   : > { %21307 = vst [vmem:[#allocation31_spill] sm:$0xff] %v16739_v12  ;;  %13713 = vmatprep.mubr.bf16.mxu1 %v2582_v1 }
 0x11c   : > { %v1040_v14 = vpop.f32.mrb[22].mxu0 }
 0x11d   : > { %v2451_v20 = vpack.c.bf16 %v1040_v14, %v1034_v18  ;;  %v16744_v21 = vpop.f32.mrb[23].mxu0  ;;  %12206 = vmatmul.mubr.msk.f32.gmra.mrb[128].mxu0 %vm523_vm0, %v16264_v22  ;;  %v16749_v5 = vpop.f32.mrb[22].mxu1  ;;  %v15058_v22 = vld [vmem:[%s21047_s3 + $0x70] sm:$0xff]   ;;  %v21310_v18 = vpack.c.bf16 %v16660_v17, %v16640_v16 }
 0x11e   : > { %21308 = vst [vmem:[#allocation32_spill] sm:$0xff] %v16749_v5  ;;  %13714 = vmatmul.mubr.bf16.vlgmr.msra.gmra.mrb[128].mxu1 %v2583_v58  ;;  %1362 = vmatprep.mubr.f32.mxu0 %v21291_v13  ;;  %v16754_v1 = vpop.f32.mrb[23].mxu1  ;;  %v2522_v58 = vadd.bf16 %v16685_v27, %v2450_v62 }
 0x11f   : > { %21309 = vst [vmem:[#allocation33_spill] sm:$0xff] %v16754_v1  ;;  %13717 = vmatprep.mubr.bf16.mxu1 %v2584_v61  ;;  %v2521_v63 = vadd.bf16 %v16685_v27, %v21310_v18  ;;  %13853 = vmatprep.subr.bf16.mxu0 %v15058_v22  ;;  %v15657_v1 = vld [vmem:[%s15891_s25 + $0x330] sm:$0xff] }
 0x120   : > { %v1046_v14 = vpop.f32.mrb[24].mxu0  ;;  %13854 = vmatpush3.bf16.msra.mxu0 %v15058_v22 }
 0x121   : > { %v16766_v3 = vpop.f32.mrb[25].mxu0  ;;  %12207 = vmatmul.mubr.msk.f32.gmra.mrb[130].mxu0 %vm523_vm0, %v16277_v24  ;;  %v16770_v61 = vpop.f32.mrb[24].mxu1  ;;  %v2585_v18 = vmax.bf16 %v21088_v9, %v2521_v63  ;;  %v2586_v24 = vmax.bf16 %v21088_v9, %v2522_v58 }
 0x122   : > { %21311 = vst [vmem:[#allocation34_spill] sm:$0xff] %v16770_v61  ;;  %1368 = vmatprep.mubr.f32.mxu0 %v21291_v13  ;;  %v16773_v10 = vpop.f32.mrb[25].mxu1 }
 0x123   : > { %21312 = vst [vmem:[#allocation35_spill] sm:$0xff] %v16773_v10 }
 0x124   : > { %v1052_v17 = vpop.f32.mrb[26].mxu0 }
 0x125   : > { %v2452_v62 = vpack.c.bf16 %v1052_v17, %v1046_v14  ;;  %v16778_v19 = vpop.f32.mrb[27].mxu0  ;;  %12208 = vmatmul.mubr.msk.f32.gmra.mrb[132].mxu0 %vm523_vm0, %v16280_v25  ;;  %v16783_v12 = vpop.f32.mrb[26].mxu1  ;;  %v2523_v14 = vadd.bf16 %v16685_v27, %v2451_v20 }
 0x126   : > { %21313 = vst [vmem:[#allocation36_spill] sm:$0xff] %v16783_v12  ;;  %13718 = vmatmul.mubr.bf16.gmra.mrb[132].mxu1 %v2585_v18  ;;  %1374 = vmatprep.mubr.f32.mxu0 %v21291_v13  ;;  %v16788_v22 = vpop.f32.mrb[27].mxu1 }
 0x127   : > { %21314 = vst [vmem:[#allocation37_spill] sm:$0xff] %v16788_v22  ;;  %13721 = vmatprep.mubr.bf16.mxu1 %v2586_v24  ;;  %v2524_v25 = vadd.bf16 %v16685_v27, %v2452_v62  ;;  %v2587_v20 = vmax.bf16 %v21088_v9, %v2523_v14  ;;  %v15655_v22 = vld [vmem:[%s15891_s25 + $0x320] sm:$0xff] }
 0x128   : > { %v1058_v17 = vpop.f32.mrb[28].mxu0 }
 0x129   : > { %v16794_v58 = vpop.f32.mrb[29].mxu0  ;;  %12209 = vmatmul.mubr.msk.f32.gmra.mrb[134].mxu0 %vm523_vm0, %v16290_v26  ;;  %v16798_v16 = vpop.f32.mrb[28].mxu1  ;;  %v2588_v26 = vmax.bf16 %v21088_v9, %v2524_v25 }
 0x12a   : > { %21315 = vst [vmem:[#allocation38_spill] sm:$0xff] %v16798_v16  ;;  %1380 = vmatprep.mubr.f32.mxu0 %v21291_v13  ;;  %v16801_v18 = vpop.f32.mrb[29].mxu1 }
 0x12b   : > { %21316 = vst [vmem:[#allocation39_spill] sm:$0xff] %v16801_v18 }
 0x12c   : > { %v1064_v63 = vpop.f32.mrb[30].mxu0 }
 0x12d   : > { %v2453_v57 = vpack.c.bf16 %v1064_v63, %v1058_v17  ;;  %v16806_v10 = vpop.f32.mrb[31].mxu0  ;;  %12210 = vmatmul.mubr.msk.f32.gmra.mrb[136].mxu0 %vm523_vm0, %v16296_v28  ;;  %v16811_v62 = vpop.f32.mrb[30].mxu1 }
 0x12e   : > { %21317 = vst [vmem:[#allocation40_spill] sm:$0xff] %v16811_v62  ;;  %13722 = vmatmul.mubr.bf16.gmra.mrb[136].mxu1 %v2587_v20  ;;  %1386 = vmatprep.mubr.f32.mxu0 %v21291_v13  ;;  %v16816_v24 = vpop.f32.mrb[31].mxu1 }
 0x12f   : > { %21318 = vst [vmem:[#allocation41_spill] sm:$0xff] %v16816_v24  ;;  %13725 = vmatprep.mubr.bf16.mxu1 %v2588_v26  ;;  %v2525_v14 = vadd.bf16 %v16685_v27, %v2453_v57 }
 0x130   : > { %v1070_v17 = vpop.f32.mrb[32].mxu0 }
 0x131   : > { %v16821_v28 = vpop.f32.mrb[33].mxu0  ;;  %12211 = vmatmul.mubr.msk.f32.gmra.mrb[138].mxu0 %vm523_vm0, %v16306_v29  ;;  %v16825_v25 = vpop.f32.mrb[32].mxu1  ;;  %v2589_v63 = vmax.bf16 %v21088_v9, %v2525_v14 }
 0x132   : > { %21319 = vst [vmem:[#allocation42_spill] sm:$0xff] %v16825_v25  ;;  %1392 = vmatprep.mubr.f32.mxu0 %v21291_v13  ;;  %v16828_v20 = vpop.f32.mrb[33].mxu1 }
 0x133   : > { %21320 = vst [vmem:[#allocation43_spill] sm:$0xff] %v16828_v20 }
 0x134   : > { %v1076_v61 = vpop.f32.mrb[34].mxu0 }
 0x135   : > { %v2454_v18 = vpack.c.bf16 %v1076_v61, %v1070_v17  ;;  %v16833_v57 = vpop.f32.mrb[35].mxu0  ;;  %12212 = vmatmul.mubr.msk.f32.gmra.mrb[140].mxu0 %vm523_vm0, %v16309_v30  ;;  %v16837_v16 = vpop.f32.mrb[34].mxu1 }
 0x136   : > { %21321 = vst [vmem:[#allocation44_spill] sm:$0xff] %v16837_v16  ;;  %13726 = vmatmul.mubr.bf16.gmra.mrb[140].mxu1 %v2589_v63  ;;  %1398 = vmatprep.mubr.f32.mxu0 %v21291_v13  ;;  %v16842_v24 = vpop.f32.mrb[35].mxu1 }
 0x137   : > { %21322 = vst [vmem:[#allocation45_spill] sm:$0xff] %v16842_v24  ;;  %v2526_v26 = vadd.bf16 %v16685_v27, %v2454_v18 }
 0x138   : > { %v1082_v14 = vpop.f32.mrb[36].mxu0 }
 0x139   : > { %v16847_v17 = vpop.f32.mrb[37].mxu0  ;;  %12213 = vmatmul.mubr.msk.f32.gmra.mrb[142].mxu0 %vm523_vm0, %v16319_v31  ;;  %v2590_v30 = vmax.bf16 %v21088_v9, %v2526_v26  ;;  %v16852_v20 = vpop.f32.mrb[36].mxu1 }
 0x13a   : > { %21323 = vst [vmem:[#allocation46_spill] sm:$0xff] %v16852_v20  ;;  %1404 = vmatprep.mubr.f32.mxu0 %v21291_v13  ;;  %v16855_v63 = vpop.f32.mrb[37].mxu1 }
 0x13b   : > { %21324 = vst [vmem:[#allocation47_spill] sm:$0xff] %v16855_v63  ;;  %13729 = vmatprep.mubr.bf16.mxu1 %v2590_v30 }
 0x13c   : > { %v1088_v29 = vpop.f32.mrb[38].mxu0 }
 0x13d   : > { %v2455_v61 = vpack.c.bf16 %v1088_v29, %v1082_v14  ;;  %v16859_v25 = vpop.f32.mrb[39].mxu0  ;;  %12214 = vmatmul.mubr.msk.f32.gmra.mrb[144].mxu0 %vm523_vm0, %v16322_v32  ;;  %v16863_v31 = vpop.f32.mrb[38].mxu1  ;;  %v21327_v32 = vmov 0  }
 0x13e   : > { %21325 = vst [vmem:[#allocation48_spill] sm:$0xff] %v16863_v31  ;;  %1410 = vmatprep.mubr.f32.mxu0 %v21291_v13  ;;  %v16868_v9 = vpop.f32.mrb[39].mxu1 }
 0x13f   : > { %21326 = vst [vmem:[#allocation49_spill] sm:$0xff] %v16868_v9  ;;  %v2527_v30 = vadd.bf16 %v16685_v27, %v2455_v61 }
 0x140   : > { %v1094_v29 = vpop.f32.mrb[40].mxu0 }
 0x141   : > { %v16873_v14 = vpop.f32.mrb[41].mxu0  ;;  %12215 = vmatmul.mubr.msk.f32.gmra.mrb[146].mxu0 %vm523_vm0, %v16332_v33  ;;  %v2591_v63 = vmax.bf16 %v21327_v32, %v2527_v30  ;;  %v16878_v20 = vpop.f32.mrb[40].mxu1 }
 0x142   : > { %21328 = vst [vmem:[#allocation50_spill] sm:$0xff] %v16878_v20  ;;  %1416 = vmatprep.mubr.f32.mxu0 %v21291_v13  ;;  %v16881_v26 = vpop.f32.mrb[41].mxu1 }
 0x143   : > { %21329 = vst [vmem:[#allocation51_spill] sm:$0xff] %v16881_v26  ;;  %13730 = vmatmul.mubr.bf16.gmra.mrb[144].mxu1 %v2591_v63 }
 0x144   : > { %v1100_v24 = vpop.f32.mrb[42].mxu0 }
 0x145   : > { %v2456_v18 = vpack.c.bf16 %v1100_v24, %v1094_v29  ;;  %v16885_v9 = vpop.f32.mrb[43].mxu0  ;;  %12216 = vmatmul.mubr.msk.f32.gmra.mrb[148].mxu0 %vm523_vm0, %v16335_v34  ;;  %v16889_v33 = vpop.f32.mrb[42].mxu1 }
 0x146   : > { %21330 = vst [vmem:[#allocation52_spill] sm:$0xff] %v16889_v33  ;;  %1422 = vmatprep.mubr.f32.mxu0 %v21291_v13  ;;  %v16894_v31 = vpop.f32.mrb[43].mxu1 }
 0x147   : > { %21331 = vst [vmem:[#allocation53_spill] sm:$0xff] %v16894_v31  ;;  %v2528_v63 = vadd.bf16 %v16685_v27, %v2456_v18 }
 0x148   : > { %v1106_v24 = vpop.f32.mrb[44].mxu0 }
 0x149   : > { %v16899_v29 = vpop.f32.mrb[45].mxu0  ;;  %12217 = vmatmul.mubr.msk.f32.gmra.mrb[150].mxu0 %vm523_vm0, %v16345_v35  ;;  %v2592_v34 = vmax.bf16 %v21327_v32, %v2528_v63  ;;  %v16904_v26 = vpop.f32.mrb[44].mxu1 }
 0x14a   : > { %21332 = vst [vmem:[#allocation54_spill] sm:$0xff] %v16904_v26  ;;  %1428 = vmatprep.mubr.f32.mxu0 %v21291_v13  ;;  %v16907_v30 = vpop.f32.mrb[45].mxu1 }
 0x14b   : > { %21333 = vst [vmem:[#allocation55_spill] sm:$0xff] %v16907_v30  ;;  %13733 = vmatprep.mubr.bf16.mxu1 %v2592_v34 }
 0x14c   : > { %v1112_v20 = vpop.f32.mrb[46].mxu0 }
 0x14d   : > { %v2457_v61 = vpack.c.bf16 %v1112_v20, %v1106_v24  ;;  %v16911_v31 = vpop.f32.mrb[47].mxu0  ;;  %12218 = vmatmul.mubr.msk.f32.gmra.mrb[152].mxu0 %vm523_vm0, %v16348_v36  ;;  %v16915_v35 = vpop.f32.mrb[46].mxu1 }
 0x14e   : > { %21334 = vst [vmem:[#allocation56_spill] sm:$0xff] %v16915_v35  ;;  %1434 = vmatprep.mubr.f32.mxu0 %v21291_v13  ;;  %v16920_v33 = vpop.f32.mrb[47].mxu1 }
 0x14f   : > { %21335 = vst [vmem:[#allocation57_spill] sm:$0xff] %v16920_v33  ;;  %v2529_v34 = vadd.bf16 %v16685_v27, %v2457_v61 }
 0x150   : > { %v1118_v20 = vpop.f32.mrb[48].mxu0 }
 0x151   : > { %v16925_v24 = vpop.f32.mrb[49].mxu0  ;;  %12219 = vmatmul.mubr.msk.f32.gmra.mrb[154].mxu0 %vm523_vm0, %v16358_v37  ;;  %v2593_v36 = vmax.bf16 %v21327_v32, %v2529_v34  ;;  %v16930_v30 = vpop.f32.mrb[48].mxu1 }
 0x152   : > { %21336 = vst [vmem:[#allocation58_spill] sm:$0xff] %v16930_v30  ;;  %1440 = vmatprep.mubr.f32.mxu0 %v21291_v13  ;;  %v16933_v63 = vpop.f32.mrb[49].mxu1 }
 0x153   : > { %21337 = vst [vmem:[#allocation59_spill] sm:$0xff] %v16933_v63  ;;  %13734 = vmatmul.mubr.bf16.gmra.mrb[148].mxu1 %v2593_v36 }
 0x154   : > { %v1124_v26 = vpop.f32.mrb[50].mxu0 }
 0x155   : > { %v2458_v18 = vpack.c.bf16 %v1124_v26, %v1118_v20  ;;  %v16937_v33 = vpop.f32.mrb[51].mxu0  ;;  %12220 = vmatmul.mubr.msk.f32.gmra.mrb[156].mxu0 %vm523_vm0, %v16361_v38  ;;  %v16941_v37 = vpop.f32.mrb[50].mxu1 }
 0x156   : > { %21338 = vst [vmem:[#allocation60_spill] sm:$0xff] %v16941_v37  ;;  %1446 = vmatprep.mubr.f32.mxu0 %v21291_v13  ;;  %v16946_v35 = vpop.f32.mrb[51].mxu1 }
 0x157   : > { %21339 = vst [vmem:[#allocation61_spill] sm:$0xff] %v16946_v35  ;;  %v2530_v36 = vadd.bf16 %v16685_v27, %v2458_v18 }
 0x158   : > { %v1130_v26 = vpop.f32.mrb[52].mxu0 }
 0x159   : > { %v16951_v20 = vpop.f32.mrb[53].mxu0  ;;  %12221 = vmatmul.mubr.msk.f32.gmra.mrb[158].mxu0 %vm523_vm0, %v16371_v39  ;;  %v2594_v38 = vmax.bf16 %v21327_v32, %v2530_v36  ;;  %v16956_v63 = vpop.f32.mrb[52].mxu1 }
 0x15a   : > { %21340 = vst [vmem:[#allocation62_spill] sm:$0xff] %v16956_v63  ;;  %1452 = vmatprep.mubr.f32.mxu0 %v21291_v13  ;;  %v16959_v34 = vpop.f32.mrb[53].mxu1 }
 0x15b   : > { %21341 = vst [vmem:[#allocation63_spill] sm:$0xff] %v16959_v34  ;;  %13737 = vmatprep.mubr.bf16.mxu1 %v2594_v38 }
 0x15c   : > { %v1136_v30 = vpop.f32.mrb[54].mxu0 }
 0x15d   : > { %v2459_v61 = vpack.c.bf16 %v1136_v30, %v1130_v26  ;;  %v16963_v35 = vpop.f32.mrb[55].mxu0  ;;  %12222 = vmatmul.mubr.msk.f32.gmra.mrb[160].mxu0 %vm523_vm0, %v16374_v40  ;;  %v16967_v39 = vpop.f32.mrb[54].mxu1  ;;  %v15059_v30 = vld [vmem:[%s21047_s3 + $0x78] sm:$0xff]  }
 0x15e   : > { %21342 = vst [vmem:[#allocation64_spill] sm:$0xff] %v16967_v39  ;;  %1458 = vmatprep.mubr.f32.mxu0 %v21291_v13  ;;  %v16972_v37 = vpop.f32.mrb[55].mxu1  ;;  %13855 = vmatprep.subr.bf16.mxu0 %v15059_v30 }
 0x15f   : > { %21343 = vst [vmem:[#allocation65_spill] sm:$0xff] %v16972_v37  ;;  %v2531_v38 = vadd.bf16 %v16685_v27, %v2459_v61  ;;  %13856 = vmatpush3.bf16.msra.mxu0 %v15059_v30 }
 0x160   : > { %v1142_v26 = vpop.f32.mrb[56].mxu0 }
 0x161   : > { %v16980_v40 = vpop.f32.mrb[57].mxu0  ;;  %12223 = vmatmul.mubr.msk.f32.gmra.mrb[162].mxu0 %vm523_vm0, %v16384_v41  ;;  %v2595_v36 = vmax.bf16 %v21327_v32, %v2531_v38  ;;  %v16985_v34 = vpop.f32.mrb[56].mxu1 }
 0x162   : > { %21344 = vst [vmem:[#allocation66_spill] sm:$0xff] %v16985_v34  ;;  %1464 = vmatprep.mubr.f32.mxu0 %v21291_v13  ;;  %v16988_v61 = vpop.f32.mrb[57].mxu1 }
 0x163   : > { %21345 = vst [vmem:[#allocation67_spill] sm:$0xff] %v16988_v61  ;;  %13738 = vmatmul.mubr.bf16.gmra.mrb[152].mxu1 %v2595_v36 }
 0x164   : > { %v1148_v63 = vpop.f32.mrb[58].mxu0 }
 0x165   : > { %v2460_v37 = vpack.c.bf16 %v1148_v63, %v1142_v26  ;;  %v16992_v39 = vpop.f32.mrb[59].mxu0  ;;  %12224 = vmatmul.mubr.msk.f32.gmra.mrb[164].mxu0 %vm523_vm0, %v16387_v42  ;;  %v16996_v41 = vpop.f32.mrb[58].mxu1 }
 0x166   : > { %21346 = vst [vmem:[#allocation68_spill] sm:$0xff] %v16996_v41  ;;  %1470 = vmatprep.mubr.f32.mxu0 %v21291_v13  ;;  %v17001_v16 = vpop.f32.mrb[59].mxu1 }
 0x167   : > { %21347 = vst [vmem:[#allocation69_spill] sm:$0xff] %v17001_v16  ;;  %v2532_v36 = vadd.bf16 %v16685_v27, %v2460_v37 }
 0x168   : > { %v1154_v63 = vpop.f32.mrb[60].mxu0 }
 0x169   : > { %v17006_v26 = vpop.f32.mrb[61].mxu0  ;;  %12225 = vmatmul.mubr.msk.f32.gmra.mrb[166].mxu0 %vm523_vm0, %v16397_v43  ;;  %v2596_v42 = vmax.bf16 %v21327_v32, %v2532_v36  ;;  %v17011_v18 = vpop.f32.mrb[60].mxu1 }
 0x16a   : > { %21348 = vst [vmem:[#allocation70_spill] sm:$0xff] %v17011_v18  ;;  %1476 = vmatprep.mubr.f32.mxu0 %v21291_v13  ;;  %v17014_v38 = vpop.f32.mrb[61].mxu1 }
 0x16b   : > { %21349 = vst [vmem:[#allocation71_spill] sm:$0xff] %v17014_v38  ;;  %13741 = vmatprep.mubr.bf16.mxu1 %v2596_v42 }
 0x16c   : > { %v1160_v61 = vpop.f32.mrb[62].mxu0 }
 0x16d   : > { %v2461_v30 = vpack.c.bf16 %v1160_v61, %v1154_v63  ;;  %v17018_v34 = vpop.f32.mrb[63].mxu0  ;;  %12226 = vmatmul.mubr.msk.f32.gmra.mrb[168].mxu0 %vm523_vm0, %v16400_v44  ;;  %v17022_v43 = vpop.f32.mrb[62].mxu1 }
 0x16e   : > { %21350 = vst [vmem:[#allocation72_spill] sm:$0xff] %v17022_v43  ;;  %1482 = vmatprep.mubr.f32.mxu0 %v21291_v13  ;;  %v17027_v16 = vpop.f32.mrb[63].mxu1 }
 0x16f   : > { %21351 = vst [vmem:[#allocation73_spill] sm:$0xff] %v17027_v16  ;;  %v2533_v42 = vadd.bf16 %v16685_v27, %v2461_v30 }
 0x170   : > { %v1166_v61 = vpop.f32.mrb[64].mxu0 }
 0x171   : > { %v17032_v63 = vpop.f32.mrb[65].mxu0  ;;  %12227 = vmatmul.mubr.msk.f32.gmra.mrb[170].mxu0 %vm523_vm0, %v16410_v45  ;;  %v2597_v44 = vmax.bf16 %v21327_v32, %v2533_v42  ;;  %v17037_v38 = vpop.f32.mrb[64].mxu1 }
 0x172   : > { %21352 = vst [vmem:[#allocation74_spill] sm:$0xff] %v17032_v63  ;;  %21353 = vst [vmem:[#allocation75_spill] sm:$0xff] %v17037_v38  ;;  %1488 = vmatprep.mubr.f32.mxu0 %v21291_v13  ;;  %v17040_v36 = vpop.f32.mrb[65].mxu1 }
 0x173   : > { %21354 = vst [vmem:[#allocation76_spill] sm:$0xff] %v17040_v36  ;;  %13742 = vmatmul.mubr.bf16.gmra.mrb[156].mxu1 %v2597_v44 }
 0x174   : > { %v1172_v18 = vpop.f32.mrb[66].mxu0 }
 0x175   : > { %v2462_v37 = vpack.c.bf16 %v1172_v18, %v1166_v61  ;;  %v17044_v16 = vpop.f32.mrb[67].mxu0  ;;  %12228 = vmatmul.mubr.msk.f32.gmra.mrb[172].mxu0 %vm523_vm0, %v16413_v46  ;;  %v17048_v45 = vpop.f32.mrb[66].mxu1 }
 0x176   : > { %21355 = vst [vmem:[#allocation77_spill] sm:$0xff] %v17048_v45  ;;  %1494 = vmatprep.mubr.f32.mxu0 %v21291_v13  ;;  %v17053_v43 = vpop.f32.mrb[67].mxu1 }
 0x177   : > { %21356 = vst [vmem:[#allocation78_spill] sm:$0xff] %v17053_v43  ;;  %v2534_v44 = vadd.bf16 %v16685_v27, %v2462_v37 }
 0x178   : > { %v1178_v18 = vpop.f32.mrb[68].mxu0 }
 0x179   : > { %v17058_v61 = vpop.f32.mrb[69].mxu0  ;;  %12229 = vmatmul.mubr.msk.f32.gmra.mrb[174].mxu0 %vm523_vm0, %v16423_v47  ;;  %v2598_v46 = vmax.bf16 %v21327_v32, %v2534_v44  ;;  %v17063_v36 = vpop.f32.mrb[68].mxu1 }
 0x17a   : > { %21357 = vst [vmem:[#allocation79_spill] sm:$0xff] %v17063_v36  ;;  %1500 = vmatprep.mubr.f32.mxu0 %v21291_v13  ;;  %v17066_v42 = vpop.f32.mrb[69].mxu1 }
 0x17b   : > { %21358 = vst [vmem:[#allocation80_spill] sm:$0xff] %v17066_v42  ;;  %13745 = vmatprep.mubr.bf16.mxu1 %v2598_v46 }
 0x17c   : > { %v1184_v38 = vpop.f32.mrb[70].mxu0 }
 0x17d   : > { %v2463_v30 = vpack.c.bf16 %v1184_v38, %v1178_v18  ;;  %v17070_v43 = vpop.f32.mrb[71].mxu0  ;;  %12230 = vmatmul.mubr.msk.f32.gmra.mrb[176].mxu0 %vm523_vm0, %v16426_v48  ;;  %v17074_v47 = vpop.f32.mrb[70].mxu1  ;;  %v15060_v18 = vld [vmem:[%s21047_s3 + $0x80] sm:$0xff]  }
 0x17e   : > { %21359 = vst [vmem:[#allocation81_spill] sm:$0xff] %v17074_v47  ;;  %1506 = vmatprep.mubr.f32.mxu0 %v21291_v13  ;;  %v17079_v45 = vpop.f32.mrb[71].mxu1  ;;  %13985 = vmatprep.subr.bf16.mxu1 %v15060_v18 }
 0x17f   : > { %21360 = vst [vmem:[#allocation82_spill] sm:$0xff] %v17079_v45  ;;  %v2535_v46 = vadd.bf16 %v16685_v27, %v2463_v30  ;;  %13986 = vmatpush3.bf16.msra.mxu1 %v15060_v18 }
 0x180   : > { %v1190_v38 = vpop.f32.mrb[72].mxu0 }
 0x181   : > { %v17087_v48 = vpop.f32.mrb[73].mxu0  ;;  %12231 = vmatmul.mubr.msk.f32.gmra.mrb[178].mxu0 %vm523_vm0, %v16436_v49  ;;  %v2599_v44 = vmax.bf16 %v21327_v32, %v2535_v46  ;;  %v17092_v42 = vpop.f32.mrb[72].mxu1 }
 0x182   : > { %21361 = vst [vmem:[#allocation83_spill] sm:$0xff] %v17087_v48  ;;  %21362 = vst [vmem:[#allocation84_spill] sm:$0xff] %v17092_v42  ;;  %1512 = vmatprep.mubr.f32.mxu0 %v21291_v13  ;;  %v17095_v30 = vpop.f32.mrb[73].mxu1 }
 0x183   : > { %21363 = vst [vmem:[#allocation85_spill] sm:$0xff] %v17095_v30  ;;  %13746 = vmatmul.mubr.bf16.gmra.mrb[160].mxu1 %v2599_v44 }
 0x184   : > { %v1196_v36 = vpop.f32.mrb[74].mxu0 }
 0x185   : > { %v2464_v45 = vpack.c.bf16 %v1196_v36, %v1190_v38  ;;  %v17099_v47 = vpop.f32.mrb[75].mxu0  ;;  %12232 = vmatmul.mubr.msk.f32.gmra.mrb[180].mxu0 %vm523_vm0, %v16439_v50  ;;  %v17103_v49 = vpop.f32.mrb[74].mxu1 }
 0x186   : > { %21364 = vst [vmem:[#allocation86_spill] sm:$0xff] %v17099_v47  ;;  %21365 = vst [vmem:[#allocation87_spill] sm:$0xff] %v17103_v49  ;;  %1518 = vmatprep.mubr.f32.mxu0 %v21291_v13  ;;  %v17108_v41 = vpop.f32.mrb[75].mxu1  ;;  %v15680_v47 = vld [vmem:[%s15891_s25 + $0x3e8] sm:$0xff] }
 0x187   : > { %21366 = vst [vmem:[#allocation88_spill] sm:$0xff] %v17108_v41  ;;  %v2536_v44 = vadd.bf16 %v16685_v27, %v2464_v45 }
 0x188   : > { %v1202_v36 = vpop.f32.mrb[76].mxu0 }
 0x189   : > { %v17113_v38 = vpop.f32.mrb[77].mxu0  ;;  %12233 = vmatmul.mubr.msk.f32.gmra.mrb[182].mxu0 %vm523_vm0, %v16449_v51  ;;  %v2600_v50 = vmax.bf16 %v21327_v32, %v2536_v44  ;;  %v17118_v37 = vpop.f32.mrb[76].mxu1 }
 0x18a   : > { %21367 = vst [vmem:[#allocation89_spill] sm:$0xff] %v17113_v38  ;;  %21368 = vst [vmem:[#allocation90_spill] sm:$0xff] %v17118_v37  ;;  %1524 = vmatprep.mubr.f32.mxu0 %v21291_v13  ;;  %v17121_v46 = vpop.f32.mrb[77].mxu1  ;;  %v15679_v38 = vld [vmem:[%s15891_s25 + $0x3e0] sm:$0xff] }
 0x18b   : > { %21369 = vst [vmem:[#allocation91_spill] sm:$0xff] %v17121_v46  ;;  %13749 = vmatprep.mubr.bf16.mxu1 %v2600_v50 }
 0x18c   : > { %v1208_v30 = vpop.f32.mrb[78].mxu0 }
 0x18d   : > { %v2465_v18 = vpack.c.bf16 %v1208_v30, %v1202_v36  ;;  %v17125_v42 = vpop.f32.mrb[79].mxu0  ;;  %12234 = vmatmul.mubr.msk.f32.gmra.mrb[184].mxu0 %vm523_vm0, %v16452_v52  ;;  %v17129_v51 = vpop.f32.mrb[78].mxu1 }
 0x18e   : > { %21370 = vst [vmem:[#allocation92_spill] sm:$0xff] %v17125_v42  ;;  %21371 = vst [vmem:[#allocation93_spill] sm:$0xff] %v17129_v51  ;;  %1530 = vmatprep.mubr.f32.mxu0 %v21291_v13  ;;  %v17134_v41 = vpop.f32.mrb[79].mxu1 }
 0x18f   : > { %21372 = vst [vmem:[#allocation94_spill] sm:$0xff] %v17134_v41  ;;  %v2537_v50 = vadd.bf16 %v16685_v27, %v2465_v18 }
 0x190   : > { %v1214_v30 = vpop.f32.mrb[80].mxu0 }
 0x191   : > { %v17139_v36 = vpop.f32.mrb[81].mxu0  ;;  %12235 = vmatmul.mubr.msk.f32.gmra.mrb[186].mxu0 %vm523_vm0, %v16462_v53  ;;  %v2601_v52 = vmax.bf16 %v21327_v32, %v2537_v50  ;;  %v17144_v46 = vpop.f32.mrb[80].mxu1 }
 0x192   : > { %21373 = vst [vmem:[#allocation95_spill] sm:$0xff] %v17139_v36  ;;  %21374 = vst [vmem:[#allocation96_spill] sm:$0xff] %v17144_v46  ;;  %1536 = vmatprep.mubr.f32.mxu0 %v21291_v13  ;;  %v17147_v44 = vpop.f32.mrb[81].mxu1 }
 0x193   : > { %21375 = vst [vmem:[#allocation97_spill] sm:$0xff] %v17147_v44  ;;  %13750 = vmatmul.mubr.bf16.gmra.mrb[164].mxu1 %v2601_v52 }
 0x194   : > { %v1220_v37 = vpop.f32.mrb[82].mxu0 }
 0x195   : > { %v2466_v45 = vpack.c.bf16 %v1220_v37, %v1214_v30  ;;  %v17151_v41 = vpop.f32.mrb[83].mxu0  ;;  %12236 = vmatmul.mubr.msk.f32.gmra.mrb[188].mxu0 %vm523_vm0, %v16465_v54  ;;  %v17155_v53 = vpop.f32.mrb[82].mxu1 }
 0x196   : > { %21376 = vst [vmem:[#allocation98_spill] sm:$0xff] %v17151_v41  ;;  %21377 = vst [vmem:[#allocation99_spill] sm:$0xff] %v17155_v53  ;;  %1542 = vmatprep.mubr.f32.mxu0 %v21291_v13  ;;  %v17160_v51 = vpop.f32.mrb[83].mxu1 }
 0x197   : > { %21378 = vst [vmem:[#allocation100_spill] sm:$0xff] %v17160_v51  ;;  %v2538_v52 = vadd.bf16 %v16685_v27, %v2466_v45 }
 0x198   : > { %v1226_v37 = vpop.f32.mrb[84].mxu0 }
 0x199   : > { %v17165_v30 = vpop.f32.mrb[85].mxu0  ;;  %12237 = vmatmul.mubr.msk.f32.gmra.mrb[190].mxu0 %vm523_vm0, %v16475_v55  ;;  %v2602_v54 = vmax.bf16 %v21327_v32, %v2538_v52  ;;  %v17170_v44 = vpop.f32.mrb[84].mxu1  ;;  %v15061_v52 = vld [vmem:[%s21047_s3 + $0x88] sm:$0xff]  }
 0x19a   : > { %21379 = vst [vmem:[#allocation101_spill] sm:$0xff] %v17165_v30  ;;  %21380 = vst [vmem:[#allocation102_spill] sm:$0xff] %v17170_v44  ;;  %1548 = vmatprep.mubr.f32.mxu0 %v21291_v13  ;;  %v17173_v50 = vpop.f32.mrb[85].mxu1  ;;  %13987 = vmatprep.subr.bf16.mxu1 %v15061_v52  ;;  %v15652_v44 = vld [vmem:[%s15891_s25 + $0x308] sm:$0xff] }
 0x19b   : > { %21381 = vst [vmem:[#allocation103_spill] sm:$0xff] %v17173_v50  ;;  %13753 = vmatprep.mubr.bf16.mxu1 %v2602_v54  ;;  %13988 = vmatpush3.bf16.msra.mxu1 %v15061_v52 }
 0x19c   : > { %v1232_v18 = vpop.f32.mrb[86].mxu0 }
 0x19d   : > { %v2467_v46 = vpack.c.bf16 %v1232_v18, %v1226_v37  ;;  %v17177_v51 = vpop.f32.mrb[87].mxu0  ;;  %12238 = vmatmul.mubr.msk.f32.gmra.mrb[192].mxu0 %vm523_vm0, %v16478_v56  ;;  %v17181_v55 = vpop.f32.mrb[86].mxu1 }
 0x19e   : > { %21382 = vst [vmem:[#allocation104_spill] sm:$0xff] %v17177_v51  ;;  %21383 = vst [vmem:[#allocation105_spill] sm:$0xff] %v17181_v55  ;;  %1554 = vmatprep.mubr.f32.mxu0 %v21291_v13  ;;  %v17189_v45 = vpop.f32.mrb[87].mxu1  ;;  %v15653_v55 = vld [vmem:[%s15891_s25 + $0x310] sm:$0xff] }
 0x19f   : > { %21384 = vst [vmem:[#allocation106_spill] sm:$0xff] %v17189_v45  ;;  %v2539_v18 = vadd.bf16 %v16685_v27, %v2467_v46 }
 0x1a0   : > { %v1238_v56 = vpop.f32.mrb[88].mxu0 }
 0x1a1   : > { %v17194_v50 = vpop.f32.mrb[89].mxu0  ;;  %12239 = vmatmul.mubr.msk.f32.gmra.mrb[194].mxu0 %vm523_vm0, %v15652_v44  ;;  %v2603_v54 = vmax.bf16 %v21327_v32, %v2539_v18  ;;  %v17199_v53 = vpop.f32.mrb[88].mxu1 }
 0x1a2   : > { %21385 = vst [vmem:[#allocation107_spill] sm:$0xff] %v17194_v50  ;;  %21386 = vst [vmem:[#allocation108_spill] sm:$0xff] %v17199_v53  ;;  %1560 = vmatprep.mubr.f32.mxu0 %v21291_v13  ;;  %v17202_v49 = vpop.f32.mrb[89].mxu1 }
 0x1a3   : > { %21387 = vst [vmem:[#allocation109_spill] sm:$0xff] %v17202_v49  ;;  %13754 = vmatmul.mubr.bf16.gmra.mrb[168].mxu1 %v2603_v54  ;;  %v15654_v49 = vld [vmem:[%s15891_s25 + $0x318] sm:$0xff] }
 0x1a4   : > { %v1244_v37 = vpop.f32.mrb[90].mxu0 }
 0x1a5   : > { %v2468_v52 = vpack.c.bf16 %v1244_v37, %v1238_v56  ;;  %v17206_v45 = vpop.f32.mrb[91].mxu0  ;;  %12240 = vmatmul.mubr.msk.f32.gmra.mrb[196].mxu0 %vm523_vm0, %v15653_v55  ;;  %v17210_v44 = vpop.f32.mrb[90].mxu1 }
 0x1a6   : > { %21388 = vst [vmem:[#allocation110_spill] sm:$0xff] %v17206_v45  ;;  %21389 = vst [vmem:[#allocation111_spill] sm:$0xff] %v17210_v44  ;;  %1566 = vmatprep.mubr.f32.mxu0 %v21291_v13  ;;  %v17215_v62 = vpop.f32.mrb[91].mxu1 }
 0x1a7   : > { %21390 = vst [vmem:[#allocation112_spill] sm:$0xff] %v17215_v62  ;;  %v2540_v54 = vadd.bf16 %v16685_v27, %v2468_v52 }
 0x1a8   : > { %v1250_v56 = vpop.f32.mrb[92].mxu0 }
 0x1a9   : > { %v17220_v46 = vpop.f32.mrb[93].mxu0  ;;  %12241 = vmatmul.mubr.msk.f32.gmra.mrb[198].mxu0 %vm523_vm0, %v15654_v49  ;;  %v2604_v55 = vmax.bf16 %v21327_v32, %v2540_v54  ;;  %v17225_v53 = vpop.f32.mrb[92].mxu1 }
 0x1aa   : > { %21391 = vst [vmem:[#allocation113_spill] sm:$0xff] %v17220_v46  ;;  %21392 = vst [vmem:[#allocation114_spill] sm:$0xff] %v17225_v53  ;;  %1572 = vmatprep.mubr.f32.mxu0 %v21291_v13  ;;  %v17228_v18 = vpop.f32.mrb[93].mxu1 }
 0x1ab   : > { %21393 = vst [vmem:[#allocation115_spill] sm:$0xff] %v17228_v18  ;;  %13757 = vmatprep.mubr.bf16.mxu1 %v2604_v55  ;;  %v15656_v18 = vld [vmem:[%s15891_s25 + $0x328] sm:$0xff] }
 0x1ac   : > { %v1256_v37 = vpop.f32.mrb[94].mxu0 }
 0x1ad   : > { %v2469_v62 = vpack.c.bf16 %v1256_v37, %v1250_v56  ;;  %v17232_v44 = vpop.f32.mrb[95].mxu0  ;;  %12242 = vmatmul.mubr.msk.f32.gmra.mrb[200].mxu0 %vm523_vm0, %v15655_v22  ;;  %v17236_v49 = vpop.f32.mrb[94].mxu1 }
 0x1ae   : > { %21394 = vst [vmem:[#allocation116_spill] sm:$0xff] %v17232_v44  ;;  %21395 = vst [vmem:[#allocation117_spill] sm:$0xff] %v17236_v49  ;;  %1578 = vmatprep.mubr.f32.mxu0 %v21291_v13  ;;  %v17241_v12 = vpop.f32.mrb[95].mxu1 }
 0x1af   : > { %21396 = vst [vmem:[#allocation118_spill] sm:$0xff] %v17241_v12  ;;  %v2541_v55 = vadd.bf16 %v16685_v27, %v2469_v62 }
 0x1b0   : > { %v1262_v56 = vpop.f32.mrb[96].mxu0 }
 0x1b1   : > { %v17246_v52 = vpop.f32.mrb[97].mxu0  ;;  %12243 = vmatmul.mubr.msk.f32.gmra.mrb[202].mxu0 %vm523_vm0, %v15656_v18  ;;  %v2605_v22 = vmax.bf16 %v21327_v32, %v2541_v55  ;;  %v17251_v53 = vpop.f32.mrb[96].mxu1 }
 0x1b2   : > { %21397 = vst [vmem:[#allocation119_spill] sm:$0xff] %v17246_v52  ;;  %21398 = vst [vmem:[#allocation120_spill] sm:$0xff] %v17251_v53  ;;  %1584 = vmatprep.mubr.f32.mxu0 %v21291_v13  ;;  %v17254_v54 = vpop.f32.mrb[97].mxu1 }
 0x1b3   : > { %21399 = vst [vmem:[#allocation121_spill] sm:$0xff] %v17254_v54  ;;  %13758 = vmatmul.mubr.bf16.gmra.mrb[172].mxu1 %v2605_v22  ;;  %v15658_v54 = vld [vmem:[%s15891_s25 + $0x338] sm:$0xff] }
 0x1b4   : > { %v1268_v37 = vpop.f32.mrb[98].mxu0 }
 0x1b5   : > { %v2470_v12 = vpack.c.bf16 %v1268_v37, %v1262_v56  ;;  %v17258_v49 = vpop.f32.mrb[99].mxu0  ;;  %12244 = vmatmul.mubr.msk.f32.gmra.mrb[204].mxu0 %vm523_vm0, %v15657_v1  ;;  %v17262_v18 = vpop.f32.mrb[98].mxu1 }
 0x1b6   : > { %21400 = vst [vmem:[#allocation122_spill] sm:$0xff] %v17258_v49  ;;  %21401 = vst [vmem:[#allocation123_spill] sm:$0xff] %v17262_v18  ;;  %1590 = vmatprep.mubr.f32.mxu0 %v21291_v13  ;;  %v17267_v5 = vpop.f32.mrb[99].mxu1  ;;  %v15659_v18 = vld [vmem:[%s15891_s25 + $0x340] sm:$0xff] }
 0x1b7   : > { %21402 = vst [vmem:[#allocation124_spill] sm:$0xff] %v17267_v5  ;;  %v2542_v22 = vadd.bf16 %v16685_v27, %v2470_v12 }
 0x1b8   : > { %v1274_v56 = vpop.f32.mrb[100].mxu0 }
 0x1b9   : > { %v17272_v62 = vpop.f32.mrb[101].mxu0  ;;  %12245 = vmatmul.mubr.msk.f32.gmra.mrb[206].mxu0 %vm523_vm0, %v15658_v54  ;;  %v2606_v1 = vmax.bf16 %v21327_v32, %v2542_v22  ;;  %v17277_v53 = vpop.f32.mrb[100].mxu1  ;;  %v15062_v22 = vld [vmem:[%s21047_s3 + $0x90] sm:$0xff]  }
 0x1ba   : > { %21403 = vst [vmem:[#allocation125_spill] sm:$0xff] %v17272_v62  ;;  %21404 = vst [vmem:[#allocation126_spill] sm:$0xff] %v17277_v53  ;;  %1596 = vmatprep.mubr.f32.mxu0 %v21291_v13  ;;  %v17280_v55 = vpop.f32.mrb[101].mxu1  ;;  %13989 = vmatprep.subr.bf16.mxu1 %v15062_v22  ;;  %v15660_v53 = vld [vmem:[%s15891_s25 + $0x348] sm:$0xff] }
 0x1bb   : > { %21405 = vst [vmem:[#allocation127_spill] sm:$0xff] %v17280_v55  ;;  %13761 = vmatprep.mubr.bf16.mxu1 %v2606_v1  ;;  %13990 = vmatpush3.bf16.msra.mxu1 %v15062_v22 }
 0x1bc   : > { %v1280_v15 = vpop.f32.mrb[102].mxu0 }
 0x1bd   : > { %v2471_v37 = vpack.c.bf16 %v1280_v15, %v1274_v56  ;;  %v17284_v5 = vpop.f32.mrb[103].mxu0  ;;  %12246 = vmatmul.mubr.msk.f32.gmra.mrb[208].mxu0 %vm523_vm0, %v15659_v18  ;;  %v17288_v54 = vpop.f32.mrb[102].mxu1 }
 0x1be   : > { %21406 = vst [vmem:[#allocation128_spill] sm:$0xff] %v17284_v5  ;;  %21407 = vst [vmem:[#allocation129_spill] sm:$0xff] %v17288_v54  ;;  %1602 = vmatprep.mubr.f32.mxu0 %v21291_v13  ;;  %v17296_v12 = vpop.f32.mrb[103].mxu1  ;;  %v15661_v54 = vld [vmem:[%s15891_s25 + $0x350] sm:$0xff] }
 0x1bf   : > { %21408 = vst [vmem:[#allocation130_spill] sm:$0xff] %v17296_v12  ;;  %v2543_v15 = vadd.bf16 %v16685_v27, %v2471_v37 }
 0x1c0   : > { %v1286_v18 = vpop.f32.mrb[104].mxu0 }
 0x1c1   : > { %v17301_v55 = vpop.f32.mrb[105].mxu0  ;;  %12247 = vmatmul.mubr.msk.f32.gmra.mrb[210].mxu0 %vm523_vm0, %v15660_v53  ;;  %v2607_v1 = vmax.bf16 %v21327_v32, %v2543_v15  ;;  %v17306_v7 = vpop.f32.mrb[104].mxu1 }
 0x1c2   : > { %21409 = vst [vmem:[#allocation131_spill] sm:$0xff] %v17301_v55  ;;  %21410 = vst [vmem:[#allocation132_spill] sm:$0xff] %v17306_v7  ;;  %1608 = vmatprep.mubr.f32.mxu0 %v21291_v13  ;;  %v17309_v4 = vpop.f32.mrb[105].mxu1  ;;  %v15663_v55 = vld [vmem:[%s15891_s25 + $0x360] sm:$0xff] }
 0x1c3   : > { %21411 = vst [vmem:[#allocation133_spill] sm:$0xff] %v17309_v4  ;;  %13762 = vmatmul.mubr.bf16.gmra.mrb[176].mxu1 %v2607_v1  ;;  %v15662_v4 = vld [vmem:[%s15891_s25 + $0x358] sm:$0xff] }
 0x1c4   : > { %v1292_v56 = vpop.f32.mrb[106].mxu0 }
 0x1c5   : > { %v2472_v22 = vpack.c.bf16 %v1292_v56, %v1286_v18  ;;  %v17313_v12 = vpop.f32.mrb[107].mxu0  ;;  %12248 = vmatmul.mubr.msk.f32.gmra.mrb[212].mxu0 %vm523_vm0, %v15661_v54  ;;  %v17317_v53 = vpop.f32.mrb[106].mxu1 }
 0x1c6   : > { %21412 = vst [vmem:[#allocation134_spill] sm:$0xff] %v17313_v12  ;;  %21413 = vst [vmem:[#allocation135_spill] sm:$0xff] %v17317_v53  ;;  %1614 = vmatprep.mubr.f32.mxu0 %v21291_v13  ;;  %v17322_v52 = vpop.f32.mrb[107].mxu1 }
 0x1c7   : > { %21414 = vst [vmem:[#allocation136_spill] sm:$0xff] %v17322_v52  ;;  %v2544_v1 = vadd.bf16 %v16685_v27, %v2472_v22 }
 0x1c8   : > { %v1298_v18 = vpop.f32.mrb[108].mxu0 }
 0x1c9   : > { %v17327_v37 = vpop.f32.mrb[109].mxu0  ;;  %12249 = vmatmul.mubr.msk.f32.gmra.mrb[214].mxu0 %vm523_vm0, %v15662_v4  ;;  %v2608_v54 = vmax.bf16 %v21327_v32, %v2544_v1  ;;  %v17332_v7 = vpop.f32.mrb[108].mxu1 }
 0x1ca   : > { %21415 = vst [vmem:[#allocation137_spill] sm:$0xff] %v17327_v37  ;;  %21416 = vst [vmem:[#allocation138_spill] sm:$0xff] %v17332_v7  ;;  %1620 = vmatprep.mubr.f32.mxu0 %v21291_v13  ;;  %v17335_v15 = vpop.f32.mrb[109].mxu1  ;;  %v15665_v37 = vld [vmem:[%s15891_s25 + $0x370] sm:$0xff] }
 0x1cb   : > { %21417 = vst [vmem:[#allocation139_spill] sm:$0xff] %v17335_v15  ;;  %13765 = vmatprep.mubr.bf16.mxu1 %v2608_v54  ;;  %v15664_v15 = vld [vmem:[%s15891_s25 + $0x368] sm:$0xff] }
 0x1cc   : > { %v1304_v56 = vpop.f32.mrb[110].mxu0 }
 0x1cd   : > { %v2473_v52 = vpack.c.bf16 %v1304_v56, %v1298_v18  ;;  %v17339_v53 = vpop.f32.mrb[111].mxu0  ;;  %12250 = vmatmul.mubr.msk.f32.gmra.mrb[216].mxu0 %vm523_vm0, %v15663_v55  ;;  %v17343_v4 = vpop.f32.mrb[110].mxu1 }
 0x1ce   : > { %21418 = vst [vmem:[#allocation140_spill] sm:$0xff] %v17339_v53  ;;  %21419 = vst [vmem:[#allocation141_spill] sm:$0xff] %v17343_v4  ;;  %1626 = vmatprep.mubr.f32.mxu0 %v21291_v13  ;;  %v17348_v12 = vpop.f32.mrb[111].mxu1 }
 0x1cf   : > { %21420 = vst [vmem:[#allocation142_spill] sm:$0xff] %v17348_v12  ;;  %v2545_v54 = vadd.bf16 %v16685_v27, %v2473_v52 }
 0x1d0   : > { %v1310_v18 = vpop.f32.mrb[112].mxu0 }
 0x1d1   : > { %v17353_v22 = vpop.f32.mrb[113].mxu0  ;;  %12251 = vmatmul.mubr.msk.f32.gmra.mrb[218].mxu0 %vm523_vm0, %v15664_v15  ;;  %v2609_v55 = vmax.bf16 %v21327_v32, %v2545_v54  ;;  %v17358_v7 = vpop.f32.mrb[112].mxu1 }
 0x1d2   : > { %21421 = vst [vmem:[#allocation143_spill] sm:$0xff] %v17353_v22  ;;  %21422 = vst [vmem:[#allocation144_spill] sm:$0xff] %v17358_v7  ;;  %1632 = vmatprep.mubr.f32.mxu0 %v21291_v13  ;;  %v17361_v1 = vpop.f32.mrb[113].mxu1 }
 0x1d3   : > { %21423 = vst [vmem:[#allocation145_spill] sm:$0xff] %v17361_v1  ;;  %13766 = vmatmul.mubr.bf16.gmra.mrb[180].mxu1 %v2609_v55  ;;  %v15666_v1 = vld [vmem:[%s15891_s25 + $0x378] sm:$0xff] }
 0x1d4   : > { %v1316_v56 = vpop.f32.mrb[114].mxu0 }
 0x1d5   : > { %v2474_v12 = vpack.c.bf16 %v1316_v56, %v1310_v18  ;;  %v17365_v4 = vpop.f32.mrb[115].mxu0  ;;  %12252 = vmatmul.mubr.msk.f32.gmra.mrb[220].mxu0 %vm523_vm0, %v15665_v37  ;;  %v17369_v15 = vpop.f32.mrb[114].mxu1 }
 0x1d6   : > { %21424 = vst [vmem:[#allocation146_spill] sm:$0xff] %v17365_v4  ;;  %21425 = vst [vmem:[#allocation147_spill] sm:$0xff] %v17369_v15  ;;  %1638 = vmatprep.mubr.f32.mxu0 %v21291_v13  ;;  %v17374_v53 = vpop.f32.mrb[115].mxu1  ;;  %v15667_v15 = vld [vmem:[%s15891_s25 + $0x380] sm:$0xff] }
 0x1d7   : > { %21426 = vst [vmem:[#allocation148_spill] sm:$0xff] %v17374_v53  ;;  %v2546_v55 = vadd.bf16 %v16685_v27, %v2474_v12 }
 0x1d8   : > { %v1322_v18 = vpop.f32.mrb[116].mxu0 }
 0x1d9   : > { %v17379_v52 = vpop.f32.mrb[117].mxu0  ;;  %12253 = vmatmul.mubr.msk.f32.gmra.mrb[222].mxu0 %vm523_vm0, %v15666_v1  ;;  %v2610_v37 = vmax.bf16 %v21327_v32, %v2546_v55  ;;  %v17384_v7 = vpop.f32.mrb[116].mxu1  ;;  %v15063_v55 = vld [vmem:[%s21047_s3 + $0x98] sm:$0xff]  }
 0x1da   : > { %21427 = vst [vmem:[#allocation149_spill] sm:$0xff] %v17379_v52  ;;  %21428 = vst [vmem:[#allocation150_spill] sm:$0xff] %v17384_v7  ;;  %1644 = vmatprep.mubr.f32.mxu0 %v21291_v13  ;;  %v17387_v54 = vpop.f32.mrb[117].mxu1  ;;  %13991 = vmatprep.subr.bf16.mxu1 %v15063_v55  ;;  %v15668_v7 = vld [vmem:[%s15891_s25 + $0x388] sm:$0xff] }
 0x1db   : > { %21429 = vst [vmem:[#allocation151_spill] sm:$0xff] %v17387_v54  ;;  %13769 = vmatprep.mubr.bf16.mxu1 %v2610_v37  ;;  %13992 = vmatpush3.bf16.msra.mxu1 %v15063_v55 }
 0x1dc   : > { %v1328_v22 = vpop.f32.mrb[118].mxu0 }
 0x1dd   : > { %v2475_v56 = vpack.c.bf16 %v1328_v22, %v1322_v18  ;;  %v17391_v53 = vpop.f32.mrb[119].mxu0  ;;  %12254 = vmatmul.mubr.msk.f32.gmra.mrb[224].mxu0 %vm523_vm0, %v15667_v15  ;;  %v17395_v1 = vpop.f32.mrb[118].mxu1 }
 0x1de   : > { %21430 = vst [vmem:[#allocation152_spill] sm:$0xff] %v17391_v53  ;;  %21431 = vst [vmem:[#allocation153_spill] sm:$0xff] %v17395_v1  ;;  %1650 = vmatprep.mubr.f32.mxu0 %v21291_v13  ;;  %v17403_v12 = vpop.f32.mrb[119].mxu1  ;;  %v15669_v1 = vld [vmem:[%s15891_s25 + $0x390] sm:$0xff] }
 0x1df   : > { %21432 = vst [vmem:[#allocation154_spill] sm:$0xff] %v17403_v12  ;;  %v2547_v22 = vadd.bf16 %v16685_v27, %v2475_v56 }
 0x1e0   : > { %v1334_v15 = vpop.f32.mrb[120].mxu0 }
 0x1e1   : > { %v17408_v54 = vpop.f32.mrb[121].mxu0  ;;  %12255 = vmatmul.mubr.msk.f32.gmra.mrb[226].mxu0 %vm523_vm0, %v15668_v7  ;;  %v2611_v37 = vmax.bf16 %v21327_v32, %v2547_v22  ;;  %v17413_v4 = vpop.f32.mrb[120].mxu1 }
 0x1e2   : > { %21433 = vst [vmem:[#allocation155_spill] sm:$0xff] %v17408_v54  ;;  %21434 = vst [vmem:[#allocation156_spill] sm:$0xff] %v17413_v4  ;;  %1656 = vmatprep.mubr.f32.mxu0 %v21291_v13  ;;  %v17416_v52 = vpop.f32.mrb[121].mxu1  ;;  %v15671_v54 = vld [vmem:[%s15891_s25 + $0x3a0] sm:$0xff] }
 0x1e3   : > { %21435 = vst [vmem:[#allocation157_spill] sm:$0xff] %v17416_v52  ;;  %13770 = vmatmul.mubr.bf16.gmra.mrb[184].mxu1 %v2611_v37  ;;  %v15670_v52 = vld [vmem:[%s15891_s25 + $0x398] sm:$0xff] }
 0x1e4   : > { %v1340_v18 = vpop.f32.mrb[122].mxu0 }
 0x1e5   : > { %v2476_v55 = vpack.c.bf16 %v1340_v18, %v1334_v15  ;;  %v17420_v12 = vpop.f32.mrb[123].mxu0  ;;  %12256 = vmatmul.mubr.msk.f32.gmra.mrb[228].mxu0 %vm523_vm0, %v15669_v1  ;;  %v17424_v7 = vpop.f32.mrb[122].mxu1 }
 0x1e6   : > { %21436 = vst [vmem:[#allocation158_spill] sm:$0xff] %v17420_v12  ;;  %21437 = vst [vmem:[#allocation159_spill] sm:$0xff] %v17424_v7  ;;  %1662 = vmatprep.mubr.f32.mxu0 %v21291_v13  ;;  %v17429_v53 = vpop.f32.mrb[123].mxu1 }
 0x1e7   : > { %21438 = vst [vmem:[#allocation160_spill] sm:$0xff] %v17429_v53  ;;  %v2548_v37 = vadd.bf16 %v16685_v27, %v2476_v55 }
 0x1e8   : > { %v1346_v15 = vpop.f32.mrb[124].mxu0 }
 0x1e9   : > { %v17434_v56 = vpop.f32.mrb[125].mxu0  ;;  %12257 = vmatmul.mubr.msk.f32.gmra.mrb[230].mxu0 %vm523_vm0, %v15670_v52  ;;  %v2612_v1 = vmax.bf16 %v21327_v32, %v2548_v37  ;;  %v17439_v4 = vpop.f32.mrb[124].mxu1 }
 0x1ea   : > { %21439 = vst [vmem:[#allocation161_spill] sm:$0xff] %v17434_v56  ;;  %21440 = vst [vmem:[#allocation162_spill] sm:$0xff] %v17439_v4  ;;  %1668 = vmatprep.mubr.f32.mxu0 %v21291_v13  ;;  %v17442_v22 = vpop.f32.mrb[125].mxu1 }
 0x1eb   : > { %21441 = vst [vmem:[#allocation163_spill] sm:$0xff] %v17442_v22  ;;  %13773 = vmatprep.mubr.bf16.mxu1 %v2612_v1  ;;  %v15672_v22 = vld [vmem:[%s15891_s25 + $0x3a8] sm:$0xff] }
 0x1ec   : > { %v1352_v18 = vpop.f32.mrb[126].mxu0 }
 0x1ed   : > { %v2477_v53 = vpack.c.bf16 %v1352_v18, %v1346_v15  ;;  %v17446_v7 = vpop.f32.mrb[127].mxu0  ;;  %12258 = vmatmul.mubr.msk.f32.gmra.mrb[232].mxu0 %vm523_vm0, %v15671_v54  ;;  %v17450_v52 = vpop.f32.mrb[126].mxu1 }
 0x1ee   : > { %21442 = vst [vmem:[#allocation164_spill] sm:$0xff] %v17446_v7  ;;  %21443 = vst [vmem:[#allocation165_spill] sm:$0xff] %v17450_v52  ;;  %1674 = vmatprep.mubr.f32.mxu0 %v21291_v13  ;;  %v17455_v12 = vpop.f32.mrb[127].mxu1 }
 0x1ef   : > { %21444 = vst [vmem:[#allocation166_spill] sm:$0xff] %v17455_v12  ;;  %v2549_v1 = vadd.bf16 %v16685_v27, %v2477_v53 }
 0x1f0   : > { %v1358_v18 = vpop.f32.mrb[128].mxu0 }
 0x1f1   : > { %v17460_v15 = vpop.f32.mrb[129].mxu0  ;;  %12259 = vmatmul.mubr.msk.f32.gmra.mrb[234].mxu0 %vm523_vm0, %v15672_v22  ;;  %v17464_v54 = vpop.f32.mrb[128].mxu1  ;;  %v2613_v37 = vmax.bf16 %v21327_v32, %v2549_v1  ;;  %v15673_v1 = vld [vmem:[%s15891_s25 + $0x3b0] sm:$0xff] }
 0x1f2   : > { %21445 = vst [vmem:[#allocation167_spill] sm:$0xff] %v17460_v15  ;;  %v17467_v4 = vpop.f32.mrb[129].mxu1  ;;  %1680 = vmatprep.mubr.f32.mxu0 %v21291_v13 }
 0x1f3   : > { %v17470_v53 = vpop.f32.mrb[130].mxu1  ;;  %13774 = vmatmul.mubr.bf16.gmra.mrb[188].mxu1 %v2613_v37 }
 0x1f4   : > { %v1364_v12 = vpop.f32.mrb[130].mxu0  ;;  %v17474_v52 = vpop.f32.mrb[131].mxu1 }
 0x1f5   : > { %v2478_v56 = vpack.c.bf16 %v1364_v12, %v1358_v18  ;;  %v17478_v7 = vpop.f32.mrb[131].mxu0  ;;  %12260 = vmatmul.mubr.msk.f32.gmra.mrb[236].mxu0 %vm523_vm0, %v15673_v1  ;;  %v15674_v12 = vld [vmem:[%s15891_s25 + $0x3b8] sm:$0xff] }
 0x1f6   : > { %21446 = vst [vmem:[#allocation168_spill] sm:$0xff] %v17478_v7  ;;  %1686 = vmatprep.mubr.f32.mxu0 %v21291_v13 }
 0x1f7   : > { %v2550_v37 = vadd.bf16 %v16685_v27, %v2478_v56 }
 0x1f8   : > { %v1370_v55 = vpop.f32.mrb[132].mxu0 }
 0x1f9   : > { %v17486_v62 = vpop.f32.mrb[133].mxu0  ;;  %12261 = vmatmul.mubr.msk.f32.gmra.mrb[238].mxu0 %vm523_vm0, %v15674_v12  ;;  %v17490_v18 = vpop.f32.mrb[132].mxu1  ;;  %v2614_v22 = vmax.bf16 %v21327_v32, %v2550_v37  ;;  %v15675_v37 = vld [vmem:[%s15891_s25 + $0x3c0] sm:$0xff]  ;;  %v15676_v12 = vld [vmem:[%s15891_s25 + $0x3c8] sm:$0xff] }
 0x1fa   : > { %21447 = vst [vmem:[#allocation169_spill] sm:$0xff] %v17486_v62  ;;  %v17493_v5 = vpop.f32.mrb[133].mxu1  ;;  %1692 = vmatprep.mubr.f32.mxu0 %v21291_v13 }
 0x1fb   : > { %v17496_v1 = vpop.f32.mrb[134].mxu1  ;;  %13777 = vmatprep.mubr.bf16.mxu1 %v2614_v22  ;;  %v15064_v22 = vld [vmem:[%s21047_s3 + $0xa0] sm:$0xff]  }
 0x1fc   : > { %v1376_v49 = vpop.f32.mrb[134].mxu0  ;;  %v17500_v15 = vpop.f32.mrb[135].mxu1  ;;  %13993 = vmatprep.subr.bf16.mxu1 %v15064_v22 }
 0x1fd   : > { %v2479_v7 = vpack.c.bf16 %v1376_v49, %v1370_v55  ;;  %v17504_v50 = vpop.f32.mrb[135].mxu0  ;;  %12262 = vmatmul.mubr.msk.f32.gmra.mrb[240].mxu0 %vm523_vm0, %v15675_v37  ;;  %13994 = vmatpush3.bf16.msra.mxu1 %v15064_v22 }
 0x1fe   : > { %21448 = vst [vmem:[#allocation170_spill] sm:$0xff] %v17504_v50  ;;  %1698 = vmatprep.mubr.f32.mxu0 %v21291_v13 }
 0x1ff   : > { %v2551_v45 = vadd.bf16 %v16685_v27, %v2479_v7 }
 0x200   : > { %v1382_v49 = vpop.f32.mrb[136].mxu0 }
 0x201   : > { %v17515_v55 = vpop.f32.mrb[137].mxu0  ;;  %12263 = vmatmul.mubr.msk.f32.gmra.mrb[242].mxu0 %vm523_vm0, %v15676_v12  ;;  %v17519_v37 = vpop.f32.mrb[136].mxu1  ;;  %v2615_v46 = vmax.bf16 %v21327_v32, %v2551_v45  ;;  %v15677_v45 = vld [vmem:[%s15891_s25 + $0x3d0] sm:$0xff]  ;;  %v15678_v12 = vld [vmem:[%s15891_s25 + $0x3d8] sm:$0xff] }
 0x202   : > { %21449 = vst [vmem:[#allocation171_spill] sm:$0xff] %v17515_v55  ;;  %v17522_v44 = vpop.f32.mrb[137].mxu1  ;;  %1704 = vmatprep.mubr.f32.mxu0 %v21291_v13 }
 0x203   : > { %v17525_v56 = vpop.f32.mrb[138].mxu1  ;;  %13778 = vmatmul.mubr.bf16.gmra.mrb[192].mxu1 %v2615_v46 }
 0x204   : > { %v1388_v22 = vpop.f32.mrb[138].mxu0  ;;  %v17529_v62 = vpop.f32.mrb[139].mxu1 }
 0x205   : > { %v2480_v50 = vpack.c.bf16 %v1388_v22, %v1382_v49  ;;  %v17533_v36 = vpop.f32.mrb[139].mxu0  ;;  %12264 = vmatmul.mubr.msk.f32.gmra.mrb[244].mxu0 %vm523_vm0, %v15677_v45  ;;  %v3447_v49 = vld [vmem:[%s21048_s4] sm:$0x1] }
 0x206   : > { %21450 = vst [vmem:[#allocation172_spill] sm:$0xff] %v17533_v36  ;;  %1710 = vmatprep.mubr.f32.mxu0 %v21291_v13  ;;  %v3449_v55 = vpack.i.b16 %v3447_v49, %v3447_v49 }
 0x207   : > { %v2552_v46 = vadd.bf16 %v16685_v27, %v2480_v50 }
 0x208   : > { %v1394_v7 = vpop.f32.mrb[140].mxu0  ;;  %v17571_v36 = vrot.slane %v3449_v55, %v16663_v60 }
 0x209   : > { %v17544_v22 = vpop.f32.mrb[141].mxu0  ;;  %12265 = vmatmul.mubr.msk.f32.gmra.mrb[246].mxu0 %vm523_vm0, %v15678_v12  ;;  %v17548_v30 = vpop.f32.mrb[140].mxu1  ;;  %v2616_v45 = vmax.bf16 %v21327_v32, %v2552_v46 }
 0x20a   : > { %21451 = vst [vmem:[#allocation173_spill] sm:$0xff] %v17544_v22  ;;  %v17551_v41 = vpop.f32.mrb[141].mxu1  ;;  %1716 = vmatprep.mubr.f32.mxu0 %v21291_v13 }
 0x20b   : > { %v17554_v50 = vpop.f32.mrb[142].mxu1  ;;  %13781 = vmatprep.mubr.bf16.mxu1 %v2616_v45 }
 0x20c   : > { %v1400_v51 = vpop.f32.mrb[142].mxu0  ;;  %v17558_v48 = vpop.f32.mrb[143].mxu1 }
 0x20d   : > { %v2481_v12 = vpack.c.bf16 %v1400_v51, %v1394_v7  ;;  %v17562_v46 = vpop.f32.mrb[143].mxu0  ;;  %12266 = vmatmul.mubr.msk.f32.gmra.mrb[248].mxu0 %vm523_vm0, %v15679_v38  ;;  %v21454_v38 = vpack.c.bf16 %v17474_v52, %v17467_v4 }
 0x20e   : > { %21452 = vst [vmem:[#allocation174_spill] sm:$0xff] %v17562_v46  ;;  %1722 = vmatprep.mubr.f32.mxu0 %v21291_v13  ;;  %v15681_v46 = vld [vmem:[%s15891_s25 + $0x3f0] sm:$0xff] }
 0x20f   : > { %v2553_v49 = vadd.bf16 %v16685_v27, %v2481_v12  ;;  %v3455_v45 = vadd.bf16 %v17571_v36, %v21454_v38  ;;  %v21457_v38 = vpack.c.bf16 %v17500_v15, %v17493_v5 }
 0x210   : > { %v1406_v51 = vpop.f32.mrb[144].mxu0 }
 0x211   : > { %v17573_v7 = vpop.f32.mrb[145].mxu0  ;;  %12267 = vmatmul.mubr.msk.f32.gmra.mrb[250].mxu0 %vm523_vm0, %v15680_v47  ;;  %v2617_v42 = vmax.bf16 %v21327_v32, %v2553_v49 }
 0x212   : > { %21453 = vst [vmem:[#allocation175_spill] sm:$0xff] %v17573_v7  ;;  %1728 = vmatprep.mubr.f32.mxu0 %v21291_v13  ;;  %v3519_v7 = vmax.bf16 %v21327_v32, %v3455_v45 }
 0x213   : > { %13782 = vmatmul.mubr.bf16.gmra.mrb[196].mxu1 %v2617_v42  ;;  %v21456_v42 = vpack.c.bf16 %v17470_v53, %v17464_v54  ;;  %v15682_v53 = vld [vmem:[%s15891_s25 + $0x3f8] sm:$0xff]  ;;  %s21003_s25 = scalar_lea.sflag [#allocation3], %s378_s29 }
 0x214   : > { %v1412_v12 = vpop.f32.mrb[146].mxu0 }
 0x215   : > { %v2482_v22 = vpack.c.bf16 %v1412_v12, %v1406_v51  ;;  %v17583_v55 = vpop.f32.mrb[147].mxu0  ;;  %12268 = vmatmul.mubr.msk.f32.gmra.mrb[252].mxu0 %vm523_vm0, %v15681_v46  ;;  %v3456_v4 = vadd.bf16 %v17571_v36, %v21456_v42  ;;  %v3457_v46 = vadd.bf16 %v17571_v36, %v21457_v38 }
 0x216   : > { %21455 = vst [vmem:[#allocation176_spill] sm:$0xff] %v17583_v55  ;;  %v17589_v49 = vpop.f32.mrb[144].mxu1  ;;  %1734 = vmatprep.mubr.f32.mxu0 %v21291_v13 }
 0x217   : > { %v2554_v52 = vadd.bf16 %v16685_v27, %v2482_v22  ;;  %v17597_v51 = vpop.f32.mrb[145].mxu1  ;;  %v3520_v15 = vmax.bf16 %v21327_v32, %v3456_v4  ;;  %v3521_v45 = vmax.bf16 %v21327_v32, %v3457_v46  ;;  %v21459_v46 = vpack.c.bf16 %v17529_v62, %v17522_v44 }
 0x218   : > { %v1418_v12 = vpop.f32.mrb[148].mxu0  ;;  %v17603_v47 = vpop.f32.mrb[146].mxu1 }
 0x219   : > { %v17608_v54 = vpop.f32.mrb[149].mxu0  ;;  %12269 = vmatmul.mubr.msk.f32.gmra.mrb[254].mxu0 %vm523_vm0, %v15682_v53  ;;  %v2939_v22 = vpop.f32.mrb[147].mxu1  ;;  %v2618_v42 = vmax.bf16 %v21327_v32, %v2554_v52  ;;  %v15065_v53 = vld [vmem:[%s21047_s3 + $0xa8] sm:$0xff]  }
 0x21a   : > { %v3391_v5 = vpack.c.bf16 %v2939_v22, %v17597_v51  ;;  %13857 = vmatprep.mubr.bf16.mxu0 %v3519_v7  ;;  %v21458_v7 = vpack.c.bf16 %v17496_v1, %v17490_v18  ;;  %13995 = vmatprep.subr.bf16.mxu1 %v15065_v53 }
 0x21b   : > { %13785 = vmatprep.mubr.bf16.mxu1 %v2618_v42  ;;  %13996 = vmatpush3.bf16.msra.mxu1 %v15065_v53  ;;  %v21460_v53 = vpack.c.bf16 %v17525_v56, %v17519_v37 }
 0x21c   : > { %v1424_v38 = vpop.f32.mrb[150].mxu0  ;;  %v3458_v4 = vadd.bf16 %v17571_v36, %v21458_v7 }
 0x21d   : > { %v2483_v55 = vpack.c.bf16 %v1424_v38, %v1418_v12  ;;  %v17616_v63 = vpop.f32.mrb[151].mxu0  ;;  %13858 = vmatmul.mubr.bf16.vlgmr.msra.gmra.mrb[0].mxu0 %v3520_v15  ;;  %v3459_v12 = vadd.bf16 %v17571_v36, %v21459_v46  ;;  %v3460_v7 = vadd.bf16 %v17571_v36, %v21460_v53  ;;  %v21461_v46 = vpack.c.bf16 %v17558_v48, %v17551_v41 }
 0x21e   : > { %13861 = vmatprep.mubr.bf16.mxu0 %v3521_v45  ;;  %v3522_v38 = vmax.bf16 %v21327_v32, %v3458_v4  ;;  %v21462_v48 = vpack.c.bf16 %v17554_v50, %v17548_v30 }
 0x21f   : > { %v2555_v51 = vadd.bf16 %v16685_v27, %v2483_v55  ;;  %v3523_v1 = vmax.bf16 %v21327_v32, %v3459_v12  ;;  %v3461_v12 = vadd.bf16 %v17571_v36, %v21461_v46  ;;  %v3524_v56 = vmax.bf16 %v21327_v32, %v3460_v7 }
 0x220   : > { %v1430_v22 = vpop.f32.mrb[152].mxu0  ;;  %v3463_v7 = vadd.bf16 %v17571_v36, %v3391_v5  ;;  %v21463_v5 = vpack.c.bf16 %v17603_v47, %v17589_v49 }
 0x221   : > { %v17632_v42 = vpop.f32.mrb[153].mxu0  ;;  %v2619_v15 = vmax.bf16 %v21327_v32, %v2555_v51 }
 0x223   : > { %13786 = vmatmul.mubr.bf16.gmra.mrb[200].mxu1 %v2619_v15 }
 0x224   : > { %v1436_v18 = vpop.f32.mrb[154].mxu0 }
 0x225   : > { %v2484_v45 = vpack.c.bf16 %v1436_v18, %v1430_v22  ;;  %v17637_v55 = vpop.f32.mrb[155].mxu0  ;;  %13862 = vmatmul.mubr.bf16.gmra.mrb[4].mxu0 %v3522_v38 }
 0x226   : > { %v13735_v62 = vpop.f32.mrb[148].mxu1  ;;  %13865 = vmatprep.mubr.bf16.mxu0 %v3523_v1 }
 0x227   : > { %v2556_v4 = vadd.bf16 %v16685_v27, %v2484_v45  ;;  %v2952_v51 = vpop.f32.mrb[149].mxu1  ;;  %v3525_v45 = vmax.bf16 %v21327_v32, %v3461_v12 }
 0x228   : > { %v1442_v22 = vpop.f32.mrb[156].mxu0  ;;  %v13736_v15 = vpop.f32.mrb[150].mxu1 }
 0x229   : > { %v3394_v38 = vpack.c.bf16 %v13736_v15, %v13735_v62  ;;  %v17650_v18 = vpop.f32.mrb[157].mxu0  ;;  %v2955_v44 = vpop.f32.mrb[151].mxu1  ;;  %v2620_v1 = vmax.bf16 %v21327_v32, %v2556_v4  ;;  %v3462_v62 = vadd.bf16 %v17571_v36, %v21462_v48  ;;  %v3527_v15 = vmax.bf16 %v21327_v32, %v3463_v7 }
 0x22a   : > { %v3393_v52 = vpack.c.bf16 %v2955_v44, %v2952_v51 }
 0x22b   : > { %13789 = vmatprep.mubr.bf16.mxu1 %v2620_v1  ;;  %v3526_v12 = vmax.bf16 %v21327_v32, %v3462_v62 }
 0x22c   : > { %v1448_v37 = vpop.f32.mrb[158].mxu0  ;;  %v3465_v48 = vadd.bf16 %v17571_v36, %v3393_v52  ;;  %v15066_v52 = vld [vmem:[%s21047_s3 + $0xb0] sm:$0xff]  }
 0x22d   : > { %v2485_v53 = vpack.c.bf16 %v1448_v37, %v1442_v22  ;;  %v17655_v13 = vpop.f32.mrb[159].mxu0  ;;  %13866 = vmatmul.mubr.bf16.gmra.mrb[8].mxu0 %v3524_v56  ;;  %v3464_v37 = vadd.bf16 %v17571_v36, %v21463_v5  ;;  %13997 = vmatprep.subr.bf16.mxu1 %v15066_v52 }
 0x22e   : > { %13869 = vmatprep.mubr.bf16.mxu0 %v3525_v45  ;;  %v3529_v49 = vmax.bf16 %v21327_v32, %v3465_v48  ;;  %13998 = vmatpush3.bf16.msra.mxu1 %v15066_v52 }
 0x22f   : > { %v2557_v44 = vadd.bf16 %v16685_v27, %v2485_v53 }
 0x230   : > { %v1454_v4 = vpop.f32.mrb[160].mxu0 }
 0x231   : > { %v17665_v51 = vpop.f32.mrb[161].mxu0  ;;  %v2621_v46 = vmax.bf16 %v21327_v32, %v2557_v44 }
 0x233   : > { %13790 = vmatmul.mubr.bf16.gmra.mrb[204].mxu1 %v2621_v46 }
 0x234   : > { %v1460_v22 = vpop.f32.mrb[162].mxu0 }
 0x235   : > { %v2486_v1 = vpack.c.bf16 %v1460_v22, %v1454_v4  ;;  %v17670_v56 = vpop.f32.mrb[163].mxu0  ;;  %13870 = vmatmul.mubr.bf16.gmra.mrb[12].mxu0 %v3526_v12 }
 0x236   : > { %v13739_v50 = vpop.f32.mrb[152].mxu1  ;;  %13873 = vmatprep.mubr.bf16.mxu0 %v3527_v15  ;;  %v3528_v15 = vmax.bf16 %v21327_v32, %v3464_v37 }
 0x237   : > { %v2558_v45 = vadd.bf16 %v16685_v27, %v2486_v1  ;;  %v2968_v53 = vpop.f32.mrb[153].mxu1 }
 0x238   : > { %v1466_v62 = vpop.f32.mrb[164].mxu0  ;;  %v13740_v44 = vpop.f32.mrb[154].mxu1 }
 0x239   : > { %v3396_v7 = vpack.c.bf16 %v13740_v44, %v13739_v50  ;;  %v17680_v4 = vpop.f32.mrb[165].mxu0  ;;  %v2971_v46 = vpop.f32.mrb[155].mxu1  ;;  %v2622_v12 = vmax.bf16 %v21327_v32, %v2558_v45  ;;  %v3466_v45 = vadd.bf16 %v17571_v36, %v3394_v38 }
 0x23a   : > { %v3395_v22 = vpack.c.bf16 %v2971_v46, %v2968_v53 }
 0x23b   : > { %13793 = vmatprep.mubr.bf16.mxu1 %v2622_v12  ;;  %v3530_v46 = vmax.bf16 %v21327_v32, %v3466_v45 }
 0x23c   : > { %v1472_v47 = vpop.f32.mrb[166].mxu0  ;;  %v3467_v53 = vadd.bf16 %v17571_v36, %v3395_v22 }
 0x23d   : > { %v2487_v5 = vpack.c.bf16 %v1472_v47, %v1466_v62  ;;  %v17685_v1 = vpop.f32.mrb[167].mxu0  ;;  %13874 = vmatmul.mubr.bf16.gmra.mrb[16].mxu0 %v3528_v15 }
 0x23e   : > { %13877 = vmatprep.mubr.bf16.mxu0 %v3529_v49  ;;  %v3531_v15 = vmax.bf16 %v21327_v32, %v3467_v53 }
 0x23f   : > { %v2559_v37 = vadd.bf16 %v16685_v27, %v2487_v5  ;;  %v3468_v5 = vadd.bf16 %v17571_v36, %v3396_v7 }
 0x240   : > { %v1478_v48 = vpop.f32.mrb[168].mxu0 }
 0x241   : > { %v17695_v62 = vpop.f32.mrb[169].mxu0  ;;  %v2623_v44 = vmax.bf16 %v21327_v32, %v2559_v37 }
 0x242   : > { %21464 = vst [vmem:[#allocation177_spill] sm:$0xff] %v17695_v62 }
 0x243   : > { %13794 = vmatmul.mubr.bf16.gmra.mrb[208].mxu1 %v2623_v44 }
 0x244   : > { %v1484_v12 = vpop.f32.mrb[170].mxu0 }
 0x245   : > { %v2488_v47 = vpack.c.bf16 %v1484_v12, %v1478_v48  ;;  %v17700_v49 = vpop.f32.mrb[171].mxu0  ;;  %13878 = vmatmul.mubr.bf16.gmra.mrb[20].mxu0 %v3530_v46  ;;  %v3532_v46 = vmax.bf16 %v21327_v32, %v3468_v5 }
 0x246   : > { %21465 = vst [vmem:[#allocation178_spill] sm:$0xff] %v17700_v49  ;;  %v13743_v22 = vpop.f32.mrb[156].mxu1  ;;  %13881 = vmatprep.mubr.bf16.mxu0 %v3531_v15 }
 0x247   : > { %v2560_v52 = vadd.bf16 %v16685_v27, %v2488_v47  ;;  %v2984_v37 = vpop.f32.mrb[157].mxu1 }
 0x248   : > { %v1490_v30 = vpop.f32.mrb[172].mxu0  ;;  %v13744_v45 = vpop.f32.mrb[158].mxu1 }
 0x249   : > { %v3398_v44 = vpack.c.bf16 %v13744_v45, %v13743_v22  ;;  %v17706_v50 = vpop.f32.mrb[173].mxu0  ;;  %v2987_v53 = vpop.f32.mrb[159].mxu1  ;;  %v2624_v48 = vmax.bf16 %v21327_v32, %v2560_v52 }
 0x24a   : > { %21466 = vst [vmem:[#allocation179_spill] sm:$0xff] %v17706_v50  ;;  %v3397_v12 = vpack.c.bf16 %v2987_v53, %v2984_v37 }
 0x24b   : > { %13797 = vmatprep.mubr.bf16.mxu1 %v2624_v48  ;;  %v3470_v45 = vadd.bf16 %v17571_v36, %v3398_v44 }
 0x24c   : > { %v3469_v38 = vadd.bf16 %v17571_v36, %v3397_v12  ;;  %v1496_v15 = vpop.f32.mrb[174].mxu0 }
 0x24d   : > { %v2489_v41 = vpack.c.bf16 %v1496_v15, %v1490_v30  ;;  %v17711_v7 = vpop.f32.mrb[175].mxu0  ;;  %13882 = vmatmul.mubr.bf16.gmra.mrb[24].mxu0 %v3532_v46  ;;  %v3534_v30 = vmax.bf16 %v21327_v32, %v3470_v45 }
 0x24e   : > { %21467 = vst [vmem:[#allocation180_spill] sm:$0xff] %v17711_v7  ;;  %v3533_v22 = vmax.bf16 %v21327_v32, %v3469_v38 }
 0x24f   : > { %v2561_v52 = vadd.bf16 %v16685_v27, %v2489_v41 }
 0x250   : > { %v1502_v37 = vpop.f32.mrb[176].mxu0  ;;  %13885 = vmatprep.mubr.bf16.mxu0 %v3533_v22 }
 0x251   : > { %v17718_v5 = vpop.f32.mrb[177].mxu0  ;;  %v2625_v53 = vmax.bf16 %v21327_v32, %v2561_v52 }
 0x252   : > { %21468 = vst [vmem:[#allocation181_spill] sm:$0xff] %v17718_v5 }
 0x253   : > { %13798 = vmatmul.mubr.bf16.gmra.mrb[212].mxu1 %v2625_v53 }
 0x254   : > { %v1508_v48 = vpop.f32.mrb[178].mxu0 }
 0x255   : > { %v2490_v12 = vpack.c.bf16 %v1508_v48, %v1502_v37  ;;  %v17722_v46 = vpop.f32.mrb[179].mxu0  ;;  %13886 = vmatmul.mubr.bf16.gmra.mrb[28].mxu0 %v3534_v30 }
 0x256   : > { %21469 = vst [vmem:[#allocation182_spill] sm:$0xff] %v17722_v46  ;;  %v13747_v44 = vpop.f32.mrb[160].mxu1 }
 0x257   : > { %v2562_v41 = vadd.bf16 %v16685_v27, %v2490_v12  ;;  %v3000_v15 = vpop.f32.mrb[161].mxu1  ;;  %v15067_v12 = vld [vmem:[%s21047_s3 + $0xc0] sm:$0xff]  }
 0x258   : > { %v1514_v22 = vpop.f32.mrb[180].mxu0  ;;  %v13748_v47 = vpop.f32.mrb[162].mxu1  ;;  %14129 = vmatprep.subr.bf16.mxu0 %v15067_v12 }
 0x259   : > { %v3400_v62 = vpack.c.bf16 %v13748_v47, %v13747_v44  ;;  %v17727_v49 = vpop.f32.mrb[181].mxu0  ;;  %v3003_v52 = vpop.f32.mrb[163].mxu1  ;;  %v2626_v45 = vmax.bf16 %v21327_v32, %v2562_v41  ;;  %v15068_v47 = vld [vmem:[%s21047_s3 + $0xb8] sm:$0xff]   ;;  %14130 = vmatpush3.bf16.msra.mxu0 %v15067_v12 }
 0x25a   : > { %21470 = vst [vmem:[#allocation183_spill] sm:$0xff] %v17727_v49  ;;  %v3399_v53 = vpack.c.bf16 %v3003_v52, %v3000_v15  ;;  %13999 = vmatprep.subr.bf16.mxu1 %v15068_v47 }
 0x25b   : > { %v3472_v37 = vadd.bf16 %v17571_v36, %v3400_v62  ;;  %13801 = vmatprep.mubr.bf16.mxu1 %v2626_v45  ;;  %14000 = vmatpush3.bf16.msra.mxu1 %v15068_v47 }
 0x25c   : > { %v3471_v30 = vadd.bf16 %v17571_v36, %v3399_v53  ;;  %v1520_v48 = vpop.f32.mrb[182].mxu0 }
 0x25d   : > { %v2491_v38 = vpack.c.bf16 %v1520_v48, %v1514_v22  ;;  %v17732_v5 = vpop.f32.mrb[183].mxu0  ;;  %v3536_v41 = vmax.bf16 %v21327_v32, %v3472_v37 }
 0x25e   : > { %21471 = vst [vmem:[#allocation184_spill] sm:$0xff] %v17732_v5  ;;  %v3535_v62 = vmax.bf16 %v21327_v32, %v3471_v30 }
 0x25f   : > { %v2563_v15 = vadd.bf16 %v16685_v27, %v2491_v38 }
 0x260   : > { %v1526_v22 = vpop.f32.mrb[184].mxu0  ;;  %13889 = vmatprep.mubr.bf16.mxu0 %v3535_v62 }
 0x261   : > { %v17745_v52 = vpop.f32.mrb[185].mxu0  ;;  %13890 = vmatmul.mubr.bf16.gmra.mrb[32].mxu0 %v3536_v41  ;;  %v2627_v45 = vmax.bf16 %v21327_v32, %v2563_v15 }
 0x262   : > { %21472 = vst [vmem:[#allocation185_spill] sm:$0xff] %v17745_v52 }
 0x263   : > { %13802 = vmatmul.mubr.bf16.gmra.mrb[216].mxu1 %v2627_v45 }
 0x264   : > { %v1532_v53 = vpop.f32.mrb[186].mxu0 }
 0x265   : > { %v2492_v48 = vpack.c.bf16 %v1532_v53, %v1526_v22  ;;  %v17748_v44 = vpop.f32.mrb[187].mxu0 }
 0x266   : > { %21473 = vst [vmem:[#allocation186_spill] sm:$0xff] %v17748_v44  ;;  %v13751_v38 = vpop.f32.mrb[164].mxu1 }
 0x267   : > { %v2564_v30 = vadd.bf16 %v16685_v27, %v2492_v48  ;;  %v3016_v46 = vpop.f32.mrb[165].mxu1 }
 0x268   : > { %v1538_v62 = vpop.f32.mrb[188].mxu0  ;;  %v13752_v12 = vpop.f32.mrb[166].mxu1 }
 0x269   : > { %v3402_v49 = vpack.c.bf16 %v13752_v12, %v13751_v38  ;;  %v17753_v5 = vpop.f32.mrb[189].mxu0  ;;  %v3019_v41 = vpop.f32.mrb[167].mxu1  ;;  %v2628_v47 = vmax.bf16 %v21327_v32, %v2564_v30 }
 0x26a   : > { %21474 = vst [vmem:[#allocation187_spill] sm:$0xff] %v17753_v5  ;;  %v3401_v15 = vpack.c.bf16 %v3019_v41, %v3016_v46 }
 0x26b   : > { %v3474_v22 = vadd.bf16 %v17571_v36, %v3402_v49  ;;  %13805 = vmatprep.mubr.bf16.mxu1 %v2628_v47 }
 0x26c   : > { %v3473_v45 = vadd.bf16 %v17571_v36, %v3401_v15  ;;  %v1544_v53 = vpop.f32.mrb[190].mxu0 }
 0x26d   : > { %v2493_v37 = vpack.c.bf16 %v1544_v53, %v1538_v62  ;;  %v17758_v52 = vpop.f32.mrb[191].mxu0  ;;  %v3538_v12 = vmax.bf16 %v21327_v32, %v3474_v22 }
 0x26e   : > { %21475 = vst [vmem:[#allocation188_spill] sm:$0xff] %v17758_v52  ;;  %v3537_v38 = vmax.bf16 %v21327_v32, %v3473_v45 }
 0x26f   : > { %v2565_v44 = vadd.bf16 %v16685_v27, %v2493_v37 }
 0x270   : > { %v1550_v30 = vpop.f32.mrb[192].mxu0  ;;  %13893 = vmatprep.mubr.bf16.mxu0 %v3537_v38 }
 0x271   : > { %v17765_v46 = vpop.f32.mrb[193].mxu0  ;;  %13894 = vmatmul.mubr.bf16.gmra.mrb[36].mxu0 %v3538_v12  ;;  %v2629_v49 = vmax.bf16 %v21327_v32, %v2565_v44 }
 0x272   : > { %21476 = vst [vmem:[#allocation189_spill] sm:$0xff] %v17765_v46 }
 0x273   : > { %13806 = vmatmul.mubr.bf16.gmra.mrb[220].mxu1 %v2629_v49 }
 0x274   : > { %v1556_v62 = vpop.f32.mrb[194].mxu0 }
 0x275   : > { %v2494_v41 = vpack.c.bf16 %v1556_v62, %v1550_v30  ;;  %v17768_v47 = vpop.f32.mrb[195].mxu0 }
 0x276   : > { %21477 = vst [vmem:[#allocation190_spill] sm:$0xff] %v17768_v47  ;;  %v13755_v45 = vpop.f32.mrb[168].mxu1 }
 0x277   : > { %v2566_v22 = vadd.bf16 %v16685_v27, %v2494_v41  ;;  %v3032_v53 = vpop.f32.mrb[169].mxu1  ;;  %v15069_v41 = vld [vmem:[%s21047_s3 + $0xc8] sm:$0xff]  }
 0x278   : > { %v1562_v37 = vpop.f32.mrb[196].mxu0  ;;  %v13756_v48 = vpop.f32.mrb[170].mxu1  ;;  %14131 = vmatprep.subr.bf16.mxu0 %v15069_v41 }
 0x279   : > { %v3404_v38 = vpack.c.bf16 %v13756_v48, %v13755_v45  ;;  %v17773_v5 = vpop.f32.mrb[197].mxu0  ;;  %v3035_v12 = vpop.f32.mrb[171].mxu1  ;;  %v2630_v44 = vmax.bf16 %v21327_v32, %v2566_v22  ;;  %14132 = vmatpush3.bf16.msra.mxu0 %v15069_v41 }
 0x27a   : > { %21478 = vst [vmem:[#allocation191_spill] sm:$0xff] %v17773_v5  ;;  %v3403_v49 = vpack.c.bf16 %v3035_v12, %v3032_v53 }
 0x27b   : > { %v3476_v30 = vadd.bf16 %v17571_v36, %v3404_v38  ;;  %13809 = vmatprep.mubr.bf16.mxu1 %v2630_v44 }
 0x27c   : > { %v3475_v62 = vadd.bf16 %v17571_v36, %v3403_v49  ;;  %v1568_v52 = vpop.f32.mrb[198].mxu0 }
 0x27d   : > { %v2495_v15 = vpack.c.bf16 %v1568_v52, %v1562_v37  ;;  %v17778_v46 = vpop.f32.mrb[199].mxu0  ;;  %v3540_v22 = vmax.bf16 %v21327_v32, %v3476_v30 }
 0x27e   : > { %21479 = vst [vmem:[#allocation192_spill] sm:$0xff] %v17778_v46  ;;  %v3539_v45 = vmax.bf16 %v21327_v32, %v3475_v62 }
 0x27f   : > { %v2567_v53 = vadd.bf16 %v16685_v27, %v2495_v15 }
 0x280   : > { %v1574_v38 = vpop.f32.mrb[200].mxu0  ;;  %13897 = vmatprep.mubr.bf16.mxu0 %v3539_v45 }
 0x281   : > { %v17788_v52 = vpop.f32.mrb[201].mxu0  ;;  %13898 = vmatmul.mubr.bf16.gmra.mrb[40].mxu0 %v3540_v22  ;;  %v2631_v37 = vmax.bf16 %v21327_v32, %v2567_v53 }
 0x282   : > { %21480 = vst [vmem:[#allocation193_spill] sm:$0xff] %v17788_v52 }
 0x283   : > { %13810 = vmatmul.mubr.bf16.gmra.mrb[224].mxu1 %v2631_v37 }
 0x284   : > { %v1580_v12 = vpop.f32.mrb[202].mxu0 }
 0x285   : > { %v2496_v44 = vpack.c.bf16 %v1580_v12, %v1574_v38  ;;  %v17791_v49 = vpop.f32.mrb[203].mxu0 }
 0x286   : > { %21481 = vst [vmem:[#allocation194_spill] sm:$0xff] %v17791_v49  ;;  %v13759_v30 = vpop.f32.mrb[172].mxu1 }
 0x287   : > { %v2568_v15 = vadd.bf16 %v16685_v27, %v2496_v44  ;;  %v3048_v48 = vpop.f32.mrb[173].mxu1 }
 0x288   : > { %v1586_v47 = vpop.f32.mrb[204].mxu0  ;;  %v13760_v45 = vpop.f32.mrb[174].mxu1 }
 0x289   : > { %v3406_v41 = vpack.c.bf16 %v13760_v45, %v13759_v30  ;;  %v17796_v5 = vpop.f32.mrb[205].mxu0  ;;  %v3051_v22 = vpop.f32.mrb[175].mxu1  ;;  %v2632_v53 = vmax.bf16 %v21327_v32, %v2568_v15 }
 0x28a   : > { %21482 = vst [vmem:[#allocation195_spill] sm:$0xff] %v17796_v5  ;;  %v3405_v37 = vpack.c.bf16 %v3051_v22, %v3048_v48 }
 0x28b   : > { %v3478_v38 = vadd.bf16 %v17571_v36, %v3406_v41  ;;  %13813 = vmatprep.mubr.bf16.mxu1 %v2632_v53 }
 0x28c   : > { %v3477_v12 = vadd.bf16 %v17571_v36, %v3405_v37  ;;  %v1592_v46 = vpop.f32.mrb[206].mxu0 }
 0x28d   : > { %v2497_v62 = vpack.c.bf16 %v1592_v46, %v1586_v47  ;;  %v17801_v52 = vpop.f32.mrb[207].mxu0  ;;  %v3542_v45 = vmax.bf16 %v21327_v32, %v3478_v38 }
 0x28e   : > { %21483 = vst [vmem:[#allocation196_spill] sm:$0xff] %v17801_v52  ;;  %v3541_v30 = vmax.bf16 %v21327_v32, %v3477_v12 }
 0x28f   : > { %v2569_v49 = vadd.bf16 %v16685_v27, %v2497_v62 }
 0x290   : > { %v1598_v15 = vpop.f32.mrb[208].mxu0  ;;  %13901 = vmatprep.mubr.bf16.mxu0 %v3541_v30 }
 0x291   : > { %v17808_v48 = vpop.f32.mrb[209].mxu0  ;;  %13902 = vmatmul.mubr.bf16.gmra.mrb[44].mxu0 %v3542_v45  ;;  %v2633_v41 = vmax.bf16 %v21327_v32, %v2569_v49 }
 0x292   : > { %21484 = vst [vmem:[#allocation197_spill] sm:$0xff] %v17808_v48 }
 0x293   : > { %13814 = vmatmul.mubr.bf16.gmra.mrb[228].mxu1 %v2633_v41 }
 0x294   : > { %v1604_v46 = vpop.f32.mrb[210].mxu0 }
 0x295   : > { %v2498_v47 = vpack.c.bf16 %v1604_v46, %v1598_v15  ;;  %v17811_v22 = vpop.f32.mrb[211].mxu0 }
 0x296   : > { %21485 = vst [vmem:[#allocation198_spill] sm:$0xff] %v17811_v22  ;;  %v13763_v37 = vpop.f32.mrb[176].mxu1 }
 0x297   : > { %v2570_v38 = vadd.bf16 %v16685_v27, %v2498_v47  ;;  %v3064_v12 = vpop.f32.mrb[177].mxu1  ;;  %v15070_v47 = vld [vmem:[%s21047_s3 + $0xd0] sm:$0xff]  }
 0x298   : > { %v1610_v62 = vpop.f32.mrb[212].mxu0  ;;  %v13764_v44 = vpop.f32.mrb[178].mxu1  ;;  %14133 = vmatprep.subr.bf16.mxu0 %v15070_v47 }
 0x299   : > { %v3408_v30 = vpack.c.bf16 %v13764_v44, %v13763_v37  ;;  %v17816_v5 = vpop.f32.mrb[213].mxu0  ;;  %v3067_v45 = vpop.f32.mrb[179].mxu1  ;;  %v2634_v49 = vmax.bf16 %v21327_v32, %v2570_v38  ;;  %14134 = vmatpush3.bf16.msra.mxu0 %v15070_v47 }
 0x29a   : > { %21486 = vst [vmem:[#allocation199_spill] sm:$0xff] %v17816_v5  ;;  %v3407_v41 = vpack.c.bf16 %v3067_v45, %v3064_v12 }
 0x29b   : > { %v3480_v15 = vadd.bf16 %v17571_v36, %v3408_v30  ;;  %13817 = vmatprep.mubr.bf16.mxu1 %v2634_v49 }
 0x29c   : > { %v3479_v46 = vadd.bf16 %v17571_v36, %v3407_v41  ;;  %v1616_v52 = vpop.f32.mrb[214].mxu0 }
 0x29d   : > { %v2499_v53 = vpack.c.bf16 %v1616_v52, %v1610_v62  ;;  %v17821_v48 = vpop.f32.mrb[215].mxu0  ;;  %v3544_v38 = vmax.bf16 %v21327_v32, %v3480_v15 }
 0x29e   : > { %21487 = vst [vmem:[#allocation200_spill] sm:$0xff] %v17821_v48  ;;  %v3543_v37 = vmax.bf16 %v21327_v32, %v3479_v46 }
 0x29f   : > { %v2571_v12 = vadd.bf16 %v16685_v27, %v2499_v53 }
 0x2a0   : > { %v1622_v30 = vpop.f32.mrb[216].mxu0  ;;  %13905 = vmatprep.mubr.bf16.mxu0 %v3543_v37 }
 0x2a1   : > { %v17831_v52 = vpop.f32.mrb[217].mxu0  ;;  %13906 = vmatmul.mubr.bf16.gmra.mrb[48].mxu0 %v3544_v38  ;;  %v2635_v62 = vmax.bf16 %v21327_v32, %v2571_v12 }
 0x2a2   : > { %21488 = vst [vmem:[#allocation201_spill] sm:$0xff] %v17831_v52 }
 0x2a3   : > { %13818 = vmatmul.mubr.bf16.gmra.mrb[232].mxu1 %v2635_v62 }
 0x2a4   : > { %v1628_v45 = vpop.f32.mrb[218].mxu0 }
 0x2a5   : > { %v2500_v49 = vpack.c.bf16 %v1628_v45, %v1622_v30  ;;  %v17834_v41 = vpop.f32.mrb[219].mxu0 }
 0x2a6   : > { %21489 = vst [vmem:[#allocation202_spill] sm:$0xff] %v17834_v41  ;;  %v13767_v15 = vpop.f32.mrb[180].mxu1 }
 0x2a7   : > { %v2572_v53 = vadd.bf16 %v16685_v27, %v2500_v49  ;;  %v3080_v44 = vpop.f32.mrb[181].mxu1 }
 0x2a8   : > { %v1634_v22 = vpop.f32.mrb[220].mxu0  ;;  %v13768_v37 = vpop.f32.mrb[182].mxu1 }
 0x2a9   : > { %v3410_v47 = vpack.c.bf16 %v13768_v37, %v13767_v15  ;;  %v17839_v5 = vpop.f32.mrb[221].mxu0  ;;  %v3083_v38 = vpop.f32.mrb[183].mxu1  ;;  %v2636_v12 = vmax.bf16 %v21327_v32, %v2572_v53 }
 0x2aa   : > { %21490 = vst [vmem:[#allocation203_spill] sm:$0xff] %v17839_v5  ;;  %v3409_v62 = vpack.c.bf16 %v3083_v38, %v3080_v44 }
 0x2ab   : > { %v3482_v30 = vadd.bf16 %v17571_v36, %v3410_v47  ;;  %13821 = vmatprep.mubr.bf16.mxu1 %v2636_v12 }
 0x2ac   : > { %v3481_v45 = vadd.bf16 %v17571_v36, %v3409_v62  ;;  %v1640_v48 = vpop.f32.mrb[222].mxu0 }
 0x2ad   : > { %v2501_v46 = vpack.c.bf16 %v1640_v48, %v1634_v22  ;;  %v17844_v52 = vpop.f32.mrb[223].mxu0  ;;  %v3546_v37 = vmax.bf16 %v21327_v32, %v3482_v30 }
 0x2ae   : > { %21491 = vst [vmem:[#allocation204_spill] sm:$0xff] %v17844_v52  ;;  %v3545_v15 = vmax.bf16 %v21327_v32, %v3481_v45 }
 0x2af   : > { %v2573_v41 = vadd.bf16 %v16685_v27, %v2501_v46 }
 0x2b0   : > { %v1646_v53 = vpop.f32.mrb[224].mxu0  ;;  %13909 = vmatprep.mubr.bf16.mxu0 %v3545_v15 }
 0x2b1   : > { %v17851_v44 = vpop.f32.mrb[225].mxu0  ;;  %13910 = vmatmul.mubr.bf16.gmra.mrb[52].mxu0 %v3546_v37  ;;  %v2637_v47 = vmax.bf16 %v21327_v32, %v2573_v41 }
 0x2b2   : > { %21492 = vst [vmem:[#allocation205_spill] sm:$0xff] %v17851_v44 }
 0x2b3   : > { %13822 = vmatmul.mubr.bf16.gmra.mrb[236].mxu1 %v2637_v47 }
 0x2b4   : > { %v1652_v48 = vpop.f32.mrb[226].mxu0 }
 0x2b5   : > { %v2502_v22 = vpack.c.bf16 %v1652_v48, %v1646_v53  ;;  %v17854_v38 = vpop.f32.mrb[227].mxu0 }
 0x2b6   : > { %21493 = vst [vmem:[#allocation206_spill] sm:$0xff] %v17854_v38  ;;  %v13771_v62 = vpop.f32.mrb[184].mxu1 }
 0x2b7   : > { %v2574_v30 = vadd.bf16 %v16685_v27, %v2502_v22  ;;  %v3096_v45 = vpop.f32.mrb[185].mxu1  ;;  %v15071_v22 = vld [vmem:[%s21047_s3 + $0xd8] sm:$0xff]  }
 0x2b8   : > { %v1658_v46 = vpop.f32.mrb[228].mxu0  ;;  %v13772_v49 = vpop.f32.mrb[186].mxu1  ;;  %14135 = vmatprep.subr.bf16.mxu0 %v15071_v22 }
 0x2b9   : > { %v3412_v15 = vpack.c.bf16 %v13772_v49, %v13771_v62  ;;  %v17859_v5 = vpop.f32.mrb[229].mxu0  ;;  %v3099_v37 = vpop.f32.mrb[187].mxu1  ;;  %v2638_v41 = vmax.bf16 %v21327_v32, %v2574_v30  ;;  %14136 = vmatpush3.bf16.msra.mxu0 %v15071_v22 }
 0x2ba   : > { %21494 = vst [vmem:[#allocation207_spill] sm:$0xff] %v17859_v5  ;;  %v3411_v47 = vpack.c.bf16 %v3099_v37, %v3096_v45 }
 0x2bb   : > { %v3484_v53 = vadd.bf16 %v17571_v36, %v3412_v15  ;;  %13825 = vmatprep.mubr.bf16.mxu1 %v2638_v41 }
 0x2bc   : > { %v3483_v48 = vadd.bf16 %v17571_v36, %v3411_v47  ;;  %v1664_v52 = vpop.f32.mrb[230].mxu0 }
 0x2bd   : > { %v2503_v12 = vpack.c.bf16 %v1664_v52, %v1658_v46  ;;  %v17864_v44 = vpop.f32.mrb[231].mxu0  ;;  %v3548_v30 = vmax.bf16 %v21327_v32, %v3484_v53 }
 0x2be   : > { %21495 = vst [vmem:[#allocation208_spill] sm:$0xff] %v17864_v44  ;;  %v3547_v62 = vmax.bf16 %v21327_v32, %v3483_v48 }
 0x2bf   : > { %v2575_v45 = vadd.bf16 %v16685_v27, %v2503_v12 }
 0x2c0   : > { %v1670_v15 = vpop.f32.mrb[232].mxu0  ;;  %13913 = vmatprep.mubr.bf16.mxu0 %v3547_v62 }
 0x2c1   : > { %v17874_v52 = vpop.f32.mrb[233].mxu0  ;;  %13914 = vmatmul.mubr.bf16.gmra.mrb[56].mxu0 %v3548_v30  ;;  %v2639_v46 = vmax.bf16 %v21327_v32, %v2575_v45 }
 0x2c2   : > { %21496 = vst [vmem:[#allocation209_spill] sm:$0xff] %v17874_v52 }
 0x2c3   : > { %13826 = vmatmul.mubr.bf16.gmra.mrb[240].mxu1 %v2639_v46 }
 0x2c4   : > { %v1676_v37 = vpop.f32.mrb[234].mxu0 }
 0x2c5   : > { %v2504_v41 = vpack.c.bf16 %v1676_v37, %v1670_v15  ;;  %v17877_v47 = vpop.f32.mrb[235].mxu0 }
 0x2c6   : > { %21497 = vst [vmem:[#allocation210_spill] sm:$0xff] %v17877_v47  ;;  %v13775_v53 = vpop.f32.mrb[188].mxu1 }
 0x2c7   : > { %v2576_v12 = vadd.bf16 %v16685_v27, %v2504_v41  ;;  %v3112_v49 = vpop.f32.mrb[189].mxu1 }
 0x2c8   : > { %v1682_v38 = vpop.f32.mrb[236].mxu0  ;;  %v13776_v62 = vpop.f32.mrb[190].mxu1 }
 0x2c9   : > { %v3414_v22 = vpack.c.bf16 %v13776_v62, %v13775_v53  ;;  %v17882_v5 = vpop.f32.mrb[237].mxu0  ;;  %v3115_v30 = vpop.f32.mrb[191].mxu1  ;;  %v2640_v45 = vmax.bf16 %v21327_v32, %v2576_v12 }
 0x2ca   : > { %21498 = vst [vmem:[#allocation211_spill] sm:$0xff] %v17882_v5  ;;  %v3413_v46 = vpack.c.bf16 %v3115_v30, %v3112_v49 }
 0x2cb   : > { %v3486_v15 = vadd.bf16 %v17571_v36, %v3414_v22  ;;  %13829 = vmatprep.mubr.bf16.mxu1 %v2640_v45 }
 0x2cc   : > { %v3485_v37 = vadd.bf16 %v17571_v36, %v3413_v46  ;;  %v1688_v44 = vpop.f32.mrb[238].mxu0 }
 0x2cd   : > { %v2505_v48 = vpack.c.bf16 %v1688_v44, %v1682_v38  ;;  %v17887_v52 = vpop.f32.mrb[239].mxu0  ;;  %v3550_v62 = vmax.bf16 %v21327_v32, %v3486_v15 }
 0x2ce   : > { %21499 = vst [vmem:[#allocation212_spill] sm:$0xff] %v17887_v52  ;;  %v3549_v53 = vmax.bf16 %v21327_v32, %v3485_v37 }
 0x2cf   : > { %v2577_v47 = vadd.bf16 %v16685_v27, %v2505_v48 }
 0x2d0   : > { %v1694_v12 = vpop.f32.mrb[240].mxu0  ;;  %13917 = vmatprep.mubr.bf16.mxu0 %v3549_v53 }
 0x2d1   : > { %v17894_v49 = vpop.f32.mrb[241].mxu0  ;;  %13918 = vmatmul.mubr.bf16.gmra.mrb[60].mxu0 %v3550_v62  ;;  %v2641_v22 = vmax.bf16 %v21327_v32, %v2577_v47 }
 0x2d2   : > { %21500 = vst [vmem:[#allocation213_spill] sm:$0xff] %v17894_v49 }
 0x2d3   : > { %13830 = vmatmul.mubr.bf16.gmra.mrb[244].mxu1 %v2641_v22 }
 0x2d4   : > { %v1700_v44 = vpop.f32.mrb[242].mxu0 }
 0x2d5   : > { %v2506_v38 = vpack.c.bf16 %v1700_v44, %v1694_v12  ;;  %v17897_v30 = vpop.f32.mrb[243].mxu0 }
 0x2d6   : > { %21501 = vst [vmem:[#allocation214_spill] sm:$0xff] %v17897_v30  ;;  %v13779_v46 = vpop.f32.mrb[192].mxu1 }
 0x2d7   : > { %v2578_v15 = vadd.bf16 %v16685_v27, %v2506_v38  ;;  %v3128_v37 = vpop.f32.mrb[193].mxu1  ;;  %v15072_v38 = vld [vmem:[%s21047_s3 + $0xe0] sm:$0xff]  }
 0x2d8   : > { %v1706_v48 = vpop.f32.mrb[244].mxu0  ;;  %v13780_v41 = vpop.f32.mrb[194].mxu1  ;;  %14137 = vmatprep.subr.bf16.mxu0 %v15072_v38 }
 0x2d9   : > { %v3416_v53 = vpack.c.bf16 %v13780_v41, %v13779_v46  ;;  %v17902_v5 = vpop.f32.mrb[245].mxu0  ;;  %v3131_v62 = vpop.f32.mrb[195].mxu1  ;;  %v2642_v47 = vmax.bf16 %v21327_v32, %v2578_v15  ;;  %14138 = vmatpush3.bf16.msra.mxu0 %v15072_v38 }
 0x2da   : > { %21502 = vst [vmem:[#allocation215_spill] sm:$0xff] %v17902_v5  ;;  %v3415_v22 = vpack.c.bf16 %v3131_v62, %v3128_v37 }
 0x2db   : > { %v3488_v12 = vadd.bf16 %v17571_v36, %v3416_v53  ;;  %13833 = vmatprep.mubr.bf16.mxu1 %v2642_v47 }
 0x2dc   : > { %v3487_v44 = vadd.bf16 %v17571_v36, %v3415_v22  ;;  %v1712_v52 = vpop.f32.mrb[246].mxu0 }
 0x2dd   : > { %v2507_v45 = vpack.c.bf16 %v1712_v52, %v1706_v48  ;;  %v17907_v49 = vpop.f32.mrb[247].mxu0  ;;  %v3552_v15 = vmax.bf16 %v21327_v32, %v3488_v12 }
 0x2de   : > { %21503 = vst [vmem:[#allocation216_spill] sm:$0xff] %v17907_v49  ;;  %v3551_v46 = vmax.bf16 %v21327_v32, %v3487_v44 }
 0x2df   : > { %v2579_v37 = vadd.bf16 %v16685_v27, %v2507_v45 }
 0x2e0   : > { %v1718_v53 = vpop.f32.mrb[248].mxu0  ;;  %13921 = vmatprep.mubr.bf16.mxu0 %v3551_v46 }
 0x2e1   : > { %v17917_v52 = vpop.f32.mrb[249].mxu0  ;;  %13922 = vmatmul.mubr.bf16.gmra.mrb[64].mxu0 %v3552_v15  ;;  %v2643_v48 = vmax.bf16 %v21327_v32, %v2579_v37 }
 0x2e2   : > { %21504 = vst [vmem:[#allocation217_spill] sm:$0xff] %v17917_v52 }
 0x2e3   : > { %13834 = vmatmul.mubr.bf16.gmra.mrb[248].mxu1 %v2643_v48 }
 0x2e4   : > { %v1724_v62 = vpop.f32.mrb[250].mxu0 }
 0x2e5   : > { %v2508_v47 = vpack.c.bf16 %v1724_v62, %v1718_v53  ;;  %v17920_v22 = vpop.f32.mrb[251].mxu0  ;;  %v12430_v53 = vld [vmem:[%s21048_s4 + $0x1] sm:$0x1] }
 0x2e6   : > { %21505 = vst [vmem:[#allocation218_spill] sm:$0xff] %v17920_v22  ;;  %v13783_v12 = vpop.f32.mrb[196].mxu1 }
 0x2e7   : > { %v2580_v45 = vadd.bf16 %v16685_v27, %v2508_v47  ;;  %v3144_v41 = vpop.f32.mrb[197].mxu1 }
 0x2e8   : > { %v1730_v30 = vpop.f32.mrb[252].mxu0  ;;  %v13784_v46 = vpop.f32.mrb[198].mxu1 }
 0x2e9   : > { %v3418_v38 = vpack.c.bf16 %v13784_v46, %v13783_v12  ;;  %v17925_v5 = vpop.f32.mrb[253].mxu0  ;;  %v3147_v15 = vpop.f32.mrb[199].mxu1  ;;  %v2644_v37 = vmax.bf16 %v21327_v32, %v2580_v45  ;;  %v4260_v12 = vpack.i.b16 %v12430_v53, %v12430_v53 }
 0x2ea   : > { %21506 = vst [vmem:[#allocation219_spill] sm:$0xff] %v17925_v5  ;;  %v3417_v48 = vpack.c.bf16 %v3147_v15, %v3144_v41 }
 0x2eb   : > { %v3490_v62 = vadd.bf16 %v17571_v36, %v3418_v38  ;;  %13837 = vmatprep.mubr.bf16.mxu1 %v2644_v37  ;;  %v17941_v37 = vrot.slane %v4260_v12, %v16663_v60 }
 0x2ec   : > { %v3489_v44 = vadd.bf16 %v17571_v36, %v3417_v48  ;;  %v1736_v47 = vpop.f32.mrb[254].mxu0 }
 0x2ed   : > { %v2509_v52 = vpack.c.bf16 %v1736_v47, %v1730_v30  ;;  %v17933_v22 = vpop.f32.mrb[255].mxu0  ;;  %v3554_v41 = vmax.bf16 %v21327_v32, %v3490_v62 }
 0x2ee   : > { %21507 = vst [vmem:[#allocation220_spill] sm:$0xff] %v17933_v22  ;;  %v3553_v45 = vmax.bf16 %v21327_v32, %v3489_v44 }
 0x2ef   : > { %v2581_v15 = vadd.bf16 %v16685_v27, %v2509_v52 }
 0x2f0   : > { %v13859_v49 = vpop.f32.mrb[0].mxu0  ;;  %13925 = vmatprep.mubr.bf16.mxu0 %v3553_v45 }
 0x2f1   : > { %v3682_v38 = vpop.f32.mrb[1].mxu0  ;;  %13926 = vmatmul.mubr.bf16.gmra.mrb[68].mxu0 %v3554_v41  ;;  %v2645_v30 = vmax.bf16 %v21327_v32, %v2581_v15 }
 0x2f2   : > { %v13860_v48 = vpop.f32.mrb[2].mxu0 }
 0x2f3   : > { %v4194_v53 = vpack.c.bf16 %v13860_v48, %v13859_v49  ;;  %13838 = vmatmul.mubr.bf16.gmra.mrb[252].mxu1 %v2645_v30  ;;  %v3685_v47 = vpop.f32.mrb[3].mxu0 }
 0x2f4   : > { %v4193_v46 = vpack.c.bf16 %v3685_v47, %v3682_v38 }
 0x2f5   : > { %v4267_v44 = vadd.bf16 %v17941_v37, %v4194_v53 }
 0x2f6   : > { %v4266_v62 = vadd.bf16 %v17941_v37, %v4193_v46  ;;  %v13787_v5 = vpop.f32.mrb[200].mxu1 }
 0x2f7   : > { %v3160_v27 = vpop.f32.mrb[201].mxu1  ;;  %v4331_v12 = vmax.bf16 %v21327_v32, %v4267_v44  ;;  %v15073_v44 = vld [vmem:[%s21047_s3 + $0xe8] sm:$0xff]  }
 0x2f8   : > { %v13788_v52 = vpop.f32.mrb[202].mxu1  ;;  %v13863_v45 = vpop.f32.mrb[4].mxu0  ;;  %v4330_v41 = vmax.bf16 %v21327_v32, %v4266_v62  ;;  %14139 = vmatprep.subr.bf16.mxu0 %v15073_v44 }
 0x2f9   : > { %v3420_v22 = vpack.c.bf16 %v13788_v52, %v13787_v5  ;;  %v3163_v50 = vpop.f32.mrb[203].mxu1  ;;  %v3698_v15 = vpop.f32.mrb[5].mxu0  ;;  %14140 = vmatpush3.bf16.msra.mxu0 %v15073_v44 }
 0x2fa   : > { %v3419_v7 = vpack.c.bf16 %v3163_v50, %v3160_v27  ;;  %v13864_v49 = vpop.f32.mrb[6].mxu0  ;;  %14001 = vmatprep.mubr.bf16.mxu1 %v4330_v41 }
 0x2fb   : > { %v3492_v38 = vadd.bf16 %v17571_v36, %v3420_v22  ;;  %v4196_v30 = vpack.c.bf16 %v13864_v49, %v13863_v45  ;;  %v3701_v48 = vpop.f32.mrb[7].mxu0  ;;  %14002 = vmatmul.mubr.bf16.vlgmr.msra.gmra.mrb[0].mxu1 %v4331_v12 }
 0x2fc   : > { %v3491_v46 = vadd.bf16 %v17571_v36, %v3419_v7  ;;  %v4195_v53 = vpack.c.bf16 %v3701_v48, %v3698_v15 }
 0x2fd   : > { %v4269_v47 = vadd.bf16 %v17941_v37, %v4196_v30  ;;  %v3556_v62 = vmax.bf16 %v21327_v32, %v3492_v38 }
 0x2fe   : > { %v4268_v5 = vadd.bf16 %v17941_v37, %v4195_v53  ;;  %v3555_v50 = vmax.bf16 %v21327_v32, %v3491_v46 }
 0x2ff   : > { %v4333_v7 = vmax.bf16 %v21327_v32, %v4269_v47 }
 0x300   : > { %v13867_v22 = vpop.f32.mrb[8].mxu0  ;;  %13929 = vmatprep.mubr.bf16.mxu0 %v3555_v50  ;;  %v4332_v27 = vmax.bf16 %v21327_v32, %v4268_v5 }
 0x301   : > { %v3714_v52 = vpop.f32.mrb[9].mxu0  ;;  %13930 = vmatmul.mubr.bf16.gmra.mrb[72].mxu0 %v3556_v62 }
 0x302   : > { %v13868_v45 = vpop.f32.mrb[10].mxu0  ;;  %14005 = vmatprep.mubr.bf16.mxu1 %v4332_v27 }
 0x303   : > { %v4198_v41 = vpack.c.bf16 %v13868_v45, %v13867_v22  ;;  %v3717_v12 = vpop.f32.mrb[11].mxu0  ;;  %14006 = vmatmul.mubr.bf16.gmra.mrb[4].mxu1 %v4333_v7 }
 0x304   : > { %v4197_v15 = vpack.c.bf16 %v3717_v12, %v3714_v52 }
 0x305   : > { %v4271_v49 = vadd.bf16 %v17941_v37, %v4198_v41 }
 0x306   : > { %v4270_v38 = vadd.bf16 %v17941_v37, %v4197_v15  ;;  %v13791_v30 = vpop.f32.mrb[204].mxu1 }
 0x307   : > { %v3176_v48 = vpop.f32.mrb[205].mxu1  ;;  %v4335_v47 = vmax.bf16 %v21327_v32, %v4271_v49 }
 0x308   : > { %v13792_v46 = vpop.f32.mrb[206].mxu1  ;;  %v13871_v53 = vpop.f32.mrb[12].mxu0  ;;  %v4334_v44 = vmax.bf16 %v21327_v32, %v4270_v38 }
 0x309   : > { %v3422_v5 = vpack.c.bf16 %v13792_v46, %v13791_v30  ;;  %v3179_v50 = vpop.f32.mrb[207].mxu1  ;;  %v3730_v62 = vpop.f32.mrb[13].mxu0 }
 0x30a   : > { %v3421_v27 = vpack.c.bf16 %v3179_v50, %v3176_v48  ;;  %v13872_v22 = vpop.f32.mrb[14].mxu0  ;;  %14009 = vmatprep.mubr.bf16.mxu1 %v4334_v44 }
 0x30b   : > { %v3494_v7 = vadd.bf16 %v17571_v36, %v3422_v5  ;;  %v4200_v52 = vpack.c.bf16 %v13872_v22, %v13871_v53  ;;  %v3733_v45 = vpop.f32.mrb[15].mxu0  ;;  %14010 = vmatmul.mubr.bf16.gmra.mrb[8].mxu1 %v4335_v47 }
 0x30c   : > { %v3493_v41 = vadd.bf16 %v17571_v36, %v3421_v27  ;;  %v4199_v12 = vpack.c.bf16 %v3733_v45, %v3730_v62 }
 0x30d   : > { %v4273_v15 = vadd.bf16 %v17941_v37, %v4200_v52  ;;  %v3558_v30 = vmax.bf16 %v21327_v32, %v3494_v7 }
 0x30e   : > { %v4272_v38 = vadd.bf16 %v17941_v37, %v4199_v12  ;;  %v3557_v49 = vmax.bf16 %v21327_v32, %v3493_v41 }
 0x30f   : > { %v4337_v44 = vmax.bf16 %v21327_v32, %v4273_v15 }
 0x310   : > { %v13875_v46 = vpop.f32.mrb[16].mxu0  ;;  %13933 = vmatprep.mubr.bf16.mxu0 %v3557_v49  ;;  %v4336_v48 = vmax.bf16 %v21327_v32, %v4272_v38 }
 0x311   : > { %v3746_v53 = vpop.f32.mrb[17].mxu0  ;;  %13934 = vmatmul.mubr.bf16.gmra.mrb[76].mxu0 %v3558_v30 }
 0x312   : > { %v13876_v47 = vpop.f32.mrb[18].mxu0  ;;  %14013 = vmatprep.mubr.bf16.mxu1 %v4336_v48 }
 0x313   : > { %v4202_v5 = vpack.c.bf16 %v13876_v47, %v13875_v46  ;;  %v3749_v50 = vpop.f32.mrb[19].mxu0  ;;  %14014 = vmatmul.mubr.bf16.gmra.mrb[12].mxu1 %v4337_v44 }
 0x314   : > { %v4201_v62 = vpack.c.bf16 %v3749_v50, %v3746_v53 }
 0x315   : > { %v4275_v27 = vadd.bf16 %v17941_v37, %v4202_v5 }
 0x316   : > { %v4274_v22 = vadd.bf16 %v17941_v37, %v4201_v62  ;;  %v13795_v52 = vpop.f32.mrb[208].mxu1 }
 0x317   : > { %v3192_v7 = vpop.f32.mrb[209].mxu1  ;;  %v4339_v15 = vmax.bf16 %v21327_v32, %v4275_v27  ;;  %v15074_v27 = vld [vmem:[%s21047_s3 + $0xf0] sm:$0xff]  }
 0x318   : > { %v13796_v45 = vpop.f32.mrb[210].mxu1  ;;  %v13879_v41 = vpop.f32.mrb[20].mxu0  ;;  %v4338_v12 = vmax.bf16 %v21327_v32, %v4274_v22  ;;  %14141 = vmatprep.subr.bf16.mxu0 %v15074_v27 }
 0x319   : > { %v3424_v38 = vpack.c.bf16 %v13796_v45, %v13795_v52  ;;  %v3195_v49 = vpop.f32.mrb[211].mxu1  ;;  %v3762_v30 = vpop.f32.mrb[21].mxu0  ;;  %14142 = vmatpush3.bf16.msra.mxu0 %v15074_v27 }
 0x31a   : > { %v3423_v48 = vpack.c.bf16 %v3195_v49, %v3192_v7  ;;  %v13880_v46 = vpop.f32.mrb[22].mxu0  ;;  %14017 = vmatprep.mubr.bf16.mxu1 %v4338_v12 }
 0x31b   : > { %v3496_v44 = vadd.bf16 %v17571_v36, %v3424_v38  ;;  %v4204_v53 = vpack.c.bf16 %v13880_v46, %v13879_v41  ;;  %v3765_v47 = vpop.f32.mrb[23].mxu0  ;;  %14018 = vmatmul.mubr.bf16.gmra.mrb[16].mxu1 %v4339_v15 }
 0x31c   : > { %v3495_v5 = vadd.bf16 %v17571_v36, %v3423_v48  ;;  %v4203_v50 = vpack.c.bf16 %v3765_v47, %v3762_v30 }
 0x31d   : > { %v4277_v62 = vadd.bf16 %v17941_v37, %v4204_v53  ;;  %v3560_v7 = vmax.bf16 %v21327_v32, %v3496_v44 }
 0x31e   : > { %v4276_v22 = vadd.bf16 %v17941_v37, %v4203_v50  ;;  %v3559_v52 = vmax.bf16 %v21327_v32, %v3495_v5 }
 0x31f   : > { %v4341_v12 = vmax.bf16 %v21327_v32, %v4277_v62 }
 0x320   : > { %v13883_v45 = vpop.f32.mrb[24].mxu0  ;;  %13937 = vmatprep.mubr.bf16.mxu0 %v3559_v52  ;;  %v4340_v41 = vmax.bf16 %v21327_v32, %v4276_v22 }
 0x321   : > { %v3778_v15 = vpop.f32.mrb[25].mxu0  ;;  %13938 = vmatmul.mubr.bf16.gmra.mrb[80].mxu0 %v3560_v7 }
 0x322   : > { %v13884_v38 = vpop.f32.mrb[26].mxu0  ;;  %14021 = vmatprep.mubr.bf16.mxu1 %v4340_v41 }
 0x323   : > { %v4206_v49 = vpack.c.bf16 %v13884_v38, %v13883_v45  ;;  %v3781_v30 = vpop.f32.mrb[27].mxu0  ;;  %14022 = vmatmul.mubr.bf16.gmra.mrb[20].mxu1 %v4341_v12 }
 0x324   : > { %v4205_v48 = vpack.c.bf16 %v3781_v30, %v3778_v15 }
 0x325   : > { %v4279_v46 = vadd.bf16 %v17941_v37, %v4206_v49 }
 0x326   : > { %v4278_v44 = vadd.bf16 %v17941_v37, %v4205_v48  ;;  %v13799_v53 = vpop.f32.mrb[212].mxu1 }
 0x327   : > { %v3208_v47 = vpop.f32.mrb[213].mxu1  ;;  %v4343_v62 = vmax.bf16 %v21327_v32, %v4279_v46 }
 0x328   : > { %v13800_v5 = vpop.f32.mrb[214].mxu1  ;;  %v13887_v50 = vpop.f32.mrb[28].mxu0  ;;  %v4342_v27 = vmax.bf16 %v21327_v32, %v4278_v44 }
 0x329   : > { %v3426_v22 = vpack.c.bf16 %v13800_v5, %v13799_v53  ;;  %v3211_v52 = vpop.f32.mrb[215].mxu1  ;;  %v3794_v7 = vpop.f32.mrb[29].mxu0 }
 0x32a   : > { %v3425_v41 = vpack.c.bf16 %v3211_v52, %v3208_v47  ;;  %v13888_v45 = vpop.f32.mrb[30].mxu0  ;;  %14025 = vmatprep.mubr.bf16.mxu1 %v4342_v27 }
 0x32b   : > { %v3498_v12 = vadd.bf16 %v17571_v36, %v3426_v22  ;;  %v4208_v15 = vpack.c.bf16 %v13888_v45, %v13887_v50  ;;  %v3797_v38 = vpop.f32.mrb[31].mxu0  ;;  %14026 = vmatmul.mubr.bf16.gmra.mrb[24].mxu1 %v4343_v62 }
 0x32c   : > { %v3497_v49 = vadd.bf16 %v17571_v36, %v3425_v41  ;;  %v4207_v30 = vpack.c.bf16 %v3797_v38, %v3794_v7 }
 0x32d   : > { %v4281_v48 = vadd.bf16 %v17941_v37, %v4208_v15  ;;  %v3562_v53 = vmax.bf16 %v21327_v32, %v3498_v12 }
 0x32e   : > { %v4280_v44 = vadd.bf16 %v17941_v37, %v4207_v30  ;;  %v3561_v46 = vmax.bf16 %v21327_v32, %v3497_v49 }
 0x32f   : > { %v4345_v5 = vmax.bf16 %v21327_v32, %v4281_v48 }
 0x330   : > { %13941 = vmatprep.mubr.bf16.mxu0 %v3561_v46  ;;  %v4344_v47 = vmax.bf16 %v21327_v32, %v4280_v44 }
 0x331   : > { %13942 = vmatmul.mubr.bf16.gmra.mrb[84].mxu0 %v3562_v53 }
 0x332   : > { %14029 = vmatprep.mubr.bf16.mxu1 %v4344_v47 }
 0x333   : > { %14030 = vmatmul.mubr.bf16.gmra.mrb[28].mxu1 %v4345_v5  ;;  %v15075_v5 = vld [vmem:[%s21047_s3 + $0xf8] sm:$0xff]  }
 0x334   : > { %v13891_v50 = vpop.f32.mrb[32].mxu0  ;;  %14143 = vmatprep.subr.bf16.mxu0 %v15075_v5 }
 0x335   : > { %v3810_v27 = vpop.f32.mrb[33].mxu0  ;;  %14144 = vmatpush3.bf16.msra.mxu0 %v15075_v5 }
 0x336   : > { %v13803_v62 = vpop.f32.mrb[216].mxu1  ;;  %v13892_v22 = vpop.f32.mrb[34].mxu0 }
 0x337   : > { %v4210_v52 = vpack.c.bf16 %v13892_v22, %v13891_v50  ;;  %v3224_v7 = vpop.f32.mrb[217].mxu1  ;;  %v3813_v41 = vpop.f32.mrb[35].mxu0  ;;  %v15076_v50 = vld [vmem:[%s21047_s3 + $0x100] sm:$0xff]  }
 0x338   : > { %v4209_v45 = vpack.c.bf16 %v3813_v41, %v3810_v27  ;;  %v13804_v15 = vpop.f32.mrb[218].mxu1  ;;  %14273 = vmatprep.subr.bf16.mxu1 %v15076_v50 }
 0x339   : > { %v4283_v38 = vadd.bf16 %v17941_v37, %v4210_v52  ;;  %v3428_v12 = vpack.c.bf16 %v13804_v15, %v13803_v62  ;;  %v3227_v49 = vpop.f32.mrb[219].mxu1  ;;  %14274 = vmatpush3.bf16.msra.mxu1 %v15076_v50 }
 0x33a   : > { %v4282_v30 = vadd.bf16 %v17941_v37, %v4209_v45  ;;  %v3427_v44 = vpack.c.bf16 %v3227_v49, %v3224_v7 }
 0x33b   : > { %v3500_v48 = vadd.bf16 %v17571_v36, %v3428_v12  ;;  %v4347_v47 = vmax.bf16 %v21327_v32, %v4283_v38 }
 0x33c   : > { %v3499_v46 = vadd.bf16 %v17571_v36, %v3427_v44  ;;  %v4346_v53 = vmax.bf16 %v21327_v32, %v4282_v30 }
 0x33d   : > { %v3564_v62 = vmax.bf16 %v21327_v32, %v3500_v48 }
 0x33e   : > { %14033 = vmatprep.mubr.bf16.mxu1 %v4346_v53  ;;  %v3563_v27 = vmax.bf16 %v21327_v32, %v3499_v46 }
 0x33f   : > { %14034 = vmatmul.mubr.bf16.gmra.mrb[32].mxu1 %v4347_v47 }
 0x340   : > { %13945 = vmatprep.mubr.bf16.mxu0 %v3563_v27 }
 0x341   : > { %13946 = vmatmul.mubr.bf16.gmra.mrb[88].mxu0 %v3564_v62 }
 0x344   : > { %v13895_v22 = vpop.f32.mrb[36].mxu0 }
 0x345   : > { %v3826_v52 = vpop.f32.mrb[37].mxu0 }
 0x346   : > { %v13807_v7 = vpop.f32.mrb[220].mxu1  ;;  %v13896_v41 = vpop.f32.mrb[38].mxu0 }
 0x347   : > { %v4212_v45 = vpack.c.bf16 %v13896_v41, %v13895_v22  ;;  %v3240_v15 = vpop.f32.mrb[221].mxu1  ;;  %v3829_v38 = vpop.f32.mrb[39].mxu0 }
 0x348   : > { %v4211_v12 = vpack.c.bf16 %v3829_v38, %v3826_v52  ;;  %v13808_v49 = vpop.f32.mrb[222].mxu1 }
 0x349   : > { %v4285_v30 = vadd.bf16 %v17941_v37, %v4212_v45  ;;  %v3430_v44 = vpack.c.bf16 %v13808_v49, %v13807_v7  ;;  %v3243_v48 = vpop.f32.mrb[223].mxu1 }
 0x34a   : > { %v4284_v46 = vadd.bf16 %v17941_v37, %v4211_v12  ;;  %v3429_v53 = vpack.c.bf16 %v3243_v48, %v3240_v15 }
 0x34b   : > { %v3502_v47 = vadd.bf16 %v17571_v36, %v3430_v44  ;;  %v4349_v27 = vmax.bf16 %v21327_v32, %v4285_v30 }
 0x34c   : > { %v3501_v5 = vadd.bf16 %v17571_v36, %v3429_v53  ;;  %v4348_v50 = vmax.bf16 %v21327_v32, %v4284_v46 }
 0x34d   : > { %v3566_v22 = vmax.bf16 %v21327_v32, %v3502_v47 }
 0x34e   : > { %14037 = vmatprep.mubr.bf16.mxu1 %v4348_v50  ;;  %v3565_v62 = vmax.bf16 %v21327_v32, %v3501_v5 }
 0x34f   : > { %14038 = vmatmul.mubr.bf16.gmra.mrb[36].mxu1 %v4349_v27 }
 0x350   : > { %13949 = vmatprep.mubr.bf16.mxu0 %v3565_v62 }
 0x351   : > { %13950 = vmatmul.mubr.bf16.gmra.mrb[92].mxu0 %v3566_v22  ;;  %v15077_v22 = vld [vmem:[%s21047_s3 + $0x108] sm:$0xff]  }
 0x352   : > { %14275 = vmatprep.subr.bf16.mxu1 %v15077_v22 }
 0x353   : > { %14276 = vmatpush3.bf16.msra.mxu1 %v15077_v22 }
 0x354   : > { %v13899_v52 = vpop.f32.mrb[40].mxu0 }
 0x355   : > { %v3842_v7 = vpop.f32.mrb[41].mxu0 }
 0x356   : > { %v13811_v41 = vpop.f32.mrb[224].mxu1  ;;  %v13900_v45 = vpop.f32.mrb[42].mxu0 }
 0x357   : > { %v4214_v15 = vpack.c.bf16 %v13900_v45, %v13899_v52  ;;  %v3256_v38 = vpop.f32.mrb[225].mxu1  ;;  %v3845_v12 = vpop.f32.mrb[43].mxu0 }
 0x358   : > { %v4213_v49 = vpack.c.bf16 %v3845_v12, %v3842_v7  ;;  %v13812_v44 = vpop.f32.mrb[226].mxu1 }
 0x359   : > { %v4287_v48 = vadd.bf16 %v17941_v37, %v4214_v15  ;;  %v3432_v30 = vpack.c.bf16 %v13812_v44, %v13811_v41  ;;  %v3259_v46 = vpop.f32.mrb[227].mxu1 }
 0x35a   : > { %v4286_v53 = vadd.bf16 %v17941_v37, %v4213_v49  ;;  %v3431_v5 = vpack.c.bf16 %v3259_v46, %v3256_v38 }
 0x35b   : > { %v3504_v47 = vadd.bf16 %v17571_v36, %v3432_v30  ;;  %v4351_v62 = vmax.bf16 %v21327_v32, %v4287_v48 }
 0x35c   : > { %v3503_v50 = vadd.bf16 %v17571_v36, %v3431_v5  ;;  %v4350_v27 = vmax.bf16 %v21327_v32, %v4286_v53 }
 0x35d   : > { %v3568_v7 = vmax.bf16 %v21327_v32, %v3504_v47 }
 0x35e   : > { %14041 = vmatprep.mubr.bf16.mxu1 %v4350_v27  ;;  %v3567_v52 = vmax.bf16 %v21327_v32, %v3503_v50 }
 0x35f   : > { %14042 = vmatmul.mubr.bf16.gmra.mrb[40].mxu1 %v4351_v62 }
 0x360   : > { %13953 = vmatprep.mubr.bf16.mxu0 %v3567_v52 }
 0x361   : > { %13954 = vmatmul.mubr.bf16.gmra.mrb[96].mxu0 %v3568_v7 }
 0x364   : > { %v13903_v41 = vpop.f32.mrb[44].mxu0 }
 0x365   : > { %v3858_v45 = vpop.f32.mrb[45].mxu0 }
 0x366   : > { %v13815_v15 = vpop.f32.mrb[228].mxu1  ;;  %v13904_v38 = vpop.f32.mrb[46].mxu0 }
 0x367   : > { %v4216_v12 = vpack.c.bf16 %v13904_v38, %v13903_v41  ;;  %v3272_v49 = vpop.f32.mrb[229].mxu1  ;;  %v3861_v44 = vpop.f32.mrb[47].mxu0 }
 0x368   : > { %v4215_v48 = vpack.c.bf16 %v3861_v44, %v3858_v45  ;;  %v13816_v30 = vpop.f32.mrb[230].mxu1 }
 0x369   : > { %v4289_v46 = vadd.bf16 %v17941_v37, %v4216_v12  ;;  %v3434_v53 = vpack.c.bf16 %v13816_v30, %v13815_v15  ;;  %v3275_v5 = vpop.f32.mrb[231].mxu1 }
 0x36a   : > { %v4288_v47 = vadd.bf16 %v17941_v37, %v4215_v48  ;;  %v3433_v50 = vpack.c.bf16 %v3275_v5, %v3272_v49 }
 0x36b   : > { %v3506_v27 = vadd.bf16 %v17571_v36, %v3434_v53  ;;  %v4353_v52 = vmax.bf16 %v21327_v32, %v4289_v46 }
 0x36c   : > { %v3505_v62 = vadd.bf16 %v17571_v36, %v3433_v50  ;;  %v4352_v22 = vmax.bf16 %v21327_v32, %v4288_v47 }
 0x36d   : > { %v3570_v41 = vmax.bf16 %v21327_v32, %v3506_v27 }
 0x36e   : > { %14045 = vmatprep.mubr.bf16.mxu1 %v4352_v22  ;;  %v3569_v7 = vmax.bf16 %v21327_v32, %v3505_v62 }
 0x36f   : > { %14046 = vmatmul.mubr.bf16.gmra.mrb[44].mxu1 %v4353_v52 }
 0x370   : > { %13957 = vmatprep.mubr.bf16.mxu0 %v3569_v7 }
 0x371   : > { %13958 = vmatmul.mubr.bf16.gmra.mrb[100].mxu0 %v3570_v41  ;;  %v15078_v41 = vld [vmem:[%s21047_s3 + $0x110] sm:$0xff]  }
 0x372   : > { %14277 = vmatprep.subr.bf16.mxu1 %v15078_v41 }
 0x373   : > { %14278 = vmatpush3.bf16.msra.mxu1 %v15078_v41 }
 0x374   : > { %v13907_v45 = vpop.f32.mrb[48].mxu0 }
 0x375   : > { %v3874_v15 = vpop.f32.mrb[49].mxu0 }
 0x376   : > { %v13819_v38 = vpop.f32.mrb[232].mxu1  ;;  %v13908_v12 = vpop.f32.mrb[50].mxu0 }
 0x377   : > { %v4218_v49 = vpack.c.bf16 %v13908_v12, %v13907_v45  ;;  %v3288_v44 = vpop.f32.mrb[233].mxu1  ;;  %v3877_v48 = vpop.f32.mrb[51].mxu0 }
 0x378   : > { %v4217_v30 = vpack.c.bf16 %v3877_v48, %v3874_v15  ;;  %v13820_v53 = vpop.f32.mrb[234].mxu1 }
 0x379   : > { %v4291_v5 = vadd.bf16 %v17941_v37, %v4218_v49  ;;  %v3436_v46 = vpack.c.bf16 %v13820_v53, %v13819_v38  ;;  %v3291_v47 = vpop.f32.mrb[235].mxu1 }
 0x37a   : > { %v4290_v50 = vadd.bf16 %v17941_v37, %v4217_v30  ;;  %v3435_v62 = vpack.c.bf16 %v3291_v47, %v3288_v44 }
 0x37b   : > { %v3508_v27 = vadd.bf16 %v17571_v36, %v3436_v46  ;;  %v4355_v7 = vmax.bf16 %v21327_v32, %v4291_v5 }
 0x37c   : > { %v3507_v22 = vadd.bf16 %v17571_v36, %v3435_v62  ;;  %v4354_v52 = vmax.bf16 %v21327_v32, %v4290_v50 }
 0x37d   : > { %v3572_v15 = vmax.bf16 %v21327_v32, %v3508_v27 }
 0x37e   : > { %14049 = vmatprep.mubr.bf16.mxu1 %v4354_v52  ;;  %v3571_v45 = vmax.bf16 %v21327_v32, %v3507_v22 }
 0x37f   : > { %14050 = vmatmul.mubr.bf16.gmra.mrb[48].mxu1 %v4355_v7 }
 0x380   : > { %13961 = vmatprep.mubr.bf16.mxu0 %v3571_v45 }
 0x381   : > { %13962 = vmatmul.mubr.bf16.gmra.mrb[104].mxu0 %v3572_v15 }
 0x384   : > { %v13911_v38 = vpop.f32.mrb[52].mxu0 }
 0x385   : > { %v3890_v12 = vpop.f32.mrb[53].mxu0 }
 0x386   : > { %v13823_v49 = vpop.f32.mrb[236].mxu1  ;;  %v13912_v44 = vpop.f32.mrb[54].mxu0 }
 0x387   : > { %v4220_v48 = vpack.c.bf16 %v13912_v44, %v13911_v38  ;;  %v3304_v30 = vpop.f32.mrb[237].mxu1  ;;  %v3893_v53 = vpop.f32.mrb[55].mxu0 }
 0x388   : > { %v4219_v5 = vpack.c.bf16 %v3893_v53, %v3890_v12  ;;  %v13824_v46 = vpop.f32.mrb[238].mxu1 }
 0x389   : > { %v4293_v47 = vadd.bf16 %v17941_v37, %v4220_v48  ;;  %v3438_v50 = vpack.c.bf16 %v13824_v46, %v13823_v49  ;;  %v3307_v62 = vpop.f32.mrb[239].mxu1 }
 0x38a   : > { %v4292_v27 = vadd.bf16 %v17941_v37, %v4219_v5  ;;  %v3437_v22 = vpack.c.bf16 %v3307_v62, %v3304_v30 }
 0x38b   : > { %v3510_v52 = vadd.bf16 %v17571_v36, %v3438_v50  ;;  %v4357_v45 = vmax.bf16 %v21327_v32, %v4293_v47 }
 0x38c   : > { %v3509_v7 = vadd.bf16 %v17571_v36, %v3437_v22  ;;  %v4356_v41 = vmax.bf16 %v21327_v32, %v4292_v27 }
 0x38d   : > { %v3574_v38 = vmax.bf16 %v21327_v32, %v3510_v52 }
 0x38e   : > { %14053 = vmatprep.mubr.bf16.mxu1 %v4356_v41  ;;  %v3573_v15 = vmax.bf16 %v21327_v32, %v3509_v7  ;;  %v15079_v41 = vld [vmem:[%s21047_s3 + $0x118] sm:$0xff]  }
 0x38f   : > { %14054 = vmatmul.mubr.bf16.gmra.mrb[52].mxu1 %v4357_v45  ;;  %14279 = vmatprep.subr.bf16.mxu1 %v15079_v41 }
 0x390   : > { %13965 = vmatprep.mubr.bf16.mxu0 %v3573_v15  ;;  %14280 = vmatpush3.bf16.msra.mxu1 %v15079_v41 }
 0x391   : > { %13966 = vmatmul.mubr.bf16.gmra.mrb[108].mxu0 %v3574_v38 }
 0x394   : > { %v13915_v12 = vpop.f32.mrb[56].mxu0 }
 0x395   : > { %v3906_v49 = vpop.f32.mrb[57].mxu0 }
 0x396   : > { %v13827_v44 = vpop.f32.mrb[240].mxu1  ;;  %v13916_v48 = vpop.f32.mrb[58].mxu0 }
 0x397   : > { %v4222_v30 = vpack.c.bf16 %v13916_v48, %v13915_v12  ;;  %v3320_v53 = vpop.f32.mrb[241].mxu1  ;;  %v3909_v5 = vpop.f32.mrb[59].mxu0 }
 0x398   : > { %v4221_v46 = vpack.c.bf16 %v3909_v5, %v3906_v49  ;;  %v13828_v50 = vpop.f32.mrb[242].mxu1 }
 0x399   : > { %v4295_v62 = vadd.bf16 %v17941_v37, %v4222_v30  ;;  %v3440_v47 = vpack.c.bf16 %v13828_v50, %v13827_v44  ;;  %v3323_v27 = vpop.f32.mrb[243].mxu1 }
 0x39a   : > { %v4294_v22 = vadd.bf16 %v17941_v37, %v4221_v46  ;;  %v3439_v7 = vpack.c.bf16 %v3323_v27, %v3320_v53 }
 0x39b   : > { %v3512_v52 = vadd.bf16 %v17571_v36, %v3440_v47  ;;  %v4359_v38 = vmax.bf16 %v21327_v32, %v4295_v62 }
 0x39c   : > { %v3511_v45 = vadd.bf16 %v17571_v36, %v3439_v7  ;;  %v4358_v15 = vmax.bf16 %v21327_v32, %v4294_v22 }
 0x39d   : > { %v3576_v49 = vmax.bf16 %v21327_v32, %v3512_v52 }
 0x39e   : > { %14057 = vmatprep.mubr.bf16.mxu1 %v4358_v15  ;;  %v3575_v12 = vmax.bf16 %v21327_v32, %v3511_v45 }
 0x39f   : > { %14058 = vmatmul.mubr.bf16.gmra.mrb[56].mxu1 %v4359_v38 }
 0x3a0   : > { %13969 = vmatprep.mubr.bf16.mxu0 %v3575_v12 }
 0x3a1   : > { %13970 = vmatmul.mubr.bf16.gmra.mrb[112].mxu0 %v3576_v49 }
 0x3a4   : > { %v13919_v44 = vpop.f32.mrb[60].mxu0 }
 0x3a5   : > { %v3922_v48 = vpop.f32.mrb[61].mxu0 }
 0x3a6   : > { %v13831_v30 = vpop.f32.mrb[244].mxu1  ;;  %v13920_v53 = vpop.f32.mrb[62].mxu0 }
 0x3a7   : > { %v4224_v5 = vpack.c.bf16 %v13920_v53, %v13919_v44  ;;  %v3336_v46 = vpop.f32.mrb[245].mxu1  ;;  %v3925_v50 = vpop.f32.mrb[63].mxu0 }
 0x3a8   : > { %v4223_v47 = vpack.c.bf16 %v3925_v50, %v3922_v48  ;;  %v13832_v27 = vpop.f32.mrb[246].mxu1 }
 0x3a9   : > { %v4297_v62 = vadd.bf16 %v17941_v37, %v4224_v5  ;;  %v3442_v22 = vpack.c.bf16 %v13832_v27, %v13831_v30  ;;  %v3339_v7 = vpop.f32.mrb[247].mxu1 }
 0x3aa   : > { %v4296_v41 = vadd.bf16 %v17941_v37, %v4223_v47  ;;  %v3441_v45 = vpack.c.bf16 %v3339_v7, %v3336_v46 }
 0x3ab   : > { %v3514_v52 = vadd.bf16 %v17571_v36, %v3442_v22  ;;  %v4361_v12 = vmax.bf16 %v21327_v32, %v4297_v62 }
 0x3ac   : > { %v3513_v15 = vadd.bf16 %v17571_v36, %v3441_v45  ;;  %v4360_v38 = vmax.bf16 %v21327_v32, %v4296_v41 }
 0x3ad   : > { %v3578_v44 = vmax.bf16 %v21327_v32, %v3514_v52 }
 0x3ae   : > { %14061 = vmatprep.mubr.bf16.mxu1 %v4360_v38  ;;  %v3577_v49 = vmax.bf16 %v21327_v32, %v3513_v15  ;;  %v15080_v38 = vld [vmem:[%s21047_s3 + $0x120] sm:$0xff]  }
 0x3af   : > { %14062 = vmatmul.mubr.bf16.gmra.mrb[60].mxu1 %v4361_v12  ;;  %14281 = vmatprep.subr.bf16.mxu1 %v15080_v38 }
 0x3b0   : > { %13973 = vmatprep.mubr.bf16.mxu0 %v3577_v49  ;;  %14282 = vmatpush3.bf16.msra.mxu1 %v15080_v38 }
 0x3b1   : > { %13974 = vmatmul.mubr.bf16.gmra.mrb[116].mxu0 %v3578_v44 }
 0x3b4   : > { %v13923_v48 = vpop.f32.mrb[64].mxu0 }
 0x3b5   : > { %v3938_v30 = vpop.f32.mrb[65].mxu0 }
 0x3b6   : > { %v13835_v53 = vpop.f32.mrb[248].mxu1  ;;  %v13924_v5 = vpop.f32.mrb[66].mxu0 }
 0x3b7   : > { %v4226_v46 = vpack.c.bf16 %v13924_v5, %v13923_v48  ;;  %v3352_v50 = vpop.f32.mrb[249].mxu1  ;;  %v3941_v47 = vpop.f32.mrb[67].mxu0 }
 0x3b8   : > { %v4225_v27 = vpack.c.bf16 %v3941_v47, %v3938_v30  ;;  %v13836_v22 = vpop.f32.mrb[250].mxu1 }
 0x3b9   : > { %v4299_v7 = vadd.bf16 %v17941_v37, %v4226_v46  ;;  %v3444_v62 = vpack.c.bf16 %v13836_v22, %v13835_v53  ;;  %v3355_v41 = vpop.f32.mrb[251].mxu1 }
 0x3ba   : > { %v4298_v45 = vadd.bf16 %v17941_v37, %v4225_v27  ;;  %v3443_v15 = vpack.c.bf16 %v3355_v41, %v3352_v50 }
 0x3bb   : > { %v3516_v52 = vadd.bf16 %v17571_v36, %v3444_v62  ;;  %v4363_v44 = vmax.bf16 %v21327_v32, %v4299_v7  ;;  %v12455_v7 = vld [vmem:[%s21048_s4 + $0x2] sm:$0x1] }
 0x3bc   : > { %v3515_v12 = vadd.bf16 %v17571_v36, %v3443_v15  ;;  %v4362_v49 = vmax.bf16 %v21327_v32, %v4298_v45 }
 0x3bd   : > { %v3580_v30 = vmax.bf16 %v21327_v32, %v3516_v52 }
 0x3be   : > { %14065 = vmatprep.mubr.bf16.mxu1 %v4362_v49  ;;  %v3579_v48 = vmax.bf16 %v21327_v32, %v3515_v12 }
 0x3bf   : > { %14066 = vmatmul.mubr.bf16.gmra.mrb[64].mxu1 %v4363_v44  ;;  %v5071_v44 = vpack.i.b16 %v12455_v7, %v12455_v7 }
 0x3c0   : > { %13977 = vmatprep.mubr.bf16.mxu0 %v3579_v48 }
 0x3c1   : > { %13978 = vmatmul.mubr.bf16.gmra.mrb[120].mxu0 %v3580_v30 }
 0x3c4   : > { %v13927_v53 = vpop.f32.mrb[68].mxu0 }
 0x3c5   : > { %v3954_v5 = vpop.f32.mrb[69].mxu0 }
 0x3c6   : > { %v13839_v46 = vpop.f32.mrb[252].mxu1  ;;  %v13928_v50 = vpop.f32.mrb[70].mxu0 }
 0x3c7   : > { %v4228_v47 = vpack.c.bf16 %v13928_v50, %v13927_v53  ;;  %v3368_v27 = vpop.f32.mrb[253].mxu1  ;;  %v3957_v22 = vpop.f32.mrb[71].mxu0 }
 0x3c8   : > { %v4227_v62 = vpack.c.bf16 %v3957_v22, %v3954_v5  ;;  %v13840_v41 = vpop.f32.mrb[254].mxu1  ;;  %v18100_v22 = vrot.slane %v5071_v44, %v16663_v60 }
 0x3c9   : > { %v4301_v45 = vadd.bf16 %v17941_v37, %v4228_v47  ;;  %v3446_v15 = vpack.c.bf16 %v13840_v41, %v13839_v46  ;;  %v3371_v52 = vpop.f32.mrb[255].mxu1 }
 0x3ca   : > { %v4300_v38 = vadd.bf16 %v17941_v37, %v4227_v62  ;;  %v3445_v12 = vpack.c.bf16 %v3371_v52, %v3368_v27 }
 0x3cb   : > { %v3518_v49 = vadd.bf16 %v17571_v36, %v3446_v15  ;;  %v4365_v53 = vmax.bf16 %v21327_v32, %v4301_v45 }
 0x3cc   : > { %v3517_v48 = vadd.bf16 %v17571_v36, %v3445_v12  ;;  %v4364_v30 = vmax.bf16 %v21327_v32, %v4300_v38 }
 0x3cd   : > { %v3582_v47 = vmax.bf16 %v21327_v32, %v3518_v49 }
 0x3ce   : > { %v14003_v5 = vpop.f32.mrb[0].mxu1  ;;  %14069 = vmatprep.mubr.bf16.mxu1 %v4364_v30  ;;  %v3581_v50 = vmax.bf16 %v21327_v32, %v3517_v48 }
 0x3cf   : > { %v4493_v46 = vpop.f32.mrb[1].mxu1  ;;  %14070 = vmatmul.mubr.bf16.gmra.mrb[68].mxu1 %v4365_v53 }
 0x3d0   : > { %13981 = vmatprep.mubr.bf16.mxu0 %v3581_v50  ;;  %v14004_v27 = vpop.f32.mrb[2].mxu1 }
 0x3d1   : > { %v5005_v62 = vpack.c.bf16 %v14004_v27, %v14003_v5  ;;  %13982 = vmatmul.mubr.bf16.gmra.mrb[124].mxu0 %v3582_v47  ;;  %v4496_v36 = vpop.f32.mrb[3].mxu1 }
 0x3d2   : > { %v5004_v41 = vpack.c.bf16 %v4496_v36, %v4493_v46 }
 0x3d3   : > { %v5078_v7 = vadd.bf16 %v18100_v22, %v5005_v62 }
 0x3d4   : > { %v5077_v45 = vadd.bf16 %v18100_v22, %v5004_v41  ;;  %v13931_v15 = vpop.f32.mrb[72].mxu0 }
 0x3d5   : > { %v3970_v52 = vpop.f32.mrb[73].mxu0  ;;  %v5142_v48 = vmax.bf16 %v21327_v32, %v5078_v7  ;;  %v15081_v7 = vld [vmem:[%s21047_s3 + $0x128] sm:$0xff]  }
 0x3d6   : > { %v13932_v38 = vpop.f32.mrb[74].mxu0  ;;  %v14007_v12 = vpop.f32.mrb[4].mxu1  ;;  %v5141_v49 = vmax.bf16 %v21327_v32, %v5077_v45  ;;  %14283 = vmatprep.subr.bf16.mxu1 %v15081_v7 }
 0x3d7   : > { %v4230_v44 = vpack.c.bf16 %v13932_v38, %v13931_v15  ;;  %v3973_v30 = vpop.f32.mrb[75].mxu0  ;;  %v4509_v53 = vpop.f32.mrb[5].mxu1  ;;  %14284 = vmatpush3.bf16.msra.mxu1 %v15081_v7 }
 0x3d8   : > { %v4229_v50 = vpack.c.bf16 %v3973_v30, %v3970_v52  ;;  %v14008_v5 = vpop.f32.mrb[6].mxu1  ;;  %14145 = vmatprep.mubr.bf16.mxu0 %v5141_v49 }
 0x3d9   : > { %v4303_v47 = vadd.bf16 %v17941_v37, %v4230_v44  ;;  %v5007_v46 = vpack.c.bf16 %v14008_v5, %v14007_v12  ;;  %v4512_v27 = vpop.f32.mrb[7].mxu1  ;;  %14146 = vmatmul.mubr.bf16.vlgmr.msra.gmra.mrb[128].mxu0 %v5142_v48 }
 0x3da   : > { %v4302_v62 = vadd.bf16 %v17941_v37, %v4229_v50  ;;  %v5006_v36 = vpack.c.bf16 %v4512_v27, %v4509_v53 }
 0x3db   : > { %v5080_v41 = vadd.bf16 %v18100_v22, %v5007_v46  ;;  %v4367_v52 = vmax.bf16 %v21327_v32, %v4303_v47 }
 0x3dc   : > { %v5079_v45 = vadd.bf16 %v18100_v22, %v5006_v36  ;;  %v4366_v15 = vmax.bf16 %v21327_v32, %v4302_v62 }
 0x3dd   : > { %v5144_v49 = vmax.bf16 %v21327_v32, %v5080_v41 }
 0x3de   : > { %v14011_v38 = vpop.f32.mrb[8].mxu1  ;;  %14073 = vmatprep.mubr.bf16.mxu1 %v4366_v15  ;;  %v5143_v12 = vmax.bf16 %v21327_v32, %v5079_v45 }
 0x3df   : > { %v4525_v48 = vpop.f32.mrb[9].mxu1  ;;  %14074 = vmatmul.mubr.bf16.gmra.mrb[72].mxu1 %v4367_v52 }
 0x3e0   : > { %v14012_v44 = vpop.f32.mrb[10].mxu1  ;;  %14149 = vmatprep.mubr.bf16.mxu0 %v5143_v12 }
 0x3e1   : > { %v5009_v30 = vpack.c.bf16 %v14012_v44, %v14011_v38  ;;  %v4528_v53 = vpop.f32.mrb[11].mxu1  ;;  %14150 = vmatmul.mubr.bf16.gmra.mrb[132].mxu0 %v5144_v49 }
 0x3e2   : > { %v5008_v50 = vpack.c.bf16 %v4528_v53, %v4525_v48 }
 0x3e3   : > { %v5082_v5 = vadd.bf16 %v18100_v22, %v5009_v30 }
 0x3e4   : > { %v5081_v47 = vadd.bf16 %v18100_v22, %v5008_v50  ;;  %v13935_v46 = vpop.f32.mrb[76].mxu0 }
 0x3e5   : > { %v3986_v27 = vpop.f32.mrb[77].mxu0  ;;  %v5146_v41 = vmax.bf16 %v21327_v32, %v5082_v5 }
 0x3e6   : > { %v13936_v62 = vpop.f32.mrb[78].mxu0  ;;  %v14015_v36 = vpop.f32.mrb[12].mxu1  ;;  %v5145_v7 = vmax.bf16 %v21327_v32, %v5081_v47 }
 0x3e7   : > { %v4232_v45 = vpack.c.bf16 %v13936_v62, %v13935_v46  ;;  %v3989_v15 = vpop.f32.mrb[79].mxu0  ;;  %v4541_v52 = vpop.f32.mrb[13].mxu1 }
 0x3e8   : > { %v4231_v12 = vpack.c.bf16 %v3989_v15, %v3986_v27  ;;  %v14016_v38 = vpop.f32.mrb[14].mxu1  ;;  %14153 = vmatprep.mubr.bf16.mxu0 %v5145_v7 }
 0x3e9   : > { %v4305_v49 = vadd.bf16 %v17941_v37, %v4232_v45  ;;  %v5011_v48 = vpack.c.bf16 %v14016_v38, %v14015_v36  ;;  %v4544_v44 = vpop.f32.mrb[15].mxu1  ;;  %14154 = vmatmul.mubr.bf16.gmra.mrb[136].mxu0 %v5146_v41 }
 0x3ea   : > { %v4304_v30 = vadd.bf16 %v17941_v37, %v4231_v12  ;;  %v5010_v53 = vpack.c.bf16 %v4544_v44, %v4541_v52 }
 0x3eb   : > { %v5084_v50 = vadd.bf16 %v18100_v22, %v5011_v48  ;;  %v4369_v46 = vmax.bf16 %v21327_v32, %v4305_v49 }
 0x3ec   : > { %v5083_v47 = vadd.bf16 %v18100_v22, %v5010_v53  ;;  %v4368_v5 = vmax.bf16 %v21327_v32, %v4304_v30 }
 0x3ed   : > { %v5148_v7 = vmax.bf16 %v21327_v32, %v5084_v50 }
 0x3ee   : > { %v14019_v62 = vpop.f32.mrb[16].mxu1  ;;  %14077 = vmatprep.mubr.bf16.mxu1 %v4368_v5  ;;  %v5147_v27 = vmax.bf16 %v21327_v32, %v5083_v47 }
 0x3ef   : > { %v4557_v36 = vpop.f32.mrb[17].mxu1  ;;  %14078 = vmatmul.mubr.bf16.gmra.mrb[76].mxu1 %v4369_v46 }
 0x3f0   : > { %v14020_v41 = vpop.f32.mrb[18].mxu1  ;;  %14157 = vmatprep.mubr.bf16.mxu0 %v5147_v27 }
 0x3f1   : > { %v5013_v45 = vpack.c.bf16 %v14020_v41, %v14019_v62  ;;  %v4560_v15 = vpop.f32.mrb[19].mxu1  ;;  %14158 = vmatmul.mubr.bf16.gmra.mrb[140].mxu0 %v5148_v7 }
 0x3f2   : > { %v5012_v52 = vpack.c.bf16 %v4560_v15, %v4557_v36 }
 0x3f3   : > { %v5086_v12 = vadd.bf16 %v18100_v22, %v5013_v45 }
 0x3f4   : > { %v5085_v38 = vadd.bf16 %v18100_v22, %v5012_v52  ;;  %v13939_v48 = vpop.f32.mrb[80].mxu0 }
 0x3f5   : > { %v4002_v49 = vpop.f32.mrb[81].mxu0  ;;  %v5150_v50 = vmax.bf16 %v21327_v32, %v5086_v12  ;;  %v15082_v12 = vld [vmem:[%s21047_s3 + $0x130] sm:$0xff]  }
 0x3f6   : > { %v13940_v44 = vpop.f32.mrb[82].mxu0  ;;  %v14023_v30 = vpop.f32.mrb[20].mxu1  ;;  %v5149_v53 = vmax.bf16 %v21327_v32, %v5085_v38  ;;  %14285 = vmatprep.subr.bf16.mxu1 %v15082_v12 }
 0x3f7   : > { %v4234_v47 = vpack.c.bf16 %v13940_v44, %v13939_v48  ;;  %v4005_v5 = vpop.f32.mrb[83].mxu0  ;;  %v4573_v46 = vpop.f32.mrb[21].mxu1  ;;  %14286 = vmatpush3.bf16.msra.mxu1 %v15082_v12 }
 0x3f8   : > { %v4233_v27 = vpack.c.bf16 %v4005_v5, %v4002_v49  ;;  %v14024_v62 = vpop.f32.mrb[22].mxu1  ;;  %14161 = vmatprep.mubr.bf16.mxu0 %v5149_v53 }
 0x3f9   : > { %v4307_v7 = vadd.bf16 %v17941_v37, %v4234_v47  ;;  %v5015_v36 = vpack.c.bf16 %v14024_v62, %v14023_v30  ;;  %v4576_v41 = vpop.f32.mrb[23].mxu1  ;;  %14162 = vmatmul.mubr.bf16.gmra.mrb[144].mxu0 %v5150_v50 }
 0x3fa   : > { %v4306_v45 = vadd.bf16 %v17941_v37, %v4233_v27  ;;  %v5014_v15 = vpack.c.bf16 %v4576_v41, %v4573_v46 }
 0x3fb   : > { %v5088_v52 = vadd.bf16 %v18100_v22, %v5015_v36  ;;  %v4371_v49 = vmax.bf16 %v21327_v32, %v4307_v7 }
 0x3fc   : > { %v5087_v38 = vadd.bf16 %v18100_v22, %v5014_v15  ;;  %v4370_v48 = vmax.bf16 %v21327_v32, %v4306_v45 }
 0x3fd   : > { %v5152_v53 = vmax.bf16 %v21327_v32, %v5088_v52 }
 0x3fe   : > { %v14027_v44 = vpop.f32.mrb[24].mxu1  ;;  %14081 = vmatprep.mubr.bf16.mxu1 %v4370_v48  ;;  %v5151_v30 = vmax.bf16 %v21327_v32, %v5087_v38 }
 0x3ff   : > { %v4589_v50 = vpop.f32.mrb[25].mxu1  ;;  %14082 = vmatmul.mubr.bf16.gmra.mrb[80].mxu1 %v4371_v49 }
 0x400   : > { %v14028_v47 = vpop.f32.mrb[26].mxu1  ;;  %14165 = vmatprep.mubr.bf16.mxu0 %v5151_v30 }
 0x401   : > { %v5017_v5 = vpack.c.bf16 %v14028_v47, %v14027_v44  ;;  %v4592_v46 = vpop.f32.mrb[27].mxu1  ;;  %14166 = vmatmul.mubr.bf16.gmra.mrb[148].mxu0 %v5152_v53 }
 0x402   : > { %v5016_v27 = vpack.c.bf16 %v4592_v46, %v4589_v50 }
 0x403   : > { %v5090_v62 = vadd.bf16 %v18100_v22, %v5017_v5 }
 0x404   : > { %v5089_v7 = vadd.bf16 %v18100_v22, %v5016_v27  ;;  %v13943_v36 = vpop.f32.mrb[84].mxu0 }
 0x405   : > { %v4018_v41 = vpop.f32.mrb[85].mxu0  ;;  %v5154_v52 = vmax.bf16 %v21327_v32, %v5090_v62 }
 0x406   : > { %v13944_v45 = vpop.f32.mrb[86].mxu0  ;;  %v14031_v15 = vpop.f32.mrb[28].mxu1  ;;  %v5153_v12 = vmax.bf16 %v21327_v32, %v5089_v7 }
 0x407   : > { %v4236_v38 = vpack.c.bf16 %v13944_v45, %v13943_v36  ;;  %v4021_v48 = vpop.f32.mrb[87].mxu0  ;;  %v4605_v49 = vpop.f32.mrb[29].mxu1 }
 0x408   : > { %v4235_v30 = vpack.c.bf16 %v4021_v48, %v4018_v41  ;;  %v14032_v44 = vpop.f32.mrb[30].mxu1  ;;  %14169 = vmatprep.mubr.bf16.mxu0 %v5153_v12 }
 0x409   : > { %v4309_v53 = vadd.bf16 %v17941_v37, %v4236_v38  ;;  %v5019_v50 = vpack.c.bf16 %v14032_v44, %v14031_v15  ;;  %v4608_v47 = vpop.f32.mrb[31].mxu1  ;;  %14170 = vmatmul.mubr.bf16.gmra.mrb[152].mxu0 %v5154_v52 }
 0x40a   : > { %v4308_v5 = vadd.bf16 %v17941_v37, %v4235_v30  ;;  %v5018_v46 = vpack.c.bf16 %v4608_v47, %v4605_v49 }
 0x40b   : > { %v5092_v27 = vadd.bf16 %v18100_v22, %v5019_v50  ;;  %v4373_v36 = vmax.bf16 %v21327_v32, %v4309_v53 }
 0x40c   : > { %v5091_v7 = vadd.bf16 %v18100_v22, %v5018_v46  ;;  %v4372_v62 = vmax.bf16 %v21327_v32, %v4308_v5 }
 0x40d   : > { %v5156_v45 = vmax.bf16 %v21327_v32, %v5092_v27 }
 0x40e   : > { %14085 = vmatprep.mubr.bf16.mxu1 %v4372_v62  ;;  %v5155_v41 = vmax.bf16 %v21327_v32, %v5091_v7 }
 0x40f   : > { %14086 = vmatmul.mubr.bf16.gmra.mrb[84].mxu1 %v4373_v36 }
 0x410   : > { %14173 = vmatprep.mubr.bf16.mxu0 %v5155_v41 }
 0x411   : > { %14174 = vmatmul.mubr.bf16.gmra.mrb[156].mxu0 %v5156_v45  ;;  %v15083_v45 = vld [vmem:[%s21047_s3 + $0x140] sm:$0xff]  }
 0x412   : > { %v14035_v15 = vpop.f32.mrb[32].mxu1  ;;  %14417 = vmatprep.subr.bf16.mxu0 %v15083_v45 }
 0x413   : > { %v4621_v12 = vpop.f32.mrb[33].mxu1  ;;  %14418 = vmatpush3.bf16.msra.mxu0 %v15083_v45 }
 0x414   : > { %v13947_v52 = vpop.f32.mrb[88].mxu0  ;;  %v14036_v38 = vpop.f32.mrb[34].mxu1 }
 0x415   : > { %v5021_v48 = vpack.c.bf16 %v14036_v38, %v14035_v15  ;;  %v4034_v49 = vpop.f32.mrb[89].mxu0  ;;  %v4624_v30 = vpop.f32.mrb[35].mxu1  ;;  %v15084_v15 = vld [vmem:[%s21047_s3 + $0x138] sm:$0xff]  }
 0x416   : > { %v5020_v44 = vpack.c.bf16 %v4624_v30, %v4621_v12  ;;  %v13948_v50 = vpop.f32.mrb[90].mxu0  ;;  %14287 = vmatprep.subr.bf16.mxu1 %v15084_v15 }
 0x417   : > { %v5094_v47 = vadd.bf16 %v18100_v22, %v5021_v48  ;;  %v4238_v53 = vpack.c.bf16 %v13948_v50, %v13947_v52  ;;  %v4037_v5 = vpop.f32.mrb[91].mxu0  ;;  %14288 = vmatpush3.bf16.msra.mxu1 %v15084_v15 }
 0x418   : > { %v5093_v46 = vadd.bf16 %v18100_v22, %v5020_v44  ;;  %v4237_v7 = vpack.c.bf16 %v4037_v5, %v4034_v49 }
 0x419   : > { %v4311_v27 = vadd.bf16 %v17941_v37, %v4238_v53  ;;  %v5158_v41 = vmax.bf16 %v21327_v32, %v5094_v47 }
 0x41a   : > { %v4310_v62 = vadd.bf16 %v17941_v37, %v4237_v7  ;;  %v5157_v36 = vmax.bf16 %v21327_v32, %v5093_v46 }
 0x41b   : > { %v4375_v52 = vmax.bf16 %v21327_v32, %v4311_v27 }
 0x41c   : > { %14177 = vmatprep.mubr.bf16.mxu0 %v5157_v36  ;;  %v4374_v12 = vmax.bf16 %v21327_v32, %v4310_v62 }
 0x41d   : > { %14178 = vmatmul.mubr.bf16.gmra.mrb[160].mxu0 %v5158_v41 }
 0x41e   : > { %14089 = vmatprep.mubr.bf16.mxu1 %v4374_v12 }
 0x41f   : > { %14090 = vmatmul.mubr.bf16.gmra.mrb[88].mxu1 %v4375_v52 }
 0x422   : > { %v14039_v38 = vpop.f32.mrb[36].mxu1 }
 0x423   : > { %v4637_v48 = vpop.f32.mrb[37].mxu1 }
 0x424   : > { %v13951_v49 = vpop.f32.mrb[92].mxu0  ;;  %v14040_v30 = vpop.f32.mrb[38].mxu1 }
 0x425   : > { %v5023_v44 = vpack.c.bf16 %v14040_v30, %v14039_v38  ;;  %v4050_v50 = vpop.f32.mrb[93].mxu0  ;;  %v4640_v47 = vpop.f32.mrb[39].mxu1 }
 0x426   : > { %v5022_v53 = vpack.c.bf16 %v4640_v47, %v4637_v48  ;;  %v13952_v5 = vpop.f32.mrb[94].mxu0 }
 0x427   : > { %v5096_v46 = vadd.bf16 %v18100_v22, %v5023_v44  ;;  %v4240_v7 = vpack.c.bf16 %v13952_v5, %v13951_v49  ;;  %v4053_v27 = vpop.f32.mrb[95].mxu0 }
 0x428   : > { %v5095_v62 = vadd.bf16 %v18100_v22, %v5022_v53  ;;  %v4239_v36 = vpack.c.bf16 %v4053_v27, %v4050_v50 }
 0x429   : > { %v4313_v41 = vadd.bf16 %v17941_v37, %v4240_v7  ;;  %v5160_v12 = vmax.bf16 %v21327_v32, %v5096_v46 }
 0x42a   : > { %v4312_v45 = vadd.bf16 %v17941_v37, %v4239_v36  ;;  %v5159_v15 = vmax.bf16 %v21327_v32, %v5095_v62 }
 0x42b   : > { %v4377_v38 = vmax.bf16 %v21327_v32, %v4313_v41 }
 0x42c   : > { %14181 = vmatprep.mubr.bf16.mxu0 %v5159_v15  ;;  %v4376_v52 = vmax.bf16 %v21327_v32, %v4312_v45 }
 0x42d   : > { %14182 = vmatmul.mubr.bf16.gmra.mrb[164].mxu0 %v5160_v12 }
 0x42e   : > { %14093 = vmatprep.mubr.bf16.mxu1 %v4376_v52 }
 0x42f   : > { %14094 = vmatmul.mubr.bf16.gmra.mrb[92].mxu1 %v4377_v38 }
 0x432   : > { %v14043_v48 = vpop.f32.mrb[40].mxu1 }
 0x433   : > { %v4653_v49 = vpop.f32.mrb[41].mxu1 }
 0x434   : > { %v13955_v30 = vpop.f32.mrb[96].mxu0  ;;  %v14044_v44 = vpop.f32.mrb[42].mxu1 }
 0x435   : > { %v5025_v50 = vpack.c.bf16 %v14044_v44, %v14043_v48  ;;  %v4066_v47 = vpop.f32.mrb[97].mxu0  ;;  %v4656_v53 = vpop.f32.mrb[43].mxu1 }
 0x436   : > { %v5024_v5 = vpack.c.bf16 %v4656_v53, %v4653_v49  ;;  %v13956_v7 = vpop.f32.mrb[98].mxu0  ;;  %v15085_v49 = vld [vmem:[%s21047_s3 + $0x148] sm:$0xff]  }
 0x437   : > { %v5098_v27 = vadd.bf16 %v18100_v22, %v5025_v50  ;;  %v4242_v46 = vpack.c.bf16 %v13956_v7, %v13955_v30  ;;  %v4069_v62 = vpop.f32.mrb[99].mxu0  ;;  %14419 = vmatprep.subr.bf16.mxu0 %v15085_v49 }
 0x438   : > { %v5097_v36 = vadd.bf16 %v18100_v22, %v5024_v5  ;;  %v4241_v45 = vpack.c.bf16 %v4069_v62, %v4066_v47  ;;  %14420 = vmatpush3.bf16.msra.mxu0 %v15085_v49 }
 0x439   : > { %v4315_v41 = vadd.bf16 %v17941_v37, %v4242_v46  ;;  %v5162_v52 = vmax.bf16 %v21327_v32, %v5098_v27 }
 0x43a   : > { %v4314_v15 = vadd.bf16 %v17941_v37, %v4241_v45  ;;  %v5161_v12 = vmax.bf16 %v21327_v32, %v5097_v36 }
 0x43b   : > { %v4379_v48 = vmax.bf16 %v21327_v32, %v4315_v41 }
 0x43c   : > { %14185 = vmatprep.mubr.bf16.mxu0 %v5161_v12  ;;  %v4378_v38 = vmax.bf16 %v21327_v32, %v4314_v15 }
 0x43d   : > { %14186 = vmatmul.mubr.bf16.gmra.mrb[168].mxu0 %v5162_v52 }
 0x43e   : > { %14097 = vmatprep.mubr.bf16.mxu1 %v4378_v38 }
 0x43f   : > { %14098 = vmatmul.mubr.bf16.gmra.mrb[96].mxu1 %v4379_v48 }
 0x442   : > { %v14047_v30 = vpop.f32.mrb[44].mxu1 }
 0x443   : > { %v4669_v44 = vpop.f32.mrb[45].mxu1 }
 0x444   : > { %v13959_v50 = vpop.f32.mrb[100].mxu0  ;;  %v14048_v47 = vpop.f32.mrb[46].mxu1 }
 0x445   : > { %v5027_v53 = vpack.c.bf16 %v14048_v47, %v14047_v30  ;;  %v4082_v5 = vpop.f32.mrb[101].mxu0  ;;  %v4672_v7 = vpop.f32.mrb[47].mxu1 }
 0x446   : > { %v5026_v27 = vpack.c.bf16 %v4672_v7, %v4669_v44  ;;  %v13960_v46 = vpop.f32.mrb[102].mxu0 }
 0x447   : > { %v5100_v62 = vadd.bf16 %v18100_v22, %v5027_v53  ;;  %v4244_v36 = vpack.c.bf16 %v13960_v46, %v13959_v50  ;;  %v4085_v45 = vpop.f32.mrb[103].mxu0 }
 0x448   : > { %v5099_v41 = vadd.bf16 %v18100_v22, %v5026_v27  ;;  %v4243_v15 = vpack.c.bf16 %v4085_v45, %v4082_v5 }
 0x449   : > { %v4317_v12 = vadd.bf16 %v17941_v37, %v4244_v36  ;;  %v5164_v48 = vmax.bf16 %v21327_v32, %v5100_v62 }
 0x44a   : > { %v4316_v52 = vadd.bf16 %v17941_v37, %v4243_v15  ;;  %v5163_v38 = vmax.bf16 %v21327_v32, %v5099_v41 }
 0x44b   : > { %v4381_v30 = vmax.bf16 %v21327_v32, %v4317_v12 }
 0x44c   : > { %14189 = vmatprep.mubr.bf16.mxu0 %v5163_v38  ;;  %v4380_v49 = vmax.bf16 %v21327_v32, %v4316_v52 }
 0x44d   : > { %14190 = vmatmul.mubr.bf16.gmra.mrb[172].mxu0 %v5164_v48 }
 0x44e   : > { %14101 = vmatprep.mubr.bf16.mxu1 %v4380_v49 }
 0x44f   : > { %14102 = vmatmul.mubr.bf16.gmra.mrb[100].mxu1 %v4381_v30 }
 0x452   : > { %v14051_v44 = vpop.f32.mrb[48].mxu1 }
 0x453   : > { %v4685_v50 = vpop.f32.mrb[49].mxu1 }
 0x454   : > { %v13963_v47 = vpop.f32.mrb[104].mxu0  ;;  %v14052_v53 = vpop.f32.mrb[50].mxu1 }
 0x455   : > { %v5029_v5 = vpack.c.bf16 %v14052_v53, %v14051_v44  ;;  %v4098_v7 = vpop.f32.mrb[105].mxu0  ;;  %v4688_v27 = vpop.f32.mrb[51].mxu1 }
 0x456   : > { %v5028_v46 = vpack.c.bf16 %v4688_v27, %v4685_v50  ;;  %v13964_v36 = vpop.f32.mrb[106].mxu0  ;;  %v15086_v50 = vld [vmem:[%s21047_s3 + $0x150] sm:$0xff]  }
 0x457   : > { %v5102_v45 = vadd.bf16 %v18100_v22, %v5029_v5  ;;  %v4246_v62 = vpack.c.bf16 %v13964_v36, %v13963_v47  ;;  %v4101_v41 = vpop.f32.mrb[107].mxu0  ;;  %14421 = vmatprep.subr.bf16.mxu0 %v15086_v50 }
 0x458   : > { %v5101_v15 = vadd.bf16 %v18100_v22, %v5028_v46  ;;  %v4245_v52 = vpack.c.bf16 %v4101_v41, %v4098_v7  ;;  %14422 = vmatpush3.bf16.msra.mxu0 %v15086_v50 }
 0x459   : > { %v4319_v12 = vadd.bf16 %v17941_v37, %v4246_v62  ;;  %v5166_v49 = vmax.bf16 %v21327_v32, %v5102_v45 }
 0x45a   : > { %v4318_v38 = vadd.bf16 %v17941_v37, %v4245_v52  ;;  %v5165_v48 = vmax.bf16 %v21327_v32, %v5101_v15 }
 0x45b   : > { %v4383_v44 = vmax.bf16 %v21327_v32, %v4319_v12 }
 0x45c   : > { %14193 = vmatprep.mubr.bf16.mxu0 %v5165_v48  ;;  %v4382_v30 = vmax.bf16 %v21327_v32, %v4318_v38 }
 0x45d   : > { %14194 = vmatmul.mubr.bf16.gmra.mrb[176].mxu0 %v5166_v49 }
 0x45e   : > { %14105 = vmatprep.mubr.bf16.mxu1 %v4382_v30 }
 0x45f   : > { %14106 = vmatmul.mubr.bf16.gmra.mrb[104].mxu1 %v4383_v44 }
 0x462   : > { %v14055_v47 = vpop.f32.mrb[52].mxu1 }
 0x463   : > { %v4701_v53 = vpop.f32.mrb[53].mxu1 }
 0x464   : > { %v13967_v5 = vpop.f32.mrb[108].mxu0  ;;  %v14056_v7 = vpop.f32.mrb[54].mxu1 }
 0x465   : > { %v5031_v27 = vpack.c.bf16 %v14056_v7, %v14055_v47  ;;  %v4114_v46 = vpop.f32.mrb[109].mxu0  ;;  %v4704_v36 = vpop.f32.mrb[55].mxu1 }
 0x466   : > { %v5030_v45 = vpack.c.bf16 %v4704_v36, %v4701_v53  ;;  %v13968_v62 = vpop.f32.mrb[110].mxu0 }
 0x467   : > { %v5104_v41 = vadd.bf16 %v18100_v22, %v5031_v27  ;;  %v4248_v15 = vpack.c.bf16 %v13968_v62, %v13967_v5  ;;  %v4117_v52 = vpop.f32.mrb[111].mxu0 }
 0x468   : > { %v5103_v12 = vadd.bf16 %v18100_v22, %v5030_v45  ;;  %v4247_v38 = vpack.c.bf16 %v4117_v52, %v4114_v46 }
 0x469   : > { %v4321_v48 = vadd.bf16 %v17941_v37, %v4248_v15  ;;  %v5168_v44 = vmax.bf16 %v21327_v32, %v5104_v41 }
 0x46a   : > { %v4320_v49 = vadd.bf16 %v17941_v37, %v4247_v38  ;;  %v5167_v30 = vmax.bf16 %v21327_v32, %v5103_v12 }
 0x46b   : > { %v4385_v47 = vmax.bf16 %v21327_v32, %v4321_v48 }
 0x46c   : > { %14197 = vmatprep.mubr.bf16.mxu0 %v5167_v30  ;;  %v4384_v50 = vmax.bf16 %v21327_v32, %v4320_v49  ;;  %v15087_v30 = vld [vmem:[%s21047_s3 + $0x158] sm:$0xff]  }
 0x46d   : > { %14198 = vmatmul.mubr.bf16.gmra.mrb[180].mxu0 %v5168_v44  ;;  %14423 = vmatprep.subr.bf16.mxu0 %v15087_v30 }
 0x46e   : > { %14109 = vmatprep.mubr.bf16.mxu1 %v4384_v50  ;;  %14424 = vmatpush3.bf16.msra.mxu0 %v15087_v30 }
 0x46f   : > { %14110 = vmatmul.mubr.bf16.gmra.mrb[108].mxu1 %v4385_v47 }
 0x472   : > { %v14059_v53 = vpop.f32.mrb[56].mxu1 }
 0x473   : > { %v4717_v5 = vpop.f32.mrb[57].mxu1 }
 0x474   : > { %v13971_v7 = vpop.f32.mrb[112].mxu0  ;;  %v14060_v27 = vpop.f32.mrb[58].mxu1 }
 0x475   : > { %v5033_v46 = vpack.c.bf16 %v14060_v27, %v14059_v53  ;;  %v4130_v36 = vpop.f32.mrb[113].mxu0  ;;  %v4720_v45 = vpop.f32.mrb[59].mxu1 }
 0x476   : > { %v5032_v62 = vpack.c.bf16 %v4720_v45, %v4717_v5  ;;  %v13972_v15 = vpop.f32.mrb[114].mxu0 }
 0x477   : > { %v5106_v52 = vadd.bf16 %v18100_v22, %v5033_v46  ;;  %v4250_v41 = vpack.c.bf16 %v13972_v15, %v13971_v7  ;;  %v4133_v12 = vpop.f32.mrb[115].mxu0 }
 0x478   : > { %v5105_v38 = vadd.bf16 %v18100_v22, %v5032_v62  ;;  %v4249_v49 = vpack.c.bf16 %v4133_v12, %v4130_v36 }
 0x479   : > { %v4323_v48 = vadd.bf16 %v17941_v37, %v4250_v41  ;;  %v5170_v47 = vmax.bf16 %v21327_v32, %v5106_v52 }
 0x47a   : > { %v4322_v44 = vadd.bf16 %v17941_v37, %v4249_v49  ;;  %v5169_v50 = vmax.bf16 %v21327_v32, %v5105_v38 }
 0x47b   : > { %v4387_v5 = vmax.bf16 %v21327_v32, %v4323_v48 }
 0x47c   : > { %14201 = vmatprep.mubr.bf16.mxu0 %v5169_v50  ;;  %v4386_v53 = vmax.bf16 %v21327_v32, %v4322_v44 }
 0x47d   : > { %14202 = vmatmul.mubr.bf16.gmra.mrb[184].mxu0 %v5170_v47 }
 0x47e   : > { %14113 = vmatprep.mubr.bf16.mxu1 %v4386_v53 }
 0x47f   : > { %14114 = vmatmul.mubr.bf16.gmra.mrb[112].mxu1 %v4387_v5 }
 0x482   : > { %v14063_v7 = vpop.f32.mrb[60].mxu1 }
 0x483   : > { %v4733_v27 = vpop.f32.mrb[61].mxu1 }
 0x484   : > { %v13975_v46 = vpop.f32.mrb[116].mxu0  ;;  %v14064_v36 = vpop.f32.mrb[62].mxu1 }
 0x485   : > { %v5035_v45 = vpack.c.bf16 %v14064_v36, %v14063_v7  ;;  %v4146_v62 = vpop.f32.mrb[117].mxu0  ;;  %v4736_v15 = vpop.f32.mrb[63].mxu1 }
 0x486   : > { %v5034_v41 = vpack.c.bf16 %v4736_v15, %v4733_v27  ;;  %v13976_v12 = vpop.f32.mrb[118].mxu0 }
 0x487   : > { %v5108_v52 = vadd.bf16 %v18100_v22, %v5035_v45  ;;  %v4252_v38 = vpack.c.bf16 %v13976_v12, %v13975_v46  ;;  %v4149_v49 = vpop.f32.mrb[119].mxu0 }
 0x488   : > { %v5107_v30 = vadd.bf16 %v18100_v22, %v5034_v41  ;;  %v4251_v44 = vpack.c.bf16 %v4149_v49, %v4146_v62 }
 0x489   : > { %v4325_v48 = vadd.bf16 %v17941_v37, %v4252_v38  ;;  %v5172_v53 = vmax.bf16 %v21327_v32, %v5108_v52 }
 0x48a   : > { %v4324_v50 = vadd.bf16 %v17941_v37, %v4251_v44  ;;  %v5171_v47 = vmax.bf16 %v21327_v32, %v5107_v30 }
 0x48b   : > { %v4389_v7 = vmax.bf16 %v21327_v32, %v4325_v48 }
 0x48c   : > { %14205 = vmatprep.mubr.bf16.mxu0 %v5171_v47  ;;  %v4388_v5 = vmax.bf16 %v21327_v32, %v4324_v50  ;;  %v15088_v47 = vld [vmem:[%s21047_s3 + $0x160] sm:$0xff]  }
 0x48d   : > { %14206 = vmatmul.mubr.bf16.gmra.mrb[188].mxu0 %v5172_v53  ;;  %14425 = vmatprep.subr.bf16.mxu0 %v15088_v47 }
 0x48e   : > { %14117 = vmatprep.mubr.bf16.mxu1 %v4388_v5  ;;  %14426 = vmatpush3.bf16.msra.mxu0 %v15088_v47 }
 0x48f   : > { %14118 = vmatmul.mubr.bf16.gmra.mrb[116].mxu1 %v4389_v7 }
 0x492   : > { %v14067_v27 = vpop.f32.mrb[64].mxu1 }
 0x493   : > { %v4749_v46 = vpop.f32.mrb[65].mxu1 }
 0x494   : > { %v13979_v36 = vpop.f32.mrb[120].mxu0  ;;  %v14068_v45 = vpop.f32.mrb[66].mxu1 }
 0x495   : > { %v5037_v62 = vpack.c.bf16 %v14068_v45, %v14067_v27  ;;  %v4162_v15 = vpop.f32.mrb[121].mxu0  ;;  %v4752_v41 = vpop.f32.mrb[67].mxu1 }
 0x496   : > { %v5036_v12 = vpack.c.bf16 %v4752_v41, %v4749_v46  ;;  %v13980_v38 = vpop.f32.mrb[122].mxu0 }
 0x497   : > { %v5110_v49 = vadd.bf16 %v18100_v22, %v5037_v62  ;;  %v4254_v52 = vpack.c.bf16 %v13980_v38, %v13979_v36  ;;  %v4165_v30 = vpop.f32.mrb[123].mxu0 }
 0x498   : > { %v5109_v44 = vadd.bf16 %v18100_v22, %v5036_v12  ;;  %v4253_v50 = vpack.c.bf16 %v4165_v30, %v4162_v15 }
 0x499   : > { %v4327_v48 = vadd.bf16 %v17941_v37, %v4254_v52  ;;  %v5174_v7 = vmax.bf16 %v21327_v32, %v5110_v49  ;;  %v12480_v49 = vld [vmem:[%s21048_s4 + $0x3] sm:$0x1] }
 0x49a   : > { %v4326_v53 = vadd.bf16 %v17941_v37, %v4253_v50  ;;  %v5173_v5 = vmax.bf16 %v21327_v32, %v5109_v44 }
 0x49b   : > { %v4391_v46 = vmax.bf16 %v21327_v32, %v4327_v48 }
 0x49c   : > { %14209 = vmatprep.mubr.bf16.mxu0 %v5173_v5  ;;  %v4390_v27 = vmax.bf16 %v21327_v32, %v4326_v53 }
 0x49d   : > { %14210 = vmatmul.mubr.bf16.gmra.mrb[192].mxu0 %v5174_v7  ;;  %v5882_v7 = vpack.i.b16 %v12480_v49, %v12480_v49 }
 0x49e   : > { %14121 = vmatprep.mubr.bf16.mxu1 %v4390_v27 }
 0x49f   : > { %14122 = vmatmul.mubr.bf16.gmra.mrb[120].mxu1 %v4391_v46 }
 0x4a2   : > { %v14071_v36 = vpop.f32.mrb[68].mxu1 }
 0x4a3   : > { %v4765_v45 = vpop.f32.mrb[69].mxu1 }
 0x4a4   : > { %v13983_v62 = vpop.f32.mrb[124].mxu0  ;;  %v14072_v15 = vpop.f32.mrb[70].mxu1 }
 0x4a5   : > { %v5039_v41 = vpack.c.bf16 %v14072_v15, %v14071_v36  ;;  %v4178_v12 = vpop.f32.mrb[125].mxu0  ;;  %v4768_v38 = vpop.f32.mrb[71].mxu1 }
 0x4a6   : > { %v5038_v52 = vpack.c.bf16 %v4768_v38, %v4765_v45  ;;  %v13984_v30 = vpop.f32.mrb[126].mxu0  ;;  %v18258_v38 = vrot.slane %v5882_v7, %v16663_v60  ;;  %v21509_v7 = vpack.c.bf16 %v16548_v59, %v16529_v8  ;;  %v15089_v59 = vld [vmem:[%s21047_s3 + $0x168] sm:$0xff]  }
 0x4a7   : > { %v5112_v44 = vadd.bf16 %v18100_v22, %v5039_v41  ;;  %v4256_v50 = vpack.c.bf16 %v13984_v30, %v13983_v62  ;;  %v4181_v48 = vpop.f32.mrb[127].mxu0  ;;  %14427 = vmatprep.subr.bf16.mxu0 %v15089_v59 }
 0x4a8   : > { %v5111_v47 = vadd.bf16 %v18100_v22, %v5038_v52  ;;  %v4255_v53 = vpack.c.bf16 %v4181_v48, %v4178_v12  ;;  %v21508_v48 = vpack.c.bf16 %v16586_v0, %v16567_v2  ;;  %14428 = vmatpush3.bf16.msra.mxu0 %v15089_v59  ;;  %v21516_v59 = vpack.c.bf16 %v16744_v21, %v16730_v6 }
 0x4a9   : > { %v4329_v5 = vadd.bf16 %v17941_v37, %v4256_v50  ;;  %v5176_v36 = vmax.bf16 %v21327_v32, %v5112_v44 }
 0x4aa   : > { %v4328_v27 = vadd.bf16 %v17941_v37, %v4255_v53  ;;  %v5175_v46 = vmax.bf16 %v21327_v32, %v5111_v47 }
 0x4ab   : > { %v4393_v41 = vmax.bf16 %v21327_v32, %v4329_v5 }
 0x4ac   : > { %v14147_v45 = vpop.f32.mrb[128].mxu0  ;;  %14213 = vmatprep.mubr.bf16.mxu0 %v5175_v46  ;;  %v4392_v15 = vmax.bf16 %v21327_v32, %v4328_v27 }
 0x4ad   : > { %v5304_v62 = vpop.f32.mrb[129].mxu0  ;;  %14214 = vmatmul.mubr.bf16.gmra.mrb[196].mxu0 %v5176_v36 }
 0x4ae   : > { %14125 = vmatprep.mubr.bf16.mxu1 %v4392_v15  ;;  %v14148_v12 = vpop.f32.mrb[130].mxu0 }
 0x4af   : > { %v5816_v52 = vpack.c.bf16 %v14148_v12, %v14147_v45  ;;  %14126 = vmatmul.mubr.bf16.gmra.mrb[124].mxu1 %v4393_v41  ;;  %v5307_v37 = vpop.f32.mrb[131].mxu0 }
 0x4b0   : > { %v5815_v30 = vpack.c.bf16 %v5307_v37, %v5304_v62 }
 0x4b1   : > { %v5889_v49 = vadd.bf16 %v18258_v38, %v5816_v52 }
 0x4b2   : > { %v5888_v44 = vadd.bf16 %v18258_v38, %v5815_v30  ;;  %v14075_v50 = vpop.f32.mrb[72].mxu1 }
 0x4b3   : > { %v5953_v47 = vadd.bf16 %v5889_v49, %v21508_v48  ;;  %v4781_v53 = vpop.f32.mrb[73].mxu1 }
 0x4b4   : > { %v14076_v5 = vpop.f32.mrb[74].mxu1  ;;  %v14151_v27 = vpop.f32.mrb[132].mxu0  ;;  %v5952_v46 = vadd.bf16 %v5888_v44, %v21509_v7 }
 0x4b5   : > { %v5041_v36 = vpack.c.bf16 %v14076_v5, %v14075_v50  ;;  %v4784_v45 = vpop.f32.mrb[75].mxu1  ;;  %v5320_v15 = vpop.f32.mrb[133].mxu0  ;;  %v6017_v52 = vmax.bf16 %v21327_v32, %v5953_v47  ;;  %v21510_v47 = vld [vmem:[#allocation23_spill] sm:$0xff] }
 0x4b6   : > { %v5040_v41 = vpack.c.bf16 %v4784_v45, %v4781_v53  ;;  %v14152_v62 = vpop.f32.mrb[134].mxu0  ;;  %v6016_v12 = vmax.bf16 %v21327_v32, %v5952_v46  ;;  %v21511_v53 = vld [vmem:[#allocation20_spill] sm:$0xff]  ;;  %v21513_v46 = vld [vmem:[#allocation17_spill] sm:$0xff] }
 0x4b7   : > { %v5114_v37 = vadd.bf16 %v18100_v22, %v5041_v36  ;;  %v5818_v0 = vpack.c.bf16 %v14152_v62, %v14151_v27  ;;  %v5323_v2 = vpop.f32.mrb[135].mxu0  ;;  %v21512_v5 = vpack.c.bf16 %v21510_v47, %v21511_v53  ;;  %v21514_v36 = vld [vmem:[#allocation14_spill] sm:$0xff]  ;;  %v21517_v53 = vpack.c.bf16 %v16706_v23, %v16687_v11 }
 0x4b8   : > { %v5113_v30 = vadd.bf16 %v18100_v22, %v5040_v41  ;;  %v5817_v49 = vpack.c.bf16 %v5323_v2, %v5320_v15  ;;  %14289 = vmatprep.mubr.bf16.mxu1 %v6016_v12  ;;  %v21515_v45 = vpack.c.bf16 %v21513_v46, %v21514_v36 }
 0x4b9   : > { %v5891_v8 = vadd.bf16 %v18258_v38, %v5818_v0  ;;  %14290 = vmatmul.mubr.bf16.vlgmr.msra.gmra.mrb[128].mxu1 %v6017_v52  ;;  %v5178_v48 = vmax.bf16 %v21327_v32, %v5114_v37 }
 0x4ba   : > { %v5890_v44 = vadd.bf16 %v18258_v38, %v5817_v49  ;;  %v5177_v50 = vmax.bf16 %v21327_v32, %v5113_v30 }
 0x4bb   : > { %v5955_v27 = vadd.bf16 %v5891_v8, %v21512_v5 }
 0x4bc   : > { %v14155_v7 = vpop.f32.mrb[136].mxu0  ;;  %14217 = vmatprep.mubr.bf16.mxu0 %v5177_v50  ;;  %v5954_v15 = vadd.bf16 %v5890_v44, %v21515_v45 }
 0x4bd   : > { %v5336_v41 = vpop.f32.mrb[137].mxu0  ;;  %14218 = vmatmul.mubr.bf16.gmra.mrb[200].mxu0 %v5178_v48  ;;  %v6019_v52 = vmax.bf16 %v21327_v32, %v5955_v27 }
 0x4be   : > { %v14156_v62 = vpop.f32.mrb[138].mxu0  ;;  %v6018_v12 = vmax.bf16 %v21327_v32, %v5954_v15 }
 0x4bf   : > { %v5820_v37 = vpack.c.bf16 %v14156_v62, %v14155_v7  ;;  %v5339_v0 = vpop.f32.mrb[139].mxu0 }
 0x4c0   : > { %v5819_v2 = vpack.c.bf16 %v5339_v0, %v5336_v41  ;;  %14293 = vmatprep.mubr.bf16.mxu1 %v6018_v12 }
 0x4c1   : > { %v5893_v30 = vadd.bf16 %v18258_v38, %v5820_v37  ;;  %14294 = vmatmul.mubr.bf16.gmra.mrb[132].mxu1 %v6019_v52 }
 0x4c2   : > { %v5892_v49 = vadd.bf16 %v18258_v38, %v5819_v2  ;;  %v14079_v8 = vpop.f32.mrb[76].mxu1  ;;  %v21518_v2 = vpack.c.bf16 %v16806_v10, %v16794_v58 }
 0x4c3   : > { %v5957_v44 = vadd.bf16 %v5893_v30, %v21516_v59  ;;  %v4797_v50 = vpop.f32.mrb[77].mxu1 }
 0x4c4   : > { %v14080_v48 = vpop.f32.mrb[78].mxu1  ;;  %v14159_v47 = vpop.f32.mrb[140].mxu0  ;;  %v5956_v5 = vadd.bf16 %v5892_v49, %v21517_v53 }
 0x4c5   : > { %v5043_v27 = vpack.c.bf16 %v14080_v48, %v14079_v8  ;;  %v4800_v7 = vpop.f32.mrb[79].mxu1  ;;  %v5352_v46 = vpop.f32.mrb[141].mxu0  ;;  %v6021_v41 = vmax.bf16 %v21327_v32, %v5957_v44  ;;  %v21519_v8 = vpack.c.bf16 %v16778_v19, %v16766_v3  ;;  %v21520_v3 = vpack.c.bf16 %v16859_v25, %v16847_v17 }
 0x4c6   : > { %v5042_v36 = vpack.c.bf16 %v4800_v7, %v4797_v50  ;;  %v14160_v45 = vpop.f32.mrb[142].mxu0  ;;  %v6020_v15 = vmax.bf16 %v21327_v32, %v5956_v5 }
 0x4c7   : > { %v5116_v62 = vadd.bf16 %v18100_v22, %v5043_v27  ;;  %v5822_v6 = vpack.c.bf16 %v14160_v45, %v14159_v47  ;;  %v5355_v21 = vpop.f32.mrb[143].mxu0 }
 0x4c8   : > { %v5115_v12 = vadd.bf16 %v18100_v22, %v5042_v36  ;;  %v5821_v52 = vpack.c.bf16 %v5355_v21, %v5352_v46  ;;  %14297 = vmatprep.mubr.bf16.mxu1 %v6020_v15  ;;  %v21521_v15 = vpack.c.bf16 %v16833_v57, %v16821_v28  ;;  %v15090_v57 = vld [vmem:[%s21047_s3 + $0x170] sm:$0xff]  }
 0x4c9   : > { %v5895_v11 = vadd.bf16 %v18258_v38, %v5822_v6  ;;  %14298 = vmatmul.mubr.bf16.gmra.mrb[136].mxu1 %v6021_v41  ;;  %v5180_v0 = vmax.bf16 %v21327_v32, %v5116_v62  ;;  %14429 = vmatprep.subr.bf16.mxu0 %v15090_v57 }
 0x4ca   : > { %v5894_v23 = vadd.bf16 %v18258_v38, %v5821_v52  ;;  %v5179_v37 = vmax.bf16 %v21327_v32, %v5115_v12  ;;  %14430 = vmatpush3.bf16.msra.mxu0 %v15090_v57 }
 0x4cb   : > { %v5959_v30 = vadd.bf16 %v5895_v11, %v21518_v2 }
 0x4cc   : > { %v14163_v49 = vpop.f32.mrb[144].mxu0  ;;  %14221 = vmatprep.mubr.bf16.mxu0 %v5179_v37  ;;  %v5958_v59 = vadd.bf16 %v5894_v23, %v21519_v8 }
 0x4cd   : > { %v5368_v44 = vpop.f32.mrb[145].mxu0  ;;  %14222 = vmatmul.mubr.bf16.gmra.mrb[204].mxu0 %v5180_v0  ;;  %v6023_v47 = vmax.bf16 %v21327_v32, %v5959_v30 }
 0x4ce   : > { %v14164_v50 = vpop.f32.mrb[146].mxu0  ;;  %v6022_v48 = vmax.bf16 %v21327_v32, %v5958_v59  ;;  %v21522_v59 = vpack.c.bf16 %v16911_v31, %v16899_v29 }
 0x4cf   : > { %v5824_v53 = vpack.c.bf16 %v14164_v50, %v14163_v49  ;;  %v5371_v5 = vpop.f32.mrb[147].mxu0 }
 0x4d0   : > { %v5823_v27 = vpack.c.bf16 %v5371_v5, %v5368_v44  ;;  %14301 = vmatprep.mubr.bf16.mxu1 %v6022_v48  ;;  %v21523_v48 = vpack.c.bf16 %v16885_v9, %v16873_v14  ;;  %v21524_v9 = vpack.c.bf16 %v16963_v35, %v16951_v20 }
 0x4d1   : > { %v5897_v10 = vadd.bf16 %v18258_v38, %v5824_v53  ;;  %14302 = vmatmul.mubr.bf16.gmra.mrb[140].mxu1 %v6023_v47 }
 0x4d2   : > { %v5896_v58 = vadd.bf16 %v18258_v38, %v5823_v27  ;;  %v14083_v7 = vpop.f32.mrb[80].mxu1 }
 0x4d3   : > { %v5961_v19 = vadd.bf16 %v5897_v10, %v21520_v3  ;;  %v4813_v46 = vpop.f32.mrb[81].mxu1 }
 0x4d4   : > { %v14084_v36 = vpop.f32.mrb[82].mxu1  ;;  %v14167_v45 = vpop.f32.mrb[148].mxu0  ;;  %v5960_v41 = vadd.bf16 %v5896_v58, %v21521_v15  ;;  %v21525_v15 = vpack.c.bf16 %v16937_v33, %v16925_v24 }
 0x4d5   : > { %v5045_v62 = vpack.c.bf16 %v14084_v36, %v14083_v7  ;;  %v4816_v6 = vpop.f32.mrb[83].mxu1  ;;  %v5384_v21 = vpop.f32.mrb[149].mxu0  ;;  %v6025_v23 = vmax.bf16 %v21327_v32, %v5961_v19 }
 0x4d6   : > { %v5044_v12 = vpack.c.bf16 %v4816_v6, %v4813_v46  ;;  %v14168_v52 = vpop.f32.mrb[150].mxu0  ;;  %v6024_v11 = vmax.bf16 %v21327_v32, %v5960_v41 }
 0x4d7   : > { %v5118_v37 = vadd.bf16 %v18100_v22, %v5045_v62  ;;  %v5826_v25 = vpack.c.bf16 %v14168_v52, %v14167_v45  ;;  %v5387_v17 = vpop.f32.mrb[151].mxu0 }
 0x4d8   : > { %v5117_v0 = vadd.bf16 %v18100_v22, %v5044_v12  ;;  %v5825_v2 = vpack.c.bf16 %v5387_v17, %v5384_v21  ;;  %14305 = vmatprep.mubr.bf16.mxu1 %v6024_v11 }
 0x4d9   : > { %v5899_v28 = vadd.bf16 %v18258_v38, %v5826_v25  ;;  %14306 = vmatmul.mubr.bf16.gmra.mrb[144].mxu1 %v6025_v23  ;;  %v5182_v8 = vmax.bf16 %v21327_v32, %v5118_v37 }
 0x4da   : > { %v5898_v30 = vadd.bf16 %v18258_v38, %v5825_v2  ;;  %v5181_v49 = vmax.bf16 %v21327_v32, %v5117_v0 }
 0x4db   : > { %v5963_v44 = vadd.bf16 %v5899_v28, %v21522_v59  ;;  %v21526_v28 = vpack.c.bf16 %v17018_v34, %v17006_v26 }
 0x4dc   : > { %v14171_v50 = vpop.f32.mrb[152].mxu0  ;;  %14225 = vmatprep.mubr.bf16.mxu0 %v5181_v49  ;;  %v5962_v47 = vadd.bf16 %v5898_v30, %v21523_v48  ;;  %v21527_v30 = vpack.c.bf16 %v16992_v39, %v16980_v40 }
 0x4dd   : > { %v5400_v53 = vpop.f32.mrb[153].mxu0  ;;  %14226 = vmatmul.mubr.bf16.gmra.mrb[208].mxu0 %v5182_v8  ;;  %v6027_v10 = vmax.bf16 %v21327_v32, %v5963_v44 }
 0x4de   : > { %v14172_v5 = vpop.f32.mrb[154].mxu0  ;;  %v6026_v27 = vmax.bf16 %v21327_v32, %v5962_v47 }
 0x4df   : > { %v5828_v58 = vpack.c.bf16 %v14172_v5, %v14171_v50  ;;  %v5403_v7 = vpop.f32.mrb[155].mxu0 }
 0x4e0   : > { %v5827_v3 = vpack.c.bf16 %v5403_v7, %v5400_v53  ;;  %14309 = vmatprep.mubr.bf16.mxu1 %v6026_v27 }
 0x4e1   : > { %v5901_v31 = vadd.bf16 %v18258_v38, %v5828_v58  ;;  %14310 = vmatmul.mubr.bf16.gmra.mrb[148].mxu1 %v6027_v10 }
 0x4e2   : > { %v5900_v29 = vadd.bf16 %v18258_v38, %v5827_v3  ;;  %v14087_v19 = vpop.f32.mrb[84].mxu1  ;;  %v21528_v3 = vpack.c.bf16 %v17070_v43, %v17058_v61 }
 0x4e3   : > { %v5965_v14 = vadd.bf16 %v5901_v31, %v21524_v9  ;;  %v4829_v46 = vpop.f32.mrb[85].mxu1  ;;  %v21529_v9 = vld [vmem:[#allocation74_spill] sm:$0xff] }
 0x4e4   : > { %v14088_v36 = vpop.f32.mrb[86].mxu1  ;;  %v14175_v45 = vpop.f32.mrb[156].mxu0  ;;  %v5964_v41 = vadd.bf16 %v5900_v29, %v21525_v15 }
 0x4e5   : > { %v5047_v62 = vpack.c.bf16 %v14088_v36, %v14087_v19  ;;  %v4832_v6 = vpop.f32.mrb[87].mxu1  ;;  %v5416_v21 = vpop.f32.mrb[157].mxu0  ;;  %v6029_v23 = vmax.bf16 %v21327_v32, %v5965_v14  ;;  %v21530_v14 = vpack.c.bf16 %v17044_v16, %v21529_v9  ;;  %v15091_v36 = vld [vmem:[%s21047_s3 + $0x180] sm:$0xff]  }
 0x4e6   : > { %v5046_v12 = vpack.c.bf16 %v4832_v6, %v4829_v46  ;;  %v14176_v52 = vpop.f32.mrb[158].mxu0  ;;  %v6028_v11 = vmax.bf16 %v21327_v32, %v5964_v41  ;;  %14561 = vmatprep.subr.bf16.mxu1 %v15091_v36 }
 0x4e7   : > { %v5120_v37 = vadd.bf16 %v18100_v22, %v5047_v62  ;;  %v5830_v35 = vpack.c.bf16 %v14176_v52, %v14175_v45  ;;  %v5419_v20 = vpop.f32.mrb[159].mxu0  ;;  %v15092_v45 = vld [vmem:[%s21047_s3 + $0x178] sm:$0xff]   ;;  %14562 = vmatpush3.bf16.msra.mxu1 %v15091_v36 }
 0x4e8   : > { %v5119_v25 = vadd.bf16 %v18100_v22, %v5046_v12  ;;  %v5829_v17 = vpack.c.bf16 %v5419_v20, %v5416_v21  ;;  %14313 = vmatprep.mubr.bf16.mxu1 %v6028_v11  ;;  %14431 = vmatprep.subr.bf16.mxu0 %v15092_v45 }
 0x4e9   : > { %v5903_v33 = vadd.bf16 %v18258_v38, %v5830_v35  ;;  %14314 = vmatmul.mubr.bf16.gmra.mrb[152].mxu1 %v6029_v23  ;;  %v5184_v2 = vmax.bf16 %v21327_v32, %v5120_v37  ;;  %14432 = vmatpush3.bf16.msra.mxu0 %v15092_v45 }
 0x4ea   : > { %v5902_v24 = vadd.bf16 %v18258_v38, %v5829_v17  ;;  %v5183_v0 = vmax.bf16 %v21327_v32, %v5119_v25 }
 0x4eb   : > { %v5967_v57 = vadd.bf16 %v5903_v33, %v21526_v28 }
 0x4ec   : > { %14229 = vmatprep.mubr.bf16.mxu0 %v5183_v0  ;;  %v5966_v49 = vadd.bf16 %v5902_v24, %v21527_v30  ;;  %v21531_v24 = vld [vmem:[#allocation92_spill] sm:$0xff]  ;;  %v21532_v0 = vld [vmem:[#allocation89_spill] sm:$0xff] }
 0x4ed   : > { %14230 = vmatmul.mubr.bf16.gmra.mrb[212].mxu0 %v5184_v2  ;;  %v6031_v59 = vmax.bf16 %v21327_v32, %v5967_v57  ;;  %v21533_v2 = vpack.c.bf16 %v21531_v24, %v21532_v0 }
 0x4ee   : > { %v6030_v8 = vmax.bf16 %v21327_v32, %v5966_v49  ;;  %v21534_v49 = vld [vmem:[#allocation86_spill] sm:$0xff] }
 0x4f0   : > { %v14179_v44 = vpop.f32.mrb[160].mxu0  ;;  %14317 = vmatprep.mubr.bf16.mxu1 %v6030_v8  ;;  %v21535_v8 = vld [vmem:[#allocation83_spill] sm:$0xff] }
 0x4f1   : > { %v5432_v50 = vpop.f32.mrb[161].mxu0  ;;  %14318 = vmatmul.mubr.bf16.gmra.mrb[156].mxu1 %v6031_v59  ;;  %v21536_v59 = vpack.c.bf16 %v21534_v49, %v21535_v8  ;;  %v21543_v8 = vld [vmem:[#allocation116_spill] sm:$0xff] }
 0x4f2   : > { %v14091_v48 = vpop.f32.mrb[88].mxu1  ;;  %v14180_v47 = vpop.f32.mrb[162].mxu0 }
 0x4f3   : > { %v5832_v53 = vpack.c.bf16 %v14180_v47, %v14179_v44  ;;  %v4845_v5 = vpop.f32.mrb[89].mxu1  ;;  %v5435_v34 = vpop.f32.mrb[163].mxu0 }
 0x4f4   : > { %v5831_v26 = vpack.c.bf16 %v5435_v34, %v5432_v50  ;;  %v14092_v27 = vpop.f32.mrb[90].mxu1 }
 0x4f5   : > { %v5905_v10 = vadd.bf16 %v18258_v38, %v5832_v53  ;;  %v5049_v39 = vpack.c.bf16 %v14092_v27, %v14091_v48  ;;  %v4848_v40 = vpop.f32.mrb[91].mxu1 }
 0x4f6   : > { %v5904_v58 = vadd.bf16 %v18258_v38, %v5831_v26  ;;  %v5048_v7 = vpack.c.bf16 %v4848_v40, %v4845_v5 }
 0x4f7   : > { %v5969_v31 = vadd.bf16 %v5905_v10, %v21528_v3  ;;  %v5122_v29 = vadd.bf16 %v18100_v22, %v5049_v39 }
 0x4f8   : > { %v5121_v19 = vadd.bf16 %v18100_v22, %v5048_v7  ;;  %v5968_v46 = vadd.bf16 %v5904_v58, %v21530_v14  ;;  %v21537_v14 = vld [vmem:[#allocation104_spill] sm:$0xff] }
 0x4f9   : > { %v6033_v61 = vmax.bf16 %v21327_v32, %v5969_v31  ;;  %v5186_v41 = vmax.bf16 %v21327_v32, %v5122_v29 }
 0x4fa   : > { %v5185_v15 = vmax.bf16 %v21327_v32, %v5121_v19  ;;  %v6032_v43 = vmax.bf16 %v21327_v32, %v5968_v46  ;;  %v21538_v46 = vld [vmem:[#allocation101_spill] sm:$0xff] }
 0x4fb   : > { %v21539_v36 = vpack.c.bf16 %v21537_v14, %v21538_v46 }
 0x4fc   : > { %14233 = vmatprep.mubr.bf16.mxu0 %v5185_v15  ;;  %14321 = vmatprep.mubr.bf16.mxu1 %v6032_v43 }
 0x4fd   : > { %14234 = vmatmul.mubr.bf16.gmra.mrb[216].mxu0 %v5186_v41  ;;  %14322 = vmatmul.mubr.bf16.gmra.mrb[160].mxu1 %v6033_v61  ;;  %v21540_v61 = vld [vmem:[#allocation98_spill] sm:$0xff]  ;;  %v21541_v41 = vld [vmem:[#allocation95_spill] sm:$0xff] }
 0x500   : > { %v14183_v16 = vpop.f32.mrb[164].mxu0 }
 0x501   : > { %v5448_v62 = vpop.f32.mrb[165].mxu0 }
 0x502   : > { %v14095_v6 = vpop.f32.mrb[92].mxu1  ;;  %v14184_v21 = vpop.f32.mrb[166].mxu0 }
 0x503   : > { %v5834_v12 = vpack.c.bf16 %v14184_v21, %v14183_v16  ;;  %v4861_v52 = vpop.f32.mrb[93].mxu1  ;;  %v5451_v11 = vpop.f32.mrb[167].mxu0  ;;  %v21542_v16 = vpack.c.bf16 %v21540_v61, %v21541_v41  ;;  %v21549_v41 = vld [vmem:[#allocation128_spill] sm:$0xff] }
 0x504   : > { %v5833_v23 = vpack.c.bf16 %v5451_v11, %v5448_v62  ;;  %v14096_v37 = vpop.f32.mrb[94].mxu1 }
 0x505   : > { %v5907_v35 = vadd.bf16 %v18258_v38, %v5834_v12  ;;  %v5051_v20 = vpack.c.bf16 %v14096_v37, %v14095_v6  ;;  %v4864_v25 = vpop.f32.mrb[95].mxu1  ;;  %v15093_v6 = vld [vmem:[%s21047_s3 + $0x188] sm:$0xff]  }
 0x506   : > { %v5906_v17 = vadd.bf16 %v18258_v38, %v5833_v23  ;;  %v5050_v33 = vpack.c.bf16 %v4864_v25, %v4861_v52  ;;  %14563 = vmatprep.subr.bf16.mxu1 %v15093_v6 }
 0x507   : > { %v5971_v28 = vadd.bf16 %v5907_v35, %v21533_v2  ;;  %v5124_v57 = vadd.bf16 %v18100_v22, %v5051_v20  ;;  %14564 = vmatpush3.bf16.msra.mxu1 %v15093_v6 }
 0x508   : > { %v5123_v30 = vadd.bf16 %v18100_v22, %v5050_v33  ;;  %v5970_v44 = vadd.bf16 %v5906_v17, %v21536_v59  ;;  %v21544_v59 = vld [vmem:[#allocation113_spill] sm:$0xff] }
 0x509   : > { %v6035_v47 = vmax.bf16 %v21327_v32, %v5971_v28  ;;  %v5188_v53 = vmax.bf16 %v21327_v32, %v5124_v57 }
 0x50a   : > { %v5187_v50 = vmax.bf16 %v21327_v32, %v5123_v30  ;;  %v6034_v48 = vmax.bf16 %v21327_v32, %v5970_v44  ;;  %v21545_v44 = vpack.c.bf16 %v21543_v8, %v21544_v59 }
 0x50c   : > { %14237 = vmatprep.mubr.bf16.mxu0 %v5187_v50  ;;  %14325 = vmatprep.mubr.bf16.mxu1 %v6034_v48 }
 0x50d   : > { %14238 = vmatmul.mubr.bf16.gmra.mrb[220].mxu0 %v5188_v53  ;;  %14326 = vmatmul.mubr.bf16.gmra.mrb[164].mxu1 %v6035_v47  ;;  %v21546_v53 = vld [vmem:[#allocation110_spill] sm:$0xff] }
 0x510   : > { %v14187_v5 = vpop.f32.mrb[168].mxu0 }
 0x511   : > { %v5464_v34 = vpop.f32.mrb[169].mxu0 }
 0x512   : > { %v14099_v26 = vpop.f32.mrb[96].mxu1  ;;  %v14188_v27 = vpop.f32.mrb[170].mxu0 }
 0x513   : > { %v5836_v10 = vpack.c.bf16 %v14188_v27, %v14187_v5  ;;  %v4877_v39 = vpop.f32.mrb[97].mxu1  ;;  %v5467_v40 = vpop.f32.mrb[171].mxu0  ;;  %v21547_v5 = vld [vmem:[#allocation107_spill] sm:$0xff] }
 0x514   : > { %v5835_v58 = vpack.c.bf16 %v5467_v40, %v5464_v34  ;;  %v14100_v7 = vpop.f32.mrb[98].mxu1  ;;  %v21548_v34 = vpack.c.bf16 %v21546_v53, %v21547_v5  ;;  %v21555_v5 = vld [vmem:[#allocation140_spill] sm:$0xff] }
 0x515   : > { %v5909_v3 = vadd.bf16 %v18258_v38, %v5836_v10  ;;  %v5053_v31 = vpack.c.bf16 %v14100_v7, %v14099_v26  ;;  %v4880_v29 = vpop.f32.mrb[99].mxu1 }
 0x516   : > { %v5908_v19 = vadd.bf16 %v18258_v38, %v5835_v58  ;;  %v5052_v9 = vpack.c.bf16 %v4880_v29, %v4877_v39 }
 0x517   : > { %v5973_v45 = vadd.bf16 %v5909_v3, %v21539_v36  ;;  %v5126_v15 = vadd.bf16 %v18100_v22, %v5053_v31 }
 0x518   : > { %v5125_v43 = vadd.bf16 %v18100_v22, %v5052_v9  ;;  %v5972_v62 = vadd.bf16 %v5908_v19, %v21542_v16  ;;  %v21550_v16 = vld [vmem:[#allocation125_spill] sm:$0xff] }
 0x519   : > { %v6037_v52 = vmax.bf16 %v21327_v32, %v5973_v45  ;;  %v5190_v11 = vmax.bf16 %v21327_v32, %v5126_v15 }
 0x51a   : > { %v5189_v21 = vmax.bf16 %v21327_v32, %v5125_v43  ;;  %v6036_v12 = vmax.bf16 %v21327_v32, %v5972_v62  ;;  %v21551_v62 = vpack.c.bf16 %v21549_v41, %v21550_v16 }
 0x51c   : > { %14241 = vmatprep.mubr.bf16.mxu0 %v5189_v21  ;;  %14329 = vmatprep.mubr.bf16.mxu1 %v6036_v12 }
 0x51d   : > { %14242 = vmatmul.mubr.bf16.gmra.mrb[224].mxu0 %v5190_v11  ;;  %14330 = vmatmul.mubr.bf16.gmra.mrb[168].mxu1 %v6037_v52  ;;  %v21552_v52 = vld [vmem:[#allocation122_spill] sm:$0xff]  ;;  %v21553_v11 = vld [vmem:[#allocation119_spill] sm:$0xff] }
 0x520   : > { %v14191_v23 = vpop.f32.mrb[172].mxu0 }
 0x521   : > { %v5480_v37 = vpop.f32.mrb[173].mxu0 }
 0x522   : > { %v14103_v35 = vpop.f32.mrb[100].mxu1  ;;  %v14192_v20 = vpop.f32.mrb[174].mxu0 }
 0x523   : > { %v5838_v25 = vpack.c.bf16 %v14192_v20, %v14191_v23  ;;  %v4893_v17 = vpop.f32.mrb[101].mxu1  ;;  %v5483_v33 = vpop.f32.mrb[175].mxu0  ;;  %v21554_v23 = vpack.c.bf16 %v21552_v52, %v21553_v11  ;;  %v21561_v11 = vld [vmem:[#allocation152_spill] sm:$0xff] }
 0x524   : > { %v5837_v24 = vpack.c.bf16 %v5483_v33, %v5480_v37  ;;  %v14104_v0 = vpop.f32.mrb[102].mxu1 }
 0x525   : > { %v5911_v2 = vadd.bf16 %v18258_v38, %v5838_v25  ;;  %v5055_v28 = vpack.c.bf16 %v14104_v0, %v14103_v35  ;;  %v4896_v57 = vpop.f32.mrb[103].mxu1  ;;  %v15094_v35 = vld [vmem:[%s21047_s3 + $0x190] sm:$0xff]  }
 0x526   : > { %v5910_v30 = vadd.bf16 %v18258_v38, %v5837_v24  ;;  %v5054_v49 = vpack.c.bf16 %v4896_v57, %v4893_v17  ;;  %14565 = vmatprep.subr.bf16.mxu1 %v15094_v35 }
 0x527   : > { %v5975_v50 = vadd.bf16 %v5911_v2, %v21545_v44  ;;  %v5128_v48 = vadd.bf16 %v18100_v22, %v5055_v28  ;;  %14566 = vmatpush3.bf16.msra.mxu1 %v15094_v35 }
 0x528   : > { %v5127_v47 = vadd.bf16 %v18100_v22, %v5054_v49  ;;  %v5974_v26 = vadd.bf16 %v5910_v30, %v21548_v34  ;;  %v21556_v34 = vld [vmem:[#allocation137_spill] sm:$0xff] }
 0x529   : > { %v6039_v39 = vmax.bf16 %v21327_v32, %v5975_v50  ;;  %v5192_v40 = vmax.bf16 %v21327_v32, %v5128_v48 }
 0x52a   : > { %v5191_v27 = vmax.bf16 %v21327_v32, %v5127_v47  ;;  %v6038_v10 = vmax.bf16 %v21327_v32, %v5974_v26  ;;  %v21557_v26 = vpack.c.bf16 %v21555_v5, %v21556_v34 }
 0x52c   : > { %14245 = vmatprep.mubr.bf16.mxu0 %v5191_v27  ;;  %14333 = vmatprep.mubr.bf16.mxu1 %v6038_v10 }
 0x52d   : > { %14246 = vmatmul.mubr.bf16.gmra.mrb[228].mxu0 %v5192_v40  ;;  %14334 = vmatmul.mubr.bf16.gmra.mrb[172].mxu1 %v6039_v39  ;;  %v21558_v40 = vld [vmem:[#allocation134_spill] sm:$0xff] }
 0x530   : > { %v14195_v58 = vpop.f32.mrb[176].mxu0 }
 0x531   : > { %v5496_v7 = vpop.f32.mrb[177].mxu0 }
 0x532   : > { %v14107_v3 = vpop.f32.mrb[104].mxu1  ;;  %v14196_v31 = vpop.f32.mrb[178].mxu0 }
 0x533   : > { %v5840_v29 = vpack.c.bf16 %v14196_v31, %v14195_v58  ;;  %v4909_v19 = vpop.f32.mrb[105].mxu1  ;;  %v5499_v9 = vpop.f32.mrb[179].mxu0  ;;  %v21559_v58 = vld [vmem:[#allocation131_spill] sm:$0xff] }
 0x534   : > { %v5839_v14 = vpack.c.bf16 %v5499_v9, %v5496_v7  ;;  %v14108_v46 = vpop.f32.mrb[106].mxu1  ;;  %v21560_v7 = vpack.c.bf16 %v21558_v40, %v21559_v58  ;;  %v21567_v58 = vld [vmem:[#allocation164_spill] sm:$0xff] }
 0x535   : > { %v5913_v36 = vadd.bf16 %v18258_v38, %v5840_v29  ;;  %v5057_v45 = vpack.c.bf16 %v14108_v46, %v14107_v3  ;;  %v4912_v15 = vpop.f32.mrb[107].mxu1 }
 0x536   : > { %v5912_v43 = vadd.bf16 %v18258_v38, %v5839_v14  ;;  %v5056_v61 = vpack.c.bf16 %v4912_v15, %v4909_v19 }
 0x537   : > { %v5977_v6 = vadd.bf16 %v5913_v36, %v21551_v62  ;;  %v5130_v21 = vadd.bf16 %v18100_v22, %v5057_v45 }
 0x538   : > { %v5129_v12 = vadd.bf16 %v18100_v22, %v5056_v61  ;;  %v5976_v37 = vadd.bf16 %v5912_v43, %v21554_v23  ;;  %v21562_v23 = vld [vmem:[#allocation149_spill] sm:$0xff] }
 0x539   : > { %v6041_v17 = vmax.bf16 %v21327_v32, %v5977_v6  ;;  %v5194_v33 = vmax.bf16 %v21327_v32, %v5130_v21 }
 0x53a   : > { %v5193_v20 = vmax.bf16 %v21327_v32, %v5129_v12  ;;  %v6040_v25 = vmax.bf16 %v21327_v32, %v5976_v37  ;;  %v21563_v37 = vpack.c.bf16 %v21561_v11, %v21562_v23 }
 0x53c   : > { %14249 = vmatprep.mubr.bf16.mxu0 %v5193_v20  ;;  %14337 = vmatprep.mubr.bf16.mxu1 %v6040_v25 }
 0x53d   : > { %14250 = vmatmul.mubr.bf16.gmra.mrb[232].mxu0 %v5194_v33  ;;  %14338 = vmatmul.mubr.bf16.gmra.mrb[176].mxu1 %v6041_v17  ;;  %v21564_v17 = vld [vmem:[#allocation146_spill] sm:$0xff]  ;;  %v21565_v33 = vld [vmem:[#allocation143_spill] sm:$0xff] }
 0x540   : > { %v14199_v24 = vpop.f32.mrb[180].mxu0 }
 0x541   : > { %v5512_v0 = vpop.f32.mrb[181].mxu0 }
 0x542   : > { %v14111_v2 = vpop.f32.mrb[108].mxu1  ;;  %v14200_v28 = vpop.f32.mrb[182].mxu0 }
 0x543   : > { %v5842_v57 = vpack.c.bf16 %v14200_v28, %v14199_v24  ;;  %v4925_v30 = vpop.f32.mrb[109].mxu1  ;;  %v5515_v49 = vpop.f32.mrb[183].mxu0  ;;  %v21566_v24 = vpack.c.bf16 %v21564_v17, %v21565_v33  ;;  %v21573_v33 = vld [vmem:[#allocation170_spill] sm:$0xff] }
 0x544   : > { %v5841_v8 = vpack.c.bf16 %v5515_v49, %v5512_v0  ;;  %v14112_v59 = vpop.f32.mrb[110].mxu1 }
 0x545   : > { %v5915_v44 = vadd.bf16 %v18258_v38, %v5842_v57  ;;  %v5059_v50 = vpack.c.bf16 %v14112_v59, %v14111_v2  ;;  %v4928_v48 = vpop.f32.mrb[111].mxu1  ;;  %v15095_v2 = vld [vmem:[%s21047_s3 + $0x198] sm:$0xff]  }
 0x546   : > { %v5914_v47 = vadd.bf16 %v18258_v38, %v5841_v8  ;;  %v5058_v53 = vpack.c.bf16 %v4928_v48, %v4925_v30  ;;  %14567 = vmatprep.subr.bf16.mxu1 %v15095_v2 }
 0x547   : > { %v5979_v27 = vadd.bf16 %v5915_v44, %v21557_v26  ;;  %v5132_v10 = vadd.bf16 %v18100_v22, %v5059_v50  ;;  %14568 = vmatpush3.bf16.msra.mxu1 %v15095_v2 }
 0x548   : > { %v5131_v39 = vadd.bf16 %v18100_v22, %v5058_v53  ;;  %v5978_v3 = vadd.bf16 %v5914_v47, %v21560_v7  ;;  %v21568_v7 = vld [vmem:[#allocation161_spill] sm:$0xff] }
 0x549   : > { %v6043_v19 = vmax.bf16 %v21327_v32, %v5979_v27  ;;  %v5196_v9 = vmax.bf16 %v21327_v32, %v5132_v10 }
 0x54a   : > { %v5195_v31 = vmax.bf16 %v21327_v32, %v5131_v39  ;;  %v6042_v29 = vmax.bf16 %v21327_v32, %v5978_v3  ;;  %v21569_v3 = vpack.c.bf16 %v21567_v58, %v21568_v7 }
 0x54c   : > { %14253 = vmatprep.mubr.bf16.mxu0 %v5195_v31  ;;  %14341 = vmatprep.mubr.bf16.mxu1 %v6042_v29 }
 0x54d   : > { %14254 = vmatmul.mubr.bf16.gmra.mrb[236].mxu0 %v5196_v9  ;;  %14342 = vmatmul.mubr.bf16.gmra.mrb[180].mxu1 %v6043_v19  ;;  %v21570_v9 = vld [vmem:[#allocation158_spill] sm:$0xff] }
 0x550   : > { %v14203_v14 = vpop.f32.mrb[184].mxu0 }
 0x551   : > { %v5528_v46 = vpop.f32.mrb[185].mxu0 }
 0x552   : > { %v14115_v36 = vpop.f32.mrb[112].mxu1  ;;  %v14204_v45 = vpop.f32.mrb[186].mxu0 }
 0x553   : > { %v5844_v15 = vpack.c.bf16 %v14204_v45, %v14203_v14  ;;  %v4941_v43 = vpop.f32.mrb[113].mxu1  ;;  %v5531_v61 = vpop.f32.mrb[187].mxu0  ;;  %v21571_v14 = vld [vmem:[#allocation155_spill] sm:$0xff] }
 0x554   : > { %v5843_v41 = vpack.c.bf16 %v5531_v61, %v5528_v46  ;;  %v14116_v16 = vpop.f32.mrb[114].mxu1  ;;  %v21572_v46 = vpack.c.bf16 %v21570_v9, %v21571_v14  ;;  %v12505_v14 = vld [vmem:[%s21048_s4 + $0x4] sm:$0x1] }
 0x555   : > { %v5917_v62 = vadd.bf16 %v18258_v38, %v5844_v15  ;;  %v5061_v6 = vpack.c.bf16 %v14116_v16, %v14115_v36  ;;  %v4944_v21 = vpop.f32.mrb[115].mxu1 }
 0x556   : > { %v5916_v12 = vadd.bf16 %v18258_v38, %v5843_v41  ;;  %v5060_v52 = vpack.c.bf16 %v4944_v21, %v4941_v43 }
 0x557   : > { %v5981_v35 = vadd.bf16 %v5917_v62, %v21563_v37  ;;  %v5134_v20 = vadd.bf16 %v18100_v22, %v5061_v6 }
 0x558   : > { %v5133_v25 = vadd.bf16 %v18100_v22, %v5060_v52  ;;  %v5980_v0 = vadd.bf16 %v5916_v12, %v21566_v24  ;;  %v21574_v24 = vld [vmem:[#allocation169_spill] sm:$0xff] }
 0x559   : > { %v6045_v30 = vmax.bf16 %v21327_v32, %v5981_v35  ;;  %v5198_v49 = vmax.bf16 %v21327_v32, %v5134_v20 }
 0x55a   : > { %v5197_v28 = vmax.bf16 %v21327_v32, %v5133_v25  ;;  %v6044_v57 = vmax.bf16 %v21327_v32, %v5980_v0  ;;  %v21575_v0 = vpack.c.bf16 %v21573_v33, %v21574_v24 }
 0x55c   : > { %14257 = vmatprep.mubr.bf16.mxu0 %v5197_v28  ;;  %14345 = vmatprep.mubr.bf16.mxu1 %v6044_v57 }
 0x55d   : > { %14258 = vmatmul.mubr.bf16.gmra.mrb[240].mxu0 %v5198_v49  ;;  %14346 = vmatmul.mubr.bf16.gmra.mrb[184].mxu1 %v6045_v30  ;;  %v21576_v30 = vld [vmem:[#allocation168_spill] sm:$0xff]  ;;  %v21577_v49 = vld [vmem:[#allocation167_spill] sm:$0xff] }
 0x560   : > { %v14207_v8 = vpop.f32.mrb[188].mxu0 }
 0x561   : > { %v5544_v59 = vpop.f32.mrb[189].mxu0 }
 0x562   : > { %v14119_v44 = vpop.f32.mrb[116].mxu1  ;;  %v14208_v50 = vpop.f32.mrb[190].mxu0 }
 0x563   : > { %v5846_v48 = vpack.c.bf16 %v14208_v50, %v14207_v8  ;;  %v4957_v47 = vpop.f32.mrb[117].mxu1  ;;  %v5547_v53 = vpop.f32.mrb[191].mxu0  ;;  %v21578_v8 = vpack.c.bf16 %v21576_v30, %v21577_v49 }
 0x564   : > { %v5845_v5 = vpack.c.bf16 %v5547_v53, %v5544_v59  ;;  %v14120_v34 = vpop.f32.mrb[118].mxu1 }
 0x565   : > { %v5919_v26 = vadd.bf16 %v18258_v38, %v5846_v48  ;;  %v5063_v27 = vpack.c.bf16 %v14120_v34, %v14119_v44  ;;  %v4960_v10 = vpop.f32.mrb[119].mxu1  ;;  %v15096_v44 = vld [vmem:[%s21047_s3 + $0x1a0] sm:$0xff]  }
 0x566   : > { %v5918_v39 = vadd.bf16 %v18258_v38, %v5845_v5  ;;  %v5062_v40 = vpack.c.bf16 %v4960_v10, %v4957_v47  ;;  %14569 = vmatprep.subr.bf16.mxu1 %v15096_v44 }
 0x567   : > { %v5983_v31 = vadd.bf16 %v5919_v26, %v21569_v3  ;;  %v5136_v29 = vadd.bf16 %v18100_v22, %v5063_v27  ;;  %14570 = vmatpush3.bf16.msra.mxu1 %v15096_v44 }
 0x568   : > { %v5135_v19 = vadd.bf16 %v18100_v22, %v5062_v40  ;;  %v5982_v36 = vadd.bf16 %v5918_v39, %v21572_v46  ;;  %v21579_v46 = vld [vmem:[#allocation174_spill] sm:$0xff] }
 0x569   : > { %v6047_v43 = vmax.bf16 %v21327_v32, %v5983_v31  ;;  %v5200_v61 = vmax.bf16 %v21327_v32, %v5136_v29 }
 0x56a   : > { %v5199_v45 = vmax.bf16 %v21327_v32, %v5135_v19  ;;  %v6046_v15 = vmax.bf16 %v21327_v32, %v5982_v36  ;;  %v21580_v36 = vld [vmem:[#allocation173_spill] sm:$0xff] }
 0x56c   : > { %14261 = vmatprep.mubr.bf16.mxu0 %v5199_v45  ;;  %14349 = vmatprep.mubr.bf16.mxu1 %v6046_v15  ;;  %v21581_v45 = vpack.c.bf16 %v21579_v46, %v21580_v36 }
 0x56d   : > { %14262 = vmatmul.mubr.bf16.gmra.mrb[244].mxu0 %v5200_v61  ;;  %14350 = vmatmul.mubr.bf16.gmra.mrb[188].mxu1 %v6047_v43 }
 0x570   : > { %v14211_v41 = vpop.f32.mrb[192].mxu0 }
 0x571   : > { %v5560_v16 = vpop.f32.mrb[193].mxu0 }
 0x572   : > { %v14123_v62 = vpop.f32.mrb[120].mxu1  ;;  %v14212_v6 = vpop.f32.mrb[194].mxu0 }
 0x573   : > { %v5848_v21 = vpack.c.bf16 %v14212_v6, %v14211_v41  ;;  %v4973_v12 = vpop.f32.mrb[121].mxu1  ;;  %v5563_v52 = vpop.f32.mrb[195].mxu0  ;;  %v21582_v41 = vld [vmem:[#allocation172_spill] sm:$0xff] }
 0x574   : > { %v5847_v11 = vpack.c.bf16 %v5563_v52, %v5560_v16  ;;  %v14124_v23 = vpop.f32.mrb[122].mxu1  ;;  %v21583_v16 = vld [vmem:[#allocation171_spill] sm:$0xff] }
 0x575   : > { %v5921_v37 = vadd.bf16 %v18258_v38, %v5848_v21  ;;  %v5065_v35 = vpack.c.bf16 %v14124_v23, %v14123_v62  ;;  %v4976_v20 = vpop.f32.mrb[123].mxu1  ;;  %v21584_v62 = vpack.c.bf16 %v21582_v41, %v21583_v16  ;;  %v6757_v21 = vpack.i.b16 %v12505_v14, %v12505_v14 }
 0x576   : > { %v5920_v25 = vadd.bf16 %v18258_v38, %v5847_v11  ;;  %v5064_v17 = vpack.c.bf16 %v4976_v20, %v4973_v12 }
 0x577   : > { %v5985_v2 = vadd.bf16 %v5921_v37, %v21575_v0  ;;  %v5138_v28 = vadd.bf16 %v18100_v22, %v5065_v35 }
 0x578   : > { %v5137_v57 = vadd.bf16 %v18100_v22, %v5064_v17  ;;  %v5984_v59 = vadd.bf16 %v5920_v25, %v21578_v8 }
 0x579   : > { %v6049_v47 = vmax.bf16 %v21327_v32, %v5985_v2  ;;  %v5202_v53 = vmax.bf16 %v21327_v32, %v5138_v28 }
 0x57a   : > { %v5201_v50 = vmax.bf16 %v21327_v32, %v5137_v57  ;;  %v6048_v48 = vmax.bf16 %v21327_v32, %v5984_v59 }
 0x57c   : > { %14265 = vmatprep.mubr.bf16.mxu0 %v5201_v50  ;;  %14353 = vmatprep.mubr.bf16.mxu1 %v6048_v48 }
 0x57d   : > { %14266 = vmatmul.mubr.bf16.gmra.mrb[248].mxu0 %v5202_v53  ;;  %14354 = vmatmul.mubr.bf16.gmra.mrb[192].mxu1 %v6049_v47 }
 0x580   : > { %v14215_v5 = vpop.f32.mrb[196].mxu0 }
 0x581   : > { %v5576_v34 = vpop.f32.mrb[197].mxu0 }
 0x582   : > { %v14127_v26 = vpop.f32.mrb[124].mxu1  ;;  %v14216_v27 = vpop.f32.mrb[198].mxu0 }
 0x583   : > { %v5850_v10 = vpack.c.bf16 %v14216_v27, %v14215_v5  ;;  %v4989_v39 = vpop.f32.mrb[125].mxu1  ;;  %v5579_v40 = vpop.f32.mrb[199].mxu0 }
 0x584   : > { %v5849_v58 = vpack.c.bf16 %v5579_v40, %v5576_v34  ;;  %v14128_v7 = vpop.f32.mrb[126].mxu1  ;;  %v21585_v34 = vpack.c.bf16 %v17616_v63, %v17608_v54  ;;  %v21586_v40 = vld [vmem:[#allocation176_spill] sm:$0xff] }
 0x585   : > { %v5923_v3 = vadd.bf16 %v18258_v38, %v5850_v10  ;;  %v5067_v31 = vpack.c.bf16 %v14128_v7, %v14127_v26  ;;  %v4992_v29 = vpop.f32.mrb[127].mxu1 }
 0x586   : > { %v5922_v19 = vadd.bf16 %v18258_v38, %v5849_v58  ;;  %v5066_v9 = vpack.c.bf16 %v4992_v29, %v4989_v39  ;;  %v21587_v58 = vld [vmem:[#allocation175_spill] sm:$0xff] }
 0x587   : > { %v5987_v15 = vadd.bf16 %v5923_v3, %v21581_v45  ;;  %v5140_v43 = vadd.bf16 %v18100_v22, %v5067_v31  ;;  %v21588_v7 = vpack.c.bf16 %v21586_v40, %v21587_v58  ;;  %v15097_v29 = vld [vmem:[%s21047_s3 + $0x1a8] sm:$0xff]  }
 0x588   : > { %v5139_v61 = vadd.bf16 %v18100_v22, %v5066_v9  ;;  %v5986_v6 = vadd.bf16 %v5922_v19, %v21584_v62  ;;  %v18524_v22 = vrot.slane %v6757_v21, %v16663_v60  ;;  %14571 = vmatprep.subr.bf16.mxu1 %v15097_v29 }
 0x589   : > { %v6051_v11 = vmax.bf16 %v21327_v32, %v5987_v15  ;;  %v5204_v23 = vmax.bf16 %v21327_v32, %v5140_v43  ;;  %14572 = vmatpush3.bf16.msra.mxu1 %v15097_v29 }
 0x58a   : > { %v5203_v12 = vmax.bf16 %v21327_v32, %v5139_v61  ;;  %v6050_v52 = vmax.bf16 %v21327_v32, %v5986_v6 }
 0x58c   : > { %14269 = vmatprep.mubr.bf16.mxu0 %v5203_v12  ;;  %v14291_v37 = vpop.f32.mrb[128].mxu1  ;;  %14357 = vmatprep.mubr.bf16.mxu1 %v6050_v52 }
 0x58d   : > { %14270 = vmatmul.mubr.bf16.gmra.mrb[252].mxu0 %v5204_v23  ;;  %v6179_v35 = vpop.f32.mrb[129].mxu1  ;;  %14358 = vmatmul.mubr.bf16.gmra.mrb[196].mxu1 %v6051_v11 }
 0x58e   : > { %v14292_v20 = vpop.f32.mrb[130].mxu1 }
 0x58f   : > { %v6691_v25 = vpack.c.bf16 %v14292_v20, %v14291_v37  ;;  %v6182_v17 = vpop.f32.mrb[131].mxu1 }
 0x590   : > { %v6690_v33 = vpack.c.bf16 %v6182_v17, %v6179_v35  ;;  %v14219_v24 = vpop.f32.mrb[200].mxu0 }
 0x591   : > { %v6764_v0 = vadd.bf16 %v18524_v22, %v6691_v25  ;;  %v5592_v2 = vpop.f32.mrb[201].mxu0 }
 0x592   : > { %v6763_v28 = vadd.bf16 %v18524_v22, %v6690_v33  ;;  %v14220_v57 = vpop.f32.mrb[202].mxu0 }
 0x593   : > { %v5852_v30 = vpack.c.bf16 %v14220_v57, %v14219_v24  ;;  %v5595_v49 = vpop.f32.mrb[203].mxu0  ;;  %v6828_v50 = vmax.bf16 %v21327_v32, %v6764_v0  ;;  %v21589_v24 = vpack.c.bf16 %v17655_v13, %v17650_v18 }
 0x594   : > { %v5851_v8 = vpack.c.bf16 %v5595_v49, %v5592_v2  ;;  %v14295_v59 = vpop.f32.mrb[132].mxu1  ;;  %v6827_v44 = vmax.bf16 %v21327_v32, %v6763_v28 }
 0x595   : > { %v5925_v48 = vadd.bf16 %v18258_v38, %v5852_v30  ;;  %v6195_v47 = vpop.f32.mrb[133].mxu1  ;;  %v21590_v30 = vpack.c.bf16 %v17637_v55, %v17632_v42 }
 0x596   : > { %v5924_v53 = vadd.bf16 %v18258_v38, %v5851_v8  ;;  %v14296_v5 = vpop.f32.mrb[134].mxu1  ;;  %14433 = vmatprep.mubr.bf16.mxu0 %v6827_v44 }
 0x597   : > { %v5989_v26 = vadd.bf16 %v5925_v48, %v21585_v34  ;;  %v6693_v27 = vpack.c.bf16 %v14296_v5, %v14295_v59  ;;  %v6198_v10 = vpop.f32.mrb[135].mxu1  ;;  %14434 = vmatmul.mubr.bf16.vlgmr.msra.gmra.mrb[0].mxu0 %v6828_v50 }
 0x598   : > { %v6692_v39 = vpack.c.bf16 %v6198_v10, %v6195_v47  ;;  %v5988_v3 = vadd.bf16 %v5924_v53, %v21588_v7 }
 0x599   : > { %v6766_v31 = vadd.bf16 %v18524_v22, %v6693_v27  ;;  %v6053_v63 = vmax.bf16 %v21327_v32, %v5989_v26 }
 0x59a   : > { %v6765_v19 = vadd.bf16 %v18524_v22, %v6692_v39  ;;  %v6052_v9 = vmax.bf16 %v21327_v32, %v5988_v3 }
 0x59b   : > { %v6830_v46 = vmax.bf16 %v21327_v32, %v6766_v31 }
 0x59c   : > { %v14299_v54 = vpop.f32.mrb[136].mxu1  ;;  %14361 = vmatprep.mubr.bf16.mxu1 %v6052_v9  ;;  %v6829_v14 = vmax.bf16 %v21327_v32, %v6765_v19 }
 0x59d   : > { %v6211_v36 = vpop.f32.mrb[137].mxu1  ;;  %14362 = vmatmul.mubr.bf16.gmra.mrb[200].mxu1 %v6053_v63 }
 0x59e   : > { %v14300_v45 = vpop.f32.mrb[138].mxu1  ;;  %14437 = vmatprep.mubr.bf16.mxu0 %v6829_v14  ;;  %v21591_v14 = vpack.c.bf16 %v17685_v1, %v17680_v4 }
 0x59f   : > { %v6695_v15 = vpack.c.bf16 %v14300_v45, %v14299_v54  ;;  %v6214_v43 = vpop.f32.mrb[139].mxu1  ;;  %14438 = vmatmul.mubr.bf16.gmra.mrb[4].mxu0 %v6830_v46 }
 0x5a0   : > { %v6694_v61 = vpack.c.bf16 %v6214_v43, %v6211_v36  ;;  %v14223_v41 = vpop.f32.mrb[204].mxu0  ;;  %v21592_v43 = vpack.c.bf16 %v17670_v56, %v17665_v51 }
 0x5a1   : > { %v6768_v16 = vadd.bf16 %v18524_v22, %v6695_v15  ;;  %v5608_v62 = vpop.f32.mrb[205].mxu0 }
 0x5a2   : > { %v6767_v6 = vadd.bf16 %v18524_v22, %v6694_v61  ;;  %v14224_v21 = vpop.f32.mrb[206].mxu0 }
 0x5a3   : > { %v5854_v12 = vpack.c.bf16 %v14224_v21, %v14223_v41  ;;  %v5611_v52 = vpop.f32.mrb[207].mxu0  ;;  %v6832_v35 = vmax.bf16 %v21327_v32, %v6768_v16  ;;  %v15098_v16 = vld [vmem:[%s21047_s3 + $0x1b0] sm:$0xff]  }
 0x5a4   : > { %v5853_v11 = vpack.c.bf16 %v5611_v52, %v5608_v62  ;;  %v14303_v23 = vpop.f32.mrb[140].mxu1  ;;  %v6831_v37 = vmax.bf16 %v21327_v32, %v6767_v6  ;;  %14573 = vmatprep.subr.bf16.mxu1 %v15098_v16 }
 0x5a5   : > { %v5927_v20 = vadd.bf16 %v18258_v38, %v5854_v12  ;;  %v6227_v25 = vpop.f32.mrb[141].mxu1  ;;  %14574 = vmatpush3.bf16.msra.mxu1 %v15098_v16  ;;  %v21599_v16 = vld [vmem:[#allocation184_spill] sm:$0xff] }
 0x5a6   : > { %v5926_v17 = vadd.bf16 %v18258_v38, %v5853_v11  ;;  %v14304_v33 = vpop.f32.mrb[142].mxu1  ;;  %14441 = vmatprep.mubr.bf16.mxu0 %v6831_v37 }
 0x5a7   : > { %v5991_v0 = vadd.bf16 %v5927_v20, %v21589_v24  ;;  %v6697_v2 = vpack.c.bf16 %v14304_v33, %v14303_v23  ;;  %v6230_v28 = vpop.f32.mrb[143].mxu1  ;;  %14442 = vmatmul.mubr.bf16.gmra.mrb[8].mxu0 %v6832_v35 }
 0x5a8   : > { %v6696_v57 = vpack.c.bf16 %v6230_v28, %v6227_v25  ;;  %v5990_v49 = vadd.bf16 %v5926_v17, %v21590_v30 }
 0x5a9   : > { %v6770_v8 = vadd.bf16 %v18524_v22, %v6697_v2  ;;  %v6055_v50 = vmax.bf16 %v21327_v32, %v5991_v0 }
 0x5aa   : > { %v6769_v59 = vadd.bf16 %v18524_v22, %v6696_v57  ;;  %v6054_v44 = vmax.bf16 %v21327_v32, %v5990_v49 }
 0x5ab   : > { %v6834_v18 = vmax.bf16 %v21327_v32, %v6770_v8 }
 0x5ac   : > { %v14307_v48 = vpop.f32.mrb[144].mxu1  ;;  %14365 = vmatprep.mubr.bf16.mxu1 %v6054_v44  ;;  %v6833_v13 = vmax.bf16 %v21327_v32, %v6769_v59  ;;  %v21593_v44 = vld [vmem:[#allocation180_spill] sm:$0xff] }
 0x5ad   : > { %v6243_v47 = vpop.f32.mrb[145].mxu1  ;;  %14366 = vmatmul.mubr.bf16.gmra.mrb[204].mxu1 %v6055_v50  ;;  %v21594_v50 = vld [vmem:[#allocation179_spill] sm:$0xff] }
 0x5ae   : > { %v14308_v53 = vpop.f32.mrb[146].mxu1  ;;  %14445 = vmatprep.mubr.bf16.mxu0 %v6833_v13 }
 0x5af   : > { %v6699_v42 = vpack.c.bf16 %v14308_v53, %v14307_v48  ;;  %v6246_v55 = vpop.f32.mrb[147].mxu1  ;;  %14446 = vmatmul.mubr.bf16.gmra.mrb[12].mxu0 %v6834_v18  ;;  %v21595_v48 = vpack.c.bf16 %v21593_v44, %v21594_v50 }
 0x5b0   : > { %v6698_v5 = vpack.c.bf16 %v6246_v55, %v6243_v47  ;;  %v14227_v34 = vpop.f32.mrb[208].mxu0  ;;  %v21597_v55 = vld [vmem:[#allocation177_spill] sm:$0xff] }
 0x5b1   : > { %v6772_v26 = vadd.bf16 %v18524_v22, %v6699_v42  ;;  %v5624_v27 = vpop.f32.mrb[209].mxu0  ;;  %v21596_v42 = vld [vmem:[#allocation178_spill] sm:$0xff] }
 0x5b2   : > { %v6771_v10 = vadd.bf16 %v18524_v22, %v6698_v5  ;;  %v14228_v39 = vpop.f32.mrb[210].mxu0  ;;  %v21598_v5 = vpack.c.bf16 %v21596_v42, %v21597_v55 }
 0x5b3   : > { %v5856_v40 = vpack.c.bf16 %v14228_v39, %v14227_v34  ;;  %v5627_v58 = vpop.f32.mrb[211].mxu0  ;;  %v6836_v29 = vmax.bf16 %v21327_v32, %v6772_v26 }
 0x5b4   : > { %v5855_v7 = vpack.c.bf16 %v5627_v58, %v5624_v27  ;;  %v14311_v3 = vpop.f32.mrb[148].mxu1  ;;  %v6835_v31 = vmax.bf16 %v21327_v32, %v6771_v10 }
 0x5b5   : > { %v5929_v19 = vadd.bf16 %v18258_v38, %v5856_v40  ;;  %v6259_v9 = vpop.f32.mrb[149].mxu1 }
 0x5b6   : > { %v5928_v63 = vadd.bf16 %v18258_v38, %v5855_v7  ;;  %v14312_v54 = vpop.f32.mrb[150].mxu1  ;;  %14449 = vmatprep.mubr.bf16.mxu0 %v6835_v31 }
 0x5b7   : > { %v5993_v46 = vadd.bf16 %v5929_v19, %v21591_v14  ;;  %v6701_v36 = vpack.c.bf16 %v14312_v54, %v14311_v3  ;;  %v6262_v45 = vpop.f32.mrb[151].mxu1  ;;  %14450 = vmatmul.mubr.bf16.gmra.mrb[16].mxu0 %v6836_v29 }
 0x5b8   : > { %v6700_v15 = vpack.c.bf16 %v6262_v45, %v6259_v9  ;;  %v5992_v61 = vadd.bf16 %v5928_v63, %v21592_v43 }
 0x5b9   : > { %v6774_v41 = vadd.bf16 %v18524_v22, %v6701_v36  ;;  %v6057_v4 = vmax.bf16 %v21327_v32, %v5993_v46 }
 0x5ba   : > { %v6773_v62 = vadd.bf16 %v18524_v22, %v6700_v15  ;;  %v6056_v6 = vmax.bf16 %v21327_v32, %v5992_v61 }
 0x5bb   : > { %v6838_v51 = vmax.bf16 %v21327_v32, %v6774_v41 }
 0x5bc   : > { %v14315_v1 = vpop.f32.mrb[152].mxu1  ;;  %14369 = vmatprep.mubr.bf16.mxu1 %v6056_v6  ;;  %v6837_v21 = vmax.bf16 %v21327_v32, %v6773_v62  ;;  %v21600_v62 = vld [vmem:[#allocation183_spill] sm:$0xff] }
 0x5bd   : > { %v6275_v56 = vpop.f32.mrb[153].mxu1  ;;  %14370 = vmatmul.mubr.bf16.gmra.mrb[208].mxu1 %v6057_v4  ;;  %v21601_v6 = vpack.c.bf16 %v21599_v16, %v21600_v62  ;;  %v21612_v16 = vld [vmem:[#allocation191_spill] sm:$0xff] }
 0x5be   : > { %v14316_v12 = vpop.f32.mrb[154].mxu1  ;;  %14453 = vmatprep.mubr.bf16.mxu0 %v6837_v21  ;;  %v21602_v21 = vld [vmem:[#allocation182_spill] sm:$0xff] }
 0x5bf   : > { %v6703_v52 = vpack.c.bf16 %v14316_v12, %v14315_v1  ;;  %v6278_v11 = vpop.f32.mrb[155].mxu1  ;;  %14454 = vmatmul.mubr.bf16.gmra.mrb[20].mxu0 %v6838_v51  ;;  %v21603_v51 = vld [vmem:[#allocation181_spill] sm:$0xff] }
 0x5c0   : > { %v6702_v23 = vpack.c.bf16 %v6278_v11, %v6275_v56  ;;  %v14231_v37 = vpop.f32.mrb[212].mxu0  ;;  %v21604_v56 = vpack.c.bf16 %v21602_v21, %v21603_v51  ;;  %v15099_v11 = vld [vmem:[%s21049_s5] ss:$8 sps:$4 sm:$0xff]  }
 0x5c1   : > { %v6776_v35 = vadd.bf16 %v18524_v22, %v6703_v52  ;;  %v5640_v20 = vpop.f32.mrb[213].mxu0  ;;  %v21614_v51 = vld [vmem:[#allocation190_spill] sm:$0xff] }
 0x5c2   : > { %v6775_v25 = vadd.bf16 %v18524_v22, %v6702_v23  ;;  %v14232_v17 = vpop.f32.mrb[214].mxu0  ;;  %v15101_v23 = vld [vmem:[%s21049_s5 + $0x4] ss:$8 sps:$4 sm:$0xff]  }
 0x5c3   : > { %v5858_v33 = vpack.c.bf16 %v14232_v17, %v14231_v37  ;;  %v5643_v24 = vpop.f32.mrb[215].mxu0  ;;  %v6840_v57 = vmax.bf16 %v21327_v32, %v6776_v35  ;;  %v15102_v37 = vld [vmem:[%s21047_s3 + $0x1b8] sm:$0xff]   ;;  %8609 = vmatprep.subr.bf16.mxu0 %v15101_v23 }
 0x5c4   : > { %v5857_v0 = vpack.c.bf16 %v5643_v24, %v5640_v20  ;;  %v14319_v2 = vpop.f32.mrb[156].mxu1  ;;  %v6839_v28 = vmax.bf16 %v21327_v32, %v6775_v25  ;;  %8610 = vmatpush1.bf16.msra.mxu0 %v15099_v11  ;;  %14575 = vmatprep.subr.bf16.mxu1 %v15102_v37 }
 0x5c5   : > { %v5931_v30 = vadd.bf16 %v18258_v38, %v5858_v33  ;;  %v6291_v49 = vpop.f32.mrb[157].mxu1  ;;  %14576 = vmatpush3.bf16.msra.mxu1 %v15102_v37 }
 0x5c6   : > { %v5930_v8 = vadd.bf16 %v18258_v38, %v5857_v0  ;;  %v14320_v59 = vpop.f32.mrb[158].mxu1  ;;  %14457 = vmatprep.mubr.bf16.mxu0 %v6839_v28 }
 0x5c7   : > { %v5995_v13 = vadd.bf16 %v5931_v30, %v21595_v48  ;;  %v6705_v18 = vpack.c.bf16 %v14320_v59, %v14319_v2  ;;  %v6294_v47 = vpop.f32.mrb[159].mxu1  ;;  %14458 = vmatmul.mubr.bf16.gmra.mrb[24].mxu0 %v6840_v57 }
 0x5c8   : > { %v6704_v53 = vpack.c.bf16 %v6294_v47, %v6291_v49  ;;  %v5994_v34 = vadd.bf16 %v5930_v8, %v21598_v5  ;;  %v21606_v47 = vld [vmem:[#allocation187_spill] sm:$0xff]  ;;  %v21608_v5 = vld [vmem:[#allocation186_spill] sm:$0xff] }
 0x5c9   : > { %v6778_v26 = vadd.bf16 %v18524_v22, %v6705_v18  ;;  %v6059_v39 = vmax.bf16 %v21327_v32, %v5995_v13  ;;  %v21605_v18 = vld [vmem:[#allocation188_spill] sm:$0xff] }
 0x5ca   : > { %v6777_v27 = vadd.bf16 %v18524_v22, %v6704_v53  ;;  %v6058_v10 = vmax.bf16 %v21327_v32, %v5994_v34  ;;  %v21607_v53 = vpack.c.bf16 %v21605_v18, %v21606_v47  ;;  %v21609_v34 = vld [vmem:[#allocation185_spill] sm:$0xff] }
 0x5cb   : > { %v6842_v58 = vmax.bf16 %v21327_v32, %v6778_v26  ;;  %v21610_v26 = vpack.c.bf16 %v21608_v5, %v21609_v34 }
 0x5cc   : > { %14373 = vmatprep.mubr.bf16.mxu1 %v6058_v10  ;;  %v6841_v40 = vmax.bf16 %v21327_v32, %v6777_v27 }
 0x5cd   : > { %14374 = vmatmul.mubr.bf16.gmra.mrb[212].mxu1 %v6059_v39 }
 0x5ce   : > { %14461 = vmatprep.mubr.bf16.mxu0 %v6841_v40 }
 0x5cf   : > { %14462 = vmatmul.mubr.bf16.gmra.mrb[28].mxu0 %v6842_v58 }
 0x5d0   : > { %v14235_v7 = vpop.f32.mrb[216].mxu0  ;;  %v14323_v3 = vpop.f32.mrb[160].mxu1 }
 0x5d1   : > { %v5656_v31 = vpop.f32.mrb[217].mxu0  ;;  %v6307_v29 = vpop.f32.mrb[161].mxu1 }
 0x5d2   : > { %v14236_v19 = vpop.f32.mrb[218].mxu0  ;;  %v14324_v9 = vpop.f32.mrb[162].mxu1 }
 0x5d3   : > { %v5860_v63 = vpack.c.bf16 %v14236_v19, %v14235_v7  ;;  %v6707_v54 = vpack.c.bf16 %v14324_v9, %v14323_v3  ;;  %v5659_v14 = vpop.f32.mrb[219].mxu0  ;;  %v6310_v46 = vpop.f32.mrb[163].mxu1 }
 0x5d4   : > { %v5859_v36 = vpack.c.bf16 %v5659_v14, %v5656_v31  ;;  %v6706_v45 = vpack.c.bf16 %v6310_v46, %v6307_v29 }
 0x5d5   : > { %v5933_v15 = vadd.bf16 %v18258_v38, %v5860_v63  ;;  %v6780_v43 = vadd.bf16 %v18524_v22, %v6707_v54 }
 0x5d6   : > { %v5932_v61 = vadd.bf16 %v18258_v38, %v5859_v36  ;;  %v6779_v41 = vadd.bf16 %v18524_v22, %v6706_v45 }
 0x5d7   : > { %v5997_v4 = vadd.bf16 %v5933_v15, %v21601_v6  ;;  %v6844_v52 = vmax.bf16 %v21327_v32, %v6780_v43 }
 0x5d8   : > { %v6843_v1 = vmax.bf16 %v21327_v32, %v6779_v41  ;;  %v5996_v12 = vadd.bf16 %v5932_v61, %v21604_v56  ;;  %v21611_v41 = vld [vmem:[#allocation192_spill] sm:$0xff]  ;;  %v21615_v56 = vld [vmem:[#allocation189_spill] sm:$0xff] }
 0x5d9   : > { %v6061_v20 = vmax.bf16 %v21327_v32, %v5997_v4  ;;  %v21613_v62 = vpack.c.bf16 %v21611_v41, %v21612_v16  ;;  %v15103_v4 = vld [vmem:[%s21049_s5 + $0x10] ss:$8 sps:$4 sm:$0xff]  }
 0x5da   : > { %14465 = vmatprep.mubr.bf16.mxu0 %v6843_v1  ;;  %v6060_v35 = vmax.bf16 %v21327_v32, %v5996_v12  ;;  %v15105_v1 = vld [vmem:[%s21049_s5 + $0x14] ss:$8 sps:$4 sm:$0xff]   ;;  %v21616_v12 = vpack.c.bf16 %v21614_v51, %v21615_v56 }
 0x5db   : > { %14466 = vmatmul.mubr.bf16.gmra.mrb[32].mxu0 %v6844_v52  ;;  %8611 = vmatprep.subr.bf16.mxu0 %v15105_v1  ;;  %v21626_v1 = vld [vmem:[#allocation198_spill] sm:$0xff] }
 0x5dc   : > { %14377 = vmatprep.mubr.bf16.mxu1 %v6060_v35  ;;  %8612 = vmatpush1.bf16.msra.mxu0 %v15103_v4 }
 0x5dd   : > { %14378 = vmatmul.mubr.bf16.gmra.mrb[216].mxu1 %v6061_v20 }
 0x5e0   : > { %v14239_v25 = vpop.f32.mrb[220].mxu0  ;;  %v14327_v17 = vpop.f32.mrb[164].mxu1 }
 0x5e1   : > { %v5672_v33 = vpop.f32.mrb[221].mxu0  ;;  %v6323_v24 = vpop.f32.mrb[165].mxu1 }
 0x5e2   : > { %v14240_v0 = vpop.f32.mrb[222].mxu0  ;;  %v14328_v2 = vpop.f32.mrb[166].mxu1 }
 0x5e3   : > { %v5862_v28 = vpack.c.bf16 %v14240_v0, %v14239_v25  ;;  %v6709_v57 = vpack.c.bf16 %v14328_v2, %v14327_v17  ;;  %v5675_v30 = vpop.f32.mrb[223].mxu0  ;;  %v6326_v49 = vpop.f32.mrb[167].mxu1 }
 0x5e4   : > { %v5861_v8 = vpack.c.bf16 %v5675_v30, %v5672_v33  ;;  %v6708_v59 = vpack.c.bf16 %v6326_v49, %v6323_v24 }
 0x5e5   : > { %v5935_v44 = vadd.bf16 %v18258_v38, %v5862_v28  ;;  %v6782_v50 = vadd.bf16 %v18524_v22, %v6709_v57 }
 0x5e6   : > { %v5934_v48 = vadd.bf16 %v18258_v38, %v5861_v8  ;;  %v6781_v13 = vadd.bf16 %v18524_v22, %v6708_v59 }
 0x5e7   : > { %v5999_v42 = vadd.bf16 %v5935_v44, %v21607_v53  ;;  %v6846_v10 = vmax.bf16 %v21327_v32, %v6782_v50 }
 0x5e8   : > { %v6845_v55 = vmax.bf16 %v21327_v32, %v6781_v13  ;;  %v5998_v27 = vadd.bf16 %v5934_v48, %v21610_v26  ;;  %v21617_v48 = vld [vmem:[#allocation196_spill] sm:$0xff]  ;;  %v21618_v13 = vld [vmem:[#allocation195_spill] sm:$0xff] }
 0x5e9   : > { %v6063_v40 = vmax.bf16 %v21327_v32, %v5999_v42  ;;  %v21619_v18 = vpack.c.bf16 %v21617_v48, %v21618_v13  ;;  %v21620_v42 = vld [vmem:[#allocation194_spill] sm:$0xff] }
 0x5ea   : > { %14469 = vmatprep.mubr.bf16.mxu0 %v6845_v55  ;;  %v6062_v39 = vmax.bf16 %v21327_v32, %v5998_v27  ;;  %v21621_v55 = vld [vmem:[#allocation193_spill] sm:$0xff] }
 0x5eb   : > { %14470 = vmatmul.mubr.bf16.gmra.mrb[36].mxu0 %v6846_v10  ;;  %v21622_v5 = vpack.c.bf16 %v21620_v42, %v21621_v55 }
 0x5ec   : > { %14381 = vmatprep.mubr.bf16.mxu1 %v6062_v39 }
 0x5ed   : > { %14382 = vmatmul.mubr.bf16.gmra.mrb[220].mxu1 %v6063_v40 }
 0x5f0   : > { %v14243_v58 = vpop.f32.mrb[224].mxu0  ;;  %v14331_v7 = vpop.f32.mrb[168].mxu1 }
 0x5f1   : > { %v5688_v3 = vpop.f32.mrb[225].mxu0  ;;  %v6339_v31 = vpop.f32.mrb[169].mxu1 }
 0x5f2   : > { %v14244_v29 = vpop.f32.mrb[226].mxu0  ;;  %v14332_v19 = vpop.f32.mrb[170].mxu1 }
 0x5f3   : > { %v5864_v9 = vpack.c.bf16 %v14244_v29, %v14243_v58  ;;  %v6711_v63 = vpack.c.bf16 %v14332_v19, %v14331_v7  ;;  %v5691_v54 = vpop.f32.mrb[227].mxu0  ;;  %v6342_v14 = vpop.f32.mrb[171].mxu1 }
 0x5f4   : > { %v5863_v46 = vpack.c.bf16 %v5691_v54, %v5688_v3  ;;  %v6710_v36 = vpack.c.bf16 %v6342_v14, %v6339_v31 }
 0x5f5   : > { %v5937_v45 = vadd.bf16 %v18258_v38, %v5864_v9  ;;  %v6784_v15 = vadd.bf16 %v18524_v22, %v6711_v63 }
 0x5f6   : > { %v5936_v43 = vadd.bf16 %v18258_v38, %v5863_v46  ;;  %v6783_v61 = vadd.bf16 %v18524_v22, %v6710_v36 }
 0x5f7   : > { %v6001_v6 = vadd.bf16 %v5937_v45, %v21613_v62  ;;  %v6848_v11 = vmax.bf16 %v21327_v32, %v6784_v15  ;;  %v15106_v62 = vld [vmem:[%s21049_s5 + $0x20] ss:$8 sps:$4 sm:$0xff]  }
 0x5f8   : > { %v6847_v21 = vmax.bf16 %v21327_v32, %v6783_v61  ;;  %v6000_v52 = vadd.bf16 %v5936_v43, %v21616_v12  ;;  %v21623_v43 = vld [vmem:[#allocation200_spill] sm:$0xff]  ;;  %v21624_v61 = vld [vmem:[#allocation199_spill] sm:$0xff] }
 0x5f9   : > { %v6065_v37 = vmax.bf16 %v21327_v32, %v6001_v6  ;;  %v21625_v41 = vpack.c.bf16 %v21623_v43, %v21624_v61  ;;  %v15108_v6 = vld [vmem:[%s21049_s5 + $0x24] ss:$8 sps:$4 sm:$0xff]  }
 0x5fa   : > { %14473 = vmatprep.mubr.bf16.mxu0 %v6847_v21  ;;  %v6064_v23 = vmax.bf16 %v21327_v32, %v6000_v52  ;;  %v21627_v21 = vld [vmem:[#allocation197_spill] sm:$0xff]  ;;  %8613 = vmatprep.subr.bf16.mxu0 %v15108_v6  ;;  %v21638_v6 = vld [vmem:[#allocation206_spill] sm:$0xff] }
 0x5fb   : > { %14474 = vmatmul.mubr.bf16.gmra.mrb[40].mxu0 %v6848_v11  ;;  %v21628_v51 = vpack.c.bf16 %v21626_v1, %v21627_v21 }
 0x5fc   : > { %14385 = vmatprep.mubr.bf16.mxu1 %v6064_v23  ;;  %8614 = vmatpush1.bf16.msra.mxu0 %v15106_v62 }
 0x5fd   : > { %14386 = vmatmul.mubr.bf16.gmra.mrb[224].mxu1 %v6065_v37 }
 0x600   : > { %v14247_v35 = vpop.f32.mrb[228].mxu0  ;;  %v14335_v20 = vpop.f32.mrb[172].mxu1 }
 0x601   : > { %v5704_v25 = vpop.f32.mrb[229].mxu0  ;;  %v6355_v17 = vpop.f32.mrb[173].mxu1 }
 0x602   : > { %v14248_v33 = vpop.f32.mrb[230].mxu0  ;;  %v14336_v24 = vpop.f32.mrb[174].mxu1 }
 0x603   : > { %v5866_v0 = vpack.c.bf16 %v14248_v33, %v14247_v35  ;;  %v6713_v2 = vpack.c.bf16 %v14336_v24, %v14335_v20  ;;  %v5707_v28 = vpop.f32.mrb[231].mxu0  ;;  %v6358_v57 = vpop.f32.mrb[175].mxu1 }
 0x604   : > { %v5865_v30 = vpack.c.bf16 %v5707_v28, %v5704_v25  ;;  %v6712_v49 = vpack.c.bf16 %v6358_v57, %v6355_v17 }
 0x605   : > { %v5939_v8 = vadd.bf16 %v18258_v38, %v5866_v0  ;;  %v6786_v59 = vadd.bf16 %v18524_v22, %v6713_v2 }
 0x606   : > { %v5938_v44 = vadd.bf16 %v18258_v38, %v5865_v30  ;;  %v6785_v50 = vadd.bf16 %v18524_v22, %v6712_v49 }
 0x607   : > { %v6003_v47 = vadd.bf16 %v5939_v8, %v21619_v18  ;;  %v6850_v26 = vmax.bf16 %v21327_v32, %v6786_v59 }
 0x608   : > { %v6849_v53 = vmax.bf16 %v21327_v32, %v6785_v50  ;;  %v6002_v34 = vadd.bf16 %v5938_v44, %v21622_v5  ;;  %v21629_v44 = vld [vmem:[#allocation204_spill] sm:$0xff]  ;;  %v21630_v50 = vld [vmem:[#allocation203_spill] sm:$0xff] }
 0x609   : > { %v6067_v10 = vmax.bf16 %v21327_v32, %v6003_v47  ;;  %v21631_v48 = vpack.c.bf16 %v21629_v44, %v21630_v50  ;;  %v21632_v47 = vld [vmem:[#allocation202_spill] sm:$0xff] }
 0x60a   : > { %14477 = vmatprep.mubr.bf16.mxu0 %v6849_v53  ;;  %v6066_v27 = vmax.bf16 %v21327_v32, %v6002_v34  ;;  %v21633_v53 = vld [vmem:[#allocation201_spill] sm:$0xff] }
 0x60b   : > { %14478 = vmatmul.mubr.bf16.gmra.mrb[44].mxu0 %v6850_v26  ;;  %v21634_v42 = vpack.c.bf16 %v21632_v47, %v21633_v53 }
 0x60c   : > { %14389 = vmatprep.mubr.bf16.mxu1 %v6066_v27 }
 0x60d   : > { %14390 = vmatmul.mubr.bf16.gmra.mrb[228].mxu1 %v6067_v10 }
 0x610   : > { %v14251_v39 = vpop.f32.mrb[232].mxu0  ;;  %v14339_v40 = vpop.f32.mrb[176].mxu1 }
 0x611   : > { %v5720_v58 = vpop.f32.mrb[233].mxu0  ;;  %v6371_v7 = vpop.f32.mrb[177].mxu1 }
 0x612   : > { %v14252_v3 = vpop.f32.mrb[234].mxu0  ;;  %v14340_v31 = vpop.f32.mrb[178].mxu1 }
 0x613   : > { %v5868_v29 = vpack.c.bf16 %v14252_v3, %v14251_v39  ;;  %v6715_v19 = vpack.c.bf16 %v14340_v31, %v14339_v40  ;;  %v5723_v9 = vpop.f32.mrb[235].mxu0  ;;  %v6374_v63 = vpop.f32.mrb[179].mxu1 }
 0x614   : > { %v5867_v54 = vpack.c.bf16 %v5723_v9, %v5720_v58  ;;  %v6714_v14 = vpack.c.bf16 %v6374_v63, %v6371_v7 }
 0x615   : > { %v5941_v46 = vadd.bf16 %v18258_v38, %v5868_v29  ;;  %v6788_v36 = vadd.bf16 %v18524_v22, %v6715_v19 }
 0x616   : > { %v5940_v45 = vadd.bf16 %v18258_v38, %v5867_v54  ;;  %v6787_v15 = vadd.bf16 %v18524_v22, %v6714_v14 }
 0x617   : > { %v6005_v16 = vadd.bf16 %v5941_v46, %v21625_v41  ;;  %v6852_v12 = vmax.bf16 %v21327_v32, %v6788_v36  ;;  %v15109_v41 = vld [vmem:[%s21049_s5 + $0x30] ss:$8 sps:$4 sm:$0xff]  }
 0x618   : > { %v6851_v4 = vmax.bf16 %v21327_v32, %v6787_v15  ;;  %v6004_v56 = vadd.bf16 %v5940_v45, %v21628_v51  ;;  %v21635_v45 = vld [vmem:[#allocation208_spill] sm:$0xff]  ;;  %v21636_v15 = vld [vmem:[#allocation207_spill] sm:$0xff] }
 0x619   : > { %v6069_v11 = vmax.bf16 %v21327_v32, %v6005_v16  ;;  %v21637_v43 = vpack.c.bf16 %v21635_v45, %v21636_v15  ;;  %v15111_v16 = vld [vmem:[%s21049_s5 + $0x34] ss:$8 sps:$4 sm:$0xff]  }
 0x61a   : > { %14481 = vmatprep.mubr.bf16.mxu0 %v6851_v4  ;;  %v6068_v52 = vmax.bf16 %v21327_v32, %v6004_v56  ;;  %v21639_v4 = vld [vmem:[#allocation205_spill] sm:$0xff]  ;;  %8615 = vmatprep.subr.bf16.mxu0 %v15111_v16  ;;  %v21650_v16 = vld [vmem:[#allocation214_spill] sm:$0xff] }
 0x61b   : > { %14482 = vmatmul.mubr.bf16.gmra.mrb[48].mxu0 %v6852_v12  ;;  %v21640_v1 = vpack.c.bf16 %v21638_v6, %v21639_v4 }
 0x61c   : > { %14393 = vmatprep.mubr.bf16.mxu1 %v6068_v52  ;;  %8616 = vmatpush1.bf16.msra.mxu0 %v15109_v41 }
 0x61d   : > { %14394 = vmatmul.mubr.bf16.gmra.mrb[232].mxu1 %v6069_v11 }
 0x620   : > { %v14255_v23 = vpop.f32.mrb[236].mxu0  ;;  %v14343_v37 = vpop.f32.mrb[180].mxu1 }
 0x621   : > { %v5736_v35 = vpop.f32.mrb[237].mxu0  ;;  %v6387_v20 = vpop.f32.mrb[181].mxu1 }
 0x622   : > { %v14256_v25 = vpop.f32.mrb[238].mxu0  ;;  %v14344_v17 = vpop.f32.mrb[182].mxu1 }
 0x623   : > { %v5870_v33 = vpack.c.bf16 %v14256_v25, %v14255_v23  ;;  %v6717_v24 = vpack.c.bf16 %v14344_v17, %v14343_v37  ;;  %v5739_v0 = vpop.f32.mrb[239].mxu0  ;;  %v6390_v2 = vpop.f32.mrb[183].mxu1 }
 0x624   : > { %v5869_v28 = vpack.c.bf16 %v5739_v0, %v5736_v35  ;;  %v6716_v57 = vpack.c.bf16 %v6390_v2, %v6387_v20 }
 0x625   : > { %v5943_v30 = vadd.bf16 %v18258_v38, %v5870_v33  ;;  %v6790_v49 = vadd.bf16 %v18524_v22, %v6717_v24 }
 0x626   : > { %v5942_v8 = vadd.bf16 %v18258_v38, %v5869_v28  ;;  %v6789_v59 = vadd.bf16 %v18524_v22, %v6716_v57 }
 0x627   : > { %v6007_v13 = vadd.bf16 %v5943_v30, %v21631_v48  ;;  %v6854_v5 = vmax.bf16 %v21327_v32, %v6790_v49 }
 0x628   : > { %v6853_v18 = vmax.bf16 %v21327_v32, %v6789_v59  ;;  %v6006_v55 = vadd.bf16 %v5942_v8, %v21634_v42  ;;  %v21641_v8 = vld [vmem:[#allocation212_spill] sm:$0xff]  ;;  %v21642_v59 = vld [vmem:[#allocation211_spill] sm:$0xff] }
 0x629   : > { %v6071_v26 = vmax.bf16 %v21327_v32, %v6007_v13  ;;  %v21643_v44 = vpack.c.bf16 %v21641_v8, %v21642_v59  ;;  %v21644_v13 = vld [vmem:[#allocation210_spill] sm:$0xff]  ;;  %v21654_v8 = vld [vmem:[#allocation219_spill] sm:$0xff] }
 0x62a   : > { %14485 = vmatprep.mubr.bf16.mxu0 %v6853_v18  ;;  %v6070_v34 = vmax.bf16 %v21327_v32, %v6006_v55  ;;  %v21645_v18 = vld [vmem:[#allocation209_spill] sm:$0xff] }
 0x62b   : > { %14486 = vmatmul.mubr.bf16.gmra.mrb[52].mxu0 %v6854_v5  ;;  %v21646_v47 = vpack.c.bf16 %v21644_v13, %v21645_v18  ;;  %v21656_v13 = vld [vmem:[#allocation218_spill] sm:$0xff]  ;;  %v21657_v18 = vld [vmem:[#allocation217_spill] sm:$0xff] }
 0x62c   : > { %14397 = vmatprep.mubr.bf16.mxu1 %v6070_v34 }
 0x62d   : > { %14398 = vmatmul.mubr.bf16.gmra.mrb[236].mxu1 %v6071_v26 }
 0x630   : > { %v14259_v27 = vpop.f32.mrb[240].mxu0  ;;  %v14347_v10 = vpop.f32.mrb[184].mxu1 }
 0x631   : > { %v5752_v39 = vpop.f32.mrb[241].mxu0  ;;  %v6403_v40 = vpop.f32.mrb[185].mxu1 }
 0x632   : > { %v14260_v58 = vpop.f32.mrb[242].mxu0  ;;  %v14348_v7 = vpop.f32.mrb[186].mxu1 }
 0x633   : > { %v5872_v3 = vpack.c.bf16 %v14260_v58, %v14259_v27  ;;  %v6719_v31 = vpack.c.bf16 %v14348_v7, %v14347_v10  ;;  %v5755_v29 = vpop.f32.mrb[243].mxu0  ;;  %v6406_v19 = vpop.f32.mrb[187].mxu1 }
 0x634   : > { %v5871_v9 = vpack.c.bf16 %v5755_v29, %v5752_v39  ;;  %v6718_v63 = vpack.c.bf16 %v6406_v19, %v6403_v40 }
 0x635   : > { %v5945_v54 = vadd.bf16 %v18258_v38, %v5872_v3  ;;  %v6792_v14 = vadd.bf16 %v18524_v22, %v6719_v31 }
 0x636   : > { %v5944_v46 = vadd.bf16 %v18258_v38, %v5871_v9  ;;  %v6791_v36 = vadd.bf16 %v18524_v22, %v6718_v63 }
 0x637   : > { %v6009_v61 = vadd.bf16 %v5945_v54, %v21637_v43  ;;  %v6856_v51 = vmax.bf16 %v21327_v32, %v6792_v14  ;;  %v15112_v43 = vld [vmem:[%s21049_s5 + $0x40] ss:$8 sps:$4 sm:$0xff]  }
 0x638   : > { %v6855_v62 = vmax.bf16 %v21327_v32, %v6791_v36  ;;  %v6008_v21 = vadd.bf16 %v5944_v46, %v21640_v1  ;;  %v21647_v46 = vld [vmem:[#allocation216_spill] sm:$0xff]  ;;  %v21648_v36 = vld [vmem:[#allocation215_spill] sm:$0xff] }
 0x639   : > { %v6073_v12 = vmax.bf16 %v21327_v32, %v6009_v61  ;;  %v21649_v45 = vpack.c.bf16 %v21647_v46, %v21648_v36  ;;  %v15114_v61 = vld [vmem:[%s21049_s5 + $0x44] ss:$8 sps:$4 sm:$0xff]  }
 0x63a   : > { %14489 = vmatprep.mubr.bf16.mxu0 %v6855_v62  ;;  %v6072_v56 = vmax.bf16 %v21327_v32, %v6008_v21  ;;  %v21651_v62 = vld [vmem:[#allocation213_spill] sm:$0xff]  ;;  %8617 = vmatprep.subr.bf16.mxu0 %v15114_v61 }
 0x63b   : > { %14490 = vmatmul.mubr.bf16.gmra.mrb[56].mxu0 %v6856_v51  ;;  %v21652_v6 = vpack.c.bf16 %v21650_v16, %v21651_v62 }
 0x63c   : > { %14401 = vmatprep.mubr.bf16.mxu1 %v6072_v56  ;;  %8618 = vmatpush1.bf16.msra.mxu0 %v15112_v43 }
 0x63d   : > { %14402 = vmatmul.mubr.bf16.gmra.mrb[240].mxu1 %v6073_v12 }
 0x640   : > { %v14263_v52 = vpop.f32.mrb[244].mxu0  ;;  %v14351_v11 = vpop.f32.mrb[188].mxu1 }
 0x641   : > { %v5768_v23 = vpop.f32.mrb[245].mxu0  ;;  %v6419_v37 = vpop.f32.mrb[189].mxu1 }
 0x642   : > { %v14264_v35 = vpop.f32.mrb[246].mxu0  ;;  %v14352_v20 = vpop.f32.mrb[190].mxu1 }
 0x643   : > { %v5874_v25 = vpack.c.bf16 %v14264_v35, %v14263_v52  ;;  %v6721_v17 = vpack.c.bf16 %v14352_v20, %v14351_v11  ;;  %v5771_v33 = vpop.f32.mrb[247].mxu0  ;;  %v6422_v24 = vpop.f32.mrb[191].mxu1 }
 0x644   : > { %v5873_v0 = vpack.c.bf16 %v5771_v33, %v5768_v23  ;;  %v6720_v2 = vpack.c.bf16 %v6422_v24, %v6419_v37 }
 0x645   : > { %v5947_v28 = vadd.bf16 %v18258_v38, %v5874_v25  ;;  %v6794_v57 = vadd.bf16 %v18524_v22, %v6721_v17 }
 0x646   : > { %v5946_v30 = vadd.bf16 %v18258_v38, %v5873_v0  ;;  %v6793_v49 = vadd.bf16 %v18524_v22, %v6720_v2  ;;  %v12530_v0 = vld [vmem:[%s21048_s4 + $0x5] sm:$0x1] }
 0x647   : > { %v6011_v50 = vadd.bf16 %v5947_v28, %v21643_v44  ;;  %v6858_v42 = vmax.bf16 %v21327_v32, %v6794_v57 }
 0x648   : > { %v6857_v48 = vmax.bf16 %v21327_v32, %v6793_v49  ;;  %v6010_v53 = vadd.bf16 %v5946_v30, %v21646_v47  ;;  %v21653_v49 = vld [vmem:[#allocation220_spill] sm:$0xff]  ;;  %v21658_v47 = vpack.c.bf16 %v21656_v13, %v21657_v18 }
 0x649   : > { %v6075_v5 = vmax.bf16 %v21327_v32, %v6011_v50  ;;  %v21655_v59 = vpack.c.bf16 %v21653_v49, %v21654_v8  ;;  %v7568_v50 = vpack.i.b16 %v12530_v0, %v12530_v0 }
 0x64a   : > { %14493 = vmatprep.mubr.bf16.mxu0 %v6857_v48  ;;  %v6074_v55 = vmax.bf16 %v21327_v32, %v6010_v53 }
 0x64b   : > { %14494 = vmatmul.mubr.bf16.gmra.mrb[60].mxu0 %v6858_v42 }
 0x64c   : > { %14405 = vmatprep.mubr.bf16.mxu1 %v6074_v55 }
 0x64d   : > { %14406 = vmatmul.mubr.bf16.gmra.mrb[244].mxu1 %v6075_v5 }
 0x650   : > { %v14267_v34 = vpop.f32.mrb[248].mxu0  ;;  %v14355_v26 = vpop.f32.mrb[192].mxu1 }
 0x651   : > { %v5784_v27 = vpop.f32.mrb[249].mxu0  ;;  %v6435_v10 = vpop.f32.mrb[193].mxu1 }
 0x652   : > { %v14268_v39 = vpop.f32.mrb[250].mxu0  ;;  %v14356_v40 = vpop.f32.mrb[194].mxu1 }
 0x653   : > { %v5876_v58 = vpack.c.bf16 %v14268_v39, %v14267_v34  ;;  %v6723_v7 = vpack.c.bf16 %v14356_v40, %v14355_v26  ;;  %v5787_v3 = vpop.f32.mrb[251].mxu0  ;;  %v6438_v31 = vpop.f32.mrb[195].mxu1  ;;  %v18781_v26 = vrot.slane %v7568_v50, %v16663_v60 }
 0x654   : > { %v5875_v29 = vpack.c.bf16 %v5787_v3, %v5784_v27  ;;  %v6722_v19 = vpack.c.bf16 %v6438_v31, %v6435_v10 }
 0x655   : > { %v5949_v9 = vadd.bf16 %v18258_v38, %v5876_v58  ;;  %v6796_v63 = vadd.bf16 %v18524_v22, %v6723_v7 }
 0x656   : > { %v5948_v54 = vadd.bf16 %v18258_v38, %v5875_v29  ;;  %v6795_v14 = vadd.bf16 %v18524_v22, %v6722_v19 }
 0x657   : > { %v6013_v15 = vadd.bf16 %v5949_v9, %v21649_v45  ;;  %v6860_v1 = vmax.bf16 %v21327_v32, %v6796_v63 }
 0x658   : > { %v6859_v41 = vmax.bf16 %v21327_v32, %v6795_v14  ;;  %v6012_v4 = vadd.bf16 %v5948_v54, %v21652_v6  ;;  %v15115_v6 = vld [vmem:[%s21049_s5 + $0x50] ss:$8 sps:$4 sm:$0xff]  }
 0x659   : > { %v6077_v51 = vmax.bf16 %v21327_v32, %v6013_v15 }
 0x65a   : > { %14497 = vmatprep.mubr.bf16.mxu0 %v6859_v41  ;;  %v6076_v21 = vmax.bf16 %v21327_v32, %v6012_v4  ;;  %v15117_v4 = vld [vmem:[%s21049_s5 + $0x54] ss:$8 sps:$4 sm:$0xff]  }
 0x65b   : > { %14498 = vmatmul.mubr.bf16.gmra.mrb[64].mxu0 %v6860_v1  ;;  %8619 = vmatprep.subr.bf16.mxu0 %v15117_v4 }
 0x65c   : > { %14409 = vmatprep.mubr.bf16.mxu1 %v6076_v21  ;;  %8620 = vmatpush1.bf16.msra.mxu0 %v15115_v6 }
 0x65d   : > { %14410 = vmatmul.mubr.bf16.gmra.mrb[248].mxu1 %v6077_v51 }
 0x660   : > { %v14271_v56 = vpop.f32.mrb[252].mxu0  ;;  %v14359_v12 = vpop.f32.mrb[196].mxu1 }
 0x661   : > { %v5800_v52 = vpop.f32.mrb[253].mxu0  ;;  %v6451_v11 = vpop.f32.mrb[197].mxu1 }
 0x662   : > { %v14272_v23 = vpop.f32.mrb[254].mxu0  ;;  %v14360_v37 = vpop.f32.mrb[198].mxu1 }
 0x663   : > { %v5878_v35 = vpack.c.bf16 %v14272_v23, %v14271_v56  ;;  %v6725_v20 = vpack.c.bf16 %v14360_v37, %v14359_v12  ;;  %v5803_v25 = vpop.f32.mrb[255].mxu0  ;;  %v6454_v17 = vpop.f32.mrb[199].mxu1 }
 0x664   : > { %v5877_v33 = vpack.c.bf16 %v5803_v25, %v5800_v52  ;;  %v6724_v24 = vpack.c.bf16 %v6454_v17, %v6451_v11 }
 0x665   : > { %v5951_v2 = vadd.bf16 %v18258_v38, %v5878_v35  ;;  %v6798_v28 = vadd.bf16 %v18524_v22, %v6725_v20 }
 0x666   : > { %v5950_v57 = vadd.bf16 %v18258_v38, %v5877_v33  ;;  %v6797_v30 = vadd.bf16 %v18524_v22, %v6724_v24 }
 0x667   : > { %v6015_v44 = vadd.bf16 %v5951_v2, %v21655_v59  ;;  %v6862_v42 = vmax.bf16 %v21327_v32, %v6798_v28 }
 0x668   : > { %v6861_v48 = vmax.bf16 %v21327_v32, %v6797_v30  ;;  %v6014_v53 = vadd.bf16 %v5950_v57, %v21658_v47 }
 0x669   : > { %v6079_v38 = vmax.bf16 %v21327_v32, %v6015_v44 }
 0x66a   : > { %v14435_v55 = vpop.f32.mrb[0].mxu0  ;;  %14501 = vmatprep.mubr.bf16.mxu0 %v6861_v48  ;;  %v6078_v5 = vmax.bf16 %v21327_v32, %v6014_v53 }
 0x66b   : > { %v6990_v34 = vpop.f32.mrb[1].mxu0  ;;  %14502 = vmatmul.mubr.bf16.gmra.mrb[68].mxu0 %v6862_v42 }
 0x66c   : > { %14413 = vmatprep.mubr.bf16.mxu1 %v6078_v5  ;;  %v14436_v27 = vpop.f32.mrb[2].mxu0 }
 0x66d   : > { %v7502_v10 = vpack.c.bf16 %v14436_v27, %v14435_v55  ;;  %14414 = vmatmul.mubr.bf16.gmra.mrb[252].mxu1 %v6079_v38  ;;  %v6993_v39 = vpop.f32.mrb[3].mxu0 }
 0x66e   : > { %v7501_v40 = vpack.c.bf16 %v6993_v39, %v6990_v34 }
 0x66f   : > { %v7575_v58 = vadd.bf16 %v18781_v26, %v7502_v10 }
 0x670   : > { %v7574_v7 = vadd.bf16 %v18781_v26, %v7501_v40  ;;  %v14363_v3 = vpop.f32.mrb[200].mxu1 }
 0x671   : > { %v6467_v31 = vpop.f32.mrb[201].mxu1  ;;  %v7639_v63 = vmax.bf16 %v21327_v32, %v7575_v58 }
 0x672   : > { %v14364_v29 = vpop.f32.mrb[202].mxu1  ;;  %v14439_v19 = vpop.f32.mrb[4].mxu0  ;;  %v7638_v9 = vmax.bf16 %v21327_v32, %v7574_v7 }
 0x673   : > { %v6727_v54 = vpack.c.bf16 %v14364_v29, %v14363_v3  ;;  %v6470_v14 = vpop.f32.mrb[203].mxu1  ;;  %v7006_v46 = vpop.f32.mrb[5].mxu0 }
 0x674   : > { %v6726_v36 = vpack.c.bf16 %v6470_v14, %v6467_v31  ;;  %v14440_v45 = vpop.f32.mrb[6].mxu0  ;;  %14577 = vmatprep.mubr.bf16.mxu1 %v7638_v9 }
 0x675   : > { %v6800_v15 = vadd.bf16 %v18524_v22, %v6727_v54  ;;  %v7504_v43 = vpack.c.bf16 %v14440_v45, %v14439_v19  ;;  %v7009_v61 = vpop.f32.mrb[7].mxu0  ;;  %14578 = vmatmul.mubr.bf16.vlgmr.msra.gmra.mrb[0].mxu1 %v7639_v63 }
 0x676   : > { %v6799_v41 = vadd.bf16 %v18524_v22, %v6726_v36  ;;  %v7503_v16 = vpack.c.bf16 %v7009_v61, %v7006_v46 }
 0x677   : > { %v7577_v62 = vadd.bf16 %v18781_v26, %v7504_v43  ;;  %v6864_v51 = vmax.bf16 %v21327_v32, %v6800_v15 }
 0x678   : > { %v7576_v1 = vadd.bf16 %v18781_v26, %v7503_v16  ;;  %v6863_v21 = vmax.bf16 %v21327_v32, %v6799_v41 }
 0x679   : > { %v7641_v52 = vmax.bf16 %v21327_v32, %v7577_v62 }
 0x67a   : > { %v14443_v56 = vpop.f32.mrb[8].mxu0  ;;  %14505 = vmatprep.mubr.bf16.mxu0 %v6863_v21  ;;  %v7640_v12 = vmax.bf16 %v21327_v32, %v7576_v1  ;;  %v15118_v1 = vld [vmem:[%s21049_s5 + $0x60] ss:$8 sps:$4 sm:$0xff]   ;;  %v15120_v21 = vld [vmem:[%s21049_s5 + $0x64] ss:$8 sps:$4 sm:$0xff]  }
 0x67b   : > { %v7022_v11 = vpop.f32.mrb[9].mxu0  ;;  %14506 = vmatmul.mubr.bf16.gmra.mrb[72].mxu0 %v6864_v51  ;;  %8621 = vmatprep.subr.bf16.mxu0 %v15120_v21 }
 0x67c   : > { %v14444_v23 = vpop.f32.mrb[10].mxu0  ;;  %14581 = vmatprep.mubr.bf16.mxu1 %v7640_v12  ;;  %8622 = vmatpush1.bf16.msra.mxu0 %v15118_v1 }
 0x67d   : > { %v7506_v37 = vpack.c.bf16 %v14444_v23, %v14443_v56  ;;  %v7025_v35 = vpop.f32.mrb[11].mxu0  ;;  %14582 = vmatmul.mubr.bf16.gmra.mrb[4].mxu1 %v7641_v52 }
 0x67e   : > { %v7505_v20 = vpack.c.bf16 %v7025_v35, %v7022_v11 }
 0x67f   : > { %v7579_v25 = vadd.bf16 %v18781_v26, %v7506_v37 }
 0x680   : > { %v7578_v17 = vadd.bf16 %v18781_v26, %v7505_v20  ;;  %v14367_v33 = vpop.f32.mrb[204].mxu1 }
 0x681   : > { %v6483_v24 = vpop.f32.mrb[205].mxu1  ;;  %v7643_v57 = vmax.bf16 %v21327_v32, %v7579_v25 }
 0x682   : > { %v14368_v0 = vpop.f32.mrb[206].mxu1  ;;  %v14447_v2 = vpop.f32.mrb[12].mxu0  ;;  %v7642_v28 = vmax.bf16 %v21327_v32, %v7578_v17 }
 0x683   : > { %v6729_v30 = vpack.c.bf16 %v14368_v0, %v14367_v33  ;;  %v6486_v49 = vpop.f32.mrb[207].mxu1  ;;  %v7038_v8 = vpop.f32.mrb[13].mxu0 }
 0x684   : > { %v6728_v59 = vpack.c.bf16 %v6486_v49, %v6483_v24  ;;  %v14448_v44 = vpop.f32.mrb[14].mxu0  ;;  %14585 = vmatprep.mubr.bf16.mxu1 %v7642_v28 }
 0x685   : > { %v6802_v50 = vadd.bf16 %v18524_v22, %v6729_v30  ;;  %v7508_v48 = vpack.c.bf16 %v14448_v44, %v14447_v2  ;;  %v7041_v13 = vpop.f32.mrb[15].mxu0  ;;  %14586 = vmatmul.mubr.bf16.gmra.mrb[8].mxu1 %v7643_v57 }
 0x686   : > { %v6801_v18 = vadd.bf16 %v18524_v22, %v6728_v59  ;;  %v7507_v47 = vpack.c.bf16 %v7041_v13, %v7038_v8 }
 0x687   : > { %v7581_v53 = vadd.bf16 %v18781_v26, %v7508_v48  ;;  %v6866_v5 = vmax.bf16 %v21327_v32, %v6802_v50 }
 0x688   : > { %v7580_v42 = vadd.bf16 %v18781_v26, %v7507_v47  ;;  %v6865_v55 = vmax.bf16 %v21327_v32, %v6801_v18 }
 0x689   : > { %v7645_v27 = vmax.bf16 %v21327_v32, %v7581_v53 }
 0x68a   : > { %v14451_v38 = vpop.f32.mrb[16].mxu0  ;;  %14509 = vmatprep.mubr.bf16.mxu0 %v6865_v55  ;;  %v7644_v34 = vmax.bf16 %v21327_v32, %v7580_v42 }
 0x68b   : > { %v7054_v10 = vpop.f32.mrb[17].mxu0  ;;  %14510 = vmatmul.mubr.bf16.gmra.mrb[76].mxu0 %v6866_v5 }
 0x68c   : > { %v14452_v39 = vpop.f32.mrb[18].mxu0  ;;  %14589 = vmatprep.mubr.bf16.mxu1 %v7644_v34 }
 0x68d   : > { %v7510_v40 = vpack.c.bf16 %v14452_v39, %v14451_v38  ;;  %v7057_v58 = vpop.f32.mrb[19].mxu0  ;;  %14590 = vmatmul.mubr.bf16.gmra.mrb[12].mxu1 %v7645_v27 }
 0x68e   : > { %v7509_v7 = vpack.c.bf16 %v7057_v58, %v7054_v10 }
 0x68f   : > { %v7583_v3 = vadd.bf16 %v18781_v26, %v7510_v40 }
 0x690   : > { %v7582_v31 = vadd.bf16 %v18781_v26, %v7509_v7  ;;  %v14371_v29 = vpop.f32.mrb[208].mxu1 }
 0x691   : > { %v6499_v19 = vpop.f32.mrb[209].mxu1  ;;  %v7647_v14 = vmax.bf16 %v21327_v32, %v7583_v3 }
 0x692   : > { %v14372_v9 = vpop.f32.mrb[210].mxu1  ;;  %v14455_v63 = vpop.f32.mrb[20].mxu0  ;;  %v7646_v54 = vmax.bf16 %v21327_v32, %v7582_v31 }
 0x693   : > { %v6731_v46 = vpack.c.bf16 %v14372_v9, %v14371_v29  ;;  %v6502_v36 = vpop.f32.mrb[211].mxu1  ;;  %v7070_v45 = vpop.f32.mrb[21].mxu0 }
 0x694   : > { %v6730_v15 = vpack.c.bf16 %v6502_v36, %v6499_v19  ;;  %v14456_v43 = vpop.f32.mrb[22].mxu0  ;;  %14593 = vmatprep.mubr.bf16.mxu1 %v7646_v54 }
 0x695   : > { %v6804_v61 = vadd.bf16 %v18524_v22, %v6731_v46  ;;  %v7512_v41 = vpack.c.bf16 %v14456_v43, %v14455_v63  ;;  %v7073_v16 = vpop.f32.mrb[23].mxu0  ;;  %14594 = vmatmul.mubr.bf16.gmra.mrb[16].mxu1 %v7647_v14 }
 0x696   : > { %v6803_v62 = vadd.bf16 %v18524_v22, %v6730_v15  ;;  %v7511_v6 = vpack.c.bf16 %v7073_v16, %v7070_v45  ;;  %v15123_v16 = vld [vmem:[%s21049_s5 + $0x74] ss:$8 sps:$4 sm:$0xff]  }
 0x697   : > { %v7585_v4 = vadd.bf16 %v18781_v26, %v7512_v41  ;;  %v6868_v12 = vmax.bf16 %v21327_v32, %v6804_v61  ;;  %v15121_v41 = vld [vmem:[%s21049_s5 + $0x70] ss:$8 sps:$4 sm:$0xff]   ;;  %8623 = vmatprep.subr.bf16.mxu0 %v15123_v16 }
 0x698   : > { %v7584_v51 = vadd.bf16 %v18781_v26, %v7511_v6  ;;  %v6867_v56 = vmax.bf16 %v21327_v32, %v6803_v62  ;;  %8624 = vmatpush1.bf16.msra.mxu0 %v15121_v41 }
 0x699   : > { %v7649_v23 = vmax.bf16 %v21327_v32, %v7585_v4 }
 0x69a   : > { %v14459_v52 = vpop.f32.mrb[24].mxu0  ;;  %14513 = vmatprep.mubr.bf16.mxu0 %v6867_v56  ;;  %v7648_v11 = vmax.bf16 %v21327_v32, %v7584_v51 }
 0x69b   : > { %v7086_v37 = vpop.f32.mrb[25].mxu0  ;;  %14514 = vmatmul.mubr.bf16.gmra.mrb[80].mxu0 %v6868_v12 }
 0x69c   : > { %v14460_v35 = vpop.f32.mrb[26].mxu0  ;;  %14597 = vmatprep.mubr.bf16.mxu1 %v7648_v11 }
 0x69d   : > { %v7514_v20 = vpack.c.bf16 %v14460_v35, %v14459_v52  ;;  %v7089_v25 = vpop.f32.mrb[27].mxu0  ;;  %14598 = vmatmul.mubr.bf16.gmra.mrb[20].mxu1 %v7649_v23 }
 0x69e   : > { %v7513_v17 = vpack.c.bf16 %v7089_v25, %v7086_v37 }
 0x69f   : > { %v7587_v33 = vadd.bf16 %v18781_v26, %v7514_v20 }
 0x6a0   : > { %v7586_v24 = vadd.bf16 %v18781_v26, %v7513_v17  ;;  %v14375_v0 = vpop.f32.mrb[212].mxu1 }
 0x6a1   : > { %v6515_v2 = vpop.f32.mrb[213].mxu1  ;;  %v7651_v49 = vmax.bf16 %v21327_v32, %v7587_v33 }
 0x6a2   : > { %v14376_v28 = vpop.f32.mrb[214].mxu1  ;;  %v14463_v57 = vpop.f32.mrb[28].mxu0  ;;  %v7650_v30 = vmax.bf16 %v21327_v32, %v7586_v24 }
 0x6a3   : > { %v6733_v8 = vpack.c.bf16 %v14376_v28, %v14375_v0  ;;  %v6518_v59 = vpop.f32.mrb[215].mxu1  ;;  %v7102_v44 = vpop.f32.mrb[29].mxu0 }
 0x6a4   : > { %v6732_v50 = vpack.c.bf16 %v6518_v59, %v6515_v2  ;;  %v14464_v48 = vpop.f32.mrb[30].mxu0  ;;  %14601 = vmatprep.mubr.bf16.mxu1 %v7650_v30 }
 0x6a5   : > { %v6806_v13 = vadd.bf16 %v18524_v22, %v6733_v8  ;;  %v7516_v18 = vpack.c.bf16 %v14464_v48, %v14463_v57  ;;  %v7105_v47 = vpop.f32.mrb[31].mxu0  ;;  %14602 = vmatmul.mubr.bf16.gmra.mrb[24].mxu1 %v7651_v49 }
 0x6a6   : > { %v6805_v53 = vadd.bf16 %v18524_v22, %v6732_v50  ;;  %v7515_v42 = vpack.c.bf16 %v7105_v47, %v7102_v44 }
 0x6a7   : > { %v7589_v55 = vadd.bf16 %v18781_v26, %v7516_v18  ;;  %v6870_v34 = vmax.bf16 %v21327_v32, %v6806_v13 }
 0x6a8   : > { %v7588_v5 = vadd.bf16 %v18781_v26, %v7515_v42  ;;  %v6869_v38 = vmax.bf16 %v21327_v32, %v6805_v53 }
 0x6a9   : > { %v7653_v10 = vmax.bf16 %v21327_v32, %v7589_v55 }
 0x6aa   : > { %14517 = vmatprep.mubr.bf16.mxu0 %v6869_v38  ;;  %v7652_v27 = vmax.bf16 %v21327_v32, %v7588_v5 }
 0x6ab   : > { %14518 = vmatmul.mubr.bf16.gmra.mrb[84].mxu0 %v6870_v34 }
 0x6ac   : > { %14605 = vmatprep.mubr.bf16.mxu1 %v7652_v27 }
 0x6ad   : > { %14606 = vmatmul.mubr.bf16.gmra.mrb[28].mxu1 %v7653_v10 }
 0x6ae   : > { %v14467_v39 = vpop.f32.mrb[32].mxu0 }
 0x6af   : > { %v7118_v40 = vpop.f32.mrb[33].mxu0 }
 0x6b0   : > { %v14379_v58 = vpop.f32.mrb[216].mxu1  ;;  %v14468_v7 = vpop.f32.mrb[34].mxu0 }
 0x6b1   : > { %v7518_v3 = vpack.c.bf16 %v14468_v7, %v14467_v39  ;;  %v6531_v31 = vpop.f32.mrb[217].mxu1  ;;  %v7121_v29 = vpop.f32.mrb[35].mxu0 }
 0x6b2   : > { %v7517_v19 = vpack.c.bf16 %v7121_v29, %v7118_v40  ;;  %v14380_v9 = vpop.f32.mrb[218].mxu1 }
 0x6b3   : > { %v7591_v63 = vadd.bf16 %v18781_v26, %v7518_v3  ;;  %v6735_v54 = vpack.c.bf16 %v14380_v9, %v14379_v58  ;;  %v6534_v14 = vpop.f32.mrb[219].mxu1 }
 0x6b4   : > { %v7590_v46 = vadd.bf16 %v18781_v26, %v7517_v19  ;;  %v6734_v36 = vpack.c.bf16 %v6534_v14, %v6531_v31 }
 0x6b5   : > { %v6808_v45 = vadd.bf16 %v18524_v22, %v6735_v54  ;;  %v7655_v61 = vmax.bf16 %v21327_v32, %v7591_v63 }
 0x6b6   : > { %v6807_v15 = vadd.bf16 %v18524_v22, %v6734_v36  ;;  %v7654_v43 = vmax.bf16 %v21327_v32, %v7590_v46 }
 0x6b7   : > { %v6872_v6 = vmax.bf16 %v21327_v32, %v6808_v45 }
 0x6b8   : > { %14609 = vmatprep.mubr.bf16.mxu1 %v7654_v43  ;;  %v6871_v62 = vmax.bf16 %v21327_v32, %v6807_v15 }
 0x6b9   : > { %14610 = vmatmul.mubr.bf16.gmra.mrb[32].mxu1 %v7655_v61 }
 0x6ba   : > { %14521 = vmatprep.mubr.bf16.mxu0 %v6871_v62 }
 0x6bb   : > { %14522 = vmatmul.mubr.bf16.gmra.mrb[88].mxu0 %v6872_v6 }
 0x6be   : > { %v14471_v4 = vpop.f32.mrb[36].mxu0 }
 0x6bf   : > { %v7134_v1 = vpop.f32.mrb[37].mxu0 }
 0x6c0   : > { %v14383_v21 = vpop.f32.mrb[220].mxu1  ;;  %v14472_v51 = vpop.f32.mrb[38].mxu0 }
 0x6c1   : > { %v7520_v56 = vpack.c.bf16 %v14472_v51, %v14471_v4  ;;  %v6547_v12 = vpop.f32.mrb[221].mxu1  ;;  %v7137_v52 = vpop.f32.mrb[39].mxu0 }
 0x6c2   : > { %v7519_v11 = vpack.c.bf16 %v7137_v52, %v7134_v1  ;;  %v14384_v23 = vpop.f32.mrb[222].mxu1 }
 0x6c3   : > { %v7593_v37 = vadd.bf16 %v18781_v26, %v7520_v56  ;;  %v6737_v35 = vpack.c.bf16 %v14384_v23, %v14383_v21  ;;  %v6550_v20 = vpop.f32.mrb[223].mxu1 }
 0x6c4   : > { %v7592_v25 = vadd.bf16 %v18781_v26, %v7519_v11  ;;  %v6736_v17 = vpack.c.bf16 %v6550_v20, %v6547_v12 }
 0x6c5   : > { %v6810_v33 = vadd.bf16 %v18524_v22, %v6737_v35  ;;  %v7657_v2 = vmax.bf16 %v21327_v32, %v7593_v37 }
 0x6c6   : > { %v6809_v24 = vadd.bf16 %v18524_v22, %v6736_v17  ;;  %v7656_v0 = vmax.bf16 %v21327_v32, %v7592_v25 }
 0x6c7   : > { %v6874_v57 = vmax.bf16 %v21327_v32, %v6810_v33 }
 0x6c8   : > { %14613 = vmatprep.mubr.bf16.mxu1 %v7656_v0  ;;  %v6873_v28 = vmax.bf16 %v21327_v32, %v6809_v24 }
 0x6c9   : > { %14614 = vmatmul.mubr.bf16.gmra.mrb[36].mxu1 %v7657_v2 }
 0x6ca   : > { %14525 = vmatprep.mubr.bf16.mxu0 %v6873_v28 }
 0x6cb   : > { %14526 = vmatmul.mubr.bf16.gmra.mrb[92].mxu0 %v6874_v57 }
 0x6ce   : > { %v14475_v30 = vpop.f32.mrb[40].mxu0 }
 0x6cf   : > { %v7150_v49 = vpop.f32.mrb[41].mxu0 }
 0x6d0   : > { %v14387_v8 = vpop.f32.mrb[224].mxu1  ;;  %v14476_v59 = vpop.f32.mrb[42].mxu0 }
 0x6d1   : > { %v7522_v44 = vpack.c.bf16 %v14476_v59, %v14475_v30  ;;  %v6563_v50 = vpop.f32.mrb[225].mxu1  ;;  %v7153_v48 = vpop.f32.mrb[43].mxu0 }
 0x6d2   : > { %v7521_v13 = vpack.c.bf16 %v7153_v48, %v7150_v49  ;;  %v14388_v18 = vpop.f32.mrb[226].mxu1 }
 0x6d3   : > { %v7595_v47 = vadd.bf16 %v18781_v26, %v7522_v44  ;;  %v6739_v53 = vpack.c.bf16 %v14388_v18, %v14387_v8  ;;  %v6566_v42 = vpop.f32.mrb[227].mxu1 }
 0x6d4   : > { %v7594_v55 = vadd.bf16 %v18781_v26, %v7521_v13  ;;  %v6738_v5 = vpack.c.bf16 %v6566_v42, %v6563_v50 }
 0x6d5   : > { %v6812_v38 = vadd.bf16 %v18524_v22, %v6739_v53  ;;  %v7659_v10 = vmax.bf16 %v21327_v32, %v7595_v47 }
 0x6d6   : > { %v6811_v34 = vadd.bf16 %v18524_v22, %v6738_v5  ;;  %v7658_v27 = vmax.bf16 %v21327_v32, %v7594_v55 }
 0x6d7   : > { %v6876_v40 = vmax.bf16 %v21327_v32, %v6812_v38 }
 0x6d8   : > { %14617 = vmatprep.mubr.bf16.mxu1 %v7658_v27  ;;  %v6875_v39 = vmax.bf16 %v21327_v32, %v6811_v34 }
 0x6d9   : > { %14618 = vmatmul.mubr.bf16.gmra.mrb[40].mxu1 %v7659_v10 }
 0x6da   : > { %14529 = vmatprep.mubr.bf16.mxu0 %v6875_v39 }
 0x6db   : > { %14530 = vmatmul.mubr.bf16.gmra.mrb[96].mxu0 %v6876_v40 }
 0x6de   : > { %v14479_v58 = vpop.f32.mrb[44].mxu0 }
 0x6df   : > { %v7166_v7 = vpop.f32.mrb[45].mxu0 }
 0x6e0   : > { %v14391_v3 = vpop.f32.mrb[228].mxu1  ;;  %v14480_v31 = vpop.f32.mrb[46].mxu0 }
 0x6e1   : > { %v7524_v29 = vpack.c.bf16 %v14480_v31, %v14479_v58  ;;  %v6579_v19 = vpop.f32.mrb[229].mxu1  ;;  %v7169_v9 = vpop.f32.mrb[47].mxu0 }
 0x6e2   : > { %v7523_v63 = vpack.c.bf16 %v7169_v9, %v7166_v7  ;;  %v14392_v54 = vpop.f32.mrb[230].mxu1 }
 0x6e3   : > { %v7597_v14 = vadd.bf16 %v18781_v26, %v7524_v29  ;;  %v6741_v46 = vpack.c.bf16 %v14392_v54, %v14391_v3  ;;  %v6582_v36 = vpop.f32.mrb[231].mxu1 }
 0x6e4   : > { %v7596_v45 = vadd.bf16 %v18781_v26, %v7523_v63  ;;  %v6740_v15 = vpack.c.bf16 %v6582_v36, %v6579_v19 }
 0x6e5   : > { %v6814_v43 = vadd.bf16 %v18524_v22, %v6741_v46  ;;  %v7661_v16 = vmax.bf16 %v21327_v32, %v7597_v14 }
 0x6e6   : > { %v6813_v61 = vadd.bf16 %v18524_v22, %v6740_v15  ;;  %v7660_v41 = vmax.bf16 %v21327_v32, %v7596_v45 }
 0x6e7   : > { %v6878_v6 = vmax.bf16 %v21327_v32, %v6814_v43 }
 0x6e8   : > { %14621 = vmatprep.mubr.bf16.mxu1 %v7660_v41  ;;  %v6877_v62 = vmax.bf16 %v21327_v32, %v6813_v61 }
 0x6e9   : > { %14622 = vmatmul.mubr.bf16.gmra.mrb[44].mxu1 %v7661_v16 }
 0x6ea   : > { %14533 = vmatprep.mubr.bf16.mxu0 %v6877_v62 }
 0x6eb   : > { %14534 = vmatmul.mubr.bf16.gmra.mrb[100].mxu0 %v6878_v6 }
 0x6ee   : > { %v14483_v4 = vpop.f32.mrb[48].mxu0 }
 0x6ef   : > { %v7182_v1 = vpop.f32.mrb[49].mxu0 }
 0x6f0   : > { %v14395_v21 = vpop.f32.mrb[232].mxu1  ;;  %v14484_v51 = vpop.f32.mrb[50].mxu0 }
 0x6f1   : > { %v7526_v56 = vpack.c.bf16 %v14484_v51, %v14483_v4  ;;  %v6595_v12 = vpop.f32.mrb[233].mxu1  ;;  %v7185_v52 = vpop.f32.mrb[51].mxu0 }
 0x6f2   : > { %v7525_v11 = vpack.c.bf16 %v7185_v52, %v7182_v1  ;;  %v14396_v23 = vpop.f32.mrb[234].mxu1 }
 0x6f3   : > { %v7599_v37 = vadd.bf16 %v18781_v26, %v7526_v56  ;;  %v6743_v35 = vpack.c.bf16 %v14396_v23, %v14395_v21  ;;  %v6598_v20 = vpop.f32.mrb[235].mxu1 }
 0x6f4   : > { %v7598_v25 = vadd.bf16 %v18781_v26, %v7525_v11  ;;  %v6742_v17 = vpack.c.bf16 %v6598_v20, %v6595_v12 }
 0x6f5   : > { %v6816_v33 = vadd.bf16 %v18524_v22, %v6743_v35  ;;  %v7663_v2 = vmax.bf16 %v21327_v32, %v7599_v37 }
 0x6f6   : > { %v6815_v24 = vadd.bf16 %v18524_v22, %v6742_v17  ;;  %v7662_v0 = vmax.bf16 %v21327_v32, %v7598_v25 }
 0x6f7   : > { %v6880_v57 = vmax.bf16 %v21327_v32, %v6816_v33 }
 0x6f8   : > { %14625 = vmatprep.mubr.bf16.mxu1 %v7662_v0  ;;  %v6879_v28 = vmax.bf16 %v21327_v32, %v6815_v24 }
 0x6f9   : > { %14626 = vmatmul.mubr.bf16.gmra.mrb[48].mxu1 %v7663_v2 }
 0x6fa   : > { %14537 = vmatprep.mubr.bf16.mxu0 %v6879_v28 }
 0x6fb   : > { %14538 = vmatmul.mubr.bf16.gmra.mrb[104].mxu0 %v6880_v57 }
 0x6fe   : > { %v14487_v30 = vpop.f32.mrb[52].mxu0 }
 0x6ff   : > { %v7198_v49 = vpop.f32.mrb[53].mxu0 }
 0x700   : > { %v14399_v8 = vpop.f32.mrb[236].mxu1  ;;  %v14488_v59 = vpop.f32.mrb[54].mxu0 }
 0x701   : > { %v7528_v44 = vpack.c.bf16 %v14488_v59, %v14487_v30  ;;  %v6611_v50 = vpop.f32.mrb[237].mxu1  ;;  %v7201_v48 = vpop.f32.mrb[55].mxu0 }
 0x702   : > { %v7527_v13 = vpack.c.bf16 %v7201_v48, %v7198_v49  ;;  %v14400_v18 = vpop.f32.mrb[238].mxu1 }
 0x703   : > { %v7601_v47 = vadd.bf16 %v18781_v26, %v7528_v44  ;;  %v6745_v53 = vpack.c.bf16 %v14400_v18, %v14399_v8  ;;  %v6614_v42 = vpop.f32.mrb[239].mxu1 }
 0x704   : > { %v7600_v55 = vadd.bf16 %v18781_v26, %v7527_v13  ;;  %v6744_v5 = vpack.c.bf16 %v6614_v42, %v6611_v50 }
 0x705   : > { %v6818_v38 = vadd.bf16 %v18524_v22, %v6745_v53  ;;  %v7665_v10 = vmax.bf16 %v21327_v32, %v7601_v47 }
 0x706   : > { %v6817_v34 = vadd.bf16 %v18524_v22, %v6744_v5  ;;  %v7664_v27 = vmax.bf16 %v21327_v32, %v7600_v55 }
 0x707   : > { %v6882_v40 = vmax.bf16 %v21327_v32, %v6818_v38 }
 0x708   : > { %14629 = vmatprep.mubr.bf16.mxu1 %v7664_v27  ;;  %v6881_v39 = vmax.bf16 %v21327_v32, %v6817_v34 }
 0x709   : > { %14630 = vmatmul.mubr.bf16.gmra.mrb[52].mxu1 %v7665_v10 }
 0x70a   : > { %14541 = vmatprep.mubr.bf16.mxu0 %v6881_v39 }
 0x70b   : > { %14542 = vmatmul.mubr.bf16.gmra.mrb[108].mxu0 %v6882_v40 }
 0x70e   : > { %v14491_v58 = vpop.f32.mrb[56].mxu0 }
 0x70f   : > { %v7214_v7 = vpop.f32.mrb[57].mxu0 }
 0x710   : > { %v14403_v3 = vpop.f32.mrb[240].mxu1  ;;  %v14492_v31 = vpop.f32.mrb[58].mxu0 }
 0x711   : > { %v7530_v29 = vpack.c.bf16 %v14492_v31, %v14491_v58  ;;  %v6627_v19 = vpop.f32.mrb[241].mxu1  ;;  %v7217_v9 = vpop.f32.mrb[59].mxu0 }
 0x712   : > { %v7529_v63 = vpack.c.bf16 %v7217_v9, %v7214_v7  ;;  %v14404_v54 = vpop.f32.mrb[242].mxu1 }
 0x713   : > { %v7603_v14 = vadd.bf16 %v18781_v26, %v7530_v29  ;;  %v6747_v46 = vpack.c.bf16 %v14404_v54, %v14403_v3  ;;  %v6630_v36 = vpop.f32.mrb[243].mxu1 }
 0x714   : > { %v7602_v45 = vadd.bf16 %v18781_v26, %v7529_v63  ;;  %v6746_v15 = vpack.c.bf16 %v6630_v36, %v6627_v19 }
 0x715   : > { %v6820_v43 = vadd.bf16 %v18524_v22, %v6747_v46  ;;  %v7667_v16 = vmax.bf16 %v21327_v32, %v7603_v14 }
 0x716   : > { %v6819_v61 = vadd.bf16 %v18524_v22, %v6746_v15  ;;  %v7666_v41 = vmax.bf16 %v21327_v32, %v7602_v45  ;;  %v12555_v45 = vld [vmem:[%s21048_s4 + $0x6] sm:$0x1] }
 0x717   : > { %v6884_v6 = vmax.bf16 %v21327_v32, %v6820_v43 }
 0x718   : > { %14633 = vmatprep.mubr.bf16.mxu1 %v7666_v41  ;;  %v6883_v62 = vmax.bf16 %v21327_v32, %v6819_v61 }
 0x719   : > { %14634 = vmatmul.mubr.bf16.gmra.mrb[56].mxu1 %v7667_v16 }
 0x71a   : > { %14545 = vmatprep.mubr.bf16.mxu0 %v6883_v62  ;;  %v8379_v62 = vpack.i.b16 %v12555_v45, %v12555_v45 }
 0x71b   : > { %14546 = vmatmul.mubr.bf16.gmra.mrb[112].mxu0 %v6884_v6 }
 0x71e   : > { %v14495_v4 = vpop.f32.mrb[60].mxu0 }
 0x71f   : > { %v7230_v1 = vpop.f32.mrb[61].mxu0 }
 0x720   : > { %v14407_v21 = vpop.f32.mrb[244].mxu1  ;;  %v14496_v51 = vpop.f32.mrb[62].mxu0 }
 0x721   : > { %v7532_v56 = vpack.c.bf16 %v14496_v51, %v14495_v4  ;;  %v6643_v12 = vpop.f32.mrb[245].mxu1  ;;  %v7233_v52 = vpop.f32.mrb[63].mxu0 }
 0x722   : > { %v7531_v11 = vpack.c.bf16 %v7233_v52, %v7230_v1  ;;  %v14408_v23 = vpop.f32.mrb[246].mxu1 }
 0x723   : > { %v7605_v37 = vadd.bf16 %v18781_v26, %v7532_v56  ;;  %v6749_v35 = vpack.c.bf16 %v14408_v23, %v14407_v21  ;;  %v6646_v20 = vpop.f32.mrb[247].mxu1 }
 0x724   : > { %v7604_v25 = vadd.bf16 %v18781_v26, %v7531_v11  ;;  %v6748_v17 = vpack.c.bf16 %v6646_v20, %v6643_v12  ;;  %v18933_v12 = vrot.slane %v8379_v62, %v16663_v60 }
 0x725   : > { %v6822_v33 = vadd.bf16 %v18524_v22, %v6749_v35  ;;  %v7669_v2 = vmax.bf16 %v21327_v32, %v7605_v37 }
 0x726   : > { %v6821_v24 = vadd.bf16 %v18524_v22, %v6748_v17  ;;  %v7668_v0 = vmax.bf16 %v21327_v32, %v7604_v25 }
 0x727   : > { %v6886_v57 = vmax.bf16 %v21327_v32, %v6822_v33 }
 0x728   : > { %14637 = vmatprep.mubr.bf16.mxu1 %v7668_v0  ;;  %v6885_v28 = vmax.bf16 %v21327_v32, %v6821_v24 }
 0x729   : > { %14638 = vmatmul.mubr.bf16.gmra.mrb[60].mxu1 %v7669_v2 }
 0x72a   : > { %14549 = vmatprep.mubr.bf16.mxu0 %v6885_v28 }
 0x72b   : > { %14550 = vmatmul.mubr.bf16.gmra.mrb[116].mxu0 %v6886_v57 }
 0x72e   : > { %v14499_v30 = vpop.f32.mrb[64].mxu0 }
 0x72f   : > { %v7246_v49 = vpop.f32.mrb[65].mxu0 }
 0x730   : > { %v14411_v8 = vpop.f32.mrb[248].mxu1  ;;  %v14500_v59 = vpop.f32.mrb[66].mxu0 }
 0x731   : > { %v7534_v44 = vpack.c.bf16 %v14500_v59, %v14499_v30  ;;  %v6659_v50 = vpop.f32.mrb[249].mxu1  ;;  %v7249_v48 = vpop.f32.mrb[67].mxu0 }
 0x732   : > { %v7533_v13 = vpack.c.bf16 %v7249_v48, %v7246_v49  ;;  %v14412_v18 = vpop.f32.mrb[250].mxu1 }
 0x733   : > { %v7607_v47 = vadd.bf16 %v18781_v26, %v7534_v44  ;;  %v6751_v53 = vpack.c.bf16 %v14412_v18, %v14411_v8  ;;  %v6662_v42 = vpop.f32.mrb[251].mxu1 }
 0x734   : > { %v7606_v55 = vadd.bf16 %v18781_v26, %v7533_v13  ;;  %v6750_v5 = vpack.c.bf16 %v6662_v42, %v6659_v50 }
 0x735   : > { %v6824_v38 = vadd.bf16 %v18524_v22, %v6751_v53  ;;  %v7671_v10 = vmax.bf16 %v21327_v32, %v7607_v47 }
 0x736   : > { %v6823_v34 = vadd.bf16 %v18524_v22, %v6750_v5  ;;  %v7670_v27 = vmax.bf16 %v21327_v32, %v7606_v55 }
 0x737   : > { %v6888_v40 = vmax.bf16 %v21327_v32, %v6824_v38 }
 0x738   : > { %14641 = vmatprep.mubr.bf16.mxu1 %v7670_v27  ;;  %v6887_v39 = vmax.bf16 %v21327_v32, %v6823_v34 }
 0x739   : > { %14642 = vmatmul.mubr.bf16.gmra.mrb[64].mxu1 %v7671_v10 }
 0x73a   : > { %14553 = vmatprep.mubr.bf16.mxu0 %v6887_v39 }
 0x73b   : > { %14554 = vmatmul.mubr.bf16.gmra.mrb[120].mxu0 %v6888_v40 }
 0x73e   : > { %v14503_v58 = vpop.f32.mrb[68].mxu0 }
 0x73f   : > { %v7262_v7 = vpop.f32.mrb[69].mxu0 }
 0x740   : > { %v14415_v3 = vpop.f32.mrb[252].mxu1  ;;  %v14504_v31 = vpop.f32.mrb[70].mxu0 }
 0x741   : > { %v7536_v29 = vpack.c.bf16 %v14504_v31, %v14503_v58  ;;  %v6675_v19 = vpop.f32.mrb[253].mxu1  ;;  %v7265_v9 = vpop.f32.mrb[71].mxu0 }
 0x742   : > { %v7535_v63 = vpack.c.bf16 %v7265_v9, %v7262_v7  ;;  %v14416_v54 = vpop.f32.mrb[254].mxu1 }
 0x743   : > { %v7609_v14 = vadd.bf16 %v18781_v26, %v7536_v29  ;;  %v6753_v46 = vpack.c.bf16 %v14416_v54, %v14415_v3  ;;  %v6678_v36 = vpop.f32.mrb[255].mxu1 }
 0x744   : > { %v7608_v15 = vadd.bf16 %v18781_v26, %v7535_v63  ;;  %v6752_v43 = vpack.c.bf16 %v6678_v36, %v6675_v19 }
 0x745   : > { %v6826_v61 = vadd.bf16 %v18524_v22, %v6753_v46  ;;  %v7673_v6 = vmax.bf16 %v21327_v32, %v7609_v14 }
 0x746   : > { %v6825_v41 = vadd.bf16 %v18524_v22, %v6752_v43  ;;  %v7672_v16 = vmax.bf16 %v21327_v32, %v7608_v15 }
 0x747   : > { %v6890_v21 = vmax.bf16 %v21327_v32, %v6826_v61 }
 0x748   : > { %v14579_v4 = vpop.f32.mrb[0].mxu1  ;;  %14645 = vmatprep.mubr.bf16.mxu1 %v7672_v16  ;;  %v6889_v1 = vmax.bf16 %v21327_v32, %v6825_v41 }
 0x749   : > { %v7801_v51 = vpop.f32.mrb[1].mxu1  ;;  %14646 = vmatmul.mubr.bf16.gmra.mrb[68].mxu1 %v7673_v6 }
 0x74a   : > { %14557 = vmatprep.mubr.bf16.mxu0 %v6889_v1  ;;  %v14580_v56 = vpop.f32.mrb[2].mxu1 }
 0x74b   : > { %v8313_v52 = vpack.c.bf16 %v14580_v56, %v14579_v4  ;;  %14558 = vmatmul.mubr.bf16.gmra.mrb[124].mxu0 %v6890_v21  ;;  %v7804_v22 = vpop.f32.mrb[3].mxu1 }
 0x74c   : > { %v8312_v11 = vpack.c.bf16 %v7804_v22, %v7801_v51  ;;  %8641 = vmatprep.mubr.bf16.mxu0 %v21327_v32 }
 0x74d   : > { %v8386_v44 = vadd.bf16 %v18933_v12, %v8313_v52 }
 0x74e   : > { %v8385_v23 = vadd.bf16 %v18933_v12, %v8312_v11  ;;  %v14507_v37 = vpop.f32.mrb[72].mxu0 }
 0x74f   : > { %v7278_v35 = vpop.f32.mrb[73].mxu0  ;;  %v8450_v18 = vmax.bf16 %v21327_v32, %v8386_v44 }
 0x750   : > { %v8449_v20 = vmax.bf16 %v21327_v32, %v8385_v23  ;;  %v14508_v25 = vpop.f32.mrb[74].mxu0  ;;  %v14583_v17 = vpop.f32.mrb[4].mxu1 }
 0x751   : > { %v7538_v33 = vpack.c.bf16 %v14508_v25, %v14507_v37  ;;  %v7281_v24 = vpop.f32.mrb[75].mxu0  ;;  %v7817_v0 = vpop.f32.mrb[5].mxu1 }
 0x752   : > { %v7537_v2 = vpack.c.bf16 %v7281_v24, %v7278_v35  ;;  %v14584_v28 = vpop.f32.mrb[6].mxu1 }
 0x753   : > { %v7611_v57 = vadd.bf16 %v18781_v26, %v7538_v33  ;;  %v8315_v30 = vpack.c.bf16 %v14584_v28, %v14583_v17  ;;  %v7820_v49 = vpop.f32.mrb[7].mxu1  ;;  %8642 = vmatmul.mubr.bf16.vlgmr.msra.gmra.mrb[128].mxu0 %v8449_v20 }
 0x754   : > { %v7610_v8 = vadd.bf16 %v18781_v26, %v7537_v2  ;;  %v8314_v59 = vpack.c.bf16 %v7820_v49, %v7817_v0  ;;  %8651 = vmatprep.mubr.bf16.mxu0 %v21327_v32 }
 0x755   : > { %v7675_v48 = vmax.bf16 %v21327_v32, %v7611_v57  ;;  %v8388_v46 = vadd.bf16 %v18933_v12, %v8315_v30 }
 0x756   : > { %v7674_v50 = vmax.bf16 %v21327_v32, %v7610_v8  ;;  %v8387_v38 = vadd.bf16 %v18933_v12, %v8314_v59 }
 0x757   : > { %v8452_v43 = vmax.bf16 %v21327_v32, %v8388_v46 }
 0x758   : > { %v14587_v13 = vpop.f32.mrb[8].mxu1  ;;  %14649 = vmatprep.mubr.bf16.mxu1 %v7674_v50  ;;  %v8451_v40 = vmax.bf16 %v21327_v32, %v8387_v38 }
 0x759   : > { %v7833_v47 = vpop.f32.mrb[9].mxu1  ;;  %14650 = vmatmul.mubr.bf16.gmra.mrb[72].mxu1 %v7675_v48 }
 0x75a   : > { %v14588_v53 = vpop.f32.mrb[10].mxu1 }
 0x75b   : > { %v8317_v42 = vpack.c.bf16 %v14588_v53, %v14587_v13  ;;  %v7836_v55 = vpop.f32.mrb[11].mxu1  ;;  %8652 = vmatmul.mubr.bf16.gmra.mrb[132].mxu0 %v8450_v18 }
 0x75c   : > { %v8316_v5 = vpack.c.bf16 %v7836_v55, %v7833_v47  ;;  %8661 = vmatprep.mubr.bf16.mxu0 %v21327_v32 }
 0x75d   : > { %v8390_v0 = vadd.bf16 %v18933_v12, %v8317_v42 }
 0x75e   : > { %v14511_v34 = vpop.f32.mrb[76].mxu0  ;;  %v8389_v4 = vadd.bf16 %v18933_v12, %v8316_v5 }
 0x75f   : > { %v7294_v27 = vpop.f32.mrb[77].mxu0  ;;  %v8454_v30 = vmax.bf16 %v21327_v32, %v8390_v0 }
 0x760   : > { %v14512_v10 = vpop.f32.mrb[78].mxu0  ;;  %v18947_v39 = vpop.f32.mrb[12].mxu1  ;;  %v8453_v52 = vmax.bf16 %v21327_v32, %v8389_v4 }
 0x761   : > { %v7540_v58 = vpack.c.bf16 %v14512_v10, %v14511_v34  ;;  %v7297_v7 = vpop.f32.mrb[79].mxu0  ;;  %v7849_v3 = vpop.f32.mrb[13].mxu1 }
 0x762   : > { %v7539_v31 = vpack.c.bf16 %v7297_v7, %v7294_v27  ;;  %v18950_v29 = vpop.f32.mrb[14].mxu1 }
 0x763   : > { %v7613_v19 = vadd.bf16 %v18781_v26, %v7540_v58  ;;  %v8319_v9 = vpack.c.bf16 %v18950_v29, %v18947_v39  ;;  %v7852_v63 = vpop.f32.mrb[15].mxu1  ;;  %8662 = vmatmul.mubr.bf16.gmra.mrb[136].mxu0 %v8451_v40 }
 0x764   : > { %v7612_v54 = vadd.bf16 %v18781_v26, %v7539_v31  ;;  %v8318_v14 = vpack.c.bf16 %v7852_v63, %v7849_v3  ;;  %8671 = vmatprep.mubr.bf16.mxu0 %v21327_v32 }
 0x765   : > { %v7677_v45 = vmax.bf16 %v21327_v32, %v7613_v19  ;;  %v8392_v31 = vadd.bf16 %v18933_v12, %v8319_v9 }
 0x766   : > { %v7676_v36 = vmax.bf16 %v21327_v32, %v7612_v54  ;;  %v8391_v48 = vadd.bf16 %v18933_v12, %v8318_v14 }
 0x767   : > { %v8456_v54 = vmax.bf16 %v21327_v32, %v8392_v31 }
 0x768   : > { %v18960_v15 = vpop.f32.mrb[16].mxu1  ;;  %14653 = vmatprep.mubr.bf16.mxu1 %v7676_v36  ;;  %v8455_v42 = vmax.bf16 %v21327_v32, %v8391_v48 }
 0x769   : > { %v18963_v61 = vpop.f32.mrb[17].mxu1  ;;  %14654 = vmatmul.mubr.bf16.gmra.mrb[76].mxu1 %v7677_v45 }
 0x76a   : > { %v18965_v41 = vpop.f32.mrb[18].mxu1 }
 0x76b   : > { %v8321_v16 = vpack.c.bf16 %v18965_v41, %v18960_v15  ;;  %v18969_v62 = vpop.f32.mrb[19].mxu1  ;;  %8672 = vmatmul.mubr.bf16.gmra.mrb[140].mxu0 %v8452_v43  ;;  %v15126_v15 = vld [vmem:[%s21051_s7 + $0x10] sm:$0xff]  }
 0x76c   : > { %v8320_v6 = vpack.c.bf16 %v18969_v62, %v18963_v61  ;;  %8681 = vmatprep.mubr.bf16.mxu0 %v21327_v32 }
 0x76e   : > { %v14515_v1 = vpop.f32.mrb[80].mxu0  ;;  %v8393_v46 = vadd.bf16 %v18933_v12, %v8320_v6 }
 0x76f   : > { %v7310_v21 = vpop.f32.mrb[81].mxu0 }
 0x770   : > { %v14516_v51 = vpop.f32.mrb[82].mxu0  ;;  %v18975_v56 = vpop.f32.mrb[20].mxu1  ;;  %v8457_v4 = vmax.bf16 %v21327_v32, %v8393_v46 }
 0x771   : > { %v7542_v22 = vpack.c.bf16 %v14516_v51, %v14515_v1  ;;  %v7313_v11 = vpop.f32.mrb[83].mxu0  ;;  %v18978_v23 = vpop.f32.mrb[21].mxu1 }
 0x772   : > { %v7541_v37 = vpack.c.bf16 %v7313_v11, %v7310_v21  ;;  %v18980_v35 = vpop.f32.mrb[22].mxu1  ;;  %v8394_v11 = vadd.bf16 %v18933_v12, %v8321_v16 }
 0x773   : > { %v7615_v20 = vadd.bf16 %v18781_v26, %v7542_v22  ;;  %v8323_v25 = vpack.c.bf16 %v18980_v35, %v18975_v56  ;;  %v18985_v17 = vpop.f32.mrb[23].mxu1  ;;  %8682 = vmatmul.mubr.bf16.gmra.mrb[144].mxu0 %v8453_v52  ;;  %v15124_v52 = vld [vmem:[%s21051_s7] sm:$0xff]   ;;  %v15130_v56 = vld [vmem:[%s21051_s7 + $0x30] sm:$0xff]  }
 0x774   : > { %v7614_v33 = vadd.bf16 %v18781_v26, %v7541_v37  ;;  %v8322_v24 = vpack.c.bf16 %v18985_v17, %v18978_v23  ;;  %8691 = vmatprep.mubr.bf16.mxu0 %v21327_v32  ;;  %14705 = vmatprep.subr.bf16.mxu1 %v15124_v52  ;;  %v8458_v0 = vmax.bf16 %v21327_v32, %v8394_v11 }
 0x775   : > { %v7679_v28 = vmax.bf16 %v21327_v32, %v7615_v20  ;;  %14706 = vmatpush3.bf16.msra.mxu1 %v15124_v52  ;;  %v8396_v31 = vadd.bf16 %v18933_v12, %v8323_v25 }
 0x776   : > { %v7678_v2 = vmax.bf16 %v21327_v32, %v7614_v33  ;;  %v15125_v33 = vld [vmem:[%s21051_s7 + $0x8] sm:$0xff]   ;;  %v8395_v16 = vadd.bf16 %v18933_v12, %v8322_v24 }
 0x777   : > { %14707 = vmatprep.subr.bf16.mxu1 %v15125_v33  ;;  %v8460_v46 = vmax.bf16 %v21327_v32, %v8396_v31 }
 0x778   : > { %v18994_v57 = vpop.f32.mrb[24].mxu1  ;;  %14657 = vmatprep.mubr.bf16.mxu1 %v7678_v2  ;;  %v8459_v24 = vmax.bf16 %v21327_v32, %v8395_v16 }
 0x779   : > { %v18997_v49 = vpop.f32.mrb[25].mxu1  ;;  %14658 = vmatmul.mubr.bf16.gmra.mrb[80].mxu1 %v7679_v28 }
 0x77a   : > { %v18999_v8 = vpop.f32.mrb[26].mxu1  ;;  %14708 = vmatpush3.bf16.msra.mxu1 %v15125_v33 }
 0x77b   : > { %v8325_v59 = vpack.c.bf16 %v18999_v8, %v18994_v57  ;;  %v19003_v44 = vpop.f32.mrb[27].mxu1  ;;  %8692 = vmatmul.mubr.bf16.gmra.mrb[148].mxu0 %v8454_v30  ;;  %14709 = vmatprep.subr.bf16.mxu1 %v15126_v15 }
 0x77c   : > { %v8324_v50 = vpack.c.bf16 %v19003_v44, %v18997_v49  ;;  %8701 = vmatprep.mubr.bf16.mxu0 %v21327_v32 }
 0x77e   : > { %v14519_v13 = vpop.f32.mrb[84].mxu0  ;;  %14710 = vmatpush3.bf16.msra.mxu1 %v15126_v15  ;;  %v8397_v25 = vadd.bf16 %v18933_v12, %v8324_v50 }
 0x77f   : > { %v7326_v18 = vpop.f32.mrb[85].mxu0 }
 0x780   : > { %v14520_v47 = vpop.f32.mrb[86].mxu0  ;;  %v19009_v53 = vpop.f32.mrb[28].mxu1  ;;  %v8461_v50 = vmax.bf16 %v21327_v32, %v8397_v25 }
 0x781   : > { %v7544_v55 = vpack.c.bf16 %v14520_v47, %v14519_v13  ;;  %v7329_v5 = vpop.f32.mrb[87].mxu0  ;;  %v19012_v38 = vpop.f32.mrb[29].mxu1  ;;  %v15127_v47 = vld [vmem:[%s21051_s7 + $0x18] sm:$0xff]  }
 0x782   : > { %v7543_v34 = vpack.c.bf16 %v7329_v5, %v7326_v18  ;;  %v19014_v27 = vpop.f32.mrb[30].mxu1  ;;  %14711 = vmatprep.subr.bf16.mxu1 %v15127_v47 }
 0x783   : > { %v7617_v10 = vadd.bf16 %v18781_v26, %v7544_v55  ;;  %v8327_v40 = vpack.c.bf16 %v19014_v27, %v19009_v53  ;;  %v19019_v58 = vpop.f32.mrb[31].mxu1  ;;  %8702 = vmatmul.mubr.bf16.gmra.mrb[152].mxu0 %v8455_v42  ;;  %14712 = vmatpush3.bf16.msra.mxu1 %v15127_v47 }
 0x784   : > { %v7616_v7 = vadd.bf16 %v18781_v26, %v7543_v34  ;;  %v8326_v3 = vpack.c.bf16 %v19019_v58, %v19012_v38  ;;  %8711 = vmatprep.mubr.bf16.mxu0 %v21327_v32 }
 0x785   : > { %v7681_v63 = vmax.bf16 %v21327_v32, %v7617_v10  ;;  %v15128_v10 = vld [vmem:[%s21051_s7 + $0x20] sm:$0xff]  }
 0x786   : > { %v7680_v19 = vmax.bf16 %v21327_v32, %v7616_v7  ;;  %14713 = vmatprep.subr.bf16.mxu1 %v15128_v10  ;;  %v8399_v57 = vadd.bf16 %v18933_v12, %v8326_v3 }
 0x787   : > { %14714 = vmatpush3.bf16.msra.mxu1 %v15128_v10  ;;  %v8400_v10 = vadd.bf16 %v18933_v12, %v8327_v40 }
 0x788   : > { %14661 = vmatprep.mubr.bf16.mxu1 %v7680_v19 }
 0x789   : > { %14662 = vmatmul.mubr.bf16.gmra.mrb[84].mxu1 %v7681_v63 }
 0x78b   : > { %8712 = vmatmul.mubr.bf16.gmra.mrb[156].mxu0 %v8456_v54  ;;  %v15129_v54 = vld [vmem:[%s21051_s7 + $0x28] sm:$0xff]  }
 0x78c   : > { %v19032_v14 = vpop.f32.mrb[32].mxu1  ;;  %8721 = vmatprep.mubr.bf16.mxu0 %v21327_v32  ;;  %14715 = vmatprep.subr.bf16.mxu1 %v15129_v54 }
 0x78d   : > { %v19036_v36 = vpop.f32.mrb[33].mxu1  ;;  %14716 = vmatpush3.bf16.msra.mxu1 %v15129_v54 }
 0x78e   : > { %v14523_v39 = vpop.f32.mrb[88].mxu0  ;;  %v19038_v29 = vpop.f32.mrb[34].mxu1  ;;  %14717 = vmatprep.subr.bf16.mxu1 %v15130_v56 }
 0x78f   : > { %v8329_v9 = vpack.c.bf16 %v19038_v29, %v19032_v14  ;;  %v7342_v45 = vpop.f32.mrb[89].mxu0  ;;  %v19042_v43 = vpop.f32.mrb[35].mxu1 }
 0x790   : > { %v8328_v61 = vpack.c.bf16 %v19042_v43, %v19036_v36  ;;  %v14524_v62 = vpop.f32.mrb[90].mxu0 }
 0x791   : > { %v7546_v1 = vpack.c.bf16 %v14524_v62, %v14523_v39  ;;  %v7345_v21 = vpop.f32.mrb[91].mxu0  ;;  %14718 = vmatpush3.bf16.msra.mxu1 %v15130_v56 }
 0x792   : > { %v7545_v6 = vpack.c.bf16 %v7345_v21, %v7342_v45  ;;  %v8401_v53 = vadd.bf16 %v18933_v12, %v8328_v61 }
 0x793   : > { %v7619_v51 = vadd.bf16 %v18781_v26, %v7546_v1  ;;  %8722 = vmatmul.mubr.bf16.gmra.mrb[160].mxu0 %v8457_v4 }
 0x794   : > { %v7618_v22 = vadd.bf16 %v18781_v26, %v7545_v6  ;;  %8731 = vmatprep.mubr.bf16.mxu0 %v21327_v32  ;;  %v15131_v6 = vld [vmem:[%s21051_s7 + $0x38] sm:$0xff]  }
 0x795   : > { %v7683_v20 = vmax.bf16 %v21327_v32, %v7619_v51  ;;  %14719 = vmatprep.subr.bf16.mxu1 %v15131_v6 }
 0x796   : > { %v7682_v37 = vmax.bf16 %v21327_v32, %v7618_v22  ;;  %14720 = vmatpush3.bf16.msra.mxu1 %v15131_v6  ;;  %v8465_v6 = vmax.bf16 %v21327_v32, %v8401_v53 }
 0x798   : > { %14665 = vmatprep.mubr.bf16.mxu1 %v7682_v37 }
 0x799   : > { %14666 = vmatmul.mubr.bf16.gmra.mrb[88].mxu1 %v7683_v20  ;;  %v8398_v20 = vadd.bf16 %v18933_v12, %v8325_v59 }
 0x79b   : > { %8732 = vmatmul.mubr.bf16.gmra.mrb[164].mxu0 %v8458_v0  ;;  %v8462_v15 = vmax.bf16 %v21327_v32, %v8398_v20 }
 0x79c   : > { %v19066_v41 = vpop.f32.mrb[36].mxu1  ;;  %8741 = vmatprep.mubr.bf16.mxu0 %v21327_v32 }
 0x79d   : > { %v19073_v2 = vpop.f32.mrb[37].mxu1 }
 0x79e   : > { %v14527_v28 = vpop.f32.mrb[92].mxu0  ;;  %v19075_v30 = vpop.f32.mrb[38].mxu1 }
 0x79f   : > { %v8331_v48 = vpack.c.bf16 %v19075_v30, %v19066_v41  ;;  %v7358_v13 = vpop.f32.mrb[93].mxu0  ;;  %v19079_v18 = vpop.f32.mrb[39].mxu1 }
 0x7a0   : > { %v8330_v23 = vpack.c.bf16 %v19079_v18, %v19073_v2  ;;  %v14528_v17 = vpop.f32.mrb[94].mxu0 }
 0x7a1   : > { %v7548_v42 = vpack.c.bf16 %v14528_v17, %v14527_v28  ;;  %v7361_v55 = vpop.f32.mrb[95].mxu0 }
 0x7a2   : > { %v7547_v5 = vpack.c.bf16 %v7361_v55, %v7358_v13  ;;  %v8463_v55 = vmax.bf16 %v21327_v32, %v8399_v57  ;;  %v8403_v14 = vadd.bf16 %v18933_v12, %v8330_v23 }
 0x7a3   : > { %v7621_v34 = vadd.bf16 %v18781_v26, %v7548_v42  ;;  %8742 = vmatmul.mubr.bf16.gmra.mrb[168].mxu0 %v8459_v24 }
 0x7a4   : > { %v7620_v7 = vadd.bf16 %v18781_v26, %v7547_v5  ;;  %8751 = vmatprep.mubr.bf16.mxu0 %v21327_v32 }
 0x7a5   : > { %v7685_v63 = vmax.bf16 %v21327_v32, %v7621_v34 }
 0x7a6   : > { %v7684_v19 = vmax.bf16 %v21327_v32, %v7620_v7 }
 0x7a8   : > { %14669 = vmatprep.mubr.bf16.mxu1 %v7684_v19  ;;  %v8464_v19 = vmax.bf16 %v21327_v32, %v8400_v10 }
 0x7a9   : > { %14670 = vmatmul.mubr.bf16.gmra.mrb[92].mxu1 %v7685_v63 }
 0x7ab   : > { %8752 = vmatmul.mubr.bf16.gmra.mrb[172].mxu0 %v8460_v46 }
 0x7ac   : > { %v19106_v35 = vpop.f32.mrb[40].mxu1  ;;  %8761 = vmatprep.mubr.bf16.mxu0 %v21327_v32 }
 0x7ad   : > { %v19113_v39 = vpop.f32.mrb[41].mxu1 }
 0x7ae   : > { %v14531_v45 = vpop.f32.mrb[96].mxu0  ;;  %v19115_v62 = vpop.f32.mrb[42].mxu1 }
 0x7af   : > { %v8333_v4 = vpack.c.bf16 %v19115_v62, %v19106_v35  ;;  %v7374_v1 = vpop.f32.mrb[97].mxu0  ;;  %v19119_v21 = vpop.f32.mrb[43].mxu1 }
 0x7b0   : > { %v8332_v49 = vpack.c.bf16 %v19119_v21, %v19113_v39  ;;  %v14532_v44 = vpop.f32.mrb[98].mxu0 }
 0x7b1   : > { %v7550_v51 = vpack.c.bf16 %v14532_v44, %v14531_v45  ;;  %v7377_v52 = vpop.f32.mrb[99].mxu0 }
 0x7b2   : > { %v7549_v22 = vpack.c.bf16 %v7377_v52, %v7374_v1  ;;  %v8405_v41 = vadd.bf16 %v18933_v12, %v8332_v49 }
 0x7b3   : > { %v7623_v11 = vadd.bf16 %v18781_v26, %v7550_v51  ;;  %8762 = vmatmul.mubr.bf16.gmra.mrb[176].mxu0 %v8461_v50  ;;  %v8402_v51 = vadd.bf16 %v18933_v12, %v8329_v9 }
 0x7b4   : > { %v7622_v37 = vadd.bf16 %v18781_v26, %v7549_v22  ;;  %8771 = vmatprep.mubr.bf16.mxu0 %v21327_v32 }
 0x7b5   : > { %v7687_v0 = vmax.bf16 %v21327_v32, %v7623_v11  ;;  %v8466_v11 = vmax.bf16 %v21327_v32, %v8402_v51 }
 0x7b6   : > { %v7686_v33 = vmax.bf16 %v21327_v32, %v7622_v37 }
 0x7b8   : > { %14673 = vmatprep.mubr.bf16.mxu1 %v7686_v33 }
 0x7b9   : > { %14674 = vmatmul.mubr.bf16.gmra.mrb[96].mxu1 %v7687_v0 }
 0x7bb   : > { %8772 = vmatmul.mubr.bf16.gmra.mrb[180].mxu0 %v8462_v15 }
 0x7bc   : > { %v19137_v16 = vpop.f32.mrb[44].mxu1  ;;  %8781 = vmatprep.mubr.bf16.mxu0 %v21327_v32 }
 0x7bd   : > { %v19144_v8 = vpop.f32.mrb[45].mxu1 }
 0x7be   : > { %v14535_v59 = vpop.f32.mrb[100].mxu0  ;;  %v19146_v28 = vpop.f32.mrb[46].mxu1 }
 0x7bf   : > { %v8335_v13 = vpack.c.bf16 %v19146_v28, %v19137_v16  ;;  %v7390_v47 = vpop.f32.mrb[101].mxu0  ;;  %v19150_v17 = vpop.f32.mrb[47].mxu1 }
 0x7c0   : > { %v8334_v24 = vpack.c.bf16 %v19150_v17, %v19144_v8  ;;  %v14536_v42 = vpop.f32.mrb[102].mxu0 }
 0x7c1   : > { %v7552_v38 = vpack.c.bf16 %v14536_v42, %v14535_v59  ;;  %v7393_v58 = vpop.f32.mrb[103].mxu0 }
 0x7c2   : > { %v7551_v3 = vpack.c.bf16 %v7393_v58, %v7390_v47  ;;  %v8467_v47 = vmax.bf16 %v21327_v32, %v8403_v14  ;;  %v8407_v35 = vadd.bf16 %v18933_v12, %v8334_v24 }
 0x7c3   : > { %v7625_v5 = vadd.bf16 %v18781_v26, %v7552_v38  ;;  %8782 = vmatmul.mubr.bf16.gmra.mrb[184].mxu0 %v8463_v55  ;;  %v8404_v38 = vadd.bf16 %v18933_v12, %v8331_v48 }
 0x7c4   : > { %v7624_v34 = vadd.bf16 %v18781_v26, %v7551_v3  ;;  %8791 = vmatprep.mubr.bf16.mxu0 %v21327_v32 }
 0x7c5   : > { %v7689_v31 = vmax.bf16 %v21327_v32, %v7625_v5  ;;  %v8468_v5 = vmax.bf16 %v21327_v32, %v8404_v38 }
 0x7c6   : > { %v7688_v7 = vmax.bf16 %v21327_v32, %v7624_v34 }
 0x7c8   : > { %14677 = vmatprep.mubr.bf16.mxu1 %v7688_v7 }
 0x7c9   : > { %14678 = vmatmul.mubr.bf16.gmra.mrb[100].mxu1 %v7689_v31 }
 0x7cb   : > { %8792 = vmatmul.mubr.bf16.gmra.mrb[188].mxu0 %v8464_v19 }
 0x7cc   : > { %v19165_v63 = vpop.f32.mrb[48].mxu1  ;;  %8801 = vmatprep.mubr.bf16.mxu0 %v21327_v32 }
 0x7cd   : > { %v19172_v27 = vpop.f32.mrb[49].mxu1 }
 0x7ce   : > { %v14539_v40 = vpop.f32.mrb[104].mxu0  ;;  %v19174_v54 = vpop.f32.mrb[50].mxu1 }
 0x7cf   : > { %v8337_v46 = vpack.c.bf16 %v19174_v54, %v19165_v63  ;;  %v7406_v56 = vpop.f32.mrb[105].mxu0  ;;  %v19178_v25 = vpop.f32.mrb[51].mxu1 }
 0x7d0   : > { %v8336_v45 = vpack.c.bf16 %v19178_v25, %v19172_v27  ;;  %v14540_v1 = vpop.f32.mrb[106].mxu0 }
 0x7d1   : > { %v7554_v36 = vpack.c.bf16 %v14540_v1, %v14539_v40  ;;  %v7409_v43 = vpop.f32.mrb[107].mxu0 }
 0x7d2   : > { %v7553_v61 = vpack.c.bf16 %v7409_v43, %v7406_v56  ;;  %v8469_v56 = vmax.bf16 %v21327_v32, %v8405_v41  ;;  %v8409_v16 = vadd.bf16 %v18933_v12, %v8336_v45 }
 0x7d3   : > { %v7627_v44 = vadd.bf16 %v18781_v26, %v7554_v36  ;;  %8802 = vmatmul.mubr.bf16.gmra.mrb[192].mxu0 %v8465_v6  ;;  %v8406_v36 = vadd.bf16 %v18933_v12, %v8333_v4 }
 0x7d4   : > { %v7626_v50 = vadd.bf16 %v18781_v26, %v7553_v61  ;;  %8811 = vmatprep.mubr.bf16.mxu0 %v21327_v32 }
 0x7d5   : > { %v7691_v22 = vmax.bf16 %v21327_v32, %v7627_v44  ;;  %v8470_v44 = vmax.bf16 %v21327_v32, %v8406_v36 }
 0x7d6   : > { %v7690_v52 = vmax.bf16 %v21327_v32, %v7626_v50 }
 0x7d8   : > { %14681 = vmatprep.mubr.bf16.mxu1 %v7690_v52 }
 0x7d9   : > { %14682 = vmatmul.mubr.bf16.gmra.mrb[104].mxu1 %v7691_v22 }
 0x7db   : > { %8812 = vmatmul.mubr.bf16.gmra.mrb[196].mxu0 %v8466_v11 }
 0x7dc   : > { %v19193_v37 = vpop.f32.mrb[52].mxu1  ;;  %8821 = vmatprep.mubr.bf16.mxu0 %v21327_v32 }
 0x7dd   : > { %v19200_v29 = vpop.f32.mrb[53].mxu1 }
 0x7de   : > { %v14543_v9 = vpop.f32.mrb[108].mxu0  ;;  %v19202_v20 = vpop.f32.mrb[54].mxu1 }
 0x7df   : > { %v8339_v33 = vpack.c.bf16 %v19202_v20, %v19193_v37  ;;  %v7422_v0 = vpop.f32.mrb[109].mxu0  ;;  %v19206_v15 = vpop.f32.mrb[55].mxu1 }
 0x7e0   : > { %v8338_v57 = vpack.c.bf16 %v19206_v15, %v19200_v29  ;;  %v14544_v59 = vpop.f32.mrb[110].mxu0  ;;  %v9346_v29 = vld [vmem:[%s21050_s6] sm:$0x1] }
 0x7e1   : > { %v7556_v2 = vpack.c.bf16 %v14544_v59, %v14543_v9  ;;  %v7425_v18 = vpop.f32.mrb[111].mxu0 }
 0x7e2   : > { %v7555_v23 = vpack.c.bf16 %v7425_v18, %v7422_v0  ;;  %v8471_v0 = vmax.bf16 %v21327_v32, %v8407_v35  ;;  %v8411_v63 = vadd.bf16 %v18933_v12, %v8338_v57 }
 0x7e3   : > { %v7629_v42 = vadd.bf16 %v18781_v26, %v7556_v2  ;;  %8822 = vmatmul.mubr.bf16.gmra.mrb[200].mxu0 %v8467_v47  ;;  %v8408_v2 = vadd.bf16 %v18933_v12, %v8335_v13 }
 0x7e4   : > { %v7628_v55 = vadd.bf16 %v18781_v26, %v7555_v23  ;;  %8831 = vmatprep.mubr.bf16.mxu0 %v21327_v32  ;;  %v8475_v15 = vmax.bf16 %v21327_v32, %v8411_v63 }
 0x7e5   : > { %v7693_v3 = vmax.bf16 %v21327_v32, %v7629_v42  ;;  %v8472_v42 = vmax.bf16 %v21327_v32, %v8408_v2 }
 0x7e6   : > { %v7692_v58 = vmax.bf16 %v21327_v32, %v7628_v55 }
 0x7e8   : > { %14685 = vmatprep.mubr.bf16.mxu1 %v7692_v58 }
 0x7e9   : > { %14686 = vmatmul.mubr.bf16.gmra.mrb[108].mxu1 %v7693_v3 }
 0x7eb   : > { %8832 = vmatmul.mubr.bf16.gmra.mrb[204].mxu0 %v8468_v5 }
 0x7ec   : > { %v19221_v34 = vpop.f32.mrb[56].mxu1  ;;  %8841 = vmatprep.mubr.bf16.mxu0 %v21327_v32 }
 0x7ed   : > { %v19228_v30 = vpop.f32.mrb[57].mxu1 }
 0x7ee   : > { %v14547_v48 = vpop.f32.mrb[112].mxu0  ;;  %v19230_v10 = vpop.f32.mrb[58].mxu1 }
 0x7ef   : > { %v8341_v7 = vpack.c.bf16 %v19230_v10, %v19221_v34  ;;  %v7438_v31 = vpop.f32.mrb[113].mxu0  ;;  %v19234_v19 = vpop.f32.mrb[59].mxu1 }
 0x7f0   : > { %v8340_v53 = vpack.c.bf16 %v19234_v19, %v19228_v30  ;;  %v14548_v40 = vpop.f32.mrb[114].mxu0 }
 0x7f1   : > { %v7558_v39 = vpack.c.bf16 %v14548_v40, %v14547_v48  ;;  %v7441_v21 = vpop.f32.mrb[115].mxu0 }
 0x7f2   : > { %v7557_v49 = vpack.c.bf16 %v7441_v21, %v7438_v31  ;;  %v8473_v31 = vmax.bf16 %v21327_v32, %v8409_v16 }
 0x7f3   : > { %v7631_v1 = vadd.bf16 %v18781_v26, %v7558_v39  ;;  %8842 = vmatmul.mubr.bf16.gmra.mrb[208].mxu0 %v8469_v56  ;;  %v8410_v39 = vadd.bf16 %v18933_v12, %v8337_v46 }
 0x7f4   : > { %v7630_v6 = vadd.bf16 %v18781_v26, %v7557_v49  ;;  %8851 = vmatprep.mubr.bf16.mxu0 %v21327_v32 }
 0x7f5   : > { %v7695_v61 = vmax.bf16 %v21327_v32, %v7631_v1  ;;  %v8474_v1 = vmax.bf16 %v21327_v32, %v8410_v39 }
 0x7f6   : > { %v7694_v43 = vmax.bf16 %v21327_v32, %v7630_v6 }
 0x7f8   : > { %14689 = vmatprep.mubr.bf16.mxu1 %v7694_v43 }
 0x7f9   : > { %14690 = vmatmul.mubr.bf16.gmra.mrb[112].mxu1 %v7695_v61 }
 0x7fb   : > { %8852 = vmatmul.mubr.bf16.gmra.mrb[212].mxu0 %v8470_v44 }
 0x7fc   : > { %v19249_v50 = vpop.f32.mrb[60].mxu1  ;;  %8861 = vmatprep.mubr.bf16.mxu0 %v21327_v32 }
 0x7fd   : > { %v19256_v62 = vpop.f32.mrb[61].mxu1 }
 0x7fe   : > { %v14551_v4 = vpop.f32.mrb[116].mxu0  ;;  %v19258_v51 = vpop.f32.mrb[62].mxu1 }
 0x7ff   : > { %v8343_v52 = vpack.c.bf16 %v19258_v51, %v19249_v50  ;;  %v7454_v22 = vpop.f32.mrb[117].mxu0  ;;  %v19262_v11 = vpop.f32.mrb[63].mxu1 }
 0x800   : > { %v8342_v14 = vpack.c.bf16 %v19262_v11, %v19256_v62  ;;  %v14552_v9 = vpop.f32.mrb[118].mxu0 }
 0x801   : > { %v7560_v8 = vpack.c.bf16 %v14552_v9, %v14551_v4  ;;  %v7457_v17 = vpop.f32.mrb[119].mxu0 }
 0x802   : > { %v7559_v24 = vpack.c.bf16 %v7457_v17, %v7454_v22  ;;  %v8415_v34 = vadd.bf16 %v18933_v12, %v8342_v14 }
 0x803   : > { %v7633_v59 = vadd.bf16 %v18781_v26, %v7560_v8  ;;  %8862 = vmatmul.mubr.bf16.gmra.mrb[216].mxu0 %v8471_v0  ;;  %v9348_v8 = vpack.i.b16 %v9346_v29, %v9346_v29 }
 0x804   : > { %v7632_v47 = vadd.bf16 %v18781_v26, %v7559_v24  ;;  %8871 = vmatprep.mubr.bf16.mxu0 %v21327_v32  ;;  %v8412_v24 = vadd.bf16 %v18933_v12, %v8339_v33  ;;  %v8413_v33 = vadd.bf16 %v18933_v12, %v8340_v53  ;;  %v8479_v62 = vmax.bf16 %v21327_v32, %v8415_v34 }
 0x805   : > { %v7697_v23 = vmax.bf16 %v21327_v32, %v7633_v59 }
 0x806   : > { %v7696_v18 = vmax.bf16 %v21327_v32, %v7632_v47  ;;  %v8477_v30 = vmax.bf16 %v21327_v32, %v8413_v33 }
 0x808   : > { %14693 = vmatprep.mubr.bf16.mxu1 %v7696_v18 }
 0x809   : > { %14694 = vmatmul.mubr.bf16.gmra.mrb[116].mxu1 %v7697_v23  ;;  %v19338_v23 = vrot.slane %v9348_v8, %v16663_v60 }
 0x80b   : > { %8872 = vmatmul.mubr.bf16.gmra.mrb[220].mxu0 %v8472_v42 }
 0x80c   : > { %v19277_v55 = vpop.f32.mrb[64].mxu1  ;;  %8881 = vmatprep.mubr.bf16.mxu0 %v21327_v32 }
 0x80d   : > { %v19284_v28 = vpop.f32.mrb[65].mxu1 }
 0x80e   : > { %v14555_v13 = vpop.f32.mrb[120].mxu0  ;;  %v19286_v38 = vpop.f32.mrb[66].mxu1 }
 0x80f   : > { %v8345_v58 = vpack.c.bf16 %v19286_v38, %v19277_v55  ;;  %v7470_v3 = vpop.f32.mrb[121].mxu0  ;;  %v19290_v5 = vpop.f32.mrb[67].mxu1 }
 0x810   : > { %v8344_v41 = vpack.c.bf16 %v19290_v5, %v19284_v28  ;;  %v14556_v48 = vpop.f32.mrb[122].mxu0 }
 0x811   : > { %v7562_v27 = vpack.c.bf16 %v14556_v48, %v14555_v13  ;;  %v7473_v25 = vpop.f32.mrb[123].mxu0 }
 0x812   : > { %v7561_v45 = vpack.c.bf16 %v7473_v25, %v7470_v3  ;;  %v8417_v50 = vadd.bf16 %v18933_v12, %v8344_v41 }
 0x813   : > { %v7635_v40 = vadd.bf16 %v18781_v26, %v7562_v27  ;;  %8882 = vmatmul.mubr.bf16.gmra.mrb[224].mxu0 %v8473_v31 }
 0x814   : > { %v7634_v56 = vadd.bf16 %v18781_v26, %v7561_v45  ;;  %8891 = vmatprep.mubr.bf16.mxu0 %v21327_v32  ;;  %v8481_v28 = vmax.bf16 %v21327_v32, %v8417_v50 }
 0x815   : > { %v7699_v49 = vmax.bf16 %v21327_v32, %v7635_v40 }
 0x816   : > { %v7698_v21 = vmax.bf16 %v21327_v32, %v7634_v56 }
 0x818   : > { %14697 = vmatprep.mubr.bf16.mxu1 %v7698_v21  ;;  %v8414_v21 = vadd.bf16 %v18933_v12, %v8341_v7 }
 0x819   : > { %14698 = vmatmul.mubr.bf16.gmra.mrb[120].mxu1 %v7699_v49 }
 0x81b   : > { %8892 = vmatmul.mubr.bf16.gmra.mrb[228].mxu0 %v8474_v1 }
 0x81c   : > { %v19305_v6 = vpop.f32.mrb[68].mxu1  ;;  %8901 = vmatprep.mubr.bf16.mxu0 %v21327_v32 }
 0x81d   : > { %v19312_v54 = vpop.f32.mrb[69].mxu1 }
 0x81e   : > { %v14559_v46 = vpop.f32.mrb[124].mxu0  ;;  %v19314_v36 = vpop.f32.mrb[70].mxu1 }
 0x81f   : > { %v8347_v43 = vpack.c.bf16 %v19314_v36, %v19305_v6  ;;  %v7486_v61 = vpop.f32.mrb[125].mxu0  ;;  %v19318_v44 = vpop.f32.mrb[71].mxu1 }
 0x820   : > { %v8346_v35 = vpack.c.bf16 %v19318_v44, %v19312_v54  ;;  %v14560_v4 = vpop.f32.mrb[126].mxu0 }
 0x821   : > { %v7564_v57 = vpack.c.bf16 %v14560_v4, %v14559_v46  ;;  %v7489_v22 = vpop.f32.mrb[127].mxu0  ;;  %v8478_v46 = vmax.bf16 %v21327_v32, %v8414_v21 }
 0x822   : > { %v7563_v9 = vpack.c.bf16 %v7489_v22, %v7486_v61  ;;  %v8419_v55 = vadd.bf16 %v18933_v12, %v8346_v35 }
 0x823   : > { %v7637_v0 = vadd.bf16 %v18781_v26, %v7564_v57  ;;  %8902 = vmatmul.mubr.bf16.gmra.mrb[232].mxu0 %v8475_v15 }
 0x824   : > { %v7636_v17 = vadd.bf16 %v18781_v26, %v7563_v9  ;;  %8911 = vmatprep.mubr.bf16.mxu0 %v21327_v32  ;;  %v8476_v26 = vmax.bf16 %v21327_v32, %v8412_v24  ;;  %v8483_v54 = vmax.bf16 %v21327_v32, %v8419_v55 }
 0x825   : > { %v7701_v2 = vmax.bf16 %v21327_v32, %v7637_v0 }
 0x826   : > { %v8643_v59 = vpop.f32.mrb[128].mxu0  ;;  %v7700_v47 = vmax.bf16 %v21327_v32, %v7636_v17 }
 0x827   : > { %v19335_v18 = vpop.f32.mrb[129].mxu0 }
 0x828   : > { %14701 = vmatprep.mubr.bf16.mxu1 %v7700_v47  ;;  %v8647_v42 = vpop.f32.mrb[130].mxu0 }
 0x829   : > { %v9282_v16 = vpack.c.bf16 %v8647_v42, %v8643_v59  ;;  %14702 = vmatmul.mubr.bf16.gmra.mrb[124].mxu1 %v7701_v2  ;;  %v19341_v13 = vpop.f32.mrb[131].mxu0  ;;  %v8416_v59 = vadd.bf16 %v18933_v12, %v8343_v52 }
 0x82b   : > { %v9354_v37 = vadd.bf16 %v19338_v23, %v9282_v16  ;;  %8912 = vmatmul.mubr.bf16.gmra.mrb[236].mxu0 %v8476_v26  ;;  %v8480_v26 = vmax.bf16 %v21327_v32, %v8416_v59 }
 0x82c   : > { %v19344_v20 = vpop.f32.mrb[72].mxu1  ;;  %8921 = vmatprep.mubr.bf16.mxu0 %v21327_v32 }
 0x82d   : > { %v19351_v3 = vpop.f32.mrb[73].mxu1  ;;  %14721 = vmatprep.mubr.bf16.mxu1 %v9354_v37 }
 0x82e   : > { %v19353_v48 = vpop.f32.mrb[74].mxu1  ;;  %v8653_v31 = vpop.f32.mrb[132].mxu0 }
 0x82f   : > { %v8349_v27 = vpack.c.bf16 %v19353_v48, %v19344_v20  ;;  %v19357_v25 = vpop.f32.mrb[75].mxu1  ;;  %v19359_v45 = vpop.f32.mrb[133].mxu0 }
 0x830   : > { %v8348_v40 = vpack.c.bf16 %v19357_v25, %v19351_v3  ;;  %v8657_v56 = vpop.f32.mrb[134].mxu0 }
 0x831   : > { %v9283_v19 = vpack.c.bf16 %v8657_v56, %v8653_v31  ;;  %v19364_v53 = vpop.f32.mrb[135].mxu0 }
 0x832   : > { %v8421_v6 = vadd.bf16 %v18933_v12, %v8348_v40 }
 0x833   : > { %v9355_v39 = vadd.bf16 %v19338_v23, %v9283_v19  ;;  %8922 = vmatmul.mubr.bf16.gmra.mrb[240].mxu0 %v8477_v30 }
 0x834   : > { %8931 = vmatprep.mubr.bf16.mxu0 %v21327_v32  ;;  %v8485_v3 = vmax.bf16 %v21327_v32, %v8421_v6 }
 0x835   : > { %14722 = vmatmul.mubr.bf16.vlgmr.msra.gmra.mrb[128].mxu1 %v9355_v39 }
 0x836   : > { %v8663_v49 = vpop.f32.mrb[136].mxu0 }
 0x837   : > { %v19372_v1 = vpop.f32.mrb[137].mxu0 }
 0x838   : > { %v8667_v63 = vpop.f32.mrb[138].mxu0 }
 0x839   : > { %v9284_v61 = vpack.c.bf16 %v8667_v63, %v8663_v49  ;;  %v19375_v4 = vpop.f32.mrb[139].mxu0 }
 0x83a   : > { %21659 = vst [vmem:[#allocation23_spill] sm:$0xff] %v19375_v4 }
 0x83b   : > { %v9356_v29 = vadd.bf16 %v19338_v23, %v9284_v61  ;;  %8932 = vmatmul.mubr.bf16.gmra.mrb[244].mxu0 %v8478_v46  ;;  %v8418_v46 = vadd.bf16 %v18933_v12, %v8345_v58 }
 0x83c   : > { %v19378_v15 = vpop.f32.mrb[76].mxu1  ;;  %8941 = vmatprep.mubr.bf16.mxu0 %v21327_v32 }
 0x83d   : > { %v19385_v10 = vpop.f32.mrb[77].mxu1  ;;  %14725 = vmatprep.mubr.bf16.mxu1 %v9356_v29 }
 0x83e   : > { %v19387_v7 = vpop.f32.mrb[78].mxu1  ;;  %v8673_v57 = vpop.f32.mrb[140].mxu0 }
 0x83f   : > { %v8351_v22 = vpack.c.bf16 %v19387_v7, %v19378_v15  ;;  %v19391_v9 = vpop.f32.mrb[79].mxu1  ;;  %v19393_v0 = vpop.f32.mrb[141].mxu0 }
 0x840   : > { %v8350_v8 = vpack.c.bf16 %v19391_v9, %v19385_v10  ;;  %v8677_v17 = vpop.f32.mrb[142].mxu0 }
 0x841   : > { %v9285_v11 = vpack.c.bf16 %v8677_v17, %v8673_v57  ;;  %v19398_v14 = vpop.f32.mrb[143].mxu0  ;;  %v8482_v57 = vmax.bf16 %v21327_v32, %v8418_v46 }
 0x842   : > { %v8423_v20 = vadd.bf16 %v18933_v12, %v8350_v8 }
 0x843   : > { %v9357_v24 = vadd.bf16 %v19338_v23, %v9285_v11  ;;  %8942 = vmatmul.mubr.bf16.gmra.mrb[248].mxu0 %v8479_v62 }
 0x844   : > { %8951 = vmatprep.mubr.bf16.mxu0 %v21327_v32  ;;  %v8487_v10 = vmax.bf16 %v21327_v32, %v8423_v20 }
 0x845   : > { %14726 = vmatmul.mubr.bf16.gmra.mrb[132].mxu1 %v9357_v24 }
 0x846   : > { %v8683_v47 = vpop.f32.mrb[144].mxu0 }
 0x847   : > { %v19406_v2 = vpop.f32.mrb[145].mxu0 }
 0x848   : > { %21660 = vst [vmem:[#allocation20_spill] sm:$0xff] %v19406_v2  ;;  %v8687_v42 = vpop.f32.mrb[146].mxu0 }
 0x849   : > { %v9286_v16 = vpack.c.bf16 %v8687_v42, %v8683_v47  ;;  %v19409_v37 = vpop.f32.mrb[147].mxu0 }
 0x84a   : > { %21661 = vst [vmem:[#allocation17_spill] sm:$0xff] %v19409_v37 }
 0x84b   : > { %v9358_v33 = vadd.bf16 %v19338_v23, %v9286_v16  ;;  %8952 = vmatmul.mubr.bf16.gmra.mrb[252].mxu0 %v8480_v26 }
 0x84c   : > { %v19412_v31 = vpop.f32.mrb[80].mxu1  ;;  %8961 = vmatprep.mubr.bf16.mxu0 %v21327_v32 }
 0x84d   : > { %v19419_v51 = vpop.f32.mrb[81].mxu1  ;;  %14729 = vmatprep.mubr.bf16.mxu1 %v9358_v33 }
 0x84e   : > { %v19421_v52 = vpop.f32.mrb[82].mxu1  ;;  %v8693_v56 = vpop.f32.mrb[148].mxu0 }
 0x84f   : > { %v8353_v30 = vpack.c.bf16 %v19421_v52, %v19412_v31  ;;  %v19425_v19 = vpop.f32.mrb[83].mxu1  ;;  %v19427_v39 = vpop.f32.mrb[149].mxu0 }
 0x850   : > { %21662 = vst [vmem:[#allocation14_spill] sm:$0xff] %v19427_v39  ;;  %v8352_v21 = vpack.c.bf16 %v19425_v19, %v19419_v51  ;;  %v8697_v49 = vpop.f32.mrb[150].mxu0 }
 0x851   : > { %v9287_v5 = vpack.c.bf16 %v8697_v49, %v8693_v56  ;;  %v19432_v41 = vpop.f32.mrb[151].mxu0  ;;  %v8420_v56 = vadd.bf16 %v18933_v12, %v8347_v43 }
 0x852   : > { %21663 = vst [vmem:[#allocation74_spill] sm:$0xff] %v19432_v41  ;;  %v8425_v15 = vadd.bf16 %v18933_v12, %v8352_v21 }
 0x853   : > { %v9359_v63 = vadd.bf16 %v19338_v23, %v9287_v5  ;;  %8962 = vmatmul.mubr.bf16.gmra.mrb[0].mxu0 %v8481_v28 }
 0x854   : > { %8971 = vmatprep.mubr.bf16.mxu0 %v21327_v32  ;;  %v8489_v51 = vmax.bf16 %v21327_v32, %v8425_v15 }
 0x855   : > { %14730 = vmatmul.mubr.bf16.gmra.mrb[136].mxu1 %v9359_v63  ;;  %v8484_v63 = vmax.bf16 %v21327_v32, %v8420_v56 }
 0x856   : > { %v8703_v61 = vpop.f32.mrb[152].mxu0 }
 0x857   : > { %v19440_v29 = vpop.f32.mrb[153].mxu0 }
 0x858   : > { %21664 = vst [vmem:[#allocation92_spill] sm:$0xff] %v19440_v29  ;;  %v8707_v34 = vpop.f32.mrb[154].mxu0 }
 0x859   : > { %v9288_v17 = vpack.c.bf16 %v8707_v34, %v8703_v61  ;;  %v19443_v62 = vpop.f32.mrb[155].mxu0 }
 0x85a   : > { %21665 = vst [vmem:[#allocation89_spill] sm:$0xff] %v19443_v62 }
 0x85b   : > { %v9360_v11 = vadd.bf16 %v19338_v23, %v9288_v17  ;;  %8972 = vmatmul.mubr.bf16.gmra.mrb[4].mxu0 %v8482_v57 }
 0x85c   : > { %v19446_v24 = vpop.f32.mrb[84].mxu1  ;;  %8981 = vmatprep.mubr.bf16.mxu0 %v21327_v32 }
 0x85d   : > { %v19453_v38 = vpop.f32.mrb[85].mxu1  ;;  %14733 = vmatprep.mubr.bf16.mxu1 %v9360_v11 }
 0x85e   : > { %v19455_v58 = vpop.f32.mrb[86].mxu1  ;;  %v8713_v59 = vpop.f32.mrb[156].mxu0 }
 0x85f   : > { %v8355_v47 = vpack.c.bf16 %v19455_v58, %v19446_v24  ;;  %v19459_v42 = vpop.f32.mrb[87].mxu1  ;;  %v19461_v26 = vpop.f32.mrb[157].mxu0 }
 0x860   : > { %21666 = vst [vmem:[#allocation86_spill] sm:$0xff] %v19461_v26  ;;  %v8354_v16 = vpack.c.bf16 %v19459_v42, %v19453_v38  ;;  %v8717_v33 = vpop.f32.mrb[158].mxu0 }
 0x861   : > { %v9289_v44 = vpack.c.bf16 %v8717_v33, %v8713_v59  ;;  %v19466_v35 = vpop.f32.mrb[159].mxu0 }
 0x862   : > { %21667 = vst [vmem:[#allocation83_spill] sm:$0xff] %v19466_v35  ;;  %v8427_v31 = vadd.bf16 %v18933_v12, %v8354_v16 }
 0x863   : > { %v9361_v50 = vadd.bf16 %v19338_v23, %v9289_v44  ;;  %8982 = vmatmul.mubr.bf16.gmra.mrb[8].mxu0 %v8483_v54 }
 0x864   : > { %8991 = vmatprep.mubr.bf16.mxu0 %v21327_v32  ;;  %v8491_v38 = vmax.bf16 %v21327_v32, %v8427_v31 }
 0x865   : > { %14734 = vmatmul.mubr.bf16.gmra.mrb[140].mxu1 %v9361_v50  ;;  %v8422_v50 = vadd.bf16 %v18933_v12, %v8349_v27 }
 0x866   : > { %v8723_v49 = vpop.f32.mrb[160].mxu0 }
 0x867   : > { %v19474_v28 = vpop.f32.mrb[161].mxu0 }
 0x868   : > { %21668 = vst [vmem:[#allocation104_spill] sm:$0xff] %v19474_v28  ;;  %v8727_v5 = vpop.f32.mrb[162].mxu0 }
 0x869   : > { %v9290_v46 = vpack.c.bf16 %v8727_v5, %v8723_v49  ;;  %v19477_v61 = vpop.f32.mrb[163].mxu0 }
 0x86a   : > { %21669 = vst [vmem:[#allocation101_spill] sm:$0xff] %v19477_v61 }
 0x86b   : > { %v9362_v34 = vadd.bf16 %v19338_v23, %v9290_v46  ;;  %8992 = vmatmul.mubr.bf16.gmra.mrb[12].mxu0 %v8484_v63  ;;  %v8486_v63 = vmax.bf16 %v21327_v32, %v8422_v50 }
 0x86c   : > { %v19480_v57 = vpop.f32.mrb[88].mxu1  ;;  %9001 = vmatprep.mubr.bf16.mxu0 %v21327_v32 }
 0x86d   : > { %v19487_v36 = vpop.f32.mrb[89].mxu1  ;;  %14737 = vmatprep.mubr.bf16.mxu1 %v9362_v34 }
 0x86e   : > { %v19489_v43 = vpop.f32.mrb[90].mxu1  ;;  %v8733_v17 = vpop.f32.mrb[164].mxu0 }
 0x86f   : > { %v19493_v55 = vpop.f32.mrb[91].mxu1  ;;  %v19495_v59 = vpop.f32.mrb[165].mxu0 }
 0x870   : > { %21670 = vst [vmem:[#allocation98_spill] sm:$0xff] %v19495_v59  ;;  %v8737_v54 = vpop.f32.mrb[166].mxu0  ;;  %v21686_v24 = vpack.c.bf16 %v19493_v55, %v19487_v36 }
 0x871   : > { %v9291_v25 = vpack.c.bf16 %v8737_v54, %v8733_v17  ;;  %v19500_v40 = vpop.f32.mrb[167].mxu0 }
 0x872   : > { %21671 = vst [vmem:[#allocation95_spill] sm:$0xff] %v19500_v40  ;;  %v8429_v58 = vadd.bf16 %v18933_v12, %v21686_v24 }
 0x873   : > { %v9363_v44 = vadd.bf16 %v19338_v23, %v9291_v25  ;;  %9002 = vmatmul.mubr.bf16.gmra.mrb[16].mxu0 %v8485_v3 }
 0x874   : > { %9011 = vmatprep.mubr.bf16.mxu0 %v21327_v32  ;;  %v8493_v36 = vmax.bf16 %v21327_v32, %v8429_v58 }
 0x875   : > { %14738 = vmatmul.mubr.bf16.gmra.mrb[144].mxu1 %v9363_v44 }
 0x876   : > { %v8743_v56 = vpop.f32.mrb[168].mxu0 }
 0x877   : > { %v19508_v49 = vpop.f32.mrb[169].mxu0 }
 0x878   : > { %21672 = vst [vmem:[#allocation116_spill] sm:$0xff] %v19508_v49  ;;  %v8747_v5 = vpop.f32.mrb[170].mxu0 }
 0x879   : > { %v9292_v46 = vpack.c.bf16 %v8747_v5, %v8743_v56  ;;  %v19511_v34 = vpop.f32.mrb[171].mxu0 }
 0x87a   : > { %21673 = vst [vmem:[#allocation113_spill] sm:$0xff] %v19511_v34 }
 0x87b   : > { %v9364_v6 = vadd.bf16 %v19338_v23, %v9292_v46  ;;  %9012 = vmatmul.mubr.bf16.gmra.mrb[20].mxu0 %v8486_v63  ;;  %v8424_v63 = vadd.bf16 %v18933_v12, %v8351_v22 }
 0x87c   : > { %v19514_v17 = vpop.f32.mrb[92].mxu1  ;;  %9021 = vmatprep.mubr.bf16.mxu0 %v21327_v32 }
 0x87d   : > { %v19521_v48 = vpop.f32.mrb[93].mxu1  ;;  %14741 = vmatprep.mubr.bf16.mxu1 %v9364_v6  ;;  %v8488_v20 = vmax.bf16 %v21327_v32, %v8424_v63 }
 0x87e   : > { %v19523_v27 = vpop.f32.mrb[94].mxu1  ;;  %v8753_v54 = vpop.f32.mrb[172].mxu0 }
 0x87f   : > { %v19527_v25 = vpop.f32.mrb[95].mxu1  ;;  %v19529_v44 = vpop.f32.mrb[173].mxu0 }
 0x880   : > { %21674 = vst [vmem:[#allocation110_spill] sm:$0xff] %v19529_v44  ;;  %v8757_v56 = vpop.f32.mrb[174].mxu0 }
 0x881   : > { %v9293_v9 = vpack.c.bf16 %v8757_v56, %v8753_v54  ;;  %v19534_v8 = vpop.f32.mrb[175].mxu0 }
 0x882   : > { %21675 = vst [vmem:[#allocation107_spill] sm:$0xff] %v19534_v8 }
 0x883   : > { %v9365_v5 = vadd.bf16 %v19338_v23, %v9293_v9  ;;  %9022 = vmatmul.mubr.bf16.gmra.mrb[24].mxu0 %v8487_v10 }
 0x884   : > { %9031 = vmatprep.mubr.bf16.mxu0 %v21327_v32 }
 0x885   : > { %14742 = vmatmul.mubr.bf16.gmra.mrb[148].mxu1 %v9365_v5  ;;  %v8426_v5 = vadd.bf16 %v18933_v12, %v8353_v30 }
 0x886   : > { %v8763_v46 = vpop.f32.mrb[176].mxu0 }
 0x887   : > { %v19542_v6 = vpop.f32.mrb[177].mxu0  ;;  %v8490_v15 = vmax.bf16 %v21327_v32, %v8426_v5  ;;  %v8428_v5 = vadd.bf16 %v18933_v12, %v8355_v47 }
 0x888   : > { %21676 = vst [vmem:[#allocation128_spill] sm:$0xff] %v19542_v6  ;;  %v8767_v3 = vpop.f32.mrb[178].mxu0 }
 0x889   : > { %v9294_v54 = vpack.c.bf16 %v8767_v3, %v8763_v46  ;;  %v19545_v56 = vpop.f32.mrb[179].mxu0  ;;  %v8492_v31 = vmax.bf16 %v21327_v32, %v8428_v5  ;;  %v21689_v5 = vpack.c.bf16 %v19489_v43, %v19480_v57  ;;  %v21692_v57 = vpack.c.bf16 %v19527_v25, %v19521_v48 }
 0x88a   : > { %21677 = vst [vmem:[#allocation125_spill] sm:$0xff] %v19545_v56  ;;  %v21727_v56 = vld [vmem:[#allocation7_spill] sm:$0xff] }
 0x88b   : > { %v9366_v9 = vadd.bf16 %v19338_v23, %v9294_v54  ;;  %9032 = vmatmul.mubr.bf16.gmra.mrb[28].mxu0 %v8488_v20  ;;  %v8431_v43 = vadd.bf16 %v18933_v12, %v21692_v57 }
 0x88c   : > { %v19548_v10 = vpop.f32.mrb[96].mxu1  ;;  %9041 = vmatprep.mubr.bf16.mxu0 %v21327_v32 }
 0x88d   : > { %v19555_v7 = vpop.f32.mrb[97].mxu1  ;;  %14745 = vmatprep.mubr.bf16.mxu1 %v9366_v9  ;;  %v8495_v48 = vmax.bf16 %v21327_v32, %v8431_v43 }
 0x88e   : > { %v19557_v22 = vpop.f32.mrb[98].mxu1  ;;  %v8773_v3 = vpop.f32.mrb[180].mxu0 }
 0x88f   : > { %v19561_v63 = vpop.f32.mrb[99].mxu1  ;;  %v19563_v46 = vpop.f32.mrb[181].mxu0 }
 0x890   : > { %21678 = vst [vmem:[#allocation122_spill] sm:$0xff] %v19563_v46  ;;  %v8777_v54 = vpop.f32.mrb[182].mxu0 }
 0x891   : > { %v9295_v19 = vpack.c.bf16 %v8777_v54, %v8773_v3  ;;  %v19568_v21 = vpop.f32.mrb[183].mxu0 }
 0x892   : > { %21679 = vst [vmem:[#allocation119_spill] sm:$0xff] %v19568_v21 }
 0x893   : > { %v9367_v9 = vadd.bf16 %v19338_v23, %v9295_v19  ;;  %9042 = vmatmul.mubr.bf16.gmra.mrb[32].mxu0 %v8489_v51 }
 0x894   : > { %9051 = vmatprep.mubr.bf16.mxu0 %v21327_v32 }
 0x895   : > { %14746 = vmatmul.mubr.bf16.gmra.mrb[152].mxu1 %v9367_v9 }
 0x896   : > { %v8783_v50 = vpop.f32.mrb[184].mxu0 }
 0x897   : > { %v19576_v11 = vpop.f32.mrb[185].mxu0 }
 0x898   : > { %21680 = vst [vmem:[#allocation140_spill] sm:$0xff] %v19576_v11  ;;  %v8787_v20 = vpop.f32.mrb[186].mxu0 }
 0x899   : > { %v9296_v3 = vpack.c.bf16 %v8787_v20, %v8783_v50  ;;  %v19579_v54 = vpop.f32.mrb[187].mxu0 }
 0x89a   : > { %21681 = vst [vmem:[#allocation137_spill] sm:$0xff] %v19579_v54 }
 0x89b   : > { %v9368_v19 = vadd.bf16 %v19338_v23, %v9296_v3  ;;  %9052 = vmatmul.mubr.bf16.gmra.mrb[36].mxu0 %v8490_v15 }
 0x89c   : > { %v19582_v51 = vpop.f32.mrb[100].mxu1  ;;  %9061 = vmatprep.mubr.bf16.mxu0 %v21327_v32 }
 0x89d   : > { %v19589_v52 = vpop.f32.mrb[101].mxu1  ;;  %14749 = vmatprep.mubr.bf16.mxu1 %v9368_v19 }
 0x89e   : > { %v19591_v30 = vpop.f32.mrb[102].mxu1  ;;  %v8793_v50 = vpop.f32.mrb[188].mxu0 }
 0x89f   : > { %v19595_v20 = vpop.f32.mrb[103].mxu1  ;;  %v19597_v9 = vpop.f32.mrb[189].mxu0 }
 0x8a0   : > { %21682 = vst [vmem:[#allocation134_spill] sm:$0xff] %v19597_v9  ;;  %v8797_v3 = vpop.f32.mrb[190].mxu0 }
 0x8a1   : > { %v9297_v42 = vpack.c.bf16 %v8797_v3, %v8793_v50  ;;  %v19602_v16 = vpop.f32.mrb[191].mxu0 }
 0x8a2   : > { %21683 = vst [vmem:[#allocation131_spill] sm:$0xff] %v19602_v16 }
 0x8a3   : > { %v9369_v19 = vadd.bf16 %v19338_v23, %v9297_v42  ;;  %9062 = vmatmul.mubr.bf16.gmra.mrb[40].mxu0 %v8491_v38 }
 0x8a4   : > { %9071 = vmatprep.mubr.bf16.mxu0 %v21327_v32 }
 0x8a5   : > { %14750 = vmatmul.mubr.bf16.gmra.mrb[156].mxu1 %v9369_v19 }
 0x8a6   : > { %v8803_v33 = vpop.f32.mrb[192].mxu0 }
 0x8a7   : > { %v19610_v54 = vpop.f32.mrb[193].mxu0 }
 0x8a8   : > { %21684 = vst [vmem:[#allocation152_spill] sm:$0xff] %v19610_v54  ;;  %v8807_v15 = vpop.f32.mrb[194].mxu0 }
 0x8a9   : > { %v9298_v50 = vpack.c.bf16 %v8807_v15, %v8803_v33  ;;  %v19613_v3 = vpop.f32.mrb[195].mxu0 }
 0x8aa   : > { %21685 = vst [vmem:[#allocation149_spill] sm:$0xff] %v19613_v3 }
 0x8ab   : > { %v9370_v42 = vadd.bf16 %v19338_v23, %v9298_v50  ;;  %9072 = vmatmul.mubr.bf16.gmra.mrb[44].mxu0 %v8492_v31  ;;  %v8430_v50 = vadd.bf16 %v18933_v12, %v21689_v5 }
 0x8ac   : > { %v19616_v38 = vpop.f32.mrb[104].mxu1  ;;  %9081 = vmatprep.mubr.bf16.mxu0 %v21327_v32 }
 0x8ad   : > { %v19623_v47 = vpop.f32.mrb[105].mxu1  ;;  %14753 = vmatprep.mubr.bf16.mxu1 %v9370_v42  ;;  %v15132_v42 = vld [vmem:[%s21053_s9] sm:$0xff]  }
 0x8ae   : > { %v19625_v19 = vpop.f32.mrb[106].mxu1  ;;  %v8813_v33 = vpop.f32.mrb[196].mxu0  ;;  %14849 = vmatprep.subr.bf16.mxu1 %v15132_v42 }
 0x8af   : > { %v19629_v15 = vpop.f32.mrb[107].mxu1  ;;  %v19631_v31 = vpop.f32.mrb[197].mxu0  ;;  %14850 = vmatpush3.bf16.msra.mxu1 %v15132_v42  ;;  %v21695_v42 = vpack.c.bf16 %v19523_v27, %v19514_v17  ;;  %v21698_v17 = vpack.c.bf16 %v19561_v63, %v19555_v7 }
 0x8b0   : > { %21687 = vst [vmem:[#allocation146_spill] sm:$0xff] %v19631_v31  ;;  %v8817_v3 = vpop.f32.mrb[198].mxu0 }
 0x8b1   : > { %v9299_v55 = vpack.c.bf16 %v8817_v3, %v8813_v33  ;;  %v19636_v24 = vpop.f32.mrb[199].mxu0  ;;  %v8433_v27 = vadd.bf16 %v18933_v12, %v21698_v17 }
 0x8b2   : > { %21688 = vst [vmem:[#allocation143_spill] sm:$0xff] %v19636_v24  ;;  %v8494_v24 = vmax.bf16 %v21327_v32, %v8430_v50 }
 0x8b3   : > { %v9371_v54 = vadd.bf16 %v19338_v23, %v9299_v55  ;;  %9082 = vmatmul.mubr.bf16.gmra.mrb[48].mxu0 %v8493_v36  ;;  %v8497_v7 = vmax.bf16 %v21327_v32, %v8433_v27 }
 0x8b4   : > { %9091 = vmatprep.mubr.bf16.mxu0 %v21327_v32 }
 0x8b5   : > { %14754 = vmatmul.mubr.bf16.gmra.mrb[160].mxu1 %v9371_v54 }
 0x8b6   : > { %v8823_v3 = vpop.f32.mrb[200].mxu0 }
 0x8b7   : > { %v19647_v58 = vpop.f32.mrb[201].mxu0 }
 0x8b8   : > { %21690 = vst [vmem:[#allocation164_spill] sm:$0xff] %v19647_v58  ;;  %v8827_v33 = vpop.f32.mrb[202].mxu0 }
 0x8b9   : > { %v9300_v31 = vpack.c.bf16 %v8827_v33, %v8823_v3  ;;  %v19650_v16 = vpop.f32.mrb[203].mxu0 }
 0x8ba   : > { %21691 = vst [vmem:[#allocation161_spill] sm:$0xff] %v19650_v16  ;;  %v8432_v16 = vadd.bf16 %v18933_v12, %v21695_v42 }
 0x8bb   : > { %v9372_v36 = vadd.bf16 %v19338_v23, %v9300_v31  ;;  %9092 = vmatmul.mubr.bf16.gmra.mrb[52].mxu0 %v8494_v24 }
 0x8bc   : > { %v19653_v55 = vpop.f32.mrb[108].mxu1  ;;  %9101 = vmatprep.mubr.bf16.mxu0 %v21327_v32  ;;  %v8496_v43 = vmax.bf16 %v21327_v32, %v8432_v16 }
 0x8bd   : > { %v19660_v54 = vpop.f32.mrb[109].mxu1  ;;  %14757 = vmatprep.mubr.bf16.mxu1 %v9372_v36 }
 0x8be   : > { %v19662_v5 = vpop.f32.mrb[110].mxu1  ;;  %v8833_v50 = vpop.f32.mrb[204].mxu0 }
 0x8bf   : > { %v19666_v31 = vpop.f32.mrb[111].mxu1  ;;  %v19668_v24 = vpop.f32.mrb[205].mxu0 }
 0x8c0   : > { %21693 = vst [vmem:[#allocation158_spill] sm:$0xff] %v19668_v24  ;;  %v8837_v33 = vpop.f32.mrb[206].mxu0 }
 0x8c1   : > { %v9301_v25 = vpack.c.bf16 %v8837_v33, %v8833_v50  ;;  %v19673_v57 = vpop.f32.mrb[207].mxu0 }
 0x8c2   : > { %21694 = vst [vmem:[#allocation155_spill] sm:$0xff] %v19673_v57 }
 0x8c3   : > { %v9373_v36 = vadd.bf16 %v19338_v23, %v9301_v25  ;;  %9102 = vmatmul.mubr.bf16.gmra.mrb[56].mxu0 %v8495_v48 }
 0x8c4   : > { %9111 = vmatprep.mubr.bf16.mxu0 %v21327_v32 }
 0x8c5   : > { %14758 = vmatmul.mubr.bf16.gmra.mrb[164].mxu1 %v9373_v36 }
 0x8c6   : > { %v8843_v58 = vpop.f32.mrb[208].mxu0 }
 0x8c7   : > { %v19681_v24 = vpop.f32.mrb[209].mxu0 }
 0x8c8   : > { %21696 = vst [vmem:[#allocation170_spill] sm:$0xff] %v19681_v24  ;;  %v8847_v3 = vpop.f32.mrb[210].mxu0 }
 0x8c9   : > { %v9302_v50 = vpack.c.bf16 %v8847_v3, %v8843_v58  ;;  %v19684_v33 = vpop.f32.mrb[211].mxu0  ;;  %v21701_v58 = vpack.c.bf16 %v19557_v22, %v19548_v10  ;;  %v21704_v10 = vpack.c.bf16 %v19595_v20, %v19589_v52 }
 0x8ca   : > { %21697 = vst [vmem:[#allocation169_spill] sm:$0xff] %v19684_v33 }
 0x8cb   : > { %v9374_v25 = vadd.bf16 %v19338_v23, %v9302_v50  ;;  %9112 = vmatmul.mubr.bf16.gmra.mrb[60].mxu0 %v8496_v43  ;;  %v8434_v50 = vadd.bf16 %v18933_v12, %v21701_v58  ;;  %v8435_v22 = vadd.bf16 %v18933_v12, %v21704_v10 }
 0x8cc   : > { %v19687_v48 = vpop.f32.mrb[112].mxu1  ;;  %9121 = vmatprep.mubr.bf16.mxu0 %v21327_v32 }
 0x8cd   : > { %v19694_v42 = vpop.f32.mrb[113].mxu1  ;;  %14761 = vmatprep.mubr.bf16.mxu1 %v9374_v25  ;;  %v15133_v25 = vld [vmem:[%s21053_s9 + $0x8] sm:$0xff]   ;;  %v8499_v52 = vmax.bf16 %v21327_v32, %v8435_v22 }
 0x8ce   : > { %v19696_v36 = vpop.f32.mrb[114].mxu1  ;;  %v8853_v16 = vpop.f32.mrb[212].mxu0  ;;  %14851 = vmatprep.subr.bf16.mxu1 %v15133_v25 }
 0x8cf   : > { %v19700_v3 = vpop.f32.mrb[115].mxu1  ;;  %v19702_v43 = vpop.f32.mrb[213].mxu0  ;;  %14852 = vmatpush3.bf16.msra.mxu1 %v15133_v25  ;;  %v21707_v25 = vpack.c.bf16 %v19591_v30, %v19582_v51  ;;  %v21710_v51 = vpack.c.bf16 %v19629_v15, %v19623_v47 }
 0x8d0   : > { %21699 = vst [vmem:[#allocation168_spill] sm:$0xff] %v19702_v43  ;;  %v8857_v33 = vpop.f32.mrb[214].mxu0 }
 0x8d1   : > { %v9303_v63 = vpack.c.bf16 %v8857_v33, %v8853_v16  ;;  %v19707_v17 = vpop.f32.mrb[215].mxu0  ;;  %v8437_v30 = vadd.bf16 %v18933_v12, %v21710_v51 }
 0x8d2   : > { %21700 = vst [vmem:[#allocation167_spill] sm:$0xff] %v19707_v17  ;;  %v8498_v17 = vmax.bf16 %v21327_v32, %v8434_v50 }
 0x8d3   : > { %v9375_v24 = vadd.bf16 %v19338_v23, %v9303_v63  ;;  %9122 = vmatmul.mubr.bf16.gmra.mrb[64].mxu0 %v8497_v7  ;;  %v8501_v47 = vmax.bf16 %v21327_v32, %v8437_v30 }
 0x8d4   : > { %9131 = vmatprep.mubr.bf16.mxu0 %v21327_v32 }
 0x8d5   : > { %14762 = vmatmul.mubr.bf16.gmra.mrb[168].mxu1 %v9375_v24 }
 0x8d6   : > { %v8863_v33 = vpop.f32.mrb[216].mxu0 }
 0x8d7   : > { %v19718_v27 = vpop.f32.mrb[217].mxu0 }
 0x8d8   : > { %21702 = vst [vmem:[#allocation174_spill] sm:$0xff] %v19718_v27  ;;  %v8867_v16 = vpop.f32.mrb[218].mxu0 }
 0x8d9   : > { %v9304_v43 = vpack.c.bf16 %v8867_v16, %v8863_v33  ;;  %v19721_v57 = vpop.f32.mrb[219].mxu0 }
 0x8da   : > { %21703 = vst [vmem:[#allocation173_spill] sm:$0xff] %v19721_v57  ;;  %v8436_v57 = vadd.bf16 %v18933_v12, %v21707_v25 }
 0x8db   : > { %v9376_v7 = vadd.bf16 %v19338_v23, %v9304_v43  ;;  %9132 = vmatmul.mubr.bf16.gmra.mrb[68].mxu0 %v8498_v17 }
 0x8dc   : > { %v19724_v63 = vpop.f32.mrb[116].mxu1  ;;  %9141 = vmatprep.mubr.bf16.mxu0 %v21327_v32  ;;  %v8500_v22 = vmax.bf16 %v21327_v32, %v8436_v57 }
 0x8dd   : > { %v19731_v24 = vpop.f32.mrb[117].mxu1  ;;  %14765 = vmatprep.mubr.bf16.mxu1 %v9376_v7 }
 0x8de   : > { %v19733_v58 = vpop.f32.mrb[118].mxu1  ;;  %v8873_v50 = vpop.f32.mrb[220].mxu0 }
 0x8df   : > { %v19737_v43 = vpop.f32.mrb[119].mxu1  ;;  %v19739_v17 = vpop.f32.mrb[221].mxu0 }
 0x8e0   : > { %21705 = vst [vmem:[#allocation172_spill] sm:$0xff] %v19739_v17  ;;  %v8877_v16 = vpop.f32.mrb[222].mxu0 }
 0x8e1   : > { %v9305_v20 = vpack.c.bf16 %v8877_v16, %v8873_v50  ;;  %v19744_v10 = vpop.f32.mrb[223].mxu0 }
 0x8e2   : > { %21706 = vst [vmem:[#allocation171_spill] sm:$0xff] %v19744_v10 }
 0x8e3   : > { %v9377_v7 = vadd.bf16 %v19338_v23, %v9305_v20  ;;  %9142 = vmatmul.mubr.bf16.gmra.mrb[72].mxu0 %v8499_v52 }
 0x8e4   : > { %9151 = vmatprep.mubr.bf16.mxu0 %v21327_v32 }
 0x8e5   : > { %14766 = vmatmul.mubr.bf16.gmra.mrb[172].mxu1 %v9377_v7 }
 0x8e6   : > { %v8883_v27 = vpop.f32.mrb[224].mxu0 }
 0x8e7   : > { %v19752_v17 = vpop.f32.mrb[225].mxu0 }
 0x8e8   : > { %21708 = vst [vmem:[#allocation176_spill] sm:$0xff] %v19752_v17  ;;  %v8887_v33 = vpop.f32.mrb[226].mxu0 }
 0x8e9   : > { %v9306_v50 = vpack.c.bf16 %v8887_v33, %v8883_v27  ;;  %v19755_v16 = vpop.f32.mrb[227].mxu0  ;;  %v21713_v27 = vpack.c.bf16 %v19625_v19, %v19616_v38  ;;  %v21716_v38 = vpack.c.bf16 %v19666_v31, %v19660_v54 }
 0x8ea   : > { %21709 = vst [vmem:[#allocation175_spill] sm:$0xff] %v19755_v16 }
 0x8eb   : > { %v9378_v20 = vadd.bf16 %v19338_v23, %v9306_v50  ;;  %9152 = vmatmul.mubr.bf16.gmra.mrb[76].mxu0 %v8500_v22  ;;  %v8438_v50 = vadd.bf16 %v18933_v12, %v21713_v27  ;;  %v8439_v19 = vadd.bf16 %v18933_v12, %v21716_v38 }
 0x8ec   : > { %v19758_v52 = vpop.f32.mrb[120].mxu1  ;;  %9161 = vmatprep.mubr.bf16.mxu0 %v21327_v32 }
 0x8ed   : > { %v19765_v25 = vpop.f32.mrb[121].mxu1  ;;  %14769 = vmatprep.mubr.bf16.mxu1 %v9378_v20  ;;  %v15134_v20 = vld [vmem:[%s21053_s9 + $0x10] sm:$0xff]   ;;  %v8503_v54 = vmax.bf16 %v21327_v32, %v8439_v19 }
 0x8ee   : > { %v19767_v7 = vpop.f32.mrb[122].mxu1  ;;  %v8893_v57 = vpop.f32.mrb[228].mxu0  ;;  %14853 = vmatprep.subr.bf16.mxu1 %v15134_v20 }
 0x8ef   : > { %v19771_v33 = vpop.f32.mrb[123].mxu1  ;;  %v19773_v22 = vpop.f32.mrb[229].mxu0  ;;  %14854 = vmatpush3.bf16.msra.mxu1 %v15134_v20  ;;  %v21719_v20 = vpack.c.bf16 %v19662_v5, %v19653_v55 }
 0x8f0   : > { %21711 = vst [vmem:[#allocation180_spill] sm:$0xff] %v19773_v22  ;;  %v8897_v16 = vpop.f32.mrb[230].mxu0 }
 0x8f1   : > { %v9307_v15 = vpack.c.bf16 %v8897_v16, %v8893_v57  ;;  %v19778_v51 = vpop.f32.mrb[231].mxu0 }
 0x8f2   : > { %21712 = vst [vmem:[#allocation179_spill] sm:$0xff] %v19778_v51  ;;  %v8502_v51 = vmax.bf16 %v21327_v32, %v8438_v50 }
 0x8f3   : > { %v9379_v17 = vadd.bf16 %v19338_v23, %v9307_v15  ;;  %9162 = vmatmul.mubr.bf16.gmra.mrb[80].mxu0 %v8501_v47 }
 0x8f4   : > { %9171 = vmatprep.mubr.bf16.mxu0 %v21327_v32 }
 0x8f5   : > { %14770 = vmatmul.mubr.bf16.gmra.mrb[176].mxu1 %v9379_v17 }
 0x8f6   : > { %v8903_v16 = vpop.f32.mrb[232].mxu0 }
 0x8f7   : > { %v19789_v30 = vpop.f32.mrb[233].mxu0 }
 0x8f8   : > { %21714 = vst [vmem:[#allocation178_spill] sm:$0xff] %v19789_v30  ;;  %v8907_v57 = vpop.f32.mrb[234].mxu0 }
 0x8f9   : > { %v9308_v22 = vpack.c.bf16 %v8907_v57, %v8903_v16  ;;  %v19792_v10 = vpop.f32.mrb[235].mxu0 }
 0x8fa   : > { %21715 = vst [vmem:[#allocation177_spill] sm:$0xff] %v19792_v10  ;;  %v8440_v10 = vadd.bf16 %v18933_v12, %v21719_v20  ;;  %v21722_v20 = vpack.c.bf16 %v19700_v3, %v19694_v42 }
 0x8fb   : > { %v9380_v47 = vadd.bf16 %v19338_v23, %v9308_v22  ;;  %9172 = vmatmul.mubr.bf16.gmra.mrb[84].mxu0 %v8502_v51 }
 0x8fc   : > { %v19795_v15 = vpop.f32.mrb[124].mxu1  ;;  %9181 = vmatprep.mubr.bf16.mxu0 %v21327_v32  ;;  %v8504_v19 = vmax.bf16 %v21327_v32, %v8440_v10  ;;  %v21724_v10 = vld [vmem:[#allocation9_spill] sm:$0xff] }
 0x8fd   : > { %v19802_v17 = vpop.f32.mrb[125].mxu1  ;;  %14773 = vmatprep.mubr.bf16.mxu1 %v9380_v47 }
 0x8fe   : > { %v19804_v27 = vpop.f32.mrb[126].mxu1  ;;  %v8913_v50 = vpop.f32.mrb[236].mxu0 }
 0x8ff   : > { %v19808_v22 = vpop.f32.mrb[127].mxu1  ;;  %v19810_v51 = vpop.f32.mrb[237].mxu0 }
 0x900   : > { %21717 = vst [vmem:[#allocation184_spill] sm:$0xff] %v19810_v51  ;;  %v8917_v57 = vpop.f32.mrb[238].mxu0 }
 0x901   : > { %v9309_v31 = vpack.c.bf16 %v8917_v57, %v8913_v50  ;;  %v19815_v38 = vpop.f32.mrb[239].mxu0 }
 0x902   : > { %21718 = vst [vmem:[#allocation183_spill] sm:$0xff] %v19815_v38 }
 0x903   : > { %v9381_v47 = vadd.bf16 %v19338_v23, %v9309_v31  ;;  %9182 = vmatmul.mubr.bf16.gmra.mrb[88].mxu0 %v8503_v54 }
 0x904   : > { %9191 = vmatprep.mubr.bf16.mxu0 %v21327_v32 }
 0x905   : > { %14774 = vmatmul.mubr.bf16.gmra.mrb[180].mxu1 %v9381_v47  ;;  %v8441_v47 = vadd.bf16 %v18933_v12, %v21722_v20 }
 0x906   : > { %v8923_v30 = vpop.f32.mrb[240].mxu0 }
 0x907   : > { %v19823_v51 = vpop.f32.mrb[241].mxu0 }
 0x908   : > { %21720 = vst [vmem:[#allocation182_spill] sm:$0xff] %v19823_v51  ;;  %v8927_v16 = vpop.f32.mrb[242].mxu0  ;;  %v14723_v11 = vpop.f32.mrb[128].mxu1  ;;  %v21723_v51 = vld [vmem:[#allocation8_spill] sm:$0xff] }
 0x909   : > { %v9310_v50 = vpack.c.bf16 %v8927_v16, %v8923_v30  ;;  %v19826_v57 = vpop.f32.mrb[243].mxu0  ;;  %v9516_v31 = vpop.f32.mrb[129].mxu1  ;;  %v21725_v30 = vpack.c.bf16 %v21723_v51, %v21724_v10 }
 0x90a   : > { %21721 = vst [vmem:[#allocation181_spill] sm:$0xff] %v19826_v57  ;;  %v14724_v54 = vpop.f32.mrb[130].mxu1  ;;  %v21726_v57 = vld [vmem:[#allocation6_spill] sm:$0xff] }
 0x90b   : > { %v9382_v38 = vadd.bf16 %v19338_v23, %v9310_v50  ;;  %v10028_v9 = vpack.c.bf16 %v14724_v54, %v14723_v11  ;;  %9192 = vmatmul.mubr.bf16.gmra.mrb[92].mxu0 %v8504_v19  ;;  %v9519_v55 = vpop.f32.mrb[131].mxu1  ;;  %v21728_v50 = vpack.c.bf16 %v21726_v57, %v21727_v56  ;;  %v21731_v56 = vpack.c.bf16 %v19696_v36, %v19687_v48 }
 0x90c   : > { %v10027_v5 = vpack.c.bf16 %v9519_v55, %v9516_v31  ;;  %9201 = vmatprep.mubr.bf16.mxu0 %v21327_v32  ;;  %v8505_v55 = vmax.bf16 %v21327_v32, %v8441_v47 }
 0x90d   : > { %v19837_v16 = vadd.bf16 %v10028_v9, %v21725_v30  ;;  %14777 = vmatprep.mubr.bf16.mxu1 %v9382_v38  ;;  %v15135_v9 = vld [vmem:[%s21053_s9 + $0x18] sm:$0xff]   ;;  %v8442_v38 = vadd.bf16 %v18933_v12, %v21731_v56  ;;  %v21735_v56 = vld [vmem:[#allocation12_spill] sm:$0xff] }
 0x90e   : > { %v19842_v11 = vadd.bf16 %v10027_v5, %v21728_v50  ;;  %v8933_v19 = vpop.f32.mrb[244].mxu0  ;;  %14855 = vmatprep.subr.bf16.mxu1 %v15135_v9 }
 0x90f   : > { %v19844_v31 = vpop.f32.mrb[245].mxu0  ;;  %14856 = vmatpush3.bf16.msra.mxu1 %v15135_v9  ;;  %v8506_v10 = vmax.bf16 %v21327_v32, %v8442_v38  ;;  %v21734_v9 = vpack.c.bf16 %v19737_v43, %v19731_v24  ;;  %v21736_v38 = vld [vmem:[#allocation13_spill] sm:$0xff] }
 0x910   : > { %21729 = vst [vmem:[#allocation188_spill] sm:$0xff] %v19844_v31  ;;  %v8937_v54 = vpop.f32.mrb[246].mxu0 }
 0x911   : > { %v9311_v42 = vpack.c.bf16 %v8937_v54, %v8933_v19  ;;  %v19847_v3 = vpop.f32.mrb[247].mxu0 }
 0x912   : > { %21730 = vst [vmem:[#allocation187_spill] sm:$0xff] %v19847_v3 }
 0x913   : > { %v9383_v51 = vadd.bf16 %v19338_v23, %v9311_v42  ;;  %9202 = vmatmul.mubr.bf16.gmra.mrb[96].mxu0 %v8505_v55 }
 0x914   : > { %9211 = vmatprep.mubr.bf16.mxu0 %v21327_v32 }
 0x915   : > { %14778 = vmatmul.mubr.bf16.gmra.mrb[184].mxu1 %v9383_v51  ;;  %v8443_v51 = vadd.bf16 %v18933_v12, %v21734_v9 }
 0x916   : > { %v8943_v57 = vpop.f32.mrb[248].mxu0 }
 0x917   : > { %v19858_v5 = vpop.f32.mrb[249].mxu0 }
 0x918   : > { %21732 = vst [vmem:[#allocation186_spill] sm:$0xff] %v19858_v5  ;;  %v8947_v20 = vpop.f32.mrb[250].mxu0  ;;  %v14727_v47 = vpop.f32.mrb[132].mxu1  ;;  %v21739_v5 = vld [vmem:[#allocation11_spill] sm:$0xff] }
 0x919   : > { %v9312_v30 = vpack.c.bf16 %v8947_v20, %v8943_v57  ;;  %v19861_v50 = vpop.f32.mrb[251].mxu0  ;;  %v9532_v19 = vpop.f32.mrb[133].mxu1  ;;  %v21737_v57 = vpack.c.bf16 %v21735_v56, %v21736_v38 }
 0x91a   : > { %21733 = vst [vmem:[#allocation185_spill] sm:$0xff] %v19861_v50  ;;  %v14728_v54 = vpop.f32.mrb[134].mxu1  ;;  %v21738_v50 = vld [vmem:[#allocation10_spill] sm:$0xff] }
 0x91b   : > { %v9384_v55 = vadd.bf16 %v19338_v23, %v9312_v30  ;;  %v10030_v42 = vpack.c.bf16 %v14728_v54, %v14727_v47  ;;  %9212 = vmatmul.mubr.bf16.gmra.mrb[100].mxu0 %v8506_v10  ;;  %v9535_v48 = vpop.f32.mrb[135].mxu1  ;;  %v21740_v30 = vpack.c.bf16 %v21738_v50, %v21739_v5 }
 0x91c   : > { %v10029_v36 = vpack.c.bf16 %v9535_v48, %v9532_v19  ;;  %9221 = vmatprep.mubr.bf16.mxu0 %v21327_v32  ;;  %v8507_v48 = vmax.bf16 %v21327_v32, %v8443_v51 }
 0x91d   : > { %v19872_v20 = vadd.bf16 %v10030_v42, %v21737_v57  ;;  %14781 = vmatprep.mubr.bf16.mxu1 %v9384_v55  ;;  %v21743_v55 = vpack.c.bf16 %v19733_v58, %v19724_v63 }
 0x91e   : > { %v19877_v47 = vadd.bf16 %v10029_v36, %v21740_v30  ;;  %v8953_v10 = vpop.f32.mrb[252].mxu0 }
 0x91f   : > { %v19879_v19 = vpop.f32.mrb[253].mxu0  ;;  %v8444_v5 = vadd.bf16 %v18933_v12, %v21743_v55  ;;  %v21747_v55 = vld [vmem:[#allocation18_spill] sm:$0xff] }
 0x920   : > { %21741 = vst [vmem:[#allocation192_spill] sm:$0xff] %v19879_v19  ;;  %v8957_v54 = vpop.f32.mrb[254].mxu0 }
 0x921   : > { %v9313_v24 = vpack.c.bf16 %v8957_v54, %v8953_v10  ;;  %v19882_v43 = vpop.f32.mrb[255].mxu0  ;;  %v8508_v51 = vmax.bf16 %v21327_v32, %v8444_v5  ;;  %v21748_v5 = vld [vmem:[#allocation19_spill] sm:$0xff] }
 0x922   : > { %21742 = vst [vmem:[#allocation191_spill] sm:$0xff] %v19882_v43 }
 0x923   : > { %v9385_v9 = vadd.bf16 %v19338_v23, %v9313_v24  ;;  %9222 = vmatmul.mubr.bf16.gmra.mrb[104].mxu0 %v8507_v48  ;;  %v21746_v24 = vpack.c.bf16 %v19771_v33, %v19765_v25 }
 0x924   : > { %9231 = vmatprep.mubr.bf16.mxu0 %v21327_v32 }
 0x925   : > { %14782 = vmatmul.mubr.bf16.gmra.mrb[188].mxu1 %v9385_v9  ;;  %v8445_v9 = vadd.bf16 %v18933_v12, %v21746_v24 }
 0x926   : > { %v8963_v50 = vpop.f32.mrb[0].mxu0 }
 0x927   : > { %v19890_v42 = vpop.f32.mrb[1].mxu0 }
 0x928   : > { %21744 = vst [vmem:[#allocation190_spill] sm:$0xff] %v19890_v42  ;;  %v8967_v36 = vpop.f32.mrb[2].mxu0  ;;  %v14731_v56 = vpop.f32.mrb[136].mxu1  ;;  %v21751_v42 = vld [vmem:[#allocation16_spill] sm:$0xff] }
 0x929   : > { %v9314_v38 = vpack.c.bf16 %v8967_v36, %v8963_v50  ;;  %v19893_v57 = vpop.f32.mrb[3].mxu0  ;;  %v9548_v30 = vpop.f32.mrb[137].mxu1  ;;  %v21749_v50 = vpack.c.bf16 %v21747_v55, %v21748_v5 }
 0x92a   : > { %21745 = vst [vmem:[#allocation189_spill] sm:$0xff] %v19893_v57  ;;  %v14732_v10 = vpop.f32.mrb[138].mxu1  ;;  %v21750_v57 = vld [vmem:[#allocation15_spill] sm:$0xff] }
 0x92b   : > { %v9386_v54 = vadd.bf16 %v19338_v23, %v9314_v38  ;;  %v10032_v48 = vpack.c.bf16 %v14732_v10, %v14731_v56  ;;  %9232 = vmatmul.mubr.bf16.gmra.mrb[108].mxu0 %v8508_v51  ;;  %v9551_v63 = vpop.f32.mrb[139].mxu1  ;;  %v21752_v38 = vpack.c.bf16 %v21750_v57, %v21751_v42  ;;  %v21755_v42 = vpack.c.bf16 %v19767_v7, %v19758_v52 }
 0x92c   : > { %v10031_v58 = vpack.c.bf16 %v9551_v63, %v9548_v30  ;;  %9241 = vmatprep.mubr.bf16.mxu0 %v21327_v32  ;;  %v8509_v63 = vmax.bf16 %v21327_v32, %v8445_v9 }
 0x92d   : > { %v19904_v36 = vadd.bf16 %v10032_v48, %v21749_v50  ;;  %14785 = vmatprep.mubr.bf16.mxu1 %v9386_v54  ;;  %v15136_v48 = vld [vmem:[%s21053_s9 + $0x20] sm:$0xff]   ;;  %v8446_v57 = vadd.bf16 %v18933_v12, %v21755_v42  ;;  %v21759_v42 = vld [vmem:[#allocation24_spill] sm:$0xff] }
 0x92e   : > { %v19909_v56 = vadd.bf16 %v10031_v58, %v21752_v38  ;;  %v8973_v51 = vpop.f32.mrb[4].mxu0  ;;  %14857 = vmatprep.subr.bf16.mxu1 %v15136_v48 }
 0x92f   : > { %v19911_v30 = vpop.f32.mrb[5].mxu0  ;;  %14858 = vmatpush3.bf16.msra.mxu1 %v15136_v48  ;;  %v8510_v5 = vmax.bf16 %v21327_v32, %v8446_v57  ;;  %v21758_v48 = vpack.c.bf16 %v19808_v22, %v19802_v17  ;;  %v21760_v57 = vld [vmem:[#allocation25_spill] sm:$0xff] }
 0x930   : > { %21753 = vst [vmem:[#allocation196_spill] sm:$0xff] %v19911_v30  ;;  %v8977_v10 = vpop.f32.mrb[6].mxu0 }
 0x931   : > { %v9315_v25 = vpack.c.bf16 %v8977_v10, %v8973_v51  ;;  %v19914_v33 = vpop.f32.mrb[7].mxu0 }
 0x932   : > { %21754 = vst [vmem:[#allocation195_spill] sm:$0xff] %v19914_v33 }
 0x933   : > { %v9387_v54 = vadd.bf16 %v19338_v23, %v9315_v25  ;;  %9242 = vmatmul.mubr.bf16.gmra.mrb[112].mxu0 %v8509_v63 }
 0x934   : > { %9251 = vmatprep.mubr.bf16.mxu0 %v21327_v32 }
 0x935   : > { %14786 = vmatmul.mubr.bf16.gmra.mrb[192].mxu1 %v9387_v54  ;;  %v8447_v54 = vadd.bf16 %v18933_v12, %v21758_v48 }
 0x936   : > { %v8983_v58 = vpop.f32.mrb[8].mxu0 }
 0x937   : > { %v19925_v24 = vpop.f32.mrb[9].mxu0 }
 0x938   : > { %21756 = vst [vmem:[#allocation194_spill] sm:$0xff] %v19925_v24  ;;  %v8987_v9 = vpop.f32.mrb[10].mxu0  ;;  %v14735_v55 = vpop.f32.mrb[140].mxu1  ;;  %v21763_v24 = vld [vmem:[#allocation22_spill] sm:$0xff] }
 0x939   : > { %v9316_v50 = vpack.c.bf16 %v8987_v9, %v8983_v58  ;;  %v19928_v38 = vpop.f32.mrb[11].mxu0  ;;  %v9564_v51 = vpop.f32.mrb[141].mxu1  ;;  %v21761_v58 = vpack.c.bf16 %v21759_v42, %v21760_v57 }
 0x93a   : > { %21757 = vst [vmem:[#allocation193_spill] sm:$0xff] %v19928_v38  ;;  %v14736_v10 = vpop.f32.mrb[142].mxu1  ;;  %v21762_v38 = vld [vmem:[#allocation21_spill] sm:$0xff] }
 0x93b   : > { %v9388_v63 = vadd.bf16 %v19338_v23, %v9316_v50  ;;  %v10034_v25 = vpack.c.bf16 %v14736_v10, %v14735_v55  ;;  %9252 = vmatmul.mubr.bf16.gmra.mrb[116].mxu0 %v8510_v5  ;;  %v9567_v52 = vpop.f32.mrb[143].mxu1  ;;  %v21764_v50 = vpack.c.bf16 %v21762_v38, %v21763_v24 }
 0x93c   : > { %v10033_v7 = vpack.c.bf16 %v9567_v52, %v9564_v51  ;;  %9261 = vmatprep.mubr.bf16.mxu0 %v21327_v32  ;;  %v8511_v52 = vmax.bf16 %v21327_v32, %v8447_v54 }
 0x93d   : > { %v19939_v9 = vadd.bf16 %v10034_v25, %v21761_v58  ;;  %14789 = vmatprep.mubr.bf16.mxu1 %v9388_v63  ;;  %v21767_v63 = vpack.c.bf16 %v19804_v27, %v19795_v15 }
 0x93e   : > { %v19944_v55 = vadd.bf16 %v10033_v7, %v21764_v50  ;;  %v8993_v5 = vpop.f32.mrb[12].mxu0 }
 0x93f   : > { %v19946_v51 = vpop.f32.mrb[13].mxu0  ;;  %v8448_v24 = vadd.bf16 %v18933_v12, %v21767_v63  ;;  %v21770_v12 = vld [vmem:[#allocation28_spill] sm:$0xff] }
 0x940   : > { %21765 = vst [vmem:[#allocation200_spill] sm:$0xff] %v19946_v51  ;;  %v8997_v10 = vpop.f32.mrb[14].mxu0 }
 0x941   : > { %v9317_v17 = vpack.c.bf16 %v8997_v10, %v8993_v5  ;;  %v19949_v22 = vpop.f32.mrb[15].mxu0  ;;  %v8512_v54 = vmax.bf16 %v21327_v32, %v8448_v24 }
 0x942   : > { %21766 = vst [vmem:[#allocation199_spill] sm:$0xff] %v19949_v22  ;;  %v21774_v22 = vld [vmem:[#allocation27_spill] sm:$0xff] }
 0x943   : > { %v9389_v48 = vadd.bf16 %v19338_v23, %v9317_v17  ;;  %9262 = vmatmul.mubr.bf16.gmra.mrb[120].mxu0 %v8511_v52  ;;  %v21771_v17 = vld [vmem:[#allocation29_spill] sm:$0xff] }
 0x944   : > { %9271 = vmatprep.mubr.bf16.mxu0 %v21327_v32 }
 0x945   : > { %14790 = vmatmul.mubr.bf16.gmra.mrb[196].mxu1 %v9389_v48  ;;  %v21772_v48 = vpack.c.bf16 %v21770_v12, %v21771_v17 }
 0x946   : > { %v9003_v38 = vpop.f32.mrb[16].mxu0 }
 0x947   : > { %v19957_v25 = vpop.f32.mrb[17].mxu0 }
 0x948   : > { %21768 = vst [vmem:[#allocation198_spill] sm:$0xff] %v19957_v25  ;;  %v9007_v7 = vpop.f32.mrb[18].mxu0  ;;  %v14739_v42 = vpop.f32.mrb[144].mxu1  ;;  %v21773_v25 = vld [vmem:[#allocation26_spill] sm:$0xff] }
 0x949   : > { %v9318_v57 = vpack.c.bf16 %v9007_v7, %v9003_v38  ;;  %v19960_v58 = vpop.f32.mrb[19].mxu0  ;;  %v9580_v50 = vpop.f32.mrb[145].mxu1  ;;  %v21775_v24 = vpack.c.bf16 %v21773_v25, %v21774_v22 }
 0x94a   : > { %21769 = vst [vmem:[#allocation197_spill] sm:$0xff] %v19960_v58  ;;  %v14740_v5 = vpop.f32.mrb[146].mxu1 }
 0x94b   : > { %v9390_v10 = vadd.bf16 %v19338_v23, %v9318_v57  ;;  %v10036_v52 = vpack.c.bf16 %v14740_v5, %v14739_v42  ;;  %9272 = vmatmul.mubr.bf16.gmra.mrb[124].mxu0 %v8512_v54  ;;  %v9583_v15 = vpop.f32.mrb[147].mxu1  ;;  %v15137_v54 = vld [vmem:[%s21053_s9 + $0x28] sm:$0xff]  }
 0x94c   : > { %v10035_v27 = vpack.c.bf16 %v9583_v15, %v9580_v50  ;;  %14859 = vmatprep.subr.bf16.mxu1 %v15137_v54 }
 0x94d   : > { %v19966_v63 = vadd.bf16 %v10036_v52, %v21772_v48  ;;  %14793 = vmatprep.mubr.bf16.mxu1 %v9390_v10  ;;  %14860 = vmatpush3.bf16.msra.mxu1 %v15137_v54 }
 0x94e   : > { %v19971_v38 = vadd.bf16 %v10035_v27, %v21775_v24  ;;  %v9013_v7 = vpop.f32.mrb[20].mxu0 }
 0x94f   : > { %v19973_v58 = vpop.f32.mrb[21].mxu0 }
 0x950   : > { %21776 = vst [vmem:[#allocation204_spill] sm:$0xff] %v19973_v58  ;;  %v9017_v51 = vpop.f32.mrb[22].mxu0 }
 0x951   : > { %v9319_v57 = vpack.c.bf16 %v9017_v51, %v9013_v7  ;;  %v19975_v42 = vpop.f32.mrb[23].mxu0  ;;  %v21780_v7 = vld [vmem:[#allocation32_spill] sm:$0xff] }
 0x952   : > { %21777 = vst [vmem:[#allocation203_spill] sm:$0xff] %v19975_v42 }
 0x953   : > { %v9391_v50 = vadd.bf16 %v19338_v23, %v9319_v57  ;;  %v21781_v57 = vld [vmem:[#allocation33_spill] sm:$0xff] }
 0x954   : > { %v21782_v42 = vpack.c.bf16 %v21780_v7, %v21781_v57 }
 0x955   : > { %14794 = vmatmul.mubr.bf16.gmra.mrb[200].mxu1 %v9391_v50  ;;  %v21783_v50 = vld [vmem:[#allocation30_spill] sm:$0xff] }
 0x956   : > { %v9023_v5 = vpop.f32.mrb[24].mxu0 }
 0x957   : > { %v19981_v22 = vpop.f32.mrb[25].mxu0 }
 0x958   : > { %21778 = vst [vmem:[#allocation202_spill] sm:$0xff] %v19981_v22  ;;  %v9027_v25 = vpop.f32.mrb[26].mxu0  ;;  %v14743_v10 = vpop.f32.mrb[148].mxu1  ;;  %v21784_v22 = vld [vmem:[#allocation31_spill] sm:$0xff] }
 0x959   : > { %v9320_v52 = vpack.c.bf16 %v9027_v25, %v9023_v5  ;;  %v19983_v15 = vpop.f32.mrb[27].mxu0  ;;  %v9596_v51 = vpop.f32.mrb[149].mxu1  ;;  %v21785_v58 = vpack.c.bf16 %v21783_v50, %v21784_v22  ;;  %v21790_v50 = vld [vmem:[#allocation36_spill] sm:$0xff] }
 0x95a   : > { %21779 = vst [vmem:[#allocation201_spill] sm:$0xff] %v19983_v15  ;;  %v14744_v27 = vpop.f32.mrb[150].mxu1 }
 0x95b   : > { %v9392_v12 = vadd.bf16 %v19338_v23, %v9320_v52  ;;  %v10038_v17 = vpack.c.bf16 %v14744_v27, %v14743_v10  ;;  %v9599_v48 = vpop.f32.mrb[151].mxu1 }
 0x95c   : > { %v10037_v24 = vpack.c.bf16 %v9599_v48, %v9596_v51 }
 0x95d   : > { %v19989_v54 = vadd.bf16 %v10038_v17, %v21782_v42  ;;  %14797 = vmatprep.mubr.bf16.mxu1 %v9392_v12 }
 0x95e   : > { %v19994_v33 = vadd.bf16 %v10037_v24, %v21785_v58  ;;  %v9033_v5 = vpop.f32.mrb[28].mxu0 }
 0x95f   : > { %v19996_v25 = vpop.f32.mrb[29].mxu0 }
 0x960   : > { %21786 = vst [vmem:[#allocation208_spill] sm:$0xff] %v19996_v25  ;;  %v9037_v15 = vpop.f32.mrb[30].mxu0 }
 0x961   : > { %v9321_v30 = vpack.c.bf16 %v9037_v15, %v9033_v5  ;;  %v19998_v52 = vpop.f32.mrb[31].mxu0  ;;  %v21791_v5 = vld [vmem:[#allocation37_spill] sm:$0xff] }
 0x962   : > { %21787 = vst [vmem:[#allocation207_spill] sm:$0xff] %v19998_v52  ;;  %v21792_v52 = vpack.c.bf16 %v21790_v50, %v21791_v5 }
 0x963   : > { %v9393_v10 = vadd.bf16 %v19338_v23, %v9321_v30 }
 0x965   : > { %14798 = vmatmul.mubr.bf16.gmra.mrb[204].mxu1 %v9393_v10  ;;  %v21793_v10 = vld [vmem:[#allocation34_spill] sm:$0xff] }
 0x966   : > { %v9043_v51 = vpop.f32.mrb[32].mxu0 }
 0x967   : > { %v20001_v27 = vpop.f32.mrb[33].mxu0 }
 0x968   : > { %21788 = vst [vmem:[#allocation206_spill] sm:$0xff] %v20001_v27  ;;  %v9047_v42 = vpop.f32.mrb[34].mxu0  ;;  %v14747_v12 = vpop.f32.mrb[152].mxu1  ;;  %v21794_v27 = vld [vmem:[#allocation35_spill] sm:$0xff] }
 0x969   : > { %v9322_v17 = vpack.c.bf16 %v9047_v42, %v9043_v51  ;;  %v20003_v48 = vpop.f32.mrb[35].mxu0  ;;  %v9612_v58 = vpop.f32.mrb[153].mxu1  ;;  %v21795_v25 = vpack.c.bf16 %v21793_v10, %v21794_v27 }
 0x96a   : > { %21789 = vst [vmem:[#allocation205_spill] sm:$0xff] %v20003_v48  ;;  %v14748_v22 = vpop.f32.mrb[154].mxu1 }
 0x96b   : > { %v9394_v24 = vadd.bf16 %v19338_v23, %v9322_v17  ;;  %v10040_v7 = vpack.c.bf16 %v14748_v22, %v14747_v12  ;;  %v9615_v57 = vpop.f32.mrb[155].mxu1  ;;  %v15138_v12 = vld [vmem:[%s21053_s9 + $0x30] sm:$0xff]  }
 0x96c   : > { %v10039_v15 = vpack.c.bf16 %v9615_v57, %v9612_v58  ;;  %14861 = vmatprep.subr.bf16.mxu1 %v15138_v12 }
 0x96d   : > { %v20009_v30 = vadd.bf16 %v10040_v7, %v21792_v52  ;;  %14801 = vmatprep.mubr.bf16.mxu1 %v9394_v24  ;;  %14862 = vmatpush3.bf16.msra.mxu1 %v15138_v12 }
 0x96e   : > { %v20014_v43 = vadd.bf16 %v10039_v15, %v21795_v25  ;;  %v9053_v51 = vpop.f32.mrb[36].mxu0 }
 0x96f   : > { %v20016_v42 = vpop.f32.mrb[37].mxu0 }
 0x970   : > { %21796 = vst [vmem:[#allocation212_spill] sm:$0xff] %v20016_v42  ;;  %v9057_v48 = vpop.f32.mrb[38].mxu0 }
 0x971   : > { %v9323_v19 = vpack.c.bf16 %v9057_v48, %v9053_v51  ;;  %v20018_v17 = vpop.f32.mrb[39].mxu0  ;;  %v21800_v51 = vld [vmem:[#allocation40_spill] sm:$0xff] }
 0x972   : > { %21797 = vst [vmem:[#allocation211_spill] sm:$0xff] %v20018_v17 }
 0x973   : > { %v9395_v52 = vadd.bf16 %v19338_v23, %v9323_v19  ;;  %v21801_v19 = vld [vmem:[#allocation41_spill] sm:$0xff] }
 0x974   : > { %v21802_v17 = vpack.c.bf16 %v21800_v51, %v21801_v19 }
 0x975   : > { %14802 = vmatmul.mubr.bf16.gmra.mrb[208].mxu1 %v9395_v52  ;;  %v21803_v52 = vld [vmem:[#allocation38_spill] sm:$0xff] }
 0x976   : > { %v9063_v58 = vpop.f32.mrb[40].mxu0 }
 0x977   : > { %v20024_v27 = vpop.f32.mrb[41].mxu0 }
 0x978   : > { %21798 = vst [vmem:[#allocation210_spill] sm:$0xff] %v20024_v27  ;;  %v9067_v25 = vpop.f32.mrb[42].mxu0  ;;  %v14751_v22 = vpop.f32.mrb[156].mxu1  ;;  %v21804_v27 = vld [vmem:[#allocation39_spill] sm:$0xff] }
 0x979   : > { %v9324_v24 = vpack.c.bf16 %v9067_v25, %v9063_v58  ;;  %v20026_v7 = vpop.f32.mrb[43].mxu0  ;;  %v9628_v48 = vpop.f32.mrb[157].mxu1  ;;  %v21805_v42 = vpack.c.bf16 %v21803_v52, %v21804_v27  ;;  %v21810_v52 = vld [vmem:[#allocation44_spill] sm:$0xff] }
 0x97a   : > { %21799 = vst [vmem:[#allocation209_spill] sm:$0xff] %v20026_v7  ;;  %v14752_v57 = vpop.f32.mrb[158].mxu1 }
 0x97b   : > { %v9396_v15 = vadd.bf16 %v19338_v23, %v9324_v24  ;;  %v10042_v50 = vpack.c.bf16 %v14752_v57, %v14751_v22  ;;  %v9631_v5 = vpop.f32.mrb[159].mxu1 }
 0x97c   : > { %v10041_v10 = vpack.c.bf16 %v9631_v5, %v9628_v48 }
 0x97d   : > { %v20032_v12 = vadd.bf16 %v10042_v50, %v21802_v17  ;;  %14805 = vmatprep.mubr.bf16.mxu1 %v9396_v15 }
 0x97e   : > { %v20037_v3 = vadd.bf16 %v10041_v10, %v21805_v42  ;;  %v9073_v58 = vpop.f32.mrb[44].mxu0 }
 0x97f   : > { %v20039_v25 = vpop.f32.mrb[45].mxu0 }
 0x980   : > { %21806 = vst [vmem:[#allocation216_spill] sm:$0xff] %v20039_v25  ;;  %v9077_v7 = vpop.f32.mrb[46].mxu0 }
 0x981   : > { %v9325_v31 = vpack.c.bf16 %v9077_v7, %v9073_v58  ;;  %v20041_v24 = vpop.f32.mrb[47].mxu0  ;;  %v21811_v58 = vld [vmem:[#allocation45_spill] sm:$0xff] }
 0x982   : > { %21807 = vst [vmem:[#allocation215_spill] sm:$0xff] %v20041_v24  ;;  %v21812_v24 = vpack.c.bf16 %v21810_v52, %v21811_v58 }
 0x983   : > { %v9397_v22 = vadd.bf16 %v19338_v23, %v9325_v31 }
 0x985   : > { %14806 = vmatmul.mubr.bf16.gmra.mrb[212].mxu1 %v9397_v22  ;;  %v21813_v22 = vld [vmem:[#allocation42_spill] sm:$0xff] }
 0x986   : > { %v9083_v48 = vpop.f32.mrb[48].mxu0 }
 0x987   : > { %v20044_v57 = vpop.f32.mrb[49].mxu0 }
 0x988   : > { %21808 = vst [vmem:[#allocation214_spill] sm:$0xff] %v20044_v57  ;;  %v9087_v17 = vpop.f32.mrb[50].mxu0  ;;  %v14755_v15 = vpop.f32.mrb[160].mxu1  ;;  %v21814_v57 = vld [vmem:[#allocation43_spill] sm:$0xff] }
 0x989   : > { %v9326_v50 = vpack.c.bf16 %v9087_v17, %v9083_v48  ;;  %v20046_v5 = vpop.f32.mrb[51].mxu0  ;;  %v9644_v42 = vpop.f32.mrb[161].mxu1  ;;  %v21815_v25 = vpack.c.bf16 %v21813_v22, %v21814_v57 }
 0x98a   : > { %21809 = vst [vmem:[#allocation213_spill] sm:$0xff] %v20046_v5  ;;  %v14756_v27 = vpop.f32.mrb[162].mxu1 }
 0x98b   : > { %v9398_v10 = vadd.bf16 %v19338_v23, %v9326_v50  ;;  %v10044_v51 = vpack.c.bf16 %v14756_v27, %v14755_v15  ;;  %v9647_v19 = vpop.f32.mrb[163].mxu1  ;;  %v15139_v15 = vld [vmem:[%s21053_s9 + $0x38] sm:$0xff]  }
 0x98c   : > { %v10043_v7 = vpack.c.bf16 %v9647_v19, %v9644_v42  ;;  %14863 = vmatprep.subr.bf16.mxu1 %v15139_v15 }
 0x98d   : > { %v20052_v31 = vadd.bf16 %v10044_v51, %v21812_v24  ;;  %14809 = vmatprep.mubr.bf16.mxu1 %v9398_v10  ;;  %14864 = vmatpush3.bf16.msra.mxu1 %v15139_v15 }
 0x98e   : > { %v20057_v21 = vadd.bf16 %v10043_v7, %v21815_v25  ;;  %v9093_v48 = vpop.f32.mrb[52].mxu0 }
 0x98f   : > { %v20059_v17 = vpop.f32.mrb[53].mxu0 }
 0x990   : > { %21816 = vst [vmem:[#allocation220_spill] sm:$0xff] %v20059_v17  ;;  %v9097_v5 = vpop.f32.mrb[54].mxu0 }
 0x991   : > { %v9327_v6 = vpack.c.bf16 %v9097_v5, %v9093_v48  ;;  %v20061_v50 = vpop.f32.mrb[55].mxu0  ;;  %v21820_v48 = vld [vmem:[#allocation48_spill] sm:$0xff] }
 0x992   : > { %21817 = vst [vmem:[#allocation219_spill] sm:$0xff] %v20061_v50 }
 0x993   : > { %v9399_v24 = vadd.bf16 %v19338_v23, %v9327_v6  ;;  %v21821_v6 = vld [vmem:[#allocation49_spill] sm:$0xff] }
 0x994   : > { %v21822_v50 = vpack.c.bf16 %v21820_v48, %v21821_v6 }
 0x995   : > { %14810 = vmatmul.mubr.bf16.gmra.mrb[216].mxu1 %v9399_v24  ;;  %v21823_v24 = vld [vmem:[#allocation46_spill] sm:$0xff] }
 0x996   : > { %v9103_v42 = vpop.f32.mrb[56].mxu0 }
 0x997   : > { %v20067_v57 = vpop.f32.mrb[57].mxu0 }
 0x998   : > { %21818 = vst [vmem:[#allocation218_spill] sm:$0xff] %v20067_v57  ;;  %v9107_v25 = vpop.f32.mrb[58].mxu0  ;;  %v14759_v27 = vpop.f32.mrb[164].mxu1  ;;  %v21824_v57 = vld [vmem:[#allocation47_spill] sm:$0xff] }
 0x999   : > { %v9328_v10 = vpack.c.bf16 %v9107_v25, %v9103_v42  ;;  %v20069_v51 = vpop.f32.mrb[59].mxu0  ;;  %v9660_v5 = vpop.f32.mrb[165].mxu1  ;;  %v21825_v17 = vpack.c.bf16 %v21823_v24, %v21824_v57  ;;  %v21830_v24 = vld [vmem:[#allocation52_spill] sm:$0xff] }
 0x99a   : > { %21819 = vst [vmem:[#allocation217_spill] sm:$0xff] %v20069_v51  ;;  %v14760_v19 = vpop.f32.mrb[166].mxu1 }
 0x99b   : > { %v9400_v7 = vadd.bf16 %v19338_v23, %v9328_v10  ;;  %v10046_v52 = vpack.c.bf16 %v14760_v19, %v14759_v27  ;;  %v9663_v58 = vpop.f32.mrb[167].mxu1 }
 0x99c   : > { %v10045_v22 = vpack.c.bf16 %v9663_v58, %v9660_v5 }
 0x99d   : > { %v20075_v15 = vadd.bf16 %v10046_v52, %v21822_v50  ;;  %14813 = vmatprep.mubr.bf16.mxu1 %v9400_v7 }
 0x99e   : > { %v20080_v46 = vadd.bf16 %v10045_v22, %v21825_v17  ;;  %v9113_v42 = vpop.f32.mrb[60].mxu0 }
 0x99f   : > { %v20082_v25 = vpop.f32.mrb[61].mxu0 }
 0x9a0   : > { %21826 = vst [vmem:[#allocation8_spill] sm:$0xff] %v20082_v25  ;;  %v9117_v51 = vpop.f32.mrb[62].mxu0 }
 0x9a1   : > { %v9329_v34 = vpack.c.bf16 %v9117_v51, %v9113_v42  ;;  %v20084_v10 = vpop.f32.mrb[63].mxu0  ;;  %v21831_v42 = vld [vmem:[#allocation53_spill] sm:$0xff] }
 0x9a2   : > { %21827 = vst [vmem:[#allocation9_spill] sm:$0xff] %v20084_v10  ;;  %v21832_v10 = vpack.c.bf16 %v21830_v24, %v21831_v42 }
 0x9a3   : > { %v9401_v27 = vadd.bf16 %v19338_v23, %v9329_v34 }
 0x9a5   : > { %14814 = vmatmul.mubr.bf16.gmra.mrb[220].mxu1 %v9401_v27  ;;  %v21833_v27 = vld [vmem:[#allocation50_spill] sm:$0xff] }
 0x9a6   : > { %v9123_v5 = vpop.f32.mrb[64].mxu0 }
 0x9a7   : > { %v20087_v19 = vpop.f32.mrb[65].mxu0 }
 0x9a8   : > { %21828 = vst [vmem:[#allocation6_spill] sm:$0xff] %v20087_v19  ;;  %v9127_v50 = vpop.f32.mrb[66].mxu0  ;;  %v14763_v7 = vpop.f32.mrb[168].mxu1  ;;  %v21834_v19 = vld [vmem:[#allocation51_spill] sm:$0xff] }
 0x9a9   : > { %v9330_v52 = vpack.c.bf16 %v9127_v50, %v9123_v5  ;;  %v20089_v58 = vpop.f32.mrb[67].mxu0  ;;  %v9676_v17 = vpop.f32.mrb[169].mxu1  ;;  %v21835_v25 = vpack.c.bf16 %v21833_v27, %v21834_v19  ;;  %v21840_v27 = vld [vmem:[#allocation56_spill] sm:$0xff] }
 0x9aa   : > { %21829 = vst [vmem:[#allocation7_spill] sm:$0xff] %v20089_v58  ;;  %v14764_v57 = vpop.f32.mrb[170].mxu1 }
 0x9ab   : > { %v9402_v22 = vadd.bf16 %v19338_v23, %v9330_v52  ;;  %v10048_v48 = vpack.c.bf16 %v14764_v57, %v14763_v7  ;;  %v9679_v6 = vpop.f32.mrb[171].mxu1 }
 0x9ac   : > { %v10047_v51 = vpack.c.bf16 %v9679_v6, %v9676_v17 }
 0x9ad   : > { %v20095_v34 = vadd.bf16 %v10048_v48, %v21832_v10  ;;  %14817 = vmatprep.mubr.bf16.mxu1 %v9402_v22 }
 0x9ae   : > { %v20100_v8 = vadd.bf16 %v10047_v51, %v21835_v25  ;;  %v9133_v5 = vpop.f32.mrb[68].mxu0 }
 0x9af   : > { %v20102_v50 = vpop.f32.mrb[69].mxu0 }
 0x9b0   : > { %21836 = vst [vmem:[#allocation12_spill] sm:$0xff] %v20102_v50  ;;  %v9137_v58 = vpop.f32.mrb[70].mxu0 }
 0x9b1   : > { %v9331_v49 = vpack.c.bf16 %v9137_v58, %v9133_v5  ;;  %v20104_v52 = vpop.f32.mrb[71].mxu0  ;;  %v21841_v5 = vld [vmem:[#allocation57_spill] sm:$0xff] }
 0x9b2   : > { %21837 = vst [vmem:[#allocation13_spill] sm:$0xff] %v20104_v52  ;;  %v21842_v52 = vpack.c.bf16 %v21840_v27, %v21841_v5 }
 0x9b3   : > { %v9403_v7 = vadd.bf16 %v19338_v23, %v9331_v49 }
 0x9b5   : > { %14818 = vmatmul.mubr.bf16.gmra.mrb[224].mxu1 %v9403_v7  ;;  %v21843_v7 = vld [vmem:[#allocation54_spill] sm:$0xff] }
 0x9b6   : > { %v9143_v17 = vpop.f32.mrb[72].mxu0 }
 0x9b7   : > { %v20107_v57 = vpop.f32.mrb[73].mxu0 }
 0x9b8   : > { %21838 = vst [vmem:[#allocation10_spill] sm:$0xff] %v20107_v57  ;;  %v9147_v10 = vpop.f32.mrb[74].mxu0  ;;  %v14767_v22 = vpop.f32.mrb[172].mxu1  ;;  %v21844_v57 = vld [vmem:[#allocation55_spill] sm:$0xff] }
 0x9b9   : > { %v9332_v48 = vpack.c.bf16 %v9147_v10, %v9143_v17  ;;  %v20109_v6 = vpop.f32.mrb[75].mxu0  ;;  %v9692_v25 = vpop.f32.mrb[173].mxu1  ;;  %v21845_v50 = vpack.c.bf16 %v21843_v7, %v21844_v57  ;;  %v21850_v7 = vld [vmem:[#allocation60_spill] sm:$0xff] }
 0x9ba   : > { %21839 = vst [vmem:[#allocation11_spill] sm:$0xff] %v20109_v6  ;;  %v14768_v19 = vpop.f32.mrb[174].mxu1 }
 0x9bb   : > { %v9404_v51 = vadd.bf16 %v19338_v23, %v9332_v48  ;;  %v10050_v24 = vpack.c.bf16 %v14768_v19, %v14767_v22  ;;  %v9695_v42 = vpop.f32.mrb[175].mxu1 }
 0x9bc   : > { %v10049_v58 = vpack.c.bf16 %v9695_v42, %v9692_v25 }
 0x9bd   : > { %v20115_v49 = vadd.bf16 %v10050_v24, %v21842_v52  ;;  %14821 = vmatprep.mubr.bf16.mxu1 %v9404_v51 }
 0x9be   : > { %v20120_v44 = vadd.bf16 %v10049_v58, %v21845_v50  ;;  %v9153_v17 = vpop.f32.mrb[76].mxu0 }
 0x9bf   : > { %v20122_v10 = vpop.f32.mrb[77].mxu0 }
 0x9c0   : > { %21846 = vst [vmem:[#allocation18_spill] sm:$0xff] %v20122_v10  ;;  %v9157_v6 = vpop.f32.mrb[78].mxu0 }
 0x9c1   : > { %v9333_v61 = vpack.c.bf16 %v9157_v6, %v9153_v17  ;;  %v20124_v48 = vpop.f32.mrb[79].mxu0  ;;  %v21851_v17 = vld [vmem:[#allocation61_spill] sm:$0xff] }
 0x9c2   : > { %21847 = vst [vmem:[#allocation19_spill] sm:$0xff] %v20124_v48  ;;  %v21852_v48 = vpack.c.bf16 %v21850_v7, %v21851_v17 }
 0x9c3   : > { %v9405_v22 = vadd.bf16 %v19338_v23, %v9333_v61 }
 0x9c5   : > { %14822 = vmatmul.mubr.bf16.gmra.mrb[228].mxu1 %v9405_v22  ;;  %v21853_v22 = vld [vmem:[#allocation58_spill] sm:$0xff] }
 0x9c6   : > { %v9163_v25 = vpop.f32.mrb[80].mxu0 }
 0x9c7   : > { %v20127_v19 = vpop.f32.mrb[81].mxu0 }
 0x9c8   : > { %21848 = vst [vmem:[#allocation15_spill] sm:$0xff] %v20127_v19  ;;  %v9167_v52 = vpop.f32.mrb[82].mxu0  ;;  %v14771_v51 = vpop.f32.mrb[176].mxu1  ;;  %v21854_v19 = vld [vmem:[#allocation59_spill] sm:$0xff] }
 0x9c9   : > { %v9334_v24 = vpack.c.bf16 %v9167_v52, %v9163_v25  ;;  %v20129_v42 = vpop.f32.mrb[83].mxu0  ;;  %v9708_v50 = vpop.f32.mrb[177].mxu1  ;;  %v21855_v10 = vpack.c.bf16 %v21853_v22, %v21854_v19  ;;  %v21860_v22 = vld [vmem:[#allocation64_spill] sm:$0xff] }
 0x9ca   : > { %21849 = vst [vmem:[#allocation16_spill] sm:$0xff] %v20129_v42  ;;  %v14772_v57 = vpop.f32.mrb[178].mxu1 }
 0x9cb   : > { %v9406_v58 = vadd.bf16 %v19338_v23, %v9334_v24  ;;  %v10052_v27 = vpack.c.bf16 %v14772_v57, %v14771_v51  ;;  %v9711_v5 = vpop.f32.mrb[179].mxu1 }
 0x9cc   : > { %v10051_v6 = vpack.c.bf16 %v9711_v5, %v9708_v50 }
 0x9cd   : > { %v20135_v61 = vadd.bf16 %v10052_v27, %v21852_v48  ;;  %14825 = vmatprep.mubr.bf16.mxu1 %v9406_v58 }
 0x9ce   : > { %v20140_v40 = vadd.bf16 %v10051_v6, %v21855_v10  ;;  %v9173_v25 = vpop.f32.mrb[84].mxu0 }
 0x9cf   : > { %v20142_v52 = vpop.f32.mrb[85].mxu0 }
 0x9d0   : > { %21856 = vst [vmem:[#allocation24_spill] sm:$0xff] %v20142_v52  ;;  %v9177_v42 = vpop.f32.mrb[86].mxu0 }
 0x9d1   : > { %v9335_v28 = vpack.c.bf16 %v9177_v42, %v9173_v25  ;;  %v20144_v24 = vpop.f32.mrb[87].mxu0  ;;  %v21861_v25 = vld [vmem:[#allocation65_spill] sm:$0xff] }
 0x9d2   : > { %21857 = vst [vmem:[#allocation25_spill] sm:$0xff] %v20144_v24  ;;  %v21862_v24 = vpack.c.bf16 %v21860_v22, %v21861_v25 }
 0x9d3   : > { %v9407_v51 = vadd.bf16 %v19338_v23, %v9335_v28 }
 0x9d5   : > { %14826 = vmatmul.mubr.bf16.gmra.mrb[232].mxu1 %v9407_v51  ;;  %v21863_v51 = vld [vmem:[#allocation62_spill] sm:$0xff] }
 0x9d6   : > { %v9183_v50 = vpop.f32.mrb[88].mxu0 }
 0x9d7   : > { %v20147_v57 = vpop.f32.mrb[89].mxu0 }
 0x9d8   : > { %21858 = vst [vmem:[#allocation21_spill] sm:$0xff] %v20147_v57  ;;  %v9187_v48 = vpop.f32.mrb[90].mxu0  ;;  %v14775_v58 = vpop.f32.mrb[180].mxu1  ;;  %v21864_v57 = vld [vmem:[#allocation63_spill] sm:$0xff] }
 0x9d9   : > { %v9336_v27 = vpack.c.bf16 %v9187_v48, %v9183_v50  ;;  %v20149_v5 = vpop.f32.mrb[91].mxu0  ;;  %v9724_v10 = vpop.f32.mrb[181].mxu1  ;;  %v21865_v52 = vpack.c.bf16 %v21863_v51, %v21864_v57  ;;  %v21870_v51 = vld [vmem:[#allocation68_spill] sm:$0xff] }
 0x9da   : > { %21859 = vst [vmem:[#allocation22_spill] sm:$0xff] %v20149_v5  ;;  %v14776_v19 = vpop.f32.mrb[182].mxu1 }
 0x9db   : > { %v9408_v6 = vadd.bf16 %v19338_v23, %v9336_v27  ;;  %v10054_v7 = vpack.c.bf16 %v14776_v19, %v14775_v58  ;;  %v9727_v17 = vpop.f32.mrb[183].mxu1 }
 0x9dc   : > { %v10053_v42 = vpack.c.bf16 %v9727_v17, %v9724_v10 }
 0x9dd   : > { %v20155_v28 = vadd.bf16 %v10054_v7, %v21862_v24  ;;  %14829 = vmatprep.mubr.bf16.mxu1 %v9408_v6 }
 0x9de   : > { %v20160_v59 = vadd.bf16 %v10053_v42, %v21865_v52  ;;  %v9193_v50 = vpop.f32.mrb[92].mxu0 }
 0x9df   : > { %v20162_v48 = vpop.f32.mrb[93].mxu0 }
 0x9e0   : > { %21866 = vst [vmem:[#allocation28_spill] sm:$0xff] %v20162_v48  ;;  %v9197_v5 = vpop.f32.mrb[94].mxu0 }
 0x9e1   : > { %v9337_v62 = vpack.c.bf16 %v9197_v5, %v9193_v50  ;;  %v20164_v27 = vpop.f32.mrb[95].mxu0  ;;  %v21871_v50 = vld [vmem:[#allocation69_spill] sm:$0xff] }
 0x9e2   : > { %21867 = vst [vmem:[#allocation29_spill] sm:$0xff] %v20164_v27  ;;  %v21872_v27 = vpack.c.bf16 %v21870_v51, %v21871_v50 }
 0x9e3   : > { %v9409_v58 = vadd.bf16 %v19338_v23, %v9337_v62 }
 0x9e5   : > { %14830 = vmatmul.mubr.bf16.gmra.mrb[236].mxu1 %v9409_v58  ;;  %v21873_v58 = vld [vmem:[#allocation66_spill] sm:$0xff] }
 0x9e6   : > { %v9203_v10 = vpop.f32.mrb[96].mxu0 }
 0x9e7   : > { %v20167_v19 = vpop.f32.mrb[97].mxu0 }
 0x9e8   : > { %21868 = vst [vmem:[#allocation26_spill] sm:$0xff] %v20167_v19  ;;  %v9207_v24 = vpop.f32.mrb[98].mxu0  ;;  %v14779_v6 = vpop.f32.mrb[184].mxu1  ;;  %v21874_v19 = vld [vmem:[#allocation67_spill] sm:$0xff] }
 0x9e9   : > { %v9338_v7 = vpack.c.bf16 %v9207_v24, %v9203_v10  ;;  %v20169_v17 = vpop.f32.mrb[99].mxu0  ;;  %v9740_v52 = vpop.f32.mrb[185].mxu1  ;;  %v21875_v48 = vpack.c.bf16 %v21873_v58, %v21874_v19  ;;  %v21880_v58 = vld [vmem:[#allocation72_spill] sm:$0xff] }
 0x9ea   : > { %21869 = vst [vmem:[#allocation27_spill] sm:$0xff] %v20169_v17  ;;  %v14780_v57 = vpop.f32.mrb[186].mxu1 }
 0x9eb   : > { %v9410_v42 = vadd.bf16 %v19338_v23, %v9338_v7  ;;  %v10056_v22 = vpack.c.bf16 %v14780_v57, %v14779_v6  ;;  %v9743_v25 = vpop.f32.mrb[187].mxu1 }
 0x9ec   : > { %v10055_v5 = vpack.c.bf16 %v9743_v25, %v9740_v52 }
 0x9ed   : > { %v20175_v62 = vadd.bf16 %v10056_v22, %v21872_v27  ;;  %14833 = vmatprep.mubr.bf16.mxu1 %v9410_v42 }
 0x9ee   : > { %v20180_v35 = vadd.bf16 %v10055_v5, %v21875_v48  ;;  %v9213_v10 = vpop.f32.mrb[100].mxu0 }
 0x9ef   : > { %v20182_v24 = vpop.f32.mrb[101].mxu0 }
 0x9f0   : > { %21876 = vst [vmem:[#allocation32_spill] sm:$0xff] %v20182_v24  ;;  %v9217_v17 = vpop.f32.mrb[102].mxu0 }
 0x9f1   : > { %v9339_v29 = vpack.c.bf16 %v9217_v17, %v9213_v10  ;;  %v20184_v7 = vpop.f32.mrb[103].mxu0  ;;  %v21881_v10 = vld [vmem:[#allocation73_spill] sm:$0xff] }
 0x9f2   : > { %21877 = vst [vmem:[#allocation33_spill] sm:$0xff] %v20184_v7  ;;  %v21882_v7 = vpack.c.bf16 %v21880_v58, %v21881_v10 }
 0x9f3   : > { %v9411_v6 = vadd.bf16 %v19338_v23, %v9339_v29 }
 0x9f5   : > { %14834 = vmatmul.mubr.bf16.gmra.mrb[240].mxu1 %v9411_v6  ;;  %v21883_v6 = vld [vmem:[#allocation70_spill] sm:$0xff] }
 0x9f6   : > { %v9223_v52 = vpop.f32.mrb[104].mxu0 }
 0x9f7   : > { %v20187_v57 = vpop.f32.mrb[105].mxu0 }
 0x9f8   : > { %21878 = vst [vmem:[#allocation30_spill] sm:$0xff] %v20187_v57  ;;  %v9227_v27 = vpop.f32.mrb[106].mxu0  ;;  %v14783_v42 = vpop.f32.mrb[188].mxu1  ;;  %v21884_v57 = vld [vmem:[#allocation71_spill] sm:$0xff] }
 0x9f9   : > { %v9340_v22 = vpack.c.bf16 %v9227_v27, %v9223_v52  ;;  %v20189_v25 = vpop.f32.mrb[107].mxu0  ;;  %v9756_v48 = vpop.f32.mrb[189].mxu1  ;;  %v21885_v24 = vpack.c.bf16 %v21883_v6, %v21884_v57  ;;  %v21890_v6 = vld [vmem:[#allocation77_spill] sm:$0xff] }
 0x9fa   : > { %21879 = vst [vmem:[#allocation31_spill] sm:$0xff] %v20189_v25  ;;  %v14784_v19 = vpop.f32.mrb[190].mxu1 }
 0x9fb   : > { %v9412_v5 = vadd.bf16 %v19338_v23, %v9340_v22  ;;  %v10058_v51 = vpack.c.bf16 %v14784_v19, %v14783_v42  ;;  %v9759_v50 = vpop.f32.mrb[191].mxu1 }
 0x9fc   : > { %v10057_v17 = vpack.c.bf16 %v9759_v50, %v9756_v48 }
 0x9fd   : > { %v20195_v29 = vadd.bf16 %v10058_v51, %v21882_v7  ;;  %14837 = vmatprep.mubr.bf16.mxu1 %v9412_v5 }
 0x9fe   : > { %v20200_v26 = vadd.bf16 %v10057_v17, %v21885_v24  ;;  %v9233_v52 = vpop.f32.mrb[108].mxu0 }
 0x9ff   : > { %v20202_v27 = vpop.f32.mrb[109].mxu0 }
 0xa00   : > { %21886 = vst [vmem:[#allocation36_spill] sm:$0xff] %v20202_v27  ;;  %v9237_v25 = vpop.f32.mrb[110].mxu0 }
 0xa01   : > { %v9341_v37 = vpack.c.bf16 %v9237_v25, %v9233_v52  ;;  %v20204_v22 = vpop.f32.mrb[111].mxu0  ;;  %v21891_v52 = vld [vmem:[#allocation78_spill] sm:$0xff] }
 0xa02   : > { %21887 = vst [vmem:[#allocation37_spill] sm:$0xff] %v20204_v22  ;;  %v21892_v22 = vpack.c.bf16 %v21890_v6, %v21891_v52 }
 0xa03   : > { %v9413_v42 = vadd.bf16 %v19338_v23, %v9341_v37 }
 0xa05   : > { %14838 = vmatmul.mubr.bf16.gmra.mrb[244].mxu1 %v9413_v42  ;;  %v21893_v42 = vld [vmem:[#allocation75_spill] sm:$0xff] }
 0xa06   : > { %v9243_v48 = vpop.f32.mrb[112].mxu0 }
 0xa07   : > { %v20207_v19 = vpop.f32.mrb[113].mxu0 }
 0xa08   : > { %21888 = vst [vmem:[#allocation34_spill] sm:$0xff] %v20207_v19  ;;  %v9247_v7 = vpop.f32.mrb[114].mxu0  ;;  %v14787_v5 = vpop.f32.mrb[192].mxu1  ;;  %v21894_v19 = vld [vmem:[#allocation76_spill] sm:$0xff] }
 0xa09   : > { %v9342_v51 = vpack.c.bf16 %v9247_v7, %v9243_v48  ;;  %v20209_v50 = vpop.f32.mrb[115].mxu0  ;;  %v9772_v24 = vpop.f32.mrb[193].mxu1  ;;  %v21895_v27 = vpack.c.bf16 %v21893_v42, %v21894_v19 }
 0xa0a   : > { %21889 = vst [vmem:[#allocation35_spill] sm:$0xff] %v20209_v50  ;;  %v14788_v57 = vpop.f32.mrb[194].mxu1 }
 0xa0b   : > { %v9414_v17 = vadd.bf16 %v19338_v23, %v9342_v51  ;;  %v10060_v58 = vpack.c.bf16 %v14788_v57, %v14787_v5  ;;  %v9775_v10 = vpop.f32.mrb[195].mxu1 }
 0xa0c   : > { %v10059_v25 = vpack.c.bf16 %v9775_v10, %v9772_v24 }
 0xa0d   : > { %v20215_v37 = vadd.bf16 %v10060_v58, %v21892_v22  ;;  %14841 = vmatprep.mubr.bf16.mxu1 %v9414_v17  ;;  %v10155_v22 = vld [vmem:[%s21052_s8] sm:$0x1] }
 0xa0e   : > { %v20220_v41 = vadd.bf16 %v10059_v25, %v21895_v27  ;;  %v9253_v48 = vpop.f32.mrb[116].mxu0  ;;  %v10157_v19 = vpack.i.b16 %v10155_v22, %v10155_v22  ;;  %v21903_v22 = vld [vmem:[#allocation79_spill] sm:$0xff] }
 0xa0f   : > { %v20222_v7 = vpop.f32.mrb[117].mxu0 }
 0xa10   : > { %21896 = vst [vmem:[#allocation40_spill] sm:$0xff] %v20222_v7  ;;  %v9257_v50 = vpop.f32.mrb[118].mxu0  ;;  %v20236_v42 = vrot.slane %v10157_v19, %v16663_v60 }
 0xa11   : > { %v9343_v2 = vpack.c.bf16 %v9257_v50, %v9253_v48  ;;  %v20224_v51 = vpop.f32.mrb[119].mxu0 }
 0xa12   : > { %21897 = vst [vmem:[#allocation41_spill] sm:$0xff] %v20224_v51  ;;  %v21901_v51 = vld [vmem:[#allocation82_spill] sm:$0xff] }
 0xa13   : > { %v9415_v5 = vadd.bf16 %v19338_v23, %v9343_v2 }
 0xa15   : > { %14842 = vmatmul.mubr.bf16.gmra.mrb[248].mxu1 %v9415_v5  ;;  %v21900_v5 = vld [vmem:[#allocation81_spill] sm:$0xff] }
 0xa16   : > { %v9263_v24 = vpop.f32.mrb[120].mxu0  ;;  %v21902_v7 = vpack.c.bf16 %v21900_v5, %v21901_v51 }
 0xa17   : > { %v20230_v57 = vpop.f32.mrb[121].mxu0 }
 0xa18   : > { %21898 = vst [vmem:[#allocation38_spill] sm:$0xff] %v20230_v57  ;;  %v9267_v27 = vpop.f32.mrb[122].mxu0  ;;  %v14791_v17 = vpop.f32.mrb[196].mxu1 }
 0xa19   : > { %v9344_v58 = vpack.c.bf16 %v9267_v27, %v9263_v24  ;;  %v20232_v10 = vpop.f32.mrb[123].mxu0  ;;  %v9788_v25 = vpop.f32.mrb[197].mxu1  ;;  %v21904_v24 = vld [vmem:[#allocation80_spill] sm:$0xff] }
 0xa1a   : > { %21899 = vst [vmem:[#allocation39_spill] sm:$0xff] %v20232_v10  ;;  %v14792_v50 = vpop.f32.mrb[198].mxu1  ;;  %v21905_v27 = vpack.c.bf16 %v21903_v22, %v21904_v24  ;;  %v21906_v22 = vld [vmem:[#allocation87_spill] sm:$0xff]  ;;  %v21907_v24 = vld [vmem:[#allocation88_spill] sm:$0xff] }
 0xa1b   : > { %v9416_v6 = vadd.bf16 %v19338_v23, %v9344_v58  ;;  %v10062_v52 = vpack.c.bf16 %v14792_v50, %v14791_v17  ;;  %v9791_v2 = vpop.f32.mrb[199].mxu1  ;;  %v10163_v17 = vadd.bf16 %v20236_v42, %v19842_v11  ;;  %v10165_v50 = vadd.bf16 %v20236_v42, %v19877_v47 }
 0xa1c   : > { %v10061_v48 = vpack.c.bf16 %v9791_v2, %v9788_v25  ;;  %v10164_v25 = vadd.bf16 %v20236_v42, %v19837_v16  ;;  %v21909_v16 = vld [vmem:[#allocation84_spill] sm:$0xff] }
 0xa1d   : > { %v20241_v57 = vadd.bf16 %v10062_v52, %v21902_v7  ;;  %14845 = vmatprep.mubr.bf16.mxu1 %v9416_v6  ;;  %v10227_v7 = vmax.bf16 %v21327_v32, %v10163_v17 }
 0xa1e   : > { %v20246_v10 = vadd.bf16 %v10061_v48, %v21905_v27  ;;  %v9273_v39 = vpop.f32.mrb[124].mxu0  ;;  %v10228_v11 = vmax.bf16 %v21327_v32, %v10164_v25  ;;  %v21908_v27 = vpack.c.bf16 %v21906_v22, %v21907_v24  ;;  %v21912_v22 = vld [vmem:[#allocation93_spill] sm:$0xff]  ;;  %v21913_v24 = vld [vmem:[#allocation94_spill] sm:$0xff] }
 0xa1f   : > { %v20248_v4 = vpop.f32.mrb[125].mxu0 }
 0xa20   : > { %v9277_v60 = vpop.f32.mrb[126].mxu0 }
 0xa21   : > { %v9345_v19 = vpack.c.bf16 %v9277_v60, %v9273_v39  ;;  %v20252_v58 = vpop.f32.mrb[127].mxu0  ;;  %v21910_v60 = vld [vmem:[#allocation85_spill] sm:$0xff] }
 0xa23   : > { %v9417_v51 = vadd.bf16 %v19338_v23, %v9345_v19  ;;  %v10229_v23 = vmax.bf16 %v21327_v32, %v10165_v50  ;;  %v21911_v19 = vpack.c.bf16 %v21909_v16, %v21910_v60  ;;  %v21916_v60 = vld [vmem:[#allocation91_spill] sm:$0xff] }
 0xa25   : > { %14846 = vmatmul.mubr.bf16.gmra.mrb[252].mxu1 %v9417_v51  ;;  %v10166_v51 = vadd.bf16 %v20236_v42, %v19872_v20 }
 0xa26   : > { %14865 = vmatprep.mubr.bf16.mxu1 %v10227_v7  ;;  %v10167_v7 = vadd.bf16 %v20236_v42, %v19909_v56 }
 0xa27   : > { %v10230_v25 = vmax.bf16 %v21327_v32, %v10166_v51  ;;  %v10170_v51 = vadd.bf16 %v20236_v42, %v19939_v9 }
 0xa28   : > { %v14795_v6 = vpop.f32.mrb[200].mxu1  ;;  %v10231_v50 = vmax.bf16 %v21327_v32, %v10167_v7  ;;  %v10171_v7 = vadd.bf16 %v20236_v42, %v19971_v38 }
 0xa29   : > { %v9804_v52 = vpop.f32.mrb[201].mxu1 }
 0xa2a   : > { %v14796_v2 = vpop.f32.mrb[202].mxu1 }
 0xa2b   : > { %v10064_v39 = vpack.c.bf16 %v14796_v2, %v14795_v6  ;;  %v9807_v48 = vpop.f32.mrb[203].mxu1  ;;  %v10168_v6 = vadd.bf16 %v20236_v42, %v19904_v36  ;;  %v21915_v36 = vld [vmem:[#allocation90_spill] sm:$0xff] }
 0xa2c   : > { %v10063_v5 = vpack.c.bf16 %v9807_v48, %v9804_v52  ;;  %v10169_v52 = vadd.bf16 %v20236_v42, %v19944_v55 }
 0xa2d   : > { %v20265_v17 = vadd.bf16 %v10064_v39, %v21908_v27  ;;  %14866 = vmatmul.mubr.bf16.vlgmr.msra.gmra.mrb[0].mxu1 %v10228_v11  ;;  %v10232_v20 = vmax.bf16 %v21327_v32, %v10168_v6  ;;  %v21914_v27 = vpack.c.bf16 %v21912_v22, %v21913_v24  ;;  %v10172_v6 = vadd.bf16 %v20236_v42, %v19966_v63  ;;  %v21921_v63 = vld [vmem:[#allocation96_spill] sm:$0xff] }
 0xa2e   : > { %v20270_v47 = vadd.bf16 %v10063_v5, %v21911_v19  ;;  %14869 = vmatprep.mubr.bf16.mxu1 %v10229_v23  ;;  %v10233_v23 = vmax.bf16 %v21327_v32, %v10169_v52  ;;  %v21917_v19 = vpack.c.bf16 %v21915_v36, %v21916_v60  ;;  %v10173_v52 = vadd.bf16 %v20236_v42, %v19994_v33 }
 0xa2f   : > { %v10236_v9 = vmax.bf16 %v21327_v32, %v10172_v6  ;;  %v10174_v60 = vadd.bf16 %v20236_v42, %v19989_v54 }
 0xa35   : > { %14870 = vmatmul.mubr.bf16.gmra.mrb[4].mxu1 %v10230_v25  ;;  %v10234_v25 = vmax.bf16 %v21327_v32, %v10170_v51  ;;  %v10238_v51 = vmax.bf16 %v21327_v32, %v10174_v60  ;;  %v10180_v60 = vadd.bf16 %v20236_v42, %v20052_v31  ;;  %v21933_v31 = vld [vmem:[#allocation108_spill] sm:$0xff] }
 0xa36   : > { %14873 = vmatprep.mubr.bf16.mxu1 %v10231_v50  ;;  %v10235_v50 = vmax.bf16 %v21327_v32, %v10171_v7 }
 0xa38   : > { %v14799_v2 = vpop.f32.mrb[204].mxu1 }
 0xa39   : > { %v9820_v11 = vpop.f32.mrb[205].mxu1 }
 0xa3a   : > { %v14800_v39 = vpop.f32.mrb[206].mxu1 }
 0xa3b   : > { %v10066_v48 = vpack.c.bf16 %v14800_v39, %v14799_v2  ;;  %v9823_v5 = vpop.f32.mrb[207].mxu1 }
 0xa3c   : > { %v10065_v56 = vpack.c.bf16 %v9823_v5, %v9820_v11  ;;  %v10237_v5 = vmax.bf16 %v21327_v32, %v10173_v52 }
 0xa3d   : > { %v20287_v16 = vadd.bf16 %v10066_v48, %v21914_v27  ;;  %14874 = vmatmul.mubr.bf16.gmra.mrb[8].mxu1 %v10232_v20  ;;  %v21922_v27 = vld [vmem:[#allocation97_spill] sm:$0xff] }
 0xa3e   : > { %v20292_v55 = vadd.bf16 %v10065_v56, %v21917_v19  ;;  %14877 = vmatprep.mubr.bf16.mxu1 %v10233_v23  ;;  %v21918_v56 = vld [vmem:[#allocation99_spill] sm:$0xff]  ;;  %v21919_v23 = vld [vmem:[#allocation100_spill] sm:$0xff]  ;;  %v21923_v36 = vpack.c.bf16 %v21921_v63, %v21922_v27  ;;  %v10175_v19 = vadd.bf16 %v20236_v42, %v20014_v43  ;;  %v10179_v63 = vadd.bf16 %v20236_v42, %v20057_v21 }
 0xa3f   : > { %v21920_v22 = vpack.c.bf16 %v21918_v56, %v21919_v23  ;;  %v21928_v56 = vld [vmem:[#allocation103_spill] sm:$0xff] }
 0xa40   : > { %v10239_v7 = vmax.bf16 %v21327_v32, %v10175_v19  ;;  %v10181_v19 = vadd.bf16 %v20236_v42, %v20080_v46 }
 0xa45   : > { %14878 = vmatmul.mubr.bf16.gmra.mrb[12].mxu1 %v10234_v25  ;;  %v10176_v25 = vadd.bf16 %v20236_v42, %v20009_v30  ;;  %v21927_v30 = vld [vmem:[#allocation102_spill] sm:$0xff] }
 0xa46   : > { %14881 = vmatprep.mubr.bf16.mxu1 %v10235_v50  ;;  %v10177_v50 = vadd.bf16 %v20236_v42, %v20037_v3  ;;  %v21929_v23 = vpack.c.bf16 %v21927_v30, %v21928_v56  ;;  %v10184_v56 = vadd.bf16 %v20236_v42, %v20095_v34  ;;  %v21939_v34 = vld [vmem:[#allocation114_spill] sm:$0xff] }
 0xa47   : > { %v10240_v54 = vmax.bf16 %v21327_v32, %v10176_v25 }
 0xa48   : > { %v14803_v2 = vpop.f32.mrb[208].mxu1 }
 0xa49   : > { %v9836_v11 = vpop.f32.mrb[209].mxu1 }
 0xa4a   : > { %v14804_v39 = vpop.f32.mrb[210].mxu1 }
 0xa4b   : > { %v10068_v20 = vpack.c.bf16 %v14804_v39, %v14803_v2  ;;  %v9839_v48 = vpop.f32.mrb[211].mxu1 }
 0xa4c   : > { %v10067_v38 = vpack.c.bf16 %v9839_v48, %v9836_v11  ;;  %v21925_v48 = vld [vmem:[#allocation106_spill] sm:$0xff] }
 0xa4d   : > { %v20309_v24 = vadd.bf16 %v10068_v20, %v21920_v22  ;;  %14882 = vmatmul.mubr.bf16.gmra.mrb[16].mxu1 %v10236_v9  ;;  %v10241_v9 = vmax.bf16 %v21327_v32, %v10177_v50  ;;  %v21924_v20 = vld [vmem:[#allocation105_spill] sm:$0xff]  ;;  %v10178_v22 = vadd.bf16 %v20236_v42, %v20032_v12  ;;  %v10244_v12 = vmax.bf16 %v21327_v32, %v10180_v60 }
 0xa4e   : > { %v20314_v33 = vadd.bf16 %v10067_v38, %v21923_v36  ;;  %14885 = vmatprep.mubr.bf16.mxu1 %v10237_v5  ;;  %v21926_v38 = vpack.c.bf16 %v21924_v20, %v21925_v48  ;;  %v10243_v36 = vmax.bf16 %v21327_v32, %v10179_v63  ;;  %v10182_v20 = vadd.bf16 %v20236_v42, %v20075_v15 }
 0xa4f   : > { %v10242_v27 = vmax.bf16 %v21327_v32, %v10178_v22  ;;  %v10183_v48 = vadd.bf16 %v20236_v42, %v20100_v8  ;;  %v10248_v15 = vmax.bf16 %v21327_v32, %v10184_v56  ;;  %v21942_v56 = vld [vmem:[#allocation123_spill] sm:$0xff] }
 0xa51   : > { %v10247_v30 = vmax.bf16 %v21327_v32, %v10183_v48 }
 0xa55   : > { %14886 = vmatmul.mubr.bf16.gmra.mrb[20].mxu1 %v10238_v51 }
 0xa56   : > { %14889 = vmatprep.mubr.bf16.mxu1 %v10239_v7 }
 0xa58   : > { %v14807_v6 = vpop.f32.mrb[212].mxu1 }
 0xa59   : > { %v9852_v52 = vpop.f32.mrb[213].mxu1 }
 0xa5a   : > { %v14808_v2 = vpop.f32.mrb[214].mxu1 }
 0xa5b   : > { %v10070_v11 = vpack.c.bf16 %v14808_v2, %v14807_v6  ;;  %v9855_v39 = vpop.f32.mrb[215].mxu1  ;;  %v21930_v2 = vld [vmem:[#allocation111_spill] sm:$0xff] }
 0xa5c   : > { %v10069_v43 = vpack.c.bf16 %v9855_v39, %v9852_v52  ;;  %v10245_v52 = vmax.bf16 %v21327_v32, %v10181_v19 }
 0xa5d   : > { %v20331_v5 = vadd.bf16 %v10070_v11, %v21926_v38  ;;  %14890 = vmatmul.mubr.bf16.gmra.mrb[24].mxu1 %v10240_v54  ;;  %v21931_v54 = vld [vmem:[#allocation112_spill] sm:$0xff]  ;;  %v10246_v38 = vmax.bf16 %v21327_v32, %v10182_v20 }
 0xa5e   : > { %v20336_v3 = vadd.bf16 %v10069_v43, %v21929_v23  ;;  %14893 = vmatprep.mubr.bf16.mxu1 %v10241_v9  ;;  %v21932_v11 = vpack.c.bf16 %v21930_v2, %v21931_v54  ;;  %v21934_v43 = vld [vmem:[#allocation109_spill] sm:$0xff]  ;;  %v10185_v23 = vadd.bf16 %v20236_v42, %v20120_v44 }
 0xa5f   : > { %v21935_v9 = vpack.c.bf16 %v21933_v31, %v21934_v43  ;;  %v10189_v31 = vadd.bf16 %v20236_v42, %v20160_v59 }
 0xa60   : > { %v10249_v19 = vmax.bf16 %v21327_v32, %v10185_v23  ;;  %v21943_v23 = vld [vmem:[#allocation124_spill] sm:$0xff] }
 0xa65   : > { %14894 = vmatmul.mubr.bf16.gmra.mrb[28].mxu1 %v10242_v27 }
 0xa66   : > { %14897 = vmatprep.mubr.bf16.mxu1 %v10243_v36 }
 0xa68   : > { %v14811_v51 = vpop.f32.mrb[216].mxu1 }
 0xa69   : > { %v9868_v7 = vpop.f32.mrb[217].mxu1 }
 0xa6a   : > { %v14812_v25 = vpop.f32.mrb[218].mxu1 }
 0xa6b   : > { %v10072_v50 = vpack.c.bf16 %v14812_v25, %v14811_v51  ;;  %v9871_v6 = vpop.f32.mrb[219].mxu1  ;;  %v21936_v51 = vld [vmem:[#allocation117_spill] sm:$0xff] }
 0xa6c   : > { %v10071_v21 = vpack.c.bf16 %v9871_v6, %v9868_v7  ;;  %v21937_v7 = vld [vmem:[#allocation118_spill] sm:$0xff] }
 0xa6d   : > { %v20353_v39 = vadd.bf16 %v10072_v50, %v21932_v11  ;;  %14898 = vmatmul.mubr.bf16.gmra.mrb[32].mxu1 %v10244_v12  ;;  %v21938_v25 = vpack.c.bf16 %v21936_v51, %v21937_v7  ;;  %v21940_v50 = vld [vmem:[#allocation115_spill] sm:$0xff]  ;;  %v10188_v11 = vadd.bf16 %v20236_v42, %v20135_v61  ;;  %v21945_v61 = vld [vmem:[#allocation120_spill] sm:$0xff]  ;;  %v10192_v51 = vadd.bf16 %v20236_v42, %v20175_v62  ;;  %v21951_v62 = vld [vmem:[#allocation126_spill] sm:$0xff] }
 0xa6e   : > { %v20358_v46 = vadd.bf16 %v10071_v21, %v21935_v9  ;;  %14901 = vmatprep.mubr.bf16.mxu1 %v10245_v52  ;;  %v21941_v6 = vpack.c.bf16 %v21939_v34, %v21940_v50  ;;  %v10186_v21 = vadd.bf16 %v20236_v42, %v20115_v49  ;;  %v10187_v52 = vadd.bf16 %v20236_v42, %v20140_v40 }
 0xa6f   : > { %v10252_v49 = vmax.bf16 %v21327_v32, %v10188_v11  ;;  %v10193_v7 = vadd.bf16 %v20236_v42, %v20200_v26 }
 0xa70   : > { %v10250_v2 = vmax.bf16 %v21327_v32, %v10186_v21  ;;  %v10251_v54 = vmax.bf16 %v21327_v32, %v10187_v52 }
 0xa71   : > { %v10257_v52 = vmax.bf16 %v21327_v32, %v10193_v7 }
 0xa75   : > { %14902 = vmatmul.mubr.bf16.gmra.mrb[36].mxu1 %v10246_v38 }
 0xa76   : > { %14905 = vmatprep.mubr.bf16.mxu1 %v10247_v30  ;;  %v10253_v30 = vmax.bf16 %v21327_v32, %v10189_v31 }
 0xa78   : > { %v14815_v22 = vpop.f32.mrb[220].mxu1 }
 0xa79   : > { %v9884_v63 = vpop.f32.mrb[221].mxu1 }
 0xa7a   : > { %v14816_v27 = vpop.f32.mrb[222].mxu1 }
 0xa7b   : > { %v10074_v36 = vpack.c.bf16 %v14816_v27, %v14815_v22  ;;  %v9887_v60 = vpop.f32.mrb[223].mxu1  ;;  %v21944_v22 = vpack.c.bf16 %v21942_v56, %v21943_v23  ;;  %v21946_v27 = vld [vmem:[#allocation121_spill] sm:$0xff] }
 0xa7c   : > { %v10073_v8 = vpack.c.bf16 %v9887_v60, %v9884_v63  ;;  %v10191_v60 = vadd.bf16 %v20236_v42, %v20180_v35 }
 0xa7d   : > { %v20375_v12 = vadd.bf16 %v10074_v36, %v21938_v25  ;;  %14906 = vmatmul.mubr.bf16.gmra.mrb[40].mxu1 %v10248_v15  ;;  %v21947_v15 = vpack.c.bf16 %v21945_v61, %v21946_v27  ;;  %v10190_v36 = vadd.bf16 %v20236_v42, %v20155_v28  ;;  %v10256_v28 = vmax.bf16 %v21327_v32, %v10192_v51  ;;  %v21958_v51 = vld [vmem:[#allocation133_spill] sm:$0xff] }
 0xa7e   : > { %v20380_v44 = vadd.bf16 %v10073_v8, %v21941_v6  ;;  %14909 = vmatprep.mubr.bf16.mxu1 %v10249_v19  ;;  %v10255_v19 = vmax.bf16 %v21327_v32, %v10191_v60  ;;  %v21955_v60 = vld [vmem:[#allocation136_spill] sm:$0xff] }
 0xa7f   : > { %v10254_v8 = vmax.bf16 %v21327_v32, %v10190_v36  ;;  %v21954_v36 = vld [vmem:[#allocation135_spill] sm:$0xff] }
 0xa85   : > { %14910 = vmatmul.mubr.bf16.gmra.mrb[44].mxu1 %v10250_v2  ;;  %v21948_v2 = vld [vmem:[#allocation129_spill] sm:$0xff] }
 0xa86   : > { %14913 = vmatprep.mubr.bf16.mxu1 %v10251_v54  ;;  %v21949_v54 = vld [vmem:[#allocation130_spill] sm:$0xff] }
 0xa87   : > { %v21950_v11 = vpack.c.bf16 %v21948_v2, %v21949_v54 }
 0xa88   : > { %v14819_v43 = vpop.f32.mrb[224].mxu1 }
 0xa89   : > { %v9900_v9 = vpop.f32.mrb[225].mxu1 }
 0xa8a   : > { %v14820_v20 = vpop.f32.mrb[226].mxu1 }
 0xa8b   : > { %v10076_v48 = vpack.c.bf16 %v14820_v20, %v14819_v43  ;;  %v9903_v38 = vpop.f32.mrb[227].mxu1  ;;  %v21952_v43 = vld [vmem:[#allocation127_spill] sm:$0xff]  ;;  %v10194_v20 = vadd.bf16 %v20236_v42, %v20195_v29 }
 0xa8c   : > { %v10075_v40 = vpack.c.bf16 %v9903_v38, %v9900_v9  ;;  %v21953_v9 = vpack.c.bf16 %v21951_v62, %v21952_v43  ;;  %v21960_v43 = vld [vmem:[#allocation141_spill] sm:$0xff] }
 0xa8d   : > { %v20397_v63 = vadd.bf16 %v10076_v48, %v21944_v22  ;;  %14914 = vmatmul.mubr.bf16.gmra.mrb[48].mxu1 %v10252_v49  ;;  %v10195_v49 = vadd.bf16 %v20236_v42, %v20220_v41  ;;  %v10258_v48 = vmax.bf16 %v21327_v32, %v10194_v20 }
 0xa8e   : > { %v20402_v59 = vadd.bf16 %v10075_v40, %v21947_v15  ;;  %14917 = vmatprep.mubr.bf16.mxu1 %v10253_v30  ;;  %v10196_v40 = vadd.bf16 %v20236_v42, %v20215_v37  ;;  %v10197_v30 = vadd.bf16 %v20236_v42, %v20246_v10  ;;  %v21957_v37 = vld [vmem:[#allocation132_spill] sm:$0xff] }
 0xa8f   : > { %v10259_v38 = vmax.bf16 %v21327_v32, %v10195_v49  ;;  %v21959_v7 = vpack.c.bf16 %v21957_v37, %v21958_v51  ;;  %v21967_v37 = vld [vmem:[#allocation148_spill] sm:$0xff] }
 0xa90   : > { %v10260_v29 = vmax.bf16 %v21327_v32, %v10196_v40  ;;  %v10261_v15 = vmax.bf16 %v21327_v32, %v10197_v30  ;;  %v10202_v40 = vadd.bf16 %v20236_v42, %v20287_v16  ;;  %v10203_v30 = vadd.bf16 %v20236_v42, %v20314_v33 }
 0xa95   : > { %14918 = vmatmul.mubr.bf16.gmra.mrb[52].mxu1 %v10254_v8  ;;  %v21956_v8 = vpack.c.bf16 %v21954_v36, %v21955_v60 }
 0xa96   : > { %14921 = vmatprep.mubr.bf16.mxu1 %v10255_v19 }
 0xa98   : > { %v14823_v25 = vpop.f32.mrb[228].mxu1 }
 0xa99   : > { %v9916_v34 = vpop.f32.mrb[229].mxu1 }
 0xa9a   : > { %v14824_v50 = vpop.f32.mrb[230].mxu1 }
 0xa9b   : > { %v10078_v6 = vpack.c.bf16 %v14824_v50, %v14823_v25  ;;  %v9919_v21 = vpop.f32.mrb[231].mxu1  ;;  %v10198_v25 = vadd.bf16 %v20236_v42, %v20241_v57 }
 0xa9c   : > { %v10077_v35 = vpack.c.bf16 %v9919_v21, %v9916_v34  ;;  %v10199_v34 = vadd.bf16 %v20236_v42, %v20270_v47  ;;  %v10201_v21 = vadd.bf16 %v20236_v42, %v20292_v55 }
 0xa9d   : > { %v20419_v31 = vadd.bf16 %v10078_v6, %v21950_v11  ;;  %14922 = vmatmul.mubr.bf16.gmra.mrb[56].mxu1 %v10256_v28  ;;  %v10262_v50 = vmax.bf16 %v21327_v32, %v10198_v25  ;;  %v10200_v6 = vadd.bf16 %v20236_v42, %v20265_v17  ;;  %v21963_v17 = vld [vmem:[#allocation138_spill] sm:$0xff]  ;;  %v21970_v25 = vld [vmem:[#allocation145_spill] sm:$0xff] }
 0xa9e   : > { %v20424_v26 = vadd.bf16 %v10077_v35, %v21953_v9  ;;  %14925 = vmatprep.mubr.bf16.mxu1 %v10257_v52  ;;  %v10263_v28 = vmax.bf16 %v21327_v32, %v10199_v34  ;;  %v10265_v62 = vmax.bf16 %v21327_v32, %v10201_v21  ;;  %v21961_v9 = vld [vmem:[#allocation142_spill] sm:$0xff] }
 0xa9f   : > { %v10264_v57 = vmax.bf16 %v21327_v32, %v10200_v6  ;;  %v21962_v20 = vpack.c.bf16 %v21960_v43, %v21961_v9  ;;  %v21972_v43 = vld [vmem:[#allocation153_spill] sm:$0xff]  ;;  %v21973_v9 = vld [vmem:[#allocation154_spill] sm:$0xff] }
 0xaa5   : > { %14926 = vmatmul.mubr.bf16.gmra.mrb[60].mxu1 %v10258_v48  ;;  %v21964_v48 = vld [vmem:[#allocation139_spill] sm:$0xff] }
 0xaa6   : > { %14929 = vmatprep.mubr.bf16.mxu1 %v10259_v38  ;;  %v21965_v38 = vpack.c.bf16 %v21963_v17, %v21964_v48  ;;  %v21976_v48 = vld [vmem:[#allocation151_spill] sm:$0xff] }
 0xaa8   : > { %v14827_v56 = vpop.f32.mrb[232].mxu1 }
 0xaa9   : > { %v9932_v23 = vpop.f32.mrb[233].mxu1 }
 0xaaa   : > { %v14828_v22 = vpop.f32.mrb[234].mxu1 }
 0xaab   : > { %v10080_v61 = vpack.c.bf16 %v14828_v22, %v14827_v56  ;;  %v9935_v27 = vpop.f32.mrb[235].mxu1  ;;  %v10266_v56 = vmax.bf16 %v21327_v32, %v10202_v40  ;;  %v10204_v22 = vadd.bf16 %v20236_v42, %v20309_v24  ;;  %v21969_v24 = vld [vmem:[#allocation144_spill] sm:$0xff]  ;;  %v10210_v40 = vadd.bf16 %v20236_v42, %v20375_v12 }
 0xaac   : > { %v10079_v41 = vpack.c.bf16 %v9935_v27, %v9932_v23  ;;  %v10267_v23 = vmax.bf16 %v21327_v32, %v10203_v30  ;;  %v21971_v34 = vpack.c.bf16 %v21969_v24, %v21970_v25  ;;  %v10211_v30 = vadd.bf16 %v20236_v42, %v20402_v59 }
 0xaad   : > { %v20441_v19 = vadd.bf16 %v10080_v61, %v21956_v8  ;;  %14930 = vmatmul.mubr.bf16.gmra.mrb[64].mxu1 %v10260_v29  ;;  %v10205_v29 = vadd.bf16 %v20236_v42, %v20336_v3  ;;  %v10268_v16 = vmax.bf16 %v21327_v32, %v10204_v22  ;;  %v21966_v8 = vld [vmem:[#allocation147_spill] sm:$0xff]  ;;  %v10212_v22 = vadd.bf16 %v20236_v42, %v20397_v63  ;;  %v21981_v63 = vld [vmem:[#allocation156_spill] sm:$0xff] }
 0xaae   : > { %v20446_v10 = vadd.bf16 %v10079_v41, %v21959_v7  ;;  %14933 = vmatprep.mubr.bf16.mxu1 %v10261_v15  ;;  %v21968_v51 = vpack.c.bf16 %v21966_v8, %v21967_v37  ;;  %v10214_v25 = vadd.bf16 %v20236_v42, %v20419_v31 }
 0xaaf   : > { %v10269_v60 = vmax.bf16 %v21327_v32, %v10205_v29  ;;  %v10213_v29 = vadd.bf16 %v20236_v42, %v20424_v26  ;;  %v10276_v12 = vmax.bf16 %v21327_v32, %v10212_v22 }
 0xab5   : > { %14934 = vmatmul.mubr.bf16.gmra.mrb[68].mxu1 %v10262_v50  ;;  %v10206_v50 = vadd.bf16 %v20236_v42, %v20331_v5 }
 0xab6   : > { %14937 = vmatprep.mubr.bf16.mxu1 %v10263_v28  ;;  %v10207_v28 = vadd.bf16 %v20236_v42, %v20358_v46 }
 0xab7   : > { %v10270_v6 = vmax.bf16 %v21327_v32, %v10206_v50  ;;  %v10278_v50 = vmax.bf16 %v21327_v32, %v10214_v25 }
 0xab8   : > { %v14831_v35 = vpop.f32.mrb[236].mxu1  ;;  %v10271_v21 = vmax.bf16 %v21327_v32, %v10207_v28 }
 0xab9   : > { %v9948_v52 = vpop.f32.mrb[237].mxu1 }
 0xaba   : > { %v14832_v2 = vpop.f32.mrb[238].mxu1 }
 0xabb   : > { %v10082_v54 = vpack.c.bf16 %v14832_v2, %v14831_v35  ;;  %v9951_v11 = vpop.f32.mrb[239].mxu1  ;;  %v10208_v35 = vadd.bf16 %v20236_v42, %v20353_v39  ;;  %v21975_v39 = vld [vmem:[#allocation150_spill] sm:$0xff] }
 0xabc   : > { %v10081_v47 = vpack.c.bf16 %v9951_v11, %v9948_v52  ;;  %v10209_v52 = vadd.bf16 %v20236_v42, %v20380_v44 }
 0xabd   : > { %v20463_v49 = vadd.bf16 %v10082_v54, %v21962_v20  ;;  %14938 = vmatmul.mubr.bf16.gmra.mrb[72].mxu1 %v10264_v57  ;;  %v10272_v5 = vmax.bf16 %v21327_v32, %v10208_v35  ;;  %v21974_v20 = vpack.c.bf16 %v21972_v43, %v21973_v9  ;;  %v21988_v43 = vld [vmem:[#allocation163_spill] sm:$0xff] }
 0xabe   : > { %v20468_v55 = vadd.bf16 %v10081_v47, %v21965_v38  ;;  %14941 = vmatprep.mubr.bf16.mxu1 %v10265_v62  ;;  %v10273_v62 = vmax.bf16 %v21327_v32, %v10209_v52  ;;  %v21977_v38 = vpack.c.bf16 %v21975_v39, %v21976_v48 }
 0xac5   : > { %14942 = vmatmul.mubr.bf16.gmra.mrb[76].mxu1 %v10266_v56  ;;  %v10274_v56 = vmax.bf16 %v21327_v32, %v10210_v40 }
 0xac6   : > { %14945 = vmatprep.mubr.bf16.mxu1 %v10267_v23  ;;  %v10275_v23 = vmax.bf16 %v21327_v32, %v10211_v30 }
 0xac8   : > { %v14835_v61 = vpop.f32.mrb[240].mxu1 }
 0xac9   : > { %v9964_v27 = vpop.f32.mrb[241].mxu1 }
 0xaca   : > { %v14836_v41 = vpop.f32.mrb[242].mxu1 }
 0xacb   : > { %v10084_v15 = vpack.c.bf16 %v14836_v41, %v14835_v61  ;;  %v9967_v36 = vpop.f32.mrb[243].mxu1 }
 0xacc   : > { %v10083_v33 = vpack.c.bf16 %v9967_v36, %v9964_v27  ;;  %v10277_v36 = vmax.bf16 %v21327_v32, %v10213_v29 }
 0xacd   : > { %v20485_v7 = vadd.bf16 %v10084_v15, %v21968_v51  ;;  %14946 = vmatmul.mubr.bf16.gmra.mrb[80].mxu1 %v10268_v16  ;;  %v21982_v51 = vld [vmem:[#allocation157_spill] sm:$0xff] }
 0xace   : > { %v20490_v3 = vadd.bf16 %v10083_v33, %v21971_v34  ;;  %14949 = vmatprep.mubr.bf16.mxu1 %v10269_v60  ;;  %v21978_v33 = vld [vmem:[#allocation159_spill] sm:$0xff]  ;;  %v21979_v60 = vld [vmem:[#allocation160_spill] sm:$0xff]  ;;  %v21983_v24 = vpack.c.bf16 %v21981_v63, %v21982_v51  ;;  %v10215_v34 = vadd.bf16 %v20236_v42, %v20446_v10 }
 0xacf   : > { %v21980_v8 = vpack.c.bf16 %v21978_v33, %v21979_v60 }
 0xad0   : > { %v10279_v28 = vmax.bf16 %v21327_v32, %v10215_v34  ;;  %v10219_v39 = vadd.bf16 %v20236_v42, %v20490_v3  ;;  %v21990_v34 = vld [vmem:[#allocation23_spill] sm:$0xff] }
 0xad5   : > { %14950 = vmatmul.mubr.bf16.gmra.mrb[84].mxu1 %v10270_v6  ;;  %v10216_v6 = vadd.bf16 %v20236_v42, %v20441_v19  ;;  %v21987_v19 = vld [vmem:[#allocation162_spill] sm:$0xff] }
 0xad6   : > { %14953 = vmatprep.mubr.bf16.mxu1 %v10271_v21  ;;  %v10217_v21 = vadd.bf16 %v20236_v42, %v20468_v55  ;;  %v21989_v9 = vpack.c.bf16 %v21987_v19, %v21988_v43  ;;  %v21992_v19 = vld [vmem:[#allocation20_spill] sm:$0xff] }
 0xad7   : > { %v10280_v31 = vmax.bf16 %v21327_v32, %v10216_v6 }
 0xad8   : > { %v14839_v2 = vpop.f32.mrb[244].mxu1 }
 0xad9   : > { %v9980_v57 = vpop.f32.mrb[245].mxu1 }
 0xada   : > { %v14840_v54 = vpop.f32.mrb[246].mxu1 }
 0xadb   : > { %v10086_v11 = vpack.c.bf16 %v14840_v54, %v14839_v2  ;;  %v9983_v47 = vpop.f32.mrb[247].mxu1 }
 0xadc   : > { %v10085_v46 = vpack.c.bf16 %v9983_v47, %v9980_v57  ;;  %v21985_v47 = vld [vmem:[#allocation166_spill] sm:$0xff] }
 0xadd   : > { %v20507_v17 = vadd.bf16 %v10086_v11, %v21974_v20  ;;  %14954 = vmatmul.mubr.bf16.gmra.mrb[88].mxu1 %v10272_v5  ;;  %v10281_v5 = vmax.bf16 %v21327_v32, %v10217_v21  ;;  %v21984_v11 = vld [vmem:[#allocation165_spill] sm:$0xff]  ;;  %v10218_v20 = vadd.bf16 %v20236_v42, %v20463_v49 }
 0xade   : > { %v20512_v44 = vadd.bf16 %v10085_v46, %v21977_v38  ;;  %14957 = vmatprep.mubr.bf16.mxu1 %v10273_v62  ;;  %v21986_v46 = vpack.c.bf16 %v21984_v11, %v21985_v47  ;;  %v20565_v38 = vld [vmem:[%s21054_s10] ss:$0 sm:$0xff] }
 0xadf   : > { %v10282_v22 = vmax.bf16 %v21327_v32, %v10218_v20 }
 0xae5   : > { %14958 = vmatmul.mubr.bf16.gmra.mrb[92].mxu1 %v10274_v56 }
 0xae6   : > { %14961 = vmatprep.mubr.bf16.mxu1 %v10275_v23 }
 0xae8   : > { %v14843_v61 = vpop.f32.mrb[248].mxu1 }
 0xae9   : > { %v9996_v27 = vpop.f32.mrb[249].mxu1 }
 0xaea   : > { %v14844_v41 = vpop.f32.mrb[250].mxu1 }
 0xaeb   : > { %v10088_v16 = vpack.c.bf16 %v14844_v41, %v14843_v61  ;;  %v9999_v15 = vpop.f32.mrb[251].mxu1  ;;  %v10283_v41 = vmax.bf16 %v21327_v32, %v10219_v39 }
 0xaec   : > { %v10087_v59 = vpack.c.bf16 %v9999_v15, %v9996_v27  ;;  %v10220_v15 = vadd.bf16 %v20236_v42, %v20485_v7 }
 0xaed   : > { %v20529_v37 = vadd.bf16 %v10088_v16, %v21980_v8  ;;  %14962 = vmatmul.mubr.bf16.gmra.mrb[96].mxu1 %v10276_v12 }
 0xaee   : > { %v20534_v26 = vadd.bf16 %v10087_v59, %v21983_v24  ;;  %14965 = vmatprep.mubr.bf16.mxu1 %v10277_v36  ;;  %v10221_v59 = vadd.bf16 %v20236_v42, %v20512_v44  ;;  %v10284_v51 = vmax.bf16 %v21327_v32, %v10220_v15 }
 0xaef   : > { %v10224_v47 = vadd.bf16 %v20236_v42, %v20529_v37 }
 0xaf5   : > { %14966 = vmatmul.mubr.bf16.gmra.mrb[100].mxu1 %v10278_v50 }
 0xaf6   : > { %14969 = vmatprep.mubr.bf16.mxu1 %v10279_v28  ;;  %v10285_v28 = vmax.bf16 %v21327_v32, %v10221_v59  ;;  %v10288_v59 = vmax.bf16 %v21327_v32, %v10224_v47 }
 0xaf8   : > { %v14847_v35 = vpop.f32.mrb[252].mxu1 }
 0xaf9   : > { %v10012_v52 = vpop.f32.mrb[253].mxu1 }
 0xafa   : > { %v14848_v2 = vpop.f32.mrb[254].mxu1 }
 0xafb   : > { %v10090_v57 = vpack.c.bf16 %v14848_v2, %v14847_v35  ;;  %v10015_v54 = vpop.f32.mrb[255].mxu1 }
 0xafc   : > { %v10089_v10 = vpack.c.bf16 %v10015_v54, %v10012_v52 }
 0xafd   : > { %v20551_v62 = vadd.bf16 %v10090_v57, %v21986_v46  ;;  %14970 = vmatmul.mubr.bf16.gmra.mrb[104].mxu1 %v10280_v31 }
 0xafe   : > { %v20556_v55 = vadd.bf16 %v10089_v10, %v21989_v9  ;;  %14973 = vmatprep.mubr.bf16.mxu1 %v10281_v5 }
 0xb00   : > { %v14867_v48 = vpop.f32.mrb[0].mxu1 }
 0xb01   : > { %v10902_v40 = vadd.f32 %v14867_v48, %v19359_v45  ;;  %v10389_v30 = vpop.f32.mrb[1].mxu1  ;;  %v21993_v48 = vld [vmem:[#allocation74_spill] sm:$0xff] }
 0xb02   : > { %v10900_v56 = vadd.f32 %v10389_v30, %v19335_v18  ;;  %v14868_v23 = vpop.f32.mrb[2].mxu1 }
 0xb03   : > { %v11037_v29 = vadd.f32 %v20565_v38, %v10902_v40  ;;  %v10903_v49 = vadd.f32 %v14868_v23, %v19364_v53  ;;  %v10392_v61 = vpop.f32.mrb[3].mxu1 }
 0xb04   : > { %v11035_v3 = vadd.f32 %v20565_v38, %v10900_v56  ;;  %v10901_v27 = vadd.f32 %v10392_v61, %v19341_v13 }
 0xb05   : > { %v12591_v12 = vmul.f32 -1.442695, %v11037_v29  ;;  %v11038_v45 = vadd.f32 %v20565_v38, %v10903_v49  ;;  %14974 = vmatmul.mubr.bf16.gmra.mrb[108].mxu1 %v10282_v22  ;;  %v21994_v29 = vld [vmem:[#allocation17_spill] sm:$0xff] }
 0xb06   : > { %v12589_v16 = vmul.f32 -1.442695, %v11035_v3  ;;  %v11036_v18 = vadd.f32 %v20565_v38, %v10901_v27  ;;  %14977 = vmatprep.mubr.bf16.mxu1 %v10283_v41  ;;  %v10225_v41 = vadd.bf16 %v20236_v42, %v20556_v55 }
 0xb07   : > { %15140 = vpow2.f32 %v12591_v12  ;;  %v12592_v53 = vmul.f32 -1.442695, %v11038_v45 }
 0xb08   : > { %15142 = vpow2.f32 %v12589_v16  ;;  %v12590_v13 = vmul.f32 -1.442695, %v11036_v18  ;;  %v14871_v36 = vpop.f32.mrb[4].mxu1 }
 0xb09   : > { %15144 = vpow2.f32 %v12592_v53  ;;  %v10906_v33 = vadd.f32 %v14871_v36, %v19393_v0  ;;  %v10405_v60 = vpop.f32.mrb[5].mxu1  ;;  %v10222_v0 = vadd.bf16 %v20236_v42, %v20507_v17  ;;  %v21991_v17 = vld [vmem:[#allocation14_spill] sm:$0xff] }
 0xb0a   : > { %15146 = vpow2.f32 %v12590_v13  ;;  %v10904_v8 = vadd.f32 %v10405_v60, %v19372_v1  ;;  %v14872_v63 = vpop.f32.mrb[6].mxu1  ;;  %v21995_v13 = vld [vmem:[#allocation86_spill] sm:$0xff] }
 0xb0b   : > { %v11041_v7 = vadd.f32 %v20565_v38, %v10906_v33  ;;  %v10907_v24 = vadd.f32 %v14872_v63, %v19398_v14  ;;  %v10408_v25 = vpop.f32.mrb[7].mxu1  ;;  %v10223_v14 = vadd.bf16 %v20236_v42, %v20534_v26  ;;  %v10286_v54 = vmax.bf16 %v21327_v32, %v10222_v0 }
 0xb0c   : > { %v11039_v44 = vadd.f32 %v20565_v38, %v10904_v8  ;;  %v10905_v50 = vadd.f32 %v10408_v25, %v21990_v34  ;;  %v21996_v8 = vld [vmem:[#allocation92_spill] sm:$0xff]  ;;  %v21997_v34 = vld [vmem:[#allocation83_spill] sm:$0xff] }
 0xb0d   : > { %v12595_v6 = vmul.f32 -1.442695, %v11041_v7  ;;  %v11042_v1 = vadd.f32 %v20565_v38, %v10907_v24  ;;  %14978 = vmatmul.mubr.bf16.gmra.mrb[112].mxu1 %v10284_v51  ;;  %v10287_v56 = vmax.bf16 %v21327_v32, %v10223_v14  ;;  %v10289_v7 = vmax.bf16 %v21327_v32, %v10225_v41 }
 0xb0e   : > { %v12593_v21 = vmul.f32 -1.442695, %v11039_v44  ;;  %v11040_v35 = vadd.f32 %v20565_v38, %v10905_v50  ;;  %14981 = vmatprep.mubr.bf16.mxu1 %v10285_v28 }
 0xb0f   : > { %15148 = vpow2.f32 %v12595_v6  ;;  %v12596_v52 = vmul.f32 -1.442695, %v11042_v1 }
 0xb10   : > { %15150 = vpow2.f32 %v12593_v21  ;;  %v12594_v2 = vmul.f32 -1.442695, %v11040_v35  ;;  %v14875_v31 = vpop.f32.mrb[8].mxu1  ;;  %v21998_v21 = vld [vmem:[#allocation89_spill] sm:$0xff] }
 0xb11   : > { %v15141_v57 = vpop.eup %15140  ;;  %15152 = vpow2.f32 %v12596_v52  ;;  %v10910_v10 = vadd.f32 %v14875_v31, %v21991_v17  ;;  %v10421_v5 = vpop.f32.mrb[9].mxu1 }
 0xb12   : > { %v15143_v11 = vpop.eup %15142  ;;  %v11549_v46 = vadd.f32 1.0, %v15141_v57  ;;  %15154 = vpow2.f32 %v12594_v2  ;;  %v10908_v26 = vadd.f32 %v10421_v5, %v21992_v19  ;;  %v14876_v43 = vpop.f32.mrb[10].mxu1  ;;  %v10226_v57 = vadd.bf16 %v20236_v42, %v20551_v62 }
 0xb13   : > { %v15145_v9 = vpop.eup %15144  ;;  %v11547_v20 = vadd.f32 1.0, %v15143_v11  ;;  %v11045_v39 = vadd.f32 %v20565_v38, %v10910_v10  ;;  %v10911_v40 = vadd.f32 %v14876_v43, %v21993_v48  ;;  %v10424_v30 = vpop.f32.mrb[11].mxu1 }
 0xb14   : > { %v15147_v23 = vpop.eup %15146  ;;  %15156 = vrcp.f32 %v11549_v46  ;;  %v11550_v22 = vadd.f32 1.0, %v15145_v9  ;;  %v11043_v37 = vadd.f32 %v20565_v38, %v10908_v26  ;;  %v10909_v49 = vadd.f32 %v10424_v30, %v21994_v29  ;;  %v21999_v46 = vld [vmem:[#allocation98_spill] sm:$0xff] }
 0xb15   : > { %15158 = vrcp.f32 %v11547_v20  ;;  %v11548_v61 = vadd.f32 1.0, %v15147_v23  ;;  %v12599_v3 = vmul.f32 -1.442695, %v11045_v39  ;;  %v11046_v27 = vadd.f32 %v20565_v38, %v10911_v40  ;;  %14982 = vmatmul.mubr.bf16.gmra.mrb[116].mxu1 %v10286_v54  ;;  %v22000_v20 = vld [vmem:[#allocation104_spill] sm:$0xff]  ;;  %v22001_v23 = vld [vmem:[#allocation95_spill] sm:$0xff] }
 0xb16   : > { %15160 = vrcp.f32 %v11550_v22  ;;  %v12597_v12 = vmul.f32 -1.442695, %v11043_v37  ;;  %v11044_v45 = vadd.f32 %v20565_v38, %v10909_v49  ;;  %14985 = vmatprep.mubr.bf16.mxu1 %v10287_v56  ;;  %v10290_v9 = vmax.bf16 %v21327_v32, %v10226_v57 }
 0xb17   : > { %15162 = vrcp.f32 %v11548_v61  ;;  %v12600_v16 = vmul.f32 -1.442695, %v11046_v27 }
 0xb18   : > { %15164 = vpow2.f32 %v12599_v3  ;;  %v12598_v18 = vmul.f32 -1.442695, %v11044_v45  ;;  %v14879_v15 = vpop.f32.mrb[12].mxu1  ;;  %v22002_v3 = vld [vmem:[#allocation101_spill] sm:$0xff] }
 0xb19   : > { %v15149_v53 = vpop.eup %15148  ;;  %15166 = vpow2.f32 %v12597_v12  ;;  %v10914_v55 = vadd.f32 %v14879_v15, %v21995_v13  ;;  %v10437_v36 = vpop.f32.mrb[13].mxu1 }
 0xb1a   : > { %v15151_v33 = vpop.eup %15150  ;;  %v11553_v60 = vadd.f32 1.0, %v15149_v53  ;;  %15168 = vpow2.f32 %v12600_v16  ;;  %v10912_v63 = vadd.f32 %v10437_v36, %v21996_v8  ;;  %v14880_v51 = vpop.f32.mrb[14].mxu1  ;;  %v22003_v8 = vld [vmem:[#allocation110_spill] sm:$0xff] }
 0xb1b   : > { %v15153_v24 = vpop.eup %15152  ;;  %v11551_v25 = vadd.f32 1.0, %v15151_v33  ;;  %15170 = vpow2.f32 %v12598_v18  ;;  %v11049_v44 = vadd.f32 %v20565_v38, %v10914_v55  ;;  %v10915_v50 = vadd.f32 %v14880_v51, %v21997_v34  ;;  %v10440_v28 = vpop.f32.mrb[15].mxu1 }
 0xb1c   : > { %v15155_v0 = vpop.eup %15154  ;;  %15172 = vrcp.f32 %v11553_v60  ;;  %v11554_v6 = vadd.f32 1.0, %v15153_v24  ;;  %v11047_v1 = vadd.f32 %v20565_v38, %v10912_v63  ;;  %v10913_v35 = vadd.f32 %v10440_v28, %v21998_v21  ;;  %v22004_v24 = vld [vmem:[#allocation116_spill] sm:$0xff] }
 0xb1d   : > { %15174 = vrcp.f32 %v11551_v25  ;;  %v11552_v14 = vadd.f32 1.0, %v15155_v0  ;;  %v12603_v52 = vmul.f32 -1.442695, %v11049_v44  ;;  %v11050_v2 = vadd.f32 %v20565_v38, %v10915_v50  ;;  %14986 = vmatmul.mubr.bf16.gmra.mrb[120].mxu1 %v10288_v59  ;;  %v22005_v0 = vld [vmem:[#allocation107_spill] sm:$0xff] }
 0xb1e   : > { %v15157_v31 = vpop.eup %15156  ;;  %15176 = vrcp.f32 %v11554_v6  ;;  %v12601_v54 = vmul.f32 -1.442695, %v11047_v1  ;;  %v11048_v17 = vadd.f32 %v20565_v38, %v10913_v35  ;;  %14989 = vmatprep.mubr.bf16.mxu1 %v10289_v7 }
 0xb1f   : > { %v15159_v10 = vpop.eup %15158  ;;  %11933 = vst [vmem:[%s20627_s16 + $0x10] sm:$0xff] %v15157_v31  ;;  %15178 = vrcp.f32 %v11552_v14  ;;  %v12604_v5 = vmul.f32 -1.442695, %v11050_v2 }
 0xb20   : > { %v15161_v11 = vpop.eup %15160  ;;  %11931 = vst [vmem:[%s20627_s16] sm:$0xff] %v15159_v10  ;;  %15180 = vpow2.f32 %v12603_v52  ;;  %v12602_v47 = vmul.f32 -1.442695, %v11048_v17  ;;  %v14883_v42 = vpop.f32.mrb[16].mxu1  ;;  %v22006_v52 = vld [vmem:[#allocation113_spill] sm:$0xff] }
 0xb21   : > { %v15163_v62 = vpop.eup %15162  ;;  %11934 = vst [vmem:[%s20627_s16 + $0x18] sm:$0xff] %v15161_v11  ;;  %15182 = vpow2.f32 %v12601_v54  ;;  %v10918_v19 = vadd.f32 %v14883_v42, %v21999_v46  ;;  %v10453_v26 = vpop.f32.mrb[17].mxu1 }
 0xb22   : > { %v15165_v43 = vpop.eup %15164  ;;  %11932 = vst [vmem:[%s20627_s16 + $0x8] sm:$0xff] %v15163_v62  ;;  %15184 = vpow2.f32 %v12604_v5  ;;  %v10916_v39 = vadd.f32 %v10453_v26, %v22000_v20  ;;  %v14884_v48 = vpop.f32.mrb[18].mxu1 }
 0xb23   : > { %v15167_v40 = vpop.eup %15166  ;;  %v11557_v30 = vadd.f32 1.0, %v15165_v43  ;;  %15186 = vpow2.f32 %v12602_v47  ;;  %v11053_v56 = vadd.f32 %v20565_v38, %v10918_v19  ;;  %v10919_v22 = vadd.f32 %v14884_v48, %v22001_v23  ;;  %v10456_v37 = vpop.f32.mrb[19].mxu1  ;;  %v22007_v43 = vld [vmem:[#allocation122_spill] sm:$0xff]  ;;  %v22008_v48 = vld [vmem:[#allocation128_spill] sm:$0xff] }
 0xb24   : > { %v15169_v29 = vpop.eup %15168  ;;  %v11555_v49 = vadd.f32 1.0, %v15167_v40  ;;  %v11051_v61 = vadd.f32 %v20565_v38, %v10916_v39  ;;  %v10917_v32 = vadd.f32 %v10456_v37, %v22002_v3 }
 0xb25   : > { %v15171_v27 = vpop.eup %15170  ;;  %15188 = vrcp.f32 %v11557_v30  ;;  %v11558_v41 = vadd.f32 1.0, %v15169_v29  ;;  %v12607_v12 = vmul.f32 -1.442695, %v11053_v56  ;;  %v11054_v45 = vadd.f32 %v20565_v38, %v10919_v22  ;;  %14990 = vmatmul.mubr.bf16.gmra.mrb[124].mxu1 %v10290_v9  ;;  %v22009_v22 = vld [vmem:[#allocation119_spill] sm:$0xff] }
 0xb26   : > { %v15173_v16 = vpop.eup %15172  ;;  %15190 = vrcp.f32 %v11555_v49  ;;  %v11556_v18 = vadd.f32 1.0, %v15171_v27  ;;  %v12605_v15 = vmul.f32 -1.442695, %v11051_v61  ;;  %v11052_v53 = vadd.f32 %v20565_v38, %v10917_v32  ;;  %v22010_v32 = vld [vmem:[#allocation125_spill] sm:$0xff] }
 0xb27   : > { %v15175_v59 = vpop.eup %15174  ;;  %11937 = vst [vmem:[%s20627_s16 + $0x30] sm:$0xff] %v15173_v16  ;;  %15192 = vrcp.f32 %v11558_v41  ;;  %v12608_v13 = vmul.f32 -1.442695, %v11054_v45 }
 0xb28   : > { %v15177_v55 = vpop.eup %15176  ;;  %11935 = vst [vmem:[%s20627_s16 + $0x20] sm:$0xff] %v15175_v59  ;;  %15194 = vrcp.f32 %v11556_v18  ;;  %v12606_v36 = vmul.f32 -1.442695, %v11052_v53  ;;  %v14887_v33 = vpop.f32.mrb[20].mxu1 }
 0xb29   : > { %v15179_v60 = vpop.eup %15178  ;;  %11938 = vst [vmem:[%s20627_s16 + $0x38] sm:$0xff] %v15177_v55  ;;  %15196 = vpow2.f32 %v12607_v12  ;;  %v10922_v63 = vadd.f32 %v14887_v33, %v22003_v8  ;;  %v10469_v51 = vpop.f32.mrb[21].mxu1 }
 0xb2a   : > { %v15181_v7 = vpop.eup %15180  ;;  %11936 = vst [vmem:[%s20627_s16 + $0x28] sm:$0xff] %v15179_v60  ;;  %15198 = vpow2.f32 %v12605_v15  ;;  %v10920_v25 = vadd.f32 %v10469_v51, %v22004_v24  ;;  %v14888_v44 = vpop.f32.mrb[22].mxu1  ;;  %v22011_v51 = vld [vmem:[#allocation134_spill] sm:$0xff] }
 0xb2b   : > { %v15183_v34 = vpop.eup %15182  ;;  %v11561_v50 = vadd.f32 1.0, %v15181_v7  ;;  %15200 = vpow2.f32 %v12608_v13  ;;  %v11057_v28 = vadd.f32 %v20565_v38, %v10922_v63  ;;  %v10923_v6 = vadd.f32 %v14888_v44, %v22005_v0  ;;  %v10472_v1 = vpop.f32.mrb[23].mxu1  ;;  %v22012_v44 = vld [vmem:[#allocation140_spill] sm:$0xff] }
 0xb2c   : > { %v15185_v21 = vpop.eup %15184  ;;  %v11559_v35 = vadd.f32 1.0, %v15183_v34  ;;  %15202 = vpow2.f32 %v12606_v36  ;;  %v11055_v14 = vadd.f32 %v20565_v38, %v10920_v25  ;;  %v10921_v2 = vadd.f32 %v10472_v1, %v22006_v52 }
 0xb2d   : > { %v15187_v31 = vpop.eup %15186  ;;  %15204 = vrcp.f32 %v11561_v50  ;;  %v11562_v57 = vadd.f32 1.0, %v15185_v21  ;;  %v12611_v54 = vmul.f32 -1.442695, %v11057_v28  ;;  %v11058_v17 = vadd.f32 %v20565_v38, %v10923_v6  ;;  %v22013_v6 = vld [vmem:[#allocation131_spill] sm:$0xff] }
 0xb2e   : > { %15206 = vrcp.f32 %v11559_v35  ;;  %v11560_v10 = vadd.f32 1.0, %v15187_v31  ;;  %v12609_v5 = vmul.f32 -1.442695, %v11055_v14  ;;  %v11056_v11 = vadd.f32 %v20565_v38, %v10921_v2  ;;  %v22014_v2 = vld [vmem:[#allocation137_spill] sm:$0xff] }
 0xb2f   : > { %v15189_v47 = vpop.eup %15188  ;;  %15208 = vrcp.f32 %v11562_v57  ;;  %v12612_v42 = vmul.f32 -1.442695, %v11058_v17 }
 0xb30   : > { %v15191_v62 = vpop.eup %15190  ;;  %11941 = vst [vmem:[%s20627_s16 + $0x50] sm:$0xff] %v15189_v47  ;;  %15210 = vrcp.f32 %v11560_v10  ;;  %v12610_v46 = vmul.f32 -1.442695, %v11056_v11  ;;  %v14891_v19 = vpop.f32.mrb[24].mxu1 }
 0xb31   : > { %v15193_v26 = vpop.eup %15192  ;;  %11939 = vst [vmem:[%s20627_s16 + $0x40] sm:$0xff] %v15191_v62  ;;  %15212 = vpow2.f32 %v12611_v54  ;;  %v10926_v9 = vadd.f32 %v14891_v19, %v22007_v43  ;;  %v10485_v20 = vpop.f32.mrb[25].mxu1 }
 0xb32   : > { %v15195_v39 = vpop.eup %15194  ;;  %11942 = vst [vmem:[%s20627_s16 + $0x58] sm:$0xff] %v15193_v26  ;;  %15214 = vpow2.f32 %v12609_v5  ;;  %v10924_v40 = vadd.f32 %v10485_v20, %v22008_v48  ;;  %v14892_v30 = vpop.f32.mrb[26].mxu1  ;;  %v22015_v20 = vld [vmem:[#allocation146_spill] sm:$0xff] }
 0xb33   : > { %v15197_v56 = vpop.eup %15196  ;;  %11940 = vst [vmem:[%s20627_s16 + $0x48] sm:$0xff] %v15195_v39  ;;  %15216 = vpow2.f32 %v12612_v42  ;;  %v11061_v23 = vadd.f32 %v20565_v38, %v10926_v9  ;;  %v10927_v37 = vadd.f32 %v14892_v30, %v22009_v22  ;;  %v10488_v29 = vpop.f32.mrb[27].mxu1  ;;  %v22016_v30 = vld [vmem:[#allocation152_spill] sm:$0xff] }
 0xb34   : > { %v15199_v49 = vpop.eup %15198  ;;  %v11565_v61 = vadd.f32 1.0, %v15197_v56  ;;  %15218 = vpow2.f32 %v12610_v46  ;;  %v11059_v3 = vadd.f32 %v20565_v38, %v10924_v40  ;;  %v10925_v27 = vadd.f32 %v10488_v29, %v22010_v32  ;;  %v22017_v29 = vld [vmem:[#allocation143_spill] sm:$0xff] }
 0xb35   : > { %v15201_v41 = vpop.eup %15200  ;;  %v11563_v12 = vadd.f32 1.0, %v15199_v49  ;;  %v11062_v45 = vadd.f32 %v20565_v38, %v10927_v37  ;;  %v12615_v15 = vmul.f32 -1.442695, %v11061_v23 }
 0xb36   : > { %v15203_v16 = vpop.eup %15202  ;;  %15220 = vrcp.f32 %v11565_v61  ;;  %v11566_v18 = vadd.f32 1.0, %v15201_v41  ;;  %v11060_v53 = vadd.f32 %v20565_v38, %v10925_v27  ;;  %v12613_v55 = vmul.f32 -1.442695, %v11059_v3  ;;  %v22018_v27 = vld [vmem:[#allocation149_spill] sm:$0xff] }
 0xb37   : > { %v15205_v59 = vpop.eup %15204  ;;  %15222 = vrcp.f32 %v11563_v12  ;;  %v11564_v13 = vadd.f32 1.0, %v15203_v16  ;;  %v12616_v33 = vmul.f32 -1.442695, %v11062_v45 }
 0xb38   : > { %v15207_v36 = vpop.eup %15206  ;;  %11945 = vst [vmem:[%s20627_s16 + $0x70] sm:$0xff] %v15205_v59  ;;  %15224 = vrcp.f32 %v11566_v18  ;;  %v14895_v60 = vpop.f32.mrb[28].mxu1  ;;  %v12614_v63 = vmul.f32 -1.442695, %v11060_v53 }
 0xb39   : > { %v15209_v8 = vpop.eup %15208  ;;  %11943 = vst [vmem:[%s20627_s16 + $0x60] sm:$0xff] %v15207_v36  ;;  %15226 = vrcp.f32 %v11564_v13  ;;  %v10930_v7 = vadd.f32 %v14895_v60, %v22011_v51  ;;  %v10501_v24 = vpop.f32.mrb[29].mxu1 }
 0xb3a   : > { %v15211_v25 = vpop.eup %15210  ;;  %11946 = vst [vmem:[%s20627_s16 + $0x78] sm:$0xff] %v15209_v8  ;;  %15228 = vpow2.f32 %v12615_v15  ;;  %v10928_v34 = vadd.f32 %v10501_v24, %v22012_v44  ;;  %v14896_v50 = vpop.f32.mrb[30].mxu1 }
 0xb3b   : > { %v15213_v28 = vpop.eup %15212  ;;  %11944 = vst [vmem:[%s20627_s16 + $0x68] sm:$0xff] %v15211_v25  ;;  %15230 = vpow2.f32 %v12613_v55  ;;  %v11065_v0 = vadd.f32 %v20565_v38, %v10930_v7  ;;  %v10931_v1 = vadd.f32 %v14896_v50, %v22013_v6  ;;  %v10504_v21 = vpop.f32.mrb[31].mxu1  ;;  %v22019_v7 = vld [vmem:[#allocation158_spill] sm:$0xff]  ;;  %v22020_v50 = vld [vmem:[#allocation164_spill] sm:$0xff] }
 0xb3c   : > { %v15215_v35 = vpop.eup %15214  ;;  %v11569_v14 = vadd.f32 1.0, %v15213_v28  ;;  %15232 = vpow2.f32 %v12616_v33  ;;  %v11063_v52 = vadd.f32 %v20565_v38, %v10928_v34  ;;  %v10929_v31 = vadd.f32 %v10504_v21, %v22014_v2  ;;  %v22021_v21 = vld [vmem:[#allocation155_spill] sm:$0xff] }
 0xb3d   : > { %v15217_v57 = vpop.eup %15216  ;;  %v11567_v54 = vadd.f32 1.0, %v15215_v35  ;;  %15234 = vpow2.f32 %v12614_v63  ;;  %v11066_v17 = vadd.f32 %v20565_v38, %v10931_v1  ;;  %v12619_v11 = vmul.f32 -1.442695, %v11065_v0 }
 0xb3e   : > { %v15219_v10 = vpop.eup %15218  ;;  %15236 = vrcp.f32 %v11569_v14  ;;  %v11570_v5 = vadd.f32 1.0, %v15217_v57  ;;  %v11064_v47 = vadd.f32 %v20565_v38, %v10929_v31  ;;  %v12617_v62 = vmul.f32 -1.442695, %v11063_v52  ;;  %v22022_v31 = vld [vmem:[#allocation161_spill] sm:$0xff] }
 0xb3f   : > { %15238 = vrcp.f32 %v11567_v54  ;;  %v11568_v42 = vadd.f32 1.0, %v15219_v10  ;;  %v12620_v19 = vmul.f32 -1.442695, %v11066_v17 }
 0xb40   : > { %v15221_v46 = vpop.eup %15220  ;;  %15240 = vrcp.f32 %v11570_v5  ;;  %v14899_v26 = vpop.f32.mrb[32].mxu1  ;;  %v12618_v9 = vmul.f32 -1.442695, %v11064_v47 }
 0xb41   : > { %v15223_v43 = vpop.eup %15222  ;;  %11949 = vst [vmem:[%s20627_s16 + $0x90] sm:$0xff] %v15221_v46  ;;  %15242 = vrcp.f32 %v11568_v42  ;;  %v10934_v39 = vadd.f32 %v14899_v26, %v22015_v20  ;;  %v10517_v48 = vpop.f32.mrb[33].mxu1 }
 0xb42   : > { %v15225_v40 = vpop.eup %15224  ;;  %11947 = vst [vmem:[%s20627_s16 + $0x80] sm:$0xff] %v15223_v43  ;;  %15244 = vpow2.f32 %v12619_v11  ;;  %v10932_v56 = vadd.f32 %v10517_v48, %v22016_v30  ;;  %v14900_v23 = vpop.f32.mrb[34].mxu1 }
 0xb43   : > { %v15227_v22 = vpop.eup %15226  ;;  %11950 = vst [vmem:[%s20627_s16 + $0x98] sm:$0xff] %v15225_v40  ;;  %15246 = vpow2.f32 %v12617_v62  ;;  %v11069_v37 = vadd.f32 %v20565_v38, %v10934_v39  ;;  %v10935_v49 = vadd.f32 %v14900_v23, %v22017_v29  ;;  %v10520_v61 = vpop.f32.mrb[35].mxu1  ;;  %v22023_v39 = vld [vmem:[#allocation168_spill] sm:$0xff]  ;;  %v22024_v23 = vld [vmem:[#allocation170_spill] sm:$0xff] }
 0xb44   : > { %v15229_v3 = vpop.eup %15228  ;;  %11948 = vst [vmem:[%s20627_s16 + $0x88] sm:$0xff] %v15227_v22  ;;  %15248 = vpow2.f32 %v12620_v19  ;;  %v11067_v32 = vadd.f32 %v20565_v38, %v10932_v56  ;;  %v10933_v41 = vadd.f32 %v10520_v61, %v22018_v27  ;;  %v22025_v61 = vld [vmem:[#allocation167_spill] sm:$0xff] }
 0xb45   : > { %v15231_v12 = vpop.eup %15230  ;;  %v11573_v45 = vadd.f32 1.0, %v15229_v3  ;;  %15250 = vpow2.f32 %v12618_v9  ;;  %v11070_v16 = vadd.f32 %v20565_v38, %v10935_v49  ;;  %v12623_v55 = vmul.f32 -1.442695, %v11069_v37 }
 0xb46   : > { %v15233_v18 = vpop.eup %15232  ;;  %v11571_v15 = vadd.f32 1.0, %v15231_v12  ;;  %v11068_v53 = vadd.f32 %v20565_v38, %v10933_v41  ;;  %v12621_v60 = vmul.f32 -1.442695, %v11067_v32  ;;  %v22026_v12 = vld [vmem:[#allocation169_spill] sm:$0xff] }
 0xb47   : > { %v15235_v59 = vpop.eup %15234  ;;  %15252 = vrcp.f32 %v11573_v45  ;;  %v11574_v13 = vadd.f32 1.0, %v15233_v18  ;;  %v12624_v51 = vmul.f32 -1.442695, %v11070_v16 }
 0xb48   : > { %v15237_v36 = vpop.eup %15236  ;;  %15254 = vrcp.f32 %v11571_v15  ;;  %v11572_v33 = vadd.f32 1.0, %v15235_v59  ;;  %v14903_v8 = vpop.f32.mrb[36].mxu1  ;;  %v12622_v34 = vmul.f32 -1.442695, %v11068_v53 }
 0xb49   : > { %v15239_v63 = vpop.eup %15238  ;;  %11953 = vst [vmem:[%s20627_s16 + $0xb0] sm:$0xff] %v15237_v36  ;;  %15256 = vrcp.f32 %v11574_v13  ;;  %v10938_v24 = vadd.f32 %v14903_v8, %v22019_v7  ;;  %v10533_v25 = vpop.f32.mrb[37].mxu1 }
 0xb4a   : > { %v15241_v44 = vpop.eup %15240  ;;  %11951 = vst [vmem:[%s20627_s16 + $0xa0] sm:$0xff] %v15239_v63  ;;  %15258 = vrcp.f32 %v11572_v33  ;;  %v10936_v28 = vadd.f32 %v10533_v25, %v22020_v50  ;;  %v14904_v0 = vpop.f32.mrb[38].mxu1  ;;  %v22027_v25 = vld [vmem:[#allocation172_spill] sm:$0xff] }
 0xb4b   : > { %v15243_v6 = vpop.eup %15242  ;;  %11954 = vst [vmem:[%s20627_s16 + $0xb8] sm:$0xff] %v15241_v44  ;;  %15260 = vpow2.f32 %v12623_v55  ;;  %v11073_v1 = vadd.f32 %v20565_v38, %v10938_v24  ;;  %v10939_v35 = vadd.f32 %v14904_v0, %v22021_v21  ;;  %v10536_v14 = vpop.f32.mrb[39].mxu1  ;;  %v22028_v0 = vld [vmem:[#allocation174_spill] sm:$0xff] }
 0xb4c   : > { %v15245_v52 = vpop.eup %15244  ;;  %11952 = vst [vmem:[%s20627_s16 + $0xa8] sm:$0xff] %v15243_v6  ;;  %15262 = vpow2.f32 %v12621_v60  ;;  %v11071_v2 = vadd.f32 %v20565_v38, %v10936_v28  ;;  %v10937_v57 = vadd.f32 %v10536_v14, %v22022_v31  ;;  %v22029_v14 = vld [vmem:[#allocation171_spill] sm:$0xff] }
 0xb4d   : > { %v15247_v54 = vpop.eup %15246  ;;  %v11577_v17 = vadd.f32 1.0, %v15245_v52  ;;  %15264 = vpow2.f32 %v12624_v51  ;;  %v11074_v10 = vadd.f32 %v20565_v38, %v10939_v35  ;;  %v12627_v46 = vmul.f32 -1.442695, %v11073_v1 }
 0xb4e   : > { %v15249_v5 = vpop.eup %15248  ;;  %v11575_v11 = vadd.f32 1.0, %v15247_v54  ;;  %15266 = vpow2.f32 %v12622_v34  ;;  %v11072_v47 = vadd.f32 %v20565_v38, %v10937_v57  ;;  %v12625_v26 = vmul.f32 -1.442695, %v11071_v2  ;;  %v22030_v57 = vld [vmem:[#allocation173_spill] sm:$0xff] }
 0xb4f   : > { %v15251_v42 = vpop.eup %15250  ;;  %15268 = vrcp.f32 %v11577_v17  ;;  %v11578_v62 = vadd.f32 1.0, %v15249_v5  ;;  %v12628_v20 = vmul.f32 -1.442695, %v11074_v10 }
 0xb50   : > { %15270 = vrcp.f32 %v11575_v11  ;;  %v11576_v19 = vadd.f32 1.0, %v15251_v42  ;;  %v14907_v43 = vpop.f32.mrb[40].mxu1  ;;  %v12626_v56 = vmul.f32 -1.442695, %v11072_v47 }
 0xb51   : > { %v15253_v9 = vpop.eup %15252  ;;  %15272 = vrcp.f32 %v11578_v62  ;;  %v10942_v48 = vadd.f32 %v14907_v43, %v22023_v39  ;;  %v10549_v40 = vpop.f32.mrb[41].mxu1 }
 0xb52   : > { %v15255_v30 = vpop.eup %15254  ;;  %11957 = vst [vmem:[%s20627_s16 + $0xd0] sm:$0xff] %v15253_v9  ;;  %15274 = vrcp.f32 %v11576_v19  ;;  %v10940_v22 = vadd.f32 %v10549_v40, %v22024_v23  ;;  %v14908_v37 = vpop.f32.mrb[42].mxu1  ;;  %v22031_v40 = vld [vmem:[#allocation180_spill] sm:$0xff] }
 0xb53   : > { %v15257_v29 = vpop.eup %15256  ;;  %11955 = vst [vmem:[%s20627_s16 + $0xc0] sm:$0xff] %v15255_v30  ;;  %15276 = vpow2.f32 %v12627_v46  ;;  %v11077_v49 = vadd.f32 %v20565_v38, %v10942_v48  ;;  %v10943_v3 = vadd.f32 %v14908_v37, %v22025_v61  ;;  %v10552_v32 = vpop.f32.mrb[43].mxu1 }
 0xb54   : > { %v15259_v27 = vpop.eup %15258  ;;  %11958 = vst [vmem:[%s20627_s16 + $0xd8] sm:$0xff] %v15257_v29  ;;  %15278 = vpow2.f32 %v12625_v26  ;;  %v11075_v41 = vadd.f32 %v20565_v38, %v10940_v22  ;;  %v10941_v45 = vadd.f32 %v10552_v32, %v22026_v12  ;;  %v22032_v29 = vld [vmem:[#allocation176_spill] sm:$0xff] }
 0xb55   : > { %v15261_v16 = vpop.eup %15260  ;;  %11956 = vst [vmem:[%s20627_s16 + $0xc8] sm:$0xff] %v15259_v27  ;;  %15280 = vpow2.f32 %v12628_v20  ;;  %v12631_v18 = vmul.f32 -1.442695, %v11077_v49  ;;  %v11078_v15 = vadd.f32 %v20565_v38, %v10943_v3 }
 0xb56   : > { %v15263_v53 = vpop.eup %15262  ;;  %v11581_v59 = vadd.f32 1.0, %v15261_v16  ;;  %15282 = vpow2.f32 %v12626_v56  ;;  %v11076_v13 = vadd.f32 %v20565_v38, %v10941_v45  ;;  %v12629_v8 = vmul.f32 -1.442695, %v11075_v41  ;;  %v22033_v41 = vld [vmem:[#allocation179_spill] sm:$0xff] }
 0xb57   : > { %v15265_v55 = vpop.eup %15264  ;;  %v11579_v36 = vadd.f32 1.0, %v15263_v53  ;;  %15284 = vpow2.f32 %v12631_v18  ;;  %v12632_v24 = vmul.f32 -1.442695, %v11078_v15  ;;  %v22034_v18 = vld [vmem:[#allocation175_spill] sm:$0xff] }
 0xb58   : > { %v15267_v33 = vpop.eup %15266  ;;  %15286 = vrcp.f32 %v11581_v59  ;;  %v11582_v60 = vadd.f32 1.0, %v15265_v55  ;;  %v14911_v63 = vpop.f32.mrb[44].mxu1  ;;  %v12630_v28 = vmul.f32 -1.442695, %v11076_v13 }
 0xb59   : > { %v15269_v51 = vpop.eup %15268  ;;  %15288 = vrcp.f32 %v11579_v36  ;;  %v11580_v7 = vadd.f32 1.0, %v15267_v33  ;;  %v10946_v44 = vadd.f32 %v14911_v63, %v22027_v25  ;;  %v10565_v34 = vpop.f32.mrb[45].mxu1 }
 0xb5a   : > { %v15271_v50 = vpop.eup %15270  ;;  %11961 = vst [vmem:[%s20627_s16 + $0xf0] sm:$0xff] %v15269_v51  ;;  %15290 = vrcp.f32 %v11582_v60  ;;  %v10944_v6 = vadd.f32 %v10565_v34, %v22028_v0  ;;  %v14912_v1 = vpop.f32.mrb[46].mxu1  ;;  %v22035_v34 = vld [vmem:[#allocation184_spill] sm:$0xff] }
 0xb5b   : > { %v15273_v21 = vpop.eup %15272  ;;  %11959 = vst [vmem:[%s20627_s16 + $0xe0] sm:$0xff] %v15271_v50  ;;  %15292 = vrcp.f32 %v11580_v7  ;;  %v11081_v35 = vadd.f32 %v20565_v38, %v10946_v44  ;;  %v10947_v52 = vadd.f32 %v14912_v1, %v22029_v14  ;;  %v10568_v2 = vpop.f32.mrb[47].mxu1 }
 0xb5c   : > { %v15275_v31 = vpop.eup %15274  ;;  %11962 = vst [vmem:[%s20627_s16 + $0xf8] sm:$0xff] %v15273_v21  ;;  %15294 = vpow2.f32 %v12629_v8  ;;  %v10945_v54 = vadd.f32 %v10568_v2, %v22030_v57  ;;  %v11079_v5 = vadd.f32 %v20565_v38, %v10944_v6  ;;  %v22036_v21 = vld [vmem:[#allocation178_spill] sm:$0xff]  ;;  %v22037_v57 = vld [vmem:[#allocation183_spill] sm:$0xff] }
 0xb5d   : > { %v15277_v17 = vpop.eup %15276  ;;  %11960 = vst [vmem:[%s20627_s16 + $0xe8] sm:$0xff] %v15275_v31  ;;  %15296 = vpow2.f32 %v12632_v24  ;;  %v12635_v10 = vmul.f32 -1.442695, %v11081_v35  ;;  %v11082_v42 = vadd.f32 %v20565_v38, %v10947_v52 }
 0xb5e   : > { %v15279_v11 = vpop.eup %15278  ;;  %v11585_v47 = vadd.f32 1.0, %v15277_v17  ;;  %15298 = vpow2.f32 %v12630_v28  ;;  %v11080_v19 = vadd.f32 %v20565_v38, %v10945_v54  ;;  %v12633_v48 = vmul.f32 -1.442695, %v11079_v5 }
 0xb5f   : > { %v15281_v62 = vpop.eup %15280  ;;  %v11583_v46 = vadd.f32 1.0, %v15279_v11  ;;  %15300 = vpow2.f32 %v12635_v10  ;;  %v12636_v37 = vmul.f32 -1.442695, %v11082_v42  ;;  %v22038_v11 = vld [vmem:[#allocation177_spill] sm:$0xff] }
 0xb60   : > { %v15283_v26 = vpop.eup %15282  ;;  %15302 = vrcp.f32 %v11585_v47  ;;  %v11586_v43 = vadd.f32 1.0, %v15281_v62  ;;  %v14915_v9 = vpop.f32.mrb[48].mxu1  ;;  %v12634_v32 = vmul.f32 -1.442695, %v11080_v19 }
 0xb61   : > { %v15285_v20 = vpop.eup %15284  ;;  %15304 = vrcp.f32 %v11583_v46  ;;  %v11584_v39 = vadd.f32 1.0, %v15283_v26  ;;  %v10950_v30 = vadd.f32 %v14915_v9, %v22031_v40  ;;  %v10581_v56 = vpop.f32.mrb[49].mxu1 }
 0xb62   : > { %v15287_v23 = vpop.eup %15286  ;;  %15306 = vrcp.f32 %v11586_v43  ;;  %v11589_v22 = vadd.f32 1.0, %v15285_v20  ;;  %v10948_v49 = vadd.f32 %v10581_v56, %v22032_v29  ;;  %v14916_v61 = vpop.f32.mrb[50].mxu1  ;;  %v20752_v43 = vld [vmem:[%s21054_s10] ss:$0 sm:$0xff] }
 0xb63   : > { %v15289_v3 = vpop.eup %15288  ;;  %11965 = vst [vmem:[%s20627_s16 + $0x110] sm:$0xff] %v15287_v23  ;;  %15308 = vrcp.f32 %v11584_v39  ;;  %v11085_v27 = vadd.f32 %v20565_v38, %v10950_v30  ;;  %v10951_v12 = vadd.f32 %v14916_v61, %v22033_v41  ;;  %v10584_v45 = vpop.f32.mrb[51].mxu1  ;;  %v22039_v23 = vld [vmem:[#allocation188_spill] sm:$0xff] }
 0xb64   : > { %v15291_v16 = vpop.eup %15290  ;;  %11963 = vst [vmem:[%s20627_s16 + $0x100] sm:$0xff] %v15289_v3  ;;  %15310 = vrcp.f32 %v11589_v22  ;;  %v10949_v15 = vadd.f32 %v10584_v45, %v22034_v18  ;;  %v11083_v13 = vadd.f32 %v20565_v38, %v10948_v49  ;;  %v22040_v3 = vld [vmem:[#allocation182_spill] sm:$0xff] }
 0xb65   : > { %v15293_v53 = vpop.eup %15292  ;;  %11966 = vst [vmem:[%s20627_s16 + $0x118] sm:$0xff] %v15291_v16  ;;  %15312 = vpow2.f32 %v12633_v48  ;;  %v12639_v59 = vmul.f32 -1.442695, %v11085_v27  ;;  %v11086_v36 = vadd.f32 %v20565_v38, %v10951_v12  ;;  %v22041_v16 = vld [vmem:[#allocation187_spill] sm:$0xff] }
 0xb66   : > { %v15295_v55 = vpop.eup %15294  ;;  %11964 = vst [vmem:[%s20627_s16 + $0x108] sm:$0xff] %v15293_v53  ;;  %15314 = vpow2.f32 %v12636_v37  ;;  %v11084_v8 = vadd.f32 %v20565_v38, %v10949_v15  ;;  %v12637_v44 = vmul.f32 -1.442695, %v11083_v13  ;;  %v22042_v13 = vld [vmem:[#allocation181_spill] sm:$0xff] }
 0xb67   : > { %v15297_v33 = vpop.eup %15296  ;;  %v11587_v60 = vadd.f32 1.0, %v15295_v55  ;;  %15316 = vpow2.f32 %v12634_v32  ;;  %v12640_v1 = vmul.f32 -1.442695, %v11086_v36 }
 0xb68   : > { %v15299_v63 = vpop.eup %15298  ;;  %v11590_v51 = vadd.f32 1.0, %v15297_v33  ;;  %15318 = vpow2.f32 %v12639_v59  ;;  %v14919_v7 = vpop.f32.mrb[52].mxu1  ;;  %v12638_v2 = vmul.f32 -1.442695, %v11084_v8 }
 0xb69   : > { %v15301_v24 = vpop.eup %15300  ;;  %15320 = vrcp.f32 %v11587_v60  ;;  %v11588_v25 = vadd.f32 1.0, %v15299_v63  ;;  %v10954_v50 = vadd.f32 %v14919_v7, %v22035_v34  ;;  %v10597_v28 = vpop.f32.mrb[53].mxu1 }
 0xb6a   : > { %v15303_v0 = vpop.eup %15302  ;;  %15322 = vrcp.f32 %v11590_v51  ;;  %v11593_v6 = vadd.f32 1.0, %v15301_v24  ;;  %v10952_v35 = vadd.f32 %v10597_v28, %v22036_v21  ;;  %v14920_v14 = vpop.f32.mrb[54].mxu1 }
 0xb6b   : > { %v15305_v52 = vpop.eup %15304  ;;  %11969 = vst [vmem:[%s20627_s16 + $0x130] sm:$0xff] %v15303_v0  ;;  %15324 = vrcp.f32 %v11588_v25  ;;  %v11089_v31 = vadd.f32 %v20565_v38, %v10954_v50  ;;  %v10955_v54 = vadd.f32 %v14920_v14, %v22037_v57  ;;  %v10600_v17 = vpop.f32.mrb[55].mxu1  ;;  %v22043_v0 = vld [vmem:[#allocation192_spill] sm:$0xff] }
 0xb6c   : > { %v15307_v10 = vpop.eup %15306  ;;  %11967 = vst [vmem:[%s20627_s16 + $0x120] sm:$0xff] %v15305_v52  ;;  %15326 = vrcp.f32 %v11593_v6  ;;  %v11087_v5 = vadd.f32 %v20565_v38, %v10952_v35  ;;  %v10953_v47 = vadd.f32 %v10600_v17, %v22038_v11  ;;  %v22044_v52 = vld [vmem:[#allocation186_spill] sm:$0xff] }
 0xb6d   : > { %v15309_v42 = vpop.eup %15308  ;;  %11970 = vst [vmem:[%s20627_s16 + $0x138] sm:$0xff] %v15307_v10  ;;  %15328 = vpow2.f32 %v12637_v44  ;;  %v12643_v62 = vmul.f32 -1.442695, %v11089_v31  ;;  %v11090_v46 = vadd.f32 %v20565_v38, %v10955_v54  ;;  %v22045_v10 = vld [vmem:[#allocation191_spill] sm:$0xff] }
 0xb6e   : > { %v15311_v19 = vpop.eup %15310  ;;  %11968 = vst [vmem:[%s20627_s16 + $0x128] sm:$0xff] %v15309_v42  ;;  %15330 = vpow2.f32 %v12640_v1  ;;  %v12641_v26 = vmul.f32 -1.442695, %v11087_v5  ;;  %v11088_v9 = vadd.f32 %v20752_v43, %v10953_v47 }
 0xb6f   : > { %v15313_v20 = vpop.eup %15312  ;;  %11973 = vst [vmem:[%s20627_s16 + $0x150] sm:$0xff] %v15311_v19  ;;  %15332 = vpow2.f32 %v12638_v2  ;;  %v12644_v56 = vmul.f32 -1.442695, %v11090_v46  ;;  %v22046_v46 = vld [vmem:[#allocation185_spill] sm:$0xff] }
 0xb70   : > { %v15315_v39 = vpop.eup %15314  ;;  %v11591_v48 = vadd.f32 1.0, %v15313_v20  ;;  %15334 = vpow2.f32 %v12643_v62  ;;  %v14923_v40 = vpop.f32.mrb[56].mxu1  ;;  %v12642_v61 = vmul.f32 -1.442695, %v11088_v9 }
 0xb71   : > { %v15317_v30 = vpop.eup %15316  ;;  %v11594_v38 = vadd.f32 1.0, %v15315_v39  ;;  %15336 = vpow2.f32 %v12641_v26  ;;  %v10958_v22 = vadd.f32 %v14923_v40, %v22039_v23  ;;  %v10613_v37 = vpop.f32.mrb[57].mxu1 }
 0xb72   : > { %v15319_v29 = vpop.eup %15318  ;;  %15338 = vrcp.f32 %v11591_v48  ;;  %v11592_v49 = vadd.f32 1.0, %v15317_v30  ;;  %v10956_v32 = vadd.f32 %v10613_v37, %v22040_v3  ;;  %v14924_v27 = vpop.f32.mrb[58].mxu1 }
 0xb73   : > { %v15321_v41 = vpop.eup %15320  ;;  %15340 = vrcp.f32 %v11594_v38  ;;  %v11597_v12 = vadd.f32 1.0, %v15319_v29  ;;  %v11093_v45 = vadd.f32 %v20752_v43, %v10958_v22  ;;  %v10959_v18 = vadd.f32 %v14924_v27, %v22041_v16  ;;  %v10616_v15 = vpop.f32.mrb[59].mxu1  ;;  %v22047_v29 = vld [vmem:[#allocation196_spill] sm:$0xff] }
 0xb74   : > { %v15323_v53 = vpop.eup %15322  ;;  %11971 = vst [vmem:[%s20627_s16 + $0x140] sm:$0xff] %v15321_v41  ;;  %15342 = vrcp.f32 %v11592_v49  ;;  %v11091_v59 = vadd.f32 %v20752_v43, %v10956_v32  ;;  %v10957_v55 = vadd.f32 %v10616_v15, %v22042_v13  ;;  %v22048_v41 = vld [vmem:[#allocation190_spill] sm:$0xff] }
 0xb75   : > { %v15325_v36 = vpop.eup %15324  ;;  %11974 = vst [vmem:[%s20627_s16 + $0x158] sm:$0xff] %v15323_v53  ;;  %15344 = vrcp.f32 %v11597_v12  ;;  %v12647_v33 = vmul.f32 -1.442695, %v11093_v45  ;;  %v11094_v60 = vadd.f32 %v20752_v43, %v10959_v18  ;;  %v22049_v53 = vld [vmem:[#allocation195_spill] sm:$0xff] }
 0xb76   : > { %v15327_v8 = vpop.eup %15326  ;;  %11972 = vst [vmem:[%s20627_s16 + $0x148] sm:$0xff] %v15325_v36  ;;  %15346 = vpow2.f32 %v12644_v56  ;;  %v12645_v63 = vmul.f32 -1.442695, %v11091_v59  ;;  %v11092_v51 = vadd.f32 %v20752_v43, %v10957_v55 }
 0xb77   : > { %v15329_v7 = vpop.eup %15328  ;;  %11977 = vst [vmem:[%s20627_s16 + $0x170] sm:$0xff] %v15327_v8  ;;  %15348 = vpow2.f32 %v12642_v61  ;;  %v12648_v28 = vmul.f32 -1.442695, %v11094_v60  ;;  %v22050_v60 = vld [vmem:[#allocation189_spill] sm:$0xff] }
 0xb78   : > { %v15331_v24 = vpop.eup %15330  ;;  %v11595_v25 = vadd.f32 1.0, %v15329_v7  ;;  %15350 = vpow2.f32 %v12647_v33  ;;  %v14927_v44 = vpop.f32.mrb[60].mxu1  ;;  %v12646_v14 = vmul.f32 -1.442695, %v11092_v51 }
 0xb79   : > { %v15333_v34 = vpop.eup %15332  ;;  %v11598_v50 = vadd.f32 1.0, %v15331_v24  ;;  %15352 = vpow2.f32 %v12645_v63  ;;  %v10962_v6 = vadd.f32 %v14927_v44, %v22043_v0  ;;  %v10629_v1 = vpop.f32.mrb[61].mxu1 }
 0xb7a   : > { %v15335_v21 = vpop.eup %15334  ;;  %15354 = vrcp.f32 %v11595_v25  ;;  %v11596_v35 = vadd.f32 1.0, %v15333_v34  ;;  %v10960_v2 = vadd.f32 %v10629_v1, %v22044_v52  ;;  %v14928_v31 = vpop.f32.mrb[62].mxu1  ;;  %v22051_v1 = vld [vmem:[#allocation200_spill] sm:$0xff] }
 0xb7b   : > { %v15337_v57 = vpop.eup %15336  ;;  %15356 = vrcp.f32 %v11598_v50  ;;  %v11601_v54 = vadd.f32 1.0, %v15335_v21  ;;  %v11097_v17 = vadd.f32 %v20752_v43, %v10962_v6  ;;  %v10963_v5 = vadd.f32 %v14928_v31, %v22045_v10  ;;  %v10632_v11 = vpop.f32.mrb[63].mxu1  ;;  %v22052_v31 = vld [vmem:[#allocation194_spill] sm:$0xff] }
 0xb7c   : > { %v15339_v47 = vpop.eup %15338  ;;  %15358 = vrcp.f32 %v11596_v35  ;;  %v11599_v42 = vadd.f32 1.0, %v15337_v57  ;;  %v11095_v62 = vadd.f32 %v20752_v43, %v10960_v2  ;;  %v10961_v19 = vadd.f32 %v10632_v11, %v22046_v46  ;;  %v22053_v11 = vld [vmem:[#allocation199_spill] sm:$0xff] }
 0xb7d   : > { %v15341_v26 = vpop.eup %15340  ;;  %11975 = vst [vmem:[%s20627_s16 + $0x160] sm:$0xff] %v15339_v47  ;;  %15360 = vrcp.f32 %v11601_v54  ;;  %v12651_v9 = vmul.f32 -1.442695, %v11097_v17  ;;  %v11098_v20 = vadd.f32 %v20752_v43, %v10963_v5 }
 0xb7e   : > { %v15343_v39 = vpop.eup %15342  ;;  %11978 = vst [vmem:[%s20627_s16 + $0x178] sm:$0xff] %v15341_v26  ;;  %15362 = vrcp.f32 %v11599_v42  ;;  %v12649_v48 = vmul.f32 -1.442695, %v11095_v62  ;;  %v11096_v40 = vadd.f32 %v20752_v43, %v10961_v19  ;;  %v22054_v26 = vld [vmem:[#allocation193_spill] sm:$0xff] }
 0xb7f   : > { %v15345_v30 = vpop.eup %15344  ;;  %11976 = vst [vmem:[%s20627_s16 + $0x168] sm:$0xff] %v15343_v39  ;;  %15364 = vpow2.f32 %v12648_v28  ;;  %v12652_v37 = vmul.f32 -1.442695, %v11098_v20 }
 0xb80   : > { %v15347_v38 = vpop.eup %15346  ;;  %11981 = vst [vmem:[%s20627_s16 + $0x190] sm:$0xff] %v15345_v30  ;;  %15366 = vpow2.f32 %v12646_v14  ;;  %v14931_v56 = vpop.f32.mrb[64].mxu1  ;;  %v12650_v27 = vmul.f32 -1.442695, %v11096_v40 }
 0xb81   : > { %v15349_v23 = vpop.eup %15348  ;;  %v11602_v22 = vadd.f32 1.0, %v15347_v38  ;;  %15368 = vpow2.f32 %v12651_v9  ;;  %v10966_v49 = vadd.f32 %v14931_v56, %v22047_v29  ;;  %v10645_v61 = vpop.f32.mrb[65].mxu1 }
 0xb82   : > { %v15351_v3 = vpop.eup %15350  ;;  %v11600_v32 = vadd.f32 1.0, %v15349_v23  ;;  %15370 = vpow2.f32 %v12649_v48  ;;  %v10964_v12 = vadd.f32 %v10645_v61, %v22048_v41  ;;  %v14932_v45 = vpop.f32.mrb[66].mxu1  ;;  %v22055_v61 = vld [vmem:[#allocation204_spill] sm:$0xff] }
 0xb83   : > { %v15353_v16 = vpop.eup %15352  ;;  %15372 = vrcp.f32 %v11602_v22  ;;  %v11605_v18 = vadd.f32 1.0, %v15351_v3  ;;  %v11101_v15 = vadd.f32 %v20752_v43, %v10966_v49  ;;  %v10967_v59 = vadd.f32 %v14932_v45, %v22049_v53  ;;  %v10648_v13 = vpop.f32.mrb[67].mxu1 }
 0xb84   : > { %v15355_v55 = vpop.eup %15354  ;;  %15374 = vrcp.f32 %v11600_v32  ;;  %v11603_v36 = vadd.f32 1.0, %v15353_v16  ;;  %v11099_v33 = vadd.f32 %v20752_v43, %v10964_v12  ;;  %v10965_v8 = vadd.f32 %v10648_v13, %v22050_v60  ;;  %v22056_v12 = vld [vmem:[#allocation198_spill] sm:$0xff] }
 0xb85   : > { %v15357_v63 = vpop.eup %15356  ;;  %11979 = vst [vmem:[%s20627_s16 + $0x180] sm:$0xff] %v15355_v55  ;;  %15376 = vrcp.f32 %v11605_v18  ;;  %v12655_v51 = vmul.f32 -1.442695, %v11101_v15  ;;  %v11102_v7 = vadd.f32 %v20752_v43, %v10967_v59  ;;  %v22057_v59 = vld [vmem:[#allocation203_spill] sm:$0xff] }
 0xb86   : > { %v15359_v24 = vpop.eup %15358  ;;  %11982 = vst [vmem:[%s20627_s16 + $0x198] sm:$0xff] %v15357_v63  ;;  %15378 = vrcp.f32 %v11603_v36  ;;  %v12653_v25 = vmul.f32 -1.442695, %v11099_v33  ;;  %v11100_v44 = vadd.f32 %v20752_v43, %v10965_v8  ;;  %v22058_v8 = vld [vmem:[#allocation197_spill] sm:$0xff] }
 0xb87   : > { %v15361_v34 = vpop.eup %15360  ;;  %11980 = vst [vmem:[%s20627_s16 + $0x188] sm:$0xff] %v15359_v24  ;;  %15380 = vpow2.f32 %v12652_v37  ;;  %v12656_v50 = vmul.f32 -1.442695, %v11102_v7 }
 0xb88   : > { %v15363_v28 = vpop.eup %15362  ;;  %11985 = vst [vmem:[%s20627_s16 + $0x1b0] sm:$0xff] %v15361_v34  ;;  %15382 = vpow2.f32 %v12650_v27  ;;  %v14935_v0 = vpop.f32.mrb[68].mxu1  ;;  %v12654_v2 = vmul.f32 -1.442695, %v11100_v44 }
 0xb89   : > { %v15365_v6 = vpop.eup %15364  ;;  %11983 = vst [vmem:[%s20627_s16 + $0x1a0] sm:$0xff] %v15363_v28  ;;  %15384 = vpow2.f32 %v12655_v51  ;;  %v10970_v21 = vadd.f32 %v14935_v0, %v22051_v1  ;;  %v10661_v35 = vpop.f32.mrb[69].mxu1 }
 0xb8a   : > { %v15367_v14 = vpop.eup %15366  ;;  %v11606_v52 = vadd.f32 1.0, %v15365_v6  ;;  %15386 = vpow2.f32 %v12653_v25  ;;  %v10968_v57 = vadd.f32 %v10661_v35, %v22052_v31  ;;  %v14936_v54 = vpop.f32.mrb[70].mxu1 }
 0xb8b   : > { %v15369_v17 = vpop.eup %15368  ;;  %v11604_v10 = vadd.f32 1.0, %v15367_v14  ;;  %15388 = vpow2.f32 %v12656_v50  ;;  %v11105_v5 = vadd.f32 %v20752_v43, %v10970_v21  ;;  %v10971_v47 = vadd.f32 %v14936_v54, %v22053_v11  ;;  %v10664_v42 = vpop.f32.mrb[71].mxu1  ;;  %v22060_v54 = vld [vmem:[#allocation202_spill] sm:$0xff] }
 0xb8c   : > { %v15371_v62 = vpop.eup %15370  ;;  %15390 = vrcp.f32 %v11606_v52  ;;  %v11609_v46 = vadd.f32 1.0, %v15369_v17  ;;  %v11103_v19 = vadd.f32 %v20752_v43, %v10968_v57  ;;  %v10969_v9 = vadd.f32 %v10664_v42, %v22054_v26  ;;  %v22059_v52 = vld [vmem:[#allocation208_spill] sm:$0xff]  ;;  %v22061_v42 = vld [vmem:[#allocation207_spill] sm:$0xff] }
 0xb8d   : > { %v15373_v20 = vpop.eup %15372  ;;  %15392 = vrcp.f32 %v11604_v10  ;;  %v11607_v39 = vadd.f32 1.0, %v15371_v62  ;;  %v12659_v48 = vmul.f32 -1.442695, %v11105_v5  ;;  %v11106_v40 = vadd.f32 %v20752_v43, %v10971_v47 }
 0xb8e   : > { %v15375_v30 = vpop.eup %15374  ;;  %11986 = vst [vmem:[%s20627_s16 + $0x1b8] sm:$0xff] %v15373_v20  ;;  %15394 = vrcp.f32 %v11609_v46  ;;  %v12657_v38 = vmul.f32 -1.442695, %v11103_v19  ;;  %v11104_v49 = vadd.f32 %v20752_v43, %v10969_v9  ;;  %v22062_v20 = vld [vmem:[#allocation201_spill] sm:$0xff] }
 0xb8f   : > { %v15377_v56 = vpop.eup %15376  ;;  %11984 = vst [vmem:[%s20627_s16 + $0x1a8] sm:$0xff] %v15375_v30  ;;  %15396 = vrcp.f32 %v11607_v39  ;;  %v12660_v23 = vmul.f32 -1.442695, %v11106_v40 }
 0xb90   : > { %v15379_v22 = vpop.eup %15378  ;;  %11989 = vst [vmem:[%s20627_s16 + $0x1d0] sm:$0xff] %v15377_v56  ;;  %15398 = vpow2.f32 %v12654_v2  ;;  %v14939_v37 = vpop.f32.mrb[72].mxu1  ;;  %v12658_v24 = vmul.f32 -1.442695, %v11104_v49 }
 0xb91   : > { %v15381_v29 = vpop.eup %15380  ;;  %11987 = vst [vmem:[%s20627_s16 + $0x1c0] sm:$0xff] %v15379_v22  ;;  %15400 = vpow2.f32 %v12659_v48  ;;  %v10974_v3 = vadd.f32 %v14939_v37, %v22055_v61  ;;  %v10677_v32 = vpop.f32.mrb[73].mxu1 }
 0xb92   : > { %v15383_v27 = vpop.eup %15382  ;;  %v11610_v41 = vadd.f32 1.0, %v15381_v29  ;;  %15402 = vpow2.f32 %v12657_v38  ;;  %v10972_v45 = vadd.f32 %v10677_v32, %v22056_v12  ;;  %v14940_v16 = vpop.f32.mrb[74].mxu1  ;;  %v22063_v12 = vld [vmem:[#allocation212_spill] sm:$0xff] }
 0xb93   : > { %v15385_v18 = vpop.eup %15384  ;;  %v11608_v15 = vadd.f32 1.0, %v15383_v27  ;;  %15404 = vpow2.f32 %v12660_v23  ;;  %v11109_v53 = vadd.f32 %v20752_v43, %v10974_v3  ;;  %v10975_v13 = vadd.f32 %v14940_v16, %v22057_v59  ;;  %v10680_v55 = vpop.f32.mrb[75].mxu1 }
 0xb94   : > { %v15387_v36 = vpop.eup %15386  ;;  %15406 = vrcp.f32 %v11610_v41  ;;  %v11613_v33 = vadd.f32 1.0, %v15385_v18  ;;  %v11107_v60 = vadd.f32 %v20752_v43, %v10972_v45  ;;  %v10973_v63 = vadd.f32 %v10680_v55, %v22058_v8 }
 0xb95   : > { %v15389_v51 = vpop.eup %15388  ;;  %15408 = vrcp.f32 %v11608_v15  ;;  %v11611_v7 = vadd.f32 1.0, %v15387_v36  ;;  %v11110_v25 = vadd.f32 %v20752_v43, %v10975_v13  ;;  %v12663_v50 = vmul.f32 -1.442695, %v11109_v53  ;;  %v22064_v15 = vld [vmem:[#allocation206_spill] sm:$0xff]  ;;  %v22065_v36 = vld [vmem:[#allocation211_spill] sm:$0xff] }
 0xb96   : > { %v15391_v44 = vpop.eup %15390  ;;  %15410 = vrcp.f32 %v11613_v33  ;;  %v11614_v34 = vadd.f32 1.0, %v15389_v51  ;;  %v12661_v0 = vmul.f32 -1.442695, %v11107_v60  ;;  %v11108_v14 = vadd.f32 %v20752_v43, %v10973_v63 }
 0xb97   : > { %v15393_v28 = vpop.eup %15392  ;;  %11990 = vst [vmem:[%s20627_s16 + $0x1d8] sm:$0xff] %v15391_v44  ;;  %15412 = vrcp.f32 %v11611_v7  ;;  %v12664_v1 = vmul.f32 -1.442695, %v11110_v25  ;;  %v22066_v7 = vld [vmem:[#allocation205_spill] sm:$0xff] }
 0xb98   : > { %v15395_v6 = vpop.eup %15394  ;;  %11988 = vst [vmem:[%s20627_s16 + $0x1c8] sm:$0xff] %v15393_v28  ;;  %15414 = vrcp.f32 %v11614_v34  ;;  %v14943_v21 = vpop.f32.mrb[76].mxu1  ;;  %v12662_v30 = vmul.f32 -1.442695, %v11108_v14 }
 0xb99   : > { %v15397_v35 = vpop.eup %15396  ;;  %11993 = vst [vmem:[%s20627_s16 + $0x1f0] sm:$0xff] %v15395_v6  ;;  %15416 = vpow2.f32 %v12658_v24  ;;  %v10978_v2 = vadd.f32 %v14943_v21, %v22059_v52  ;;  %v10693_v31 = vpop.f32.mrb[77].mxu1 }
 0xb9a   : > { %v15399_v57 = vpop.eup %15398  ;;  %11991 = vst [vmem:[%s20627_s16 + $0x1e0] sm:$0xff] %v15397_v35  ;;  %15418 = vpow2.f32 %v12663_v50  ;;  %v10976_v17 = vadd.f32 %v10693_v31, %v22060_v54  ;;  %v14944_v10 = vpop.f32.mrb[78].mxu1  ;;  %v22067_v54 = vld [vmem:[#allocation216_spill] sm:$0xff] }
 0xb9b   : > { %v15401_v5 = vpop.eup %15400  ;;  %v11612_v11 = vadd.f32 1.0, %v15399_v57  ;;  %15420 = vpow2.f32 %v12661_v0  ;;  %v11113_v47 = vadd.f32 %v20752_v43, %v10978_v2  ;;  %v10979_v62 = vadd.f32 %v14944_v10, %v22061_v42  ;;  %v10696_v46 = vpop.f32.mrb[79].mxu1 }
 0xb9c   : > { %v15403_v19 = vpop.eup %15402  ;;  %v11617_v26 = vadd.f32 1.0, %v15401_v5  ;;  %15422 = vpow2.f32 %v12664_v1  ;;  %v11111_v9 = vadd.f32 %v20752_v43, %v10976_v17  ;;  %v10977_v39 = vadd.f32 %v10696_v46, %v22062_v20 }
 0xb9d   : > { %v15405_v48 = vpop.eup %15404  ;;  %15424 = vrcp.f32 %v11612_v11  ;;  %v11615_v40 = vadd.f32 1.0, %v15403_v19  ;;  %v11114_v38 = vadd.f32 %v20752_v43, %v10979_v62  ;;  %v12667_v22 = vmul.f32 -1.442695, %v11113_v47  ;;  %v22068_v11 = vld [vmem:[#allocation210_spill] sm:$0xff]  ;;  %v22069_v19 = vld [vmem:[#allocation215_spill] sm:$0xff] }
 0xb9e   : > { %v15407_v56 = vpop.eup %15406  ;;  %15426 = vrcp.f32 %v11617_v26  ;;  %v11618_v23 = vadd.f32 1.0, %v15405_v48  ;;  %v11112_v37 = vadd.f32 %v20752_v43, %v10977_v39  ;;  %v12665_v49 = vmul.f32 -1.442695, %v11111_v9 }
 0xb9f   : > { %v15409_v29 = vpop.eup %15408  ;;  %11994 = vst [vmem:[%s20627_s16 + $0x1f8] sm:$0xff] %v15407_v56  ;;  %15428 = vrcp.f32 %v11615_v40  ;;  %v12668_v3 = vmul.f32 -1.442695, %v11114_v38  ;;  %v22070_v40 = vld [vmem:[#allocation209_spill] sm:$0xff] }
 0xba0   : > { %v15411_v61 = vpop.eup %15410  ;;  %11992 = vst [vmem:[%s20627_s16 + $0x1e8] sm:$0xff] %v15409_v29  ;;  %15430 = vrcp.f32 %v11618_v23  ;;  %v14947_v32 = vpop.f32.mrb[80].mxu1  ;;  %v12666_v41 = vmul.f32 -1.442695, %v11112_v37 }
 0xba1   : > { %v15413_v27 = vpop.eup %15412  ;;  %11997 = vst [vmem:[%s20627_s16 + $0x210] sm:$0xff] %v15411_v61  ;;  %15432 = vpow2.f32 %v12662_v30  ;;  %v10982_v45 = vadd.f32 %v14947_v32, %v22063_v12  ;;  %v10709_v16 = vpop.f32.mrb[81].mxu1 }
 0xba2   : > { %v15415_v18 = vpop.eup %15414  ;;  %11995 = vst [vmem:[%s20627_s16 + $0x200] sm:$0xff] %v15413_v27  ;;  %15434 = vpow2.f32 %v12667_v22  ;;  %v10980_v53 = vadd.f32 %v10709_v16, %v22064_v15  ;;  %v14948_v59 = vpop.f32.mrb[82].mxu1 }
 0xba3   : > { %v15417_v13 = vpop.eup %15416  ;;  %11998 = vst [vmem:[%s20627_s16 + $0x218] sm:$0xff] %v15415_v18  ;;  %15436 = vpow2.f32 %v12665_v49  ;;  %v11117_v55 = vadd.f32 %v20752_v43, %v10982_v45  ;;  %v10983_v33 = vadd.f32 %v14948_v59, %v22065_v36  ;;  %v10712_v60 = vpop.f32.mrb[83].mxu1  ;;  %v22071_v18 = vld [vmem:[#allocation220_spill] sm:$0xff] }
 0xba4   : > { %v15419_v8 = vpop.eup %15418  ;;  %v11616_v63 = vadd.f32 1.0, %v15417_v13  ;;  %15438 = vpow2.f32 %v12668_v3  ;;  %v11115_v51 = vadd.f32 %v20752_v43, %v10980_v53  ;;  %v10981_v24 = vadd.f32 %v10712_v60, %v22066_v7 }
 0xba5   : > { %v15421_v25 = vpop.eup %15420  ;;  %v11621_v44 = vadd.f32 1.0, %v15419_v8  ;;  %15440 = vpow2.f32 %v12666_v41  ;;  %v11118_v34 = vadd.f32 %v20752_v43, %v10983_v33  ;;  %v12671_v0 = vmul.f32 -1.442695, %v11117_v55  ;;  %v22072_v55 = vld [vmem:[#allocation214_spill] sm:$0xff] }
 0xba6   : > { %v15423_v50 = vpop.eup %15422  ;;  %15442 = vrcp.f32 %v11616_v63  ;;  %v11619_v28 = vadd.f32 1.0, %v15421_v25  ;;  %v11116_v6 = vadd.f32 %v20752_v43, %v10981_v24  ;;  %v12669_v35 = vmul.f32 -1.442695, %v11115_v51  ;;  %v22073_v63 = vld [vmem:[#allocation219_spill] sm:$0xff] }
 0xba7   : > { %v15425_v1 = vpop.eup %15424  ;;  %15444 = vrcp.f32 %v11621_v44  ;;  %v11622_v21 = vadd.f32 1.0, %v15423_v50  ;;  %v12672_v52 = vmul.f32 -1.442695, %v11118_v34  ;;  %v22074_v44 = vld [vmem:[#allocation213_spill] sm:$0xff] }
 0xba8   : > { %v15427_v14 = vpop.eup %15426  ;;  %11996 = vst [vmem:[%s20627_s16 + $0x208] sm:$0xff] %v15425_v1  ;;  %15446 = vrcp.f32 %v11619_v28  ;;  %v14951_v2 = vpop.f32.mrb[84].mxu1  ;;  %v12670_v57 = vmul.f32 -1.442695, %v11116_v6 }
 0xba9   : > { %v15429_v31 = vpop.eup %15428  ;;  %12001 = vst [vmem:[%s20627_s16 + $0x230] sm:$0xff] %v15427_v14  ;;  %15448 = vrcp.f32 %v11622_v21  ;;  %v10986_v17 = vadd.f32 %v14951_v2, %v22067_v54  ;;  %v10725_v10 = vpop.f32.mrb[85].mxu1 }
 0xbaa   : > { %v15431_v5 = vpop.eup %15430  ;;  %11999 = vst [vmem:[%s20627_s16 + $0x220] sm:$0xff] %v15429_v31  ;;  %15450 = vpow2.f32 %v12671_v0  ;;  %v10984_v47 = vadd.f32 %v10725_v10, %v22068_v11  ;;  %v14952_v42 = vpop.f32.mrb[86].mxu1 }
 0xbab   : > { %v15433_v62 = vpop.eup %15432  ;;  %12002 = vst [vmem:[%s20627_s16 + $0x238] sm:$0xff] %v15431_v5  ;;  %15452 = vpow2.f32 %v12669_v35  ;;  %v11121_v46 = vadd.f32 %v20752_v43, %v10986_v17  ;;  %v10987_v26 = vadd.f32 %v14952_v42, %v22069_v19  ;;  %v10728_v9 = vpop.f32.mrb[87].mxu1  ;;  %v22075_v5 = vld [vmem:[#allocation8_spill] sm:$0xff] }
 0xbac   : > { %v15435_v20 = vpop.eup %15434  ;;  %v11620_v39 = vadd.f32 1.0, %v15433_v62  ;;  %15454 = vpow2.f32 %v12672_v52  ;;  %v11119_v48 = vadd.f32 %v20752_v43, %v10984_v47  ;;  %v10985_v30 = vadd.f32 %v10728_v9, %v22070_v40 }
 0xbad   : > { %v15437_v38 = vpop.eup %15436  ;;  %v11625_v56 = vadd.f32 1.0, %v15435_v20  ;;  %15456 = vpow2.f32 %v12670_v57  ;;  %v11122_v23 = vadd.f32 %v20752_v43, %v10987_v26  ;;  %v12675_v3 = vmul.f32 -1.442695, %v11121_v46  ;;  %v22076_v46 = vld [vmem:[#allocation218_spill] sm:$0xff] }
 0xbae   : > { %v15439_v22 = vpop.eup %15438  ;;  %15458 = vrcp.f32 %v11620_v39  ;;  %v11623_v37 = vadd.f32 1.0, %v15437_v38  ;;  %v11120_v29 = vadd.f32 %v20752_v43, %v10985_v30  ;;  %v12673_v41 = vmul.f32 -1.442695, %v11119_v48  ;;  %v22077_v39 = vld [vmem:[#allocation9_spill] sm:$0xff] }
 0xbaf   : > { %v15441_v49 = vpop.eup %15440  ;;  %15460 = vrcp.f32 %v11625_v56  ;;  %v11626_v61 = vadd.f32 1.0, %v15439_v22  ;;  %v12676_v16 = vmul.f32 -1.442695, %v11122_v23  ;;  %v22078_v56 = vld [vmem:[#allocation217_spill] sm:$0xff] }
 0xbb0   : > { %v15443_v32 = vpop.eup %15442  ;;  %15462 = vrcp.f32 %v11623_v37  ;;  %v11624_v27 = vadd.f32 1.0, %v15441_v49  ;;  %v14955_v12 = vpop.f32.mrb[88].mxu1  ;;  %v12674_v13 = vmul.f32 -1.442695, %v11120_v29 }
 0xbb1   : > { %v15445_v45 = vpop.eup %15444  ;;  %12000 = vst [vmem:[%s20627_s16 + $0x228] sm:$0xff] %v15443_v32  ;;  %15464 = vrcp.f32 %v11626_v61  ;;  %v10990_v15 = vadd.f32 %v14955_v12, %v22071_v18  ;;  %v10741_v53 = vpop.f32.mrb[89].mxu1 }
 0xbb2   : > { %v15447_v59 = vpop.eup %15446  ;;  %12005 = vst [vmem:[%s20627_s16 + $0x250] sm:$0xff] %v15445_v45  ;;  %15466 = vrcp.f32 %v11624_v27  ;;  %v10988_v36 = vadd.f32 %v10741_v53, %v22072_v55  ;;  %v14956_v33 = vpop.f32.mrb[90].mxu1 }
 0xbb3   : > { %v15449_v60 = vpop.eup %15448  ;;  %12003 = vst [vmem:[%s20627_s16 + $0x240] sm:$0xff] %v15447_v59  ;;  %15468 = vpow2.f32 %v12675_v3  ;;  %v11125_v8 = vadd.f32 %v20752_v43, %v10990_v15  ;;  %v10991_v51 = vadd.f32 %v14956_v33, %v22073_v63  ;;  %v10744_v7 = vpop.f32.mrb[91].mxu1  ;;  %v22079_v59 = vld [vmem:[#allocation12_spill] sm:$0xff] }
 0xbb4   : > { %v15451_v24 = vpop.eup %15450  ;;  %12006 = vst [vmem:[%s20627_s16 + $0x258] sm:$0xff] %v15449_v60  ;;  %15470 = vpow2.f32 %v12673_v41  ;;  %v11123_v25 = vadd.f32 %v20752_v43, %v10988_v36  ;;  %v10989_v34 = vadd.f32 %v10744_v7, %v22074_v44  ;;  %v22080_v60 = vld [vmem:[#allocation6_spill] sm:$0xff] }
 0xbb5   : > { %v15453_v50 = vpop.eup %15452  ;;  %v11629_v28 = vadd.f32 1.0, %v15451_v24  ;;  %15472 = vpow2.f32 %v12676_v16  ;;  %v11126_v0 = vadd.f32 %v20752_v43, %v10991_v51  ;;  %v12679_v52 = vmul.f32 -1.442695, %v11125_v8  ;;  %v22081_v24 = vld [vmem:[#allocation13_spill] sm:$0xff] }
 0xbb6   : > { %v15455_v6 = vpop.eup %15454  ;;  %v11627_v1 = vadd.f32 1.0, %v15453_v50  ;;  %15474 = vpow2.f32 %v12674_v13  ;;  %v11124_v21 = vadd.f32 %v20752_v43, %v10989_v34  ;;  %v12677_v57 = vmul.f32 -1.442695, %v11123_v25  ;;  %v22082_v50 = vld [vmem:[#allocation7_spill] sm:$0xff] }
 0xbb7   : > { %v15457_v35 = vpop.eup %15456  ;;  %15476 = vrcp.f32 %v11629_v28  ;;  %v11630_v14 = vadd.f32 1.0, %v15455_v6  ;;  %v12680_v10 = vmul.f32 -1.442695, %v11126_v0 }
 0xbb8   : > { %v15459_v2 = vpop.eup %15458  ;;  %15478 = vrcp.f32 %v11627_v1  ;;  %v11628_v31 = vadd.f32 1.0, %v15457_v35  ;;  %v14959_v54 = vpop.f32.mrb[92].mxu1  ;;  %v12678_v62 = vmul.f32 -1.442695, %v11124_v21 }
 0xbb9   : > { %v15461_v17 = vpop.eup %15460  ;;  %12004 = vst [vmem:[%s20627_s16 + $0x248] sm:$0xff] %v15459_v2  ;;  %15480 = vrcp.f32 %v11630_v14  ;;  %v10994_v11 = vadd.f32 %v14959_v54, %v22075_v5  ;;  %v10757_v47 = vpop.f32.mrb[93].mxu1 }
 0xbba   : > { %v15463_v42 = vpop.eup %15462  ;;  %12009 = vst [vmem:[%s20627_s16 + $0x270] sm:$0xff] %v15461_v17  ;;  %15482 = vrcp.f32 %v11628_v31  ;;  %v10992_v19 = vadd.f32 %v10757_v47, %v22076_v46  ;;  %v14960_v26 = vpop.f32.mrb[94].mxu1  ;;  %v22083_v47 = vld [vmem:[#allocation18_spill] sm:$0xff] }
 0xbbb   : > { %v15465_v9 = vpop.eup %15464  ;;  %12007 = vst [vmem:[%s20627_s16 + $0x260] sm:$0xff] %v15463_v42  ;;  %15484 = vpow2.f32 %v12679_v52  ;;  %v11129_v20 = vadd.f32 %v20752_v43, %v10994_v11  ;;  %v10995_v48 = vadd.f32 %v14960_v26, %v22077_v39  ;;  %v10760_v40 = vpop.f32.mrb[95].mxu1 }
 0xbbc   : > { %v15467_v30 = vpop.eup %15466  ;;  %12010 = vst [vmem:[%s20627_s16 + $0x278] sm:$0xff] %v15465_v9  ;;  %15486 = vpow2.f32 %v12677_v57  ;;  %v11127_v38 = vadd.f32 %v20752_v43, %v10992_v19  ;;  %v10993_v23 = vadd.f32 %v10760_v40, %v22078_v56  ;;  %v22084_v9 = vld [vmem:[#allocation10_spill] sm:$0xff] }
 0xbbd   : > { %v15469_v22 = vpop.eup %15468  ;;  %12008 = vst [vmem:[%s20627_s16 + $0x268] sm:$0xff] %v15467_v30  ;;  %15488 = vpow2.f32 %v12680_v10  ;;  %v12683_v37 = vmul.f32 -1.442695, %v11129_v20  ;;  %v11130_v29 = vadd.f32 %v20752_v43, %v10995_v48 }
 0xbbe   : > { %v15471_v49 = vpop.eup %15470  ;;  %v11633_v61 = vadd.f32 1.0, %v15469_v22  ;;  %15490 = vpow2.f32 %v12678_v62  ;;  %v11128_v3 = vadd.f32 %v20752_v43, %v10993_v23  ;;  %v12681_v45 = vmul.f32 -1.442695, %v11127_v38  ;;  %v22085_v38 = vld [vmem:[#allocation19_spill] sm:$0xff] }
 0xbbf   : > { %v15473_v32 = vpop.eup %15472  ;;  %v11631_v27 = vadd.f32 1.0, %v15471_v49  ;;  %15492 = vpow2.f32 %v12683_v37  ;;  %v12684_v53 = vmul.f32 -1.442695, %v11130_v29  ;;  %v22086_v37 = vld [vmem:[#allocation11_spill] sm:$0xff] }
 0xbc0   : > { %v15475_v41 = vpop.eup %15474  ;;  %15494 = vrcp.f32 %v11633_v61  ;;  %v11634_v12 = vadd.f32 1.0, %v15473_v32  ;;  %v14963_v16 = vpop.f32.mrb[96].mxu1  ;;  %v12682_v33 = vmul.f32 -1.442695, %v11128_v3 }
 0xbc1   : > { %v15477_v18 = vpop.eup %15476  ;;  %15496 = vrcp.f32 %v11631_v27  ;;  %v11632_v15 = vadd.f32 1.0, %v15475_v41  ;;  %v10998_v13 = vadd.f32 %v14963_v16, %v22079_v59  ;;  %v10773_v55 = vpop.f32.mrb[97].mxu1 }
 0xbc2   : > { %v15479_v36 = vpop.eup %15478  ;;  %12013 = vst [vmem:[%s20627_s16 + $0x290] sm:$0xff] %v15477_v18  ;;  %15498 = vrcp.f32 %v11634_v12  ;;  %v10996_v8 = vadd.f32 %v10773_v55, %v22080_v60  ;;  %v14964_v63 = vpop.f32.mrb[98].mxu1  ;;  %v22087_v55 = vld [vmem:[#allocation24_spill] sm:$0xff] }
 0xbc3   : > { %v15481_v51 = vpop.eup %15480  ;;  %12011 = vst [vmem:[%s20627_s16 + $0x280] sm:$0xff] %v15479_v36  ;;  %15500 = vrcp.f32 %v11632_v15  ;;  %v11133_v7 = vadd.f32 %v20752_v43, %v10998_v13  ;;  %v10999_v25 = vadd.f32 %v14964_v63, %v22081_v24  ;;  %v10776_v44 = vpop.f32.mrb[99].mxu1 }
 0xbc4   : > { %v15483_v34 = vpop.eup %15482  ;;  %12014 = vst [vmem:[%s20627_s16 + $0x298] sm:$0xff] %v15481_v51  ;;  %15502 = vpow2.f32 %v12681_v45  ;;  %v10997_v28 = vadd.f32 %v10776_v44, %v22082_v50  ;;  %v11131_v1 = vadd.f32 %v20752_v43, %v10996_v8  ;;  %v22088_v51 = vld [vmem:[#allocation15_spill] sm:$0xff]  ;;  %v22089_v50 = vld [vmem:[#allocation25_spill] sm:$0xff] }
 0xbc5   : > { %v15485_v0 = vpop.eup %15484  ;;  %12012 = vst [vmem:[%s20627_s16 + $0x288] sm:$0xff] %v15483_v34  ;;  %15504 = vpow2.f32 %v12684_v53  ;;  %v12687_v6 = vmul.f32 -1.442695, %v11133_v7  ;;  %v11134_v14 = vadd.f32 %v20752_v43, %v10999_v25 }
 0xbc6   : > { %v15487_v21 = vpop.eup %15486  ;;  %v11637_v35 = vadd.f32 1.0, %v15485_v0  ;;  %15506 = vpow2.f32 %v12682_v33  ;;  %v11132_v31 = vadd.f32 %v20752_v43, %v10997_v28  ;;  %v12685_v11 = vmul.f32 -1.442695, %v11131_v1 }
 0xbc7   : > { %v15489_v52 = vpop.eup %15488  ;;  %v11635_v2 = vadd.f32 1.0, %v15487_v21  ;;  %15508 = vpow2.f32 %v12687_v6  ;;  %v12688_v26 = vmul.f32 -1.442695, %v11134_v14  ;;  %v22090_v21 = vld [vmem:[#allocation16_spill] sm:$0xff] }
 0xbc8   : > { %v15491_v57 = vpop.eup %15490  ;;  %15510 = vrcp.f32 %v11637_v35  ;;  %v11638_v54 = vadd.f32 1.0, %v15489_v52  ;;  %v14967_v17 = vpop.f32.mrb[100].mxu1  ;;  %v12686_v40 = vmul.f32 -1.442695, %v11132_v31 }
 0xbc9   : > { %v15493_v10 = vpop.eup %15492  ;;  %15512 = vrcp.f32 %v11635_v2  ;;  %v11636_v5 = vadd.f32 1.0, %v15491_v57  ;;  %v11002_v42 = vadd.f32 %v14967_v17, %v22083_v47  ;;  %v10789_v62 = vpop.f32.mrb[101].mxu1  ;;  %v20911_v2 = vld [vmem:[%s21054_s10] ss:$0 sm:$0xff] }
 0xbca   : > { %v15495_v46 = vpop.eup %15494  ;;  %15514 = vrcp.f32 %v11638_v54  ;;  %v11641_v19 = vadd.f32 1.0, %v15493_v10  ;;  %v11000_v20 = vadd.f32 %v10789_v62, %v22084_v9  ;;  %v14968_v39 = vpop.f32.mrb[102].mxu1 }
 0xbcb   : > { %v15497_v48 = vpop.eup %15496  ;;  %12017 = vst [vmem:[%s20627_s16 + $0x2b0] sm:$0xff] %v15495_v46  ;;  %15516 = vrcp.f32 %v11636_v5  ;;  %v11137_v30 = vadd.f32 %v20752_v43, %v11002_v42  ;;  %v11003_v56 = vadd.f32 %v14968_v39, %v22085_v38  ;;  %v10792_v23 = vpop.f32.mrb[103].mxu1  ;;  %v22091_v46 = vld [vmem:[#allocation28_spill] sm:$0xff] }
 0xbcc   : > { %v15499_v22 = vpop.eup %15498  ;;  %12015 = vst [vmem:[%s20627_s16 + $0x2a0] sm:$0xff] %v15497_v48  ;;  %15518 = vrcp.f32 %v11641_v19  ;;  %v11001_v29 = vadd.f32 %v10792_v23, %v22086_v37  ;;  %v11135_v3 = vadd.f32 %v20752_v43, %v11000_v20  ;;  %v22092_v48 = vld [vmem:[#allocation21_spill] sm:$0xff] }
 0xbcd   : > { %v15501_v49 = vpop.eup %15500  ;;  %12018 = vst [vmem:[%s20627_s16 + $0x2b8] sm:$0xff] %v15499_v22  ;;  %15520 = vpow2.f32 %v12685_v11  ;;  %v12691_v61 = vmul.f32 -1.442695, %v11137_v30  ;;  %v11138_v27 = vadd.f32 %v20752_v43, %v11003_v56  ;;  %v22093_v22 = vld [vmem:[#allocation29_spill] sm:$0xff] }
 0xbce   : > { %v15503_v32 = vpop.eup %15502  ;;  %12016 = vst [vmem:[%s20627_s16 + $0x2a8] sm:$0xff] %v15501_v49  ;;  %15522 = vpow2.f32 %v12688_v26  ;;  %v11136_v45 = vadd.f32 %v20752_v43, %v11001_v29  ;;  %v12689_v13 = vmul.f32 -1.442695, %v11135_v3  ;;  %v22094_v3 = vld [vmem:[#allocation22_spill] sm:$0xff] }
 0xbcf   : > { %v15505_v41 = vpop.eup %15504  ;;  %v11639_v12 = vadd.f32 1.0, %v15503_v32  ;;  %15524 = vpow2.f32 %v12686_v40  ;;  %v12692_v63 = vmul.f32 -1.442695, %v11138_v27 }
 0xbd0   : > { %v15507_v16 = vpop.eup %15506  ;;  %v11642_v18 = vadd.f32 1.0, %v15505_v41  ;;  %15526 = vpow2.f32 %v12691_v61  ;;  %v14971_v15 = vpop.f32.mrb[104].mxu1  ;;  %v12690_v44 = vmul.f32 -1.442695, %v11136_v45 }
 0xbd1   : > { %v15509_v53 = vpop.eup %15508  ;;  %15528 = vrcp.f32 %v11639_v12  ;;  %v11640_v59 = vadd.f32 1.0, %v15507_v16  ;;  %v11006_v36 = vadd.f32 %v14971_v15, %v22087_v55  ;;  %v10805_v33 = vpop.f32.mrb[105].mxu1 }
 0xbd2   : > { %v15511_v60 = vpop.eup %15510  ;;  %15530 = vrcp.f32 %v11642_v18  ;;  %v11645_v8 = vadd.f32 1.0, %v15509_v53  ;;  %v11004_v7 = vadd.f32 %v10805_v33, %v22088_v51  ;;  %v14972_v24 = vpop.f32.mrb[106].mxu1 }
 0xbd3   : > { %v15513_v25 = vpop.eup %15512  ;;  %12021 = vst [vmem:[%s20627_s16 + $0x2d0] sm:$0xff] %v15511_v60  ;;  %15532 = vrcp.f32 %v11640_v59  ;;  %v11141_v34 = vadd.f32 %v20752_v43, %v11006_v36  ;;  %v11007_v28 = vadd.f32 %v14972_v24, %v22089_v50  ;;  %v10808_v0 = vpop.f32.mrb[107].mxu1  ;;  %v22095_v60 = vld [vmem:[#allocation32_spill] sm:$0xff] }
 0xbd4   : > { %v15515_v6 = vpop.eup %15514  ;;  %12019 = vst [vmem:[%s20627_s16 + $0x2c0] sm:$0xff] %v15513_v25  ;;  %15534 = vrcp.f32 %v11645_v8  ;;  %v11139_v1 = vadd.f32 %v20752_v43, %v11004_v7  ;;  %v11005_v35 = vadd.f32 %v10808_v0, %v22090_v21  ;;  %v22096_v25 = vld [vmem:[#allocation26_spill] sm:$0xff] }
 0xbd5   : > { %v15517_v14 = vpop.eup %15516  ;;  %12022 = vst [vmem:[%s20627_s16 + $0x2d8] sm:$0xff] %v15515_v6  ;;  %15536 = vpow2.f32 %v12689_v13  ;;  %v12695_v52 = vmul.f32 -1.442695, %v11141_v34  ;;  %v11142_v31 = vadd.f32 %v20911_v2, %v11007_v28  ;;  %v22097_v6 = vld [vmem:[#allocation33_spill] sm:$0xff] }
 0xbd6   : > { %v15519_v57 = vpop.eup %15518  ;;  %12020 = vst [vmem:[%s20627_s16 + $0x2c8] sm:$0xff] %v15517_v14  ;;  %15538 = vpow2.f32 %v12692_v63  ;;  %v12693_v54 = vmul.f32 -1.442695, %v11139_v1  ;;  %v11140_v17 = vadd.f32 %v20911_v2, %v11005_v35 }
 0xbd7   : > { %v15521_v43 = vpop.eup %15520  ;;  %12025 = vst [vmem:[%s20627_s16 + $0x2f0] sm:$0xff] %v15519_v57  ;;  %15540 = vpow2.f32 %v12690_v44  ;;  %v12696_v62 = vmul.f32 -1.442695, %v11142_v31  ;;  %v22098_v31 = vld [vmem:[#allocation27_spill] sm:$0xff] }
 0xbd8   : > { %v15523_v10 = vpop.eup %15522  ;;  %v11643_v5 = vadd.f32 1.0, %v15521_v43  ;;  %15542 = vpow2.f32 %v12695_v52  ;;  %v14975_v11 = vpop.f32.mrb[108].mxu1  ;;  %v12694_v39 = vmul.f32 -1.442695, %v11140_v17 }
 0xbd9   : > { %v15525_v47 = vpop.eup %15524  ;;  %v11646_v42 = vadd.f32 1.0, %v15523_v10  ;;  %15544 = vpow2.f32 %v12693_v54  ;;  %v11010_v19 = vadd.f32 %v14975_v11, %v22091_v46  ;;  %v10821_v26 = vpop.f32.mrb[109].mxu1 }
 0xbda   : > { %v15527_v9 = vpop.eup %15526  ;;  %15546 = vrcp.f32 %v11643_v5  ;;  %v11644_v20 = vadd.f32 1.0, %v15525_v47  ;;  %v11008_v40 = vadd.f32 %v10821_v26, %v22092_v48  ;;  %v14976_v30 = vpop.f32.mrb[110].mxu1 }
 0xbdb   : > { %v15529_v38 = vpop.eup %15528  ;;  %15548 = vrcp.f32 %v11646_v42  ;;  %v11649_v56 = vadd.f32 1.0, %v15527_v9  ;;  %v11145_v23 = vadd.f32 %v20911_v2, %v11010_v19  ;;  %v11011_v37 = vadd.f32 %v14976_v30, %v22093_v22  ;;  %v10824_v29 = vpop.f32.mrb[111].mxu1  ;;  %v22099_v9 = vld [vmem:[#allocation36_spill] sm:$0xff] }
 0xbdc   : > { %v15531_v49 = vpop.eup %15530  ;;  %12023 = vst [vmem:[%s20627_s16 + $0x2e0] sm:$0xff] %v15529_v38  ;;  %15550 = vrcp.f32 %v11644_v20  ;;  %v11143_v61 = vadd.f32 %v20911_v2, %v11008_v40  ;;  %v11009_v32 = vadd.f32 %v10824_v29, %v22094_v3  ;;  %v22100_v38 = vld [vmem:[#allocation30_spill] sm:$0xff] }
 0xbdd   : > { %v15533_v27 = vpop.eup %15532  ;;  %12026 = vst [vmem:[%s20627_s16 + $0x2f8] sm:$0xff] %v15531_v49  ;;  %15552 = vrcp.f32 %v11649_v56  ;;  %v12699_v41 = vmul.f32 -1.442695, %v11145_v23  ;;  %v11146_v12 = vadd.f32 %v20911_v2, %v11011_v37  ;;  %v22101_v49 = vld [vmem:[#allocation37_spill] sm:$0xff] }
 0xbde   : > { %v15535_v45 = vpop.eup %15534  ;;  %12024 = vst [vmem:[%s20627_s16 + $0x2e8] sm:$0xff] %v15533_v27  ;;  %15554 = vpow2.f32 %v12696_v62  ;;  %v12697_v16 = vmul.f32 -1.442695, %v11143_v61  ;;  %v11144_v18 = vadd.f32 %v20911_v2, %v11009_v32 }
 0xbdf   : > { %v15537_v15 = vpop.eup %15536  ;;  %12029 = vst [vmem:[%s20627_s16 + $0x310] sm:$0xff] %v15535_v45  ;;  %15556 = vpow2.f32 %v12694_v39  ;;  %v12700_v33 = vmul.f32 -1.442695, %v11146_v12  ;;  %v22102_v12 = vld [vmem:[#allocation31_spill] sm:$0xff] }
 0xbe0   : > { %v15539_v53 = vpop.eup %15538  ;;  %v11647_v59 = vadd.f32 1.0, %v15537_v15  ;;  %15558 = vpow2.f32 %v12699_v41  ;;  %v14979_v13 = vpop.f32.mrb[112].mxu1  ;;  %v12698_v24 = vmul.f32 -1.442695, %v11144_v18 }
 0xbe1   : > { %v15541_v55 = vpop.eup %15540  ;;  %v11650_v36 = vadd.f32 1.0, %v15539_v53  ;;  %15560 = vpow2.f32 %v12697_v16  ;;  %v11014_v8 = vadd.f32 %v14979_v13, %v22095_v60  ;;  %v10837_v63 = vpop.f32.mrb[113].mxu1 }
 0xbe2   : > { %v15543_v51 = vpop.eup %15542  ;;  %15562 = vrcp.f32 %v11647_v59  ;;  %v11648_v7 = vadd.f32 1.0, %v15541_v55  ;;  %v11012_v44 = vadd.f32 %v10837_v63, %v22096_v25  ;;  %v14980_v34 = vpop.f32.mrb[114].mxu1  ;;  %v22103_v63 = vld [vmem:[#allocation40_spill] sm:$0xff] }
 0xbe3   : > { %v15545_v50 = vpop.eup %15544  ;;  %15564 = vrcp.f32 %v11650_v36  ;;  %v11653_v28 = vadd.f32 1.0, %v15543_v51  ;;  %v11149_v0 = vadd.f32 %v20911_v2, %v11014_v8  ;;  %v11015_v1 = vadd.f32 %v14980_v34, %v22097_v6  ;;  %v10840_v21 = vpop.f32.mrb[115].mxu1  ;;  %v22104_v34 = vld [vmem:[#allocation34_spill] sm:$0xff] }
 0xbe4   : > { %v15547_v35 = vpop.eup %15546  ;;  %15566 = vrcp.f32 %v11648_v7  ;;  %v11651_v14 = vadd.f32 1.0, %v15545_v50  ;;  %v11147_v52 = vadd.f32 %v20911_v2, %v11012_v44  ;;  %v11013_v57 = vadd.f32 %v10840_v21, %v22098_v31  ;;  %v22105_v21 = vld [vmem:[#allocation41_spill] sm:$0xff] }
 0xbe5   : > { %v15549_v54 = vpop.eup %15548  ;;  %12027 = vst [vmem:[%s20627_s16 + $0x300] sm:$0xff] %v15547_v35  ;;  %15568 = vrcp.f32 %v11653_v28  ;;  %v12703_v17 = vmul.f32 -1.442695, %v11149_v0  ;;  %v11150_v43 = vadd.f32 %v20911_v2, %v11015_v1 }
 0xbe6   : > { %v15551_v10 = vpop.eup %15550  ;;  %12030 = vst [vmem:[%s20627_s16 + $0x318] sm:$0xff] %v15549_v54  ;;  %15570 = vrcp.f32 %v11651_v14  ;;  %v12701_v5 = vmul.f32 -1.442695, %v11147_v52  ;;  %v11148_v11 = vadd.f32 %v20911_v2, %v11013_v57  ;;  %v22106_v54 = vld [vmem:[#allocation35_spill] sm:$0xff] }
 0xbe7   : > { %v15553_v47 = vpop.eup %15552  ;;  %12028 = vst [vmem:[%s20627_s16 + $0x308] sm:$0xff] %v15551_v10  ;;  %15572 = vpow2.f32 %v12700_v33  ;;  %v12704_v26 = vmul.f32 -1.442695, %v11150_v43 }
 0xbe8   : > { %v15555_v42 = vpop.eup %15554  ;;  %12033 = vst [vmem:[%s20627_s16 + $0x330] sm:$0xff] %v15553_v47  ;;  %15574 = vpow2.f32 %v12698_v24  ;;  %v14983_v62 = vpop.f32.mrb[116].mxu1  ;;  %v12702_v30 = vmul.f32 -1.442695, %v11148_v11 }
 0xbe9   : > { %v15557_v46 = vpop.eup %15556  ;;  %v11654_v19 = vadd.f32 1.0, %v15555_v42  ;;  %15576 = vpow2.f32 %v12703_v17  ;;  %v11018_v20 = vadd.f32 %v14983_v62, %v22099_v9  ;;  %v10853_v39 = vpop.f32.mrb[117].mxu1 }
 0xbea   : > { %v15559_v48 = vpop.eup %15558  ;;  %v11652_v40 = vadd.f32 1.0, %v15557_v46  ;;  %15578 = vpow2.f32 %v12701_v5  ;;  %v11016_v56 = vadd.f32 %v10853_v39, %v22100_v38  ;;  %v14984_v23 = vpop.f32.mrb[118].mxu1  ;;  %v22107_v38 = vld [vmem:[#allocation38_spill] sm:$0xff] }
 0xbeb   : > { %v15561_v22 = vpop.eup %15560  ;;  %15580 = vrcp.f32 %v11654_v19  ;;  %v11657_v37 = vadd.f32 1.0, %v15559_v48  ;;  %v11153_v29 = vadd.f32 %v20911_v2, %v11018_v20  ;;  %v11019_v61 = vadd.f32 %v14984_v23, %v22101_v49  ;;  %v10856_v3 = vpop.f32.mrb[119].mxu1 }
 0xbec   : > { %v15563_v32 = vpop.eup %15562  ;;  %15582 = vrcp.f32 %v11652_v40  ;;  %v11655_v27 = vadd.f32 1.0, %v15561_v22  ;;  %v11151_v41 = vadd.f32 %v20911_v2, %v11016_v56  ;;  %v11017_v45 = vadd.f32 %v10856_v3, %v22102_v12 }
 0xbed   : > { %v15565_v16 = vpop.eup %15564  ;;  %12031 = vst [vmem:[%s20627_s16 + $0x320] sm:$0xff] %v15563_v32  ;;  %15584 = vrcp.f32 %v11657_v37  ;;  %v12707_v18 = vmul.f32 -1.442695, %v11153_v29  ;;  %v11154_v15 = vadd.f32 %v20911_v2, %v11019_v61 }
 0xbee   : > { %v15567_v53 = vpop.eup %15566  ;;  %12034 = vst [vmem:[%s20627_s16 + $0x338] sm:$0xff] %v15565_v16  ;;  %15586 = vrcp.f32 %v11655_v27  ;;  %v12705_v59 = vmul.f32 -1.442695, %v11151_v41  ;;  %v11152_v13 = vadd.f32 %v20911_v2, %v11017_v45  ;;  %v22108_v27 = vld [vmem:[#allocation39_spill] sm:$0xff] }
 0xbef   : > { %v15569_v55 = vpop.eup %15568  ;;  %12032 = vst [vmem:[%s20627_s16 + $0x328] sm:$0xff] %v15567_v53  ;;  %15588 = vpow2.f32 %v12704_v26  ;;  %v12708_v36 = vmul.f32 -1.442695, %v11154_v15 }
 0xbf0   : > { %v15571_v33 = vpop.eup %15570  ;;  %12037 = vst [vmem:[%s20627_s16 + $0x350] sm:$0xff] %v15569_v55  ;;  %15590 = vpow2.f32 %v12702_v30  ;;  %v14987_v60 = vpop.f32.mrb[120].mxu1  ;;  %v12706_v44 = vmul.f32 -1.442695, %v11152_v13 }
 0xbf1   : > { %v15573_v8 = vpop.eup %15572  ;;  %12035 = vst [vmem:[%s20627_s16 + $0x340] sm:$0xff] %v15571_v33  ;;  %15592 = vpow2.f32 %v12707_v18  ;;  %v11022_v51 = vadd.f32 %v14987_v60, %v22103_v63  ;;  %v10869_v7 = vpop.f32.mrb[121].mxu1 }
 0xbf2   : > { %v15575_v24 = vpop.eup %15574  ;;  %v11658_v25 = vadd.f32 1.0, %v15573_v8  ;;  %15594 = vpow2.f32 %v12705_v59  ;;  %v11020_v50 = vadd.f32 %v10869_v7, %v22104_v34  ;;  %v14988_v28 = vpop.f32.mrb[122].mxu1 }
 0xbf3   : > { %v15577_v0 = vpop.eup %15576  ;;  %v11656_v6 = vadd.f32 1.0, %v15575_v24  ;;  %15596 = vpow2.f32 %v12708_v36  ;;  %v11157_v1 = vadd.f32 %v20911_v2, %v11022_v51  ;;  %v11023_v35 = vadd.f32 %v14988_v28, %v22105_v21  ;;  %v10872_v14 = vpop.f32.mrb[123].mxu1 }
 0xbf4   : > { %v15579_v52 = vpop.eup %15578  ;;  %15598 = vrcp.f32 %v11658_v25  ;;  %v11661_v31 = vadd.f32 1.0, %v15577_v0  ;;  %v11155_v57 = vadd.f32 %v20911_v2, %v11020_v50  ;;  %v11021_v17 = vadd.f32 %v10872_v14, %v22106_v54 }
 0xbf5   : > { %v15581_v43 = vpop.eup %15580  ;;  %15600 = vrcp.f32 %v11656_v6  ;;  %v11659_v10 = vadd.f32 1.0, %v15579_v52  ;;  %v12711_v5 = vmul.f32 -1.442695, %v11157_v1  ;;  %v11158_v11 = vadd.f32 %v20911_v2, %v11023_v35 }
 0xbf6   : > { %v15583_v47 = vpop.eup %15582  ;;  %12038 = vst [vmem:[%s20627_s16 + $0x358] sm:$0xff] %v15581_v43  ;;  %15602 = vrcp.f32 %v11661_v31  ;;  %v12709_v42 = vmul.f32 -1.442695, %v11155_v57  ;;  %v11156_v20 = vadd.f32 %v20911_v2, %v11021_v17 }
 0xbf7   : > { %v15585_v62 = vpop.eup %15584  ;;  %12036 = vst [vmem:[%s20627_s16 + $0x348] sm:$0xff] %v15583_v47  ;;  %15604 = vrcp.f32 %v11659_v10  ;;  %v12712_v46 = vmul.f32 -1.442695, %v11158_v11 }
 0xbf8   : > { %v15587_v19 = vpop.eup %15586  ;;  %12041 = vst [vmem:[%s20627_s16 + $0x370] sm:$0xff] %v15585_v62  ;;  %15606 = vpow2.f32 %v12706_v44  ;;  %v14991_v26 = vpop.f32.mrb[124].mxu1  ;;  %v12710_v16 = vmul.f32 -1.442695, %v11156_v20 }
 0xbf9   : > { %v15589_v9 = vpop.eup %15588  ;;  %12039 = vst [vmem:[%s20627_s16 + $0x360] sm:$0xff] %v15587_v19  ;;  %15608 = vpow2.f32 %v12711_v5  ;;  %v11026_v39 = vadd.f32 %v14991_v26, %v20248_v4  ;;  %v10885_v48 = vpop.f32.mrb[125].mxu1 }
 0xbfa   : > { %v15591_v40 = vpop.eup %15590  ;;  %v11662_v30 = vadd.f32 1.0, %v15589_v9  ;;  %15610 = vpow2.f32 %v12709_v42  ;;  %v11024_v56 = vadd.f32 %v10885_v48, %v22107_v38  ;;  %v14992_v23 = vpop.f32.mrb[126].mxu1 }
 0xbfb   : > { %v15593_v22 = vpop.eup %15592  ;;  %v11660_v37 = vadd.f32 1.0, %v15591_v40  ;;  %15612 = vpow2.f32 %v12712_v46  ;;  %v11161_v29 = vadd.f32 %v20911_v2, %v11026_v39  ;;  %v11027_v49 = vadd.f32 %v14992_v23, %v20252_v58  ;;  %v10888_v61 = vpop.f32.mrb[127].mxu1 }
 0xbfc   : > { %v15595_v3 = vpop.eup %15594  ;;  %15614 = vrcp.f32 %v11662_v30  ;;  %v11665_v32 = vadd.f32 1.0, %v15593_v22  ;;  %v11159_v4 = vadd.f32 %v20911_v2, %v11024_v56  ;;  %v11025_v41 = vadd.f32 %v10888_v61, %v22108_v27 }
 0xbfd   : > { %v15597_v12 = vpop.eup %15596  ;;  %15616 = vrcp.f32 %v11660_v37  ;;  %v11663_v45 = vadd.f32 1.0, %v15595_v3  ;;  %v11162_v18 = vadd.f32 %v20911_v2, %v11027_v49  ;;  %v12715_v53 = vmul.f32 -1.442695, %v11161_v29 }
 0xbfe   : > { %v15599_v15 = vpop.eup %15598  ;;  %15618 = vrcp.f32 %v11665_v32  ;;  %v11666_v58 = vadd.f32 1.0, %v15597_v12  ;;  %v12713_v13 = vmul.f32 -1.442695, %v11159_v4  ;;  %v11160_v60 = vadd.f32 %v20911_v2, %v11025_v41 }
 0xbff   : > { %v15601_v59 = vpop.eup %15600  ;;  %12042 = vst [vmem:[%s20627_s16 + $0x378] sm:$0xff] %v15599_v15  ;;  %15620 = vrcp.f32 %v11663_v45  ;;  %v12716_v36 = vmul.f32 -1.442695, %v11162_v18 }
 0xc00   : > { %v15603_v55 = vpop.eup %15602  ;;  %12040 = vst [vmem:[%s20627_s16 + $0x368] sm:$0xff] %v15601_v59  ;;  %15622 = vrcp.f32 %v11666_v58  ;;  %v12714_v34 = vmul.f32 -1.442695, %v11160_v60 }
 0xc01   : > { %v15605_v33 = vpop.eup %15604  ;;  %12045 = vst [vmem:[%s20627_s16 + $0x390] sm:$0xff] %v15603_v55  ;;  %15624 = vpow2.f32 %v12710_v16 }
 0xc02   : > { %v15607_v8 = vpop.eup %15606  ;;  %12043 = vst [vmem:[%s20627_s16 + $0x380] sm:$0xff] %v15605_v33  ;;  %15626 = vpow2.f32 %v12715_v53 }
 0xc03   : > { %v15609_v63 = vpop.eup %15608  ;;  %v11664_v51 = vadd.f32 1.0, %v15607_v8  ;;  %15628 = vpow2.f32 %v12713_v13 }
 0xc04   : > { %v15611_v7 = vpop.eup %15610  ;;  %v11669_v24 = vadd.f32 1.0, %v15609_v63  ;;  %15630 = vpow2.f32 %v12716_v36 }
 0xc05   : > { %v15613_v25 = vpop.eup %15612  ;;  %15632 = vrcp.f32 %v11664_v51  ;;  %v11667_v44 = vadd.f32 1.0, %v15611_v7 }
 0xc06   : > { %v15615_v50 = vpop.eup %15614  ;;  %15634 = vrcp.f32 %v11669_v24  ;;  %v11670_v2 = vadd.f32 1.0, %v15613_v25 }
 0xc07   : > { %v15617_v28 = vpop.eup %15616  ;;  %12046 = vst [vmem:[%s20627_s16 + $0x398] sm:$0xff] %v15615_v50  ;;  %15636 = vrcp.f32 %v11667_v44 }
 0xc08   : > { %v15619_v0 = vpop.eup %15618  ;;  %12044 = vst [vmem:[%s20627_s16 + $0x388] sm:$0xff] %v15617_v28  ;;  %15638 = vrcp.f32 %v11670_v2 }
 0xc09   : > { %v15621_v6 = vpop.eup %15620  ;;  %12049 = vst [vmem:[%s20627_s16 + $0x3b0] sm:$0xff] %v15619_v0  ;;  %15640 = vpow2.f32 %v12714_v34 }
 0xc0a   : > { %v15623_v1 = vpop.eup %15622  ;;  %12047 = vst [vmem:[%s20627_s16 + $0x3a0] sm:$0xff] %v15621_v6 }
 0xc0b   : > { %v15625_v21 = vpop.eup %15624  ;;  %12050 = vst [vmem:[%s20627_s16 + $0x3b8] sm:$0xff] %v15623_v1 }
 0xc0c   : > { %v15627_v35 = vpop.eup %15626  ;;  %v11668_v14 = vadd.f32 1.0, %v15625_v21 }
 0xc0d   : > { %v15629_v52 = vpop.eup %15628  ;;  %v11673_v31 = vadd.f32 1.0, %v15627_v35 }
 0xc0e   : > { %v15631_v57 = vpop.eup %15630  ;;  %15642 = vrcp.f32 %v11668_v14  ;;  %v11671_v54 = vadd.f32 1.0, %v15629_v52 }
 0xc0f   : > { %v15633_v17 = vpop.eup %15632  ;;  %15644 = vrcp.f32 %v11673_v31  ;;  %v11674_v43 = vadd.f32 1.0, %v15631_v57 }
 0xc10   : > { %v15635_v10 = vpop.eup %15634  ;;  %12048 = vst [vmem:[%s20627_s16 + $0x3a8] sm:$0xff] %v15633_v17  ;;  %15646 = vrcp.f32 %v11671_v54 }
 0xc11   : > { %v15637_v5 = vpop.eup %15636  ;;  %12053 = vst [vmem:[%s20627_s16 + $0x3d0] sm:$0xff] %v15635_v10  ;;  %15648 = vrcp.f32 %v11674_v43 }
 0xc12   : > { %v15639_v11 = vpop.eup %15638  ;;  %12051 = vst [vmem:[%s20627_s16 + $0x3c0] sm:$0xff] %v15637_v5 }
 0xc13   : > { %v15641_v47 = vpop.eup %15640  ;;  %12054 = vst [vmem:[%s20627_s16 + $0x3d8] sm:$0xff] %v15639_v11 }
 0xc14   : > { %v11672_v42 = vadd.f32 1.0, %v15641_v47 }
 0xc16   : > { %15650 = vrcp.f32 %v11672_v42 }
 0xc18   : > { %v15643_v62 = vpop.eup %15642 }
 0xc19   : > { %v15645_v46 = vpop.eup %15644  ;;  %12052 = vst [vmem:[%s20627_s16 + $0x3c8] sm:$0xff] %v15643_v62 }
 0xc1a   : > { %v15647_v19 = vpop.eup %15646  ;;  %12057 = vst [vmem:[%s20627_s16 + $0x3f0] sm:$0xff] %v15645_v46 }
 0xc1b   : > { %v15649_v26 = vpop.eup %15648  ;;  %12055 = vst [vmem:[%s20627_s16 + $0x3e0] sm:$0xff] %v15647_v19 }
 0xc1c   : > { %12058 = vst [vmem:[%s20627_s16 + $0x3f8] sm:$0xff] %v15649_v26 }
 0xc20   : > { %v15651_v9 = vpop.eup %15650 }
 0xc21   : > { %12056 = vst [vmem:[%s20627_s16 + $0x3e8] sm:$0xff] %v15651_v9 }
 0xc22   : > { %15698 = shalt.err (!%p15695_p3)
}
 0xc23   : > { %s15699_s29 = scalar_lea.hbm %s20996_s30, 16384  ;;  %s15703_s22 = scalar_lea.hbm %s21055_s11, 65536 }
 0xc24   : > { %p15700_p4 = scmp.ne.s32.totalorder %s20996_s30, %s15699_s29  ;;  %p15704_p9 = scmp.lt.u32.totalorder %s20996_s30, %s21055_s11 }
 0xc25   : > { %p15705_p10 = scmp.lt.u32.totalorder %s15703_s22, %s15699_s29  ;;  %p15707_p12 = scmp.lt.u32.totalorder %s15699_s29, %s20996_s30 }
 0xc26   : > { %p15701_p7 = pnand %p15700_p4, %p15852_p5 }
 0xc27   : > { %p15706_p11 = por %p15705_p10, %p15704_p9 }
 0xc28   : > { %p15702_p8 = pneg %p15701_p7 }
 0xc29   : > { %p15708_p13 = por %p15707_p12, %p15706_p11 }
 0xc2b   : > { %p15709_p0 = pnand %p15708_p13, %p15702_p8 }
 0xc2d   : > { %15712 = shalt.err (!%p15709_p0)
}
 0xc2e   : > { %s15752_s12 = smov 128   ;;  %s15753_s13 = smov 8  }
 0xc2f   : > { %15001 = dma.vmem_to_hbm [thread:$0]  (%p15852_p5), %s20998_s26, 16384, %s20996_s30, %s21003_s25, %s15752_s12, %s15752_s12, %s15753_s13  }
 0xc30 PF: > { %p15007_p1 = scmp.ge.s32.totalorder %s15747_s20, 2  ;;  %s12088_s14 = sand.u32 1, %s15735_s17  }
 0xc31   : > { %s12089_s29 = scalar_lea.sflag [#allocation3], %s12088_s14 }
 0xc32   : > { %p15004_p2 = pnand %p15007_p1, %p15856_p6 }
 0xc34   : > { %15730 = dma.done.wait (!%p15004_p2), %s12089_s29, 16384  }
 0xc35   : > { %15732 = vsyncadd (!%p15004_p2), %s12089_s29, 4294950912  ;;  %s22109_s16 = sld [smem:[#allocation5_spill]]  ;;  %p21_p3 = scmp.ge.s32.totalorder %s15839_s23, 6  }
 0xc36   : > { %s22110_s17 = smov %s15739_s18  ;;  %s22111_s18 = smov %s15743_s19 }
 0xc37   : > { %s22113_s20 = smov %s15839_s23  ;;  %23 = sbr.rel (!%p21_p3) target bundleno = 3 (0x3), region = 111 }
 0xc3b   : > { %s22112_s19 = smov %s22109_s16 }
 0xc3e   :  { %12094 = vsyncpa [#allocation3], 1 }
 0xc3f   :  { %12096 = vsyncpa [#allocation3 + $0x1], 1 }

</bundles_post_ra>
